<compile_context>
chip_gen: v5e
topology: v5e:2x2
jax: 0.10.0
libtpu: 0.0.40
codegen_flags: <defaults>
</compile_context>

<pallas_src>
import jax
import jax.numpy as jnp
from jax import lax
from jax.experimental import pallas as pl
from jax.experimental.pallas import tpu as pltpu


def _round_up(x, m):
    return ((x + m - 1) // m) * m


# --------------------- tiled matmul (+bias, +gate epilogue) ------------------

def _mm_kernel(x_ref, w_ref, b_ref, o_ref, acc_ref):
    @pl.when(pl.program_id(2) == 0)
    def _():
        acc_ref[...] = jnp.zeros_like(acc_ref)

    acc_ref[...] += jnp.dot(x_ref[...], w_ref[...],
                            preferred_element_type=jnp.float32)

    @pl.when(pl.program_id(2) == pl.num_programs(2) - 1)
    def _():
        o_ref[...] = acc_ref[...] + b_ref[...]


def _mm_gate_kernel(x_ref, w_ref, b_ref, r_ref, o_ref, acc_ref):
    @pl.when(pl.program_id(2) == 0)
    def _():
        acc_ref[...] = jnp.zeros_like(acc_ref)

    acc_ref[...] += jnp.dot(x_ref[...], w_ref[...],
                            preferred_element_type=jnp.float32)

    @pl.when(pl.program_id(2) == pl.num_programs(2) - 1)
    def _():
        res = r_ref[...]
        o_ref[...] = res + res * jax.nn.sigmoid(acc_ref[...] + b_ref[...])


def matmul_bias(x, w, b, residual_gate=None):
    """out = x @ w + b   (bf16 operands, f32 accumulation, tiled grid).

    If residual_gate is given: out = res + res * sigmoid(x @ w + b)
    (the excitation epilogue fused into the matmul kernel).
    """
    M, K = x.shape
    N = w.shape[1]
    # Tile sizes chosen to stay well inside v7x's 64 MiB VMEM as well.
    tm = min(_round_up(M, 16), 256)
    Mp = _round_up(M, tm)
    tn = min(_round_up(N, 128), 256)
    Np = _round_up(N, tn)
    Kr = _round_up(K, 128)
    tk = Kr if Kr <= 768 else 512
    Kp = _round_up(K, tk)

    xb = jnp.pad(x, ((0, Mp - M), (0, Kp - K))).astype(jnp.bfloat16)
    wb = jnp.pad(w, ((0, Kp - K), (0, Np - N))).astype(jnp.bfloat16)
    bb = jnp.pad(b.astype(jnp.float32), (0, Np - N)).reshape(1, Np)

    in_specs = [pl.BlockSpec((tm, tk), lambda i, j, k: (i, k)),
                pl.BlockSpec((tk, tn), lambda i, j, k: (k, j)),
                pl.BlockSpec((1, tn), lambda i, j, k: (0, j))]
    args = [xb, wb, bb]
    kernel = _mm_kernel
    if residual_gate is not None:
        rb = jnp.pad(residual_gate.astype(jnp.float32),
                     ((0, Mp - M), (0, Np - N)))
        in_specs.append(pl.BlockSpec((tm, tn), lambda i, j, k: (i, j)))
        args.append(rb)
        kernel = _mm_gate_kernel

    out = pl.pallas_call(
        kernel,
        out_shape=jax.ShapeDtypeStruct((Mp, Np), jnp.float32),
        grid=(Mp // tm, Np // tn, Kp // tk),
        in_specs=in_specs,
        out_specs=pl.BlockSpec((tm, tn), lambda i, j, k: (i, j)),
        scratch_shapes=[pltpu.VMEM((tm, tn), jnp.float32)],
        compiler_params=pltpu.CompilerParams(
            dimension_semantics=("parallel", "parallel", "arbitrary")),
        cost_estimate=pl.CostEstimate(
            flops=2 * Mp * Np * Kp, transcendentals=0,
            bytes_accessed=2 * (Mp * Kp + Kp * Np) + 4 * Mp * Np),
    )(*args)
    return out[:M, :N]


# ------------------------- Conv1d (tap loop in-kernel) -----------------------

def _conv1d_kernel(x_ref, w_ref, b_ref, o_ref):
    # x: (1, L, Cin) f32, w: (k, Cin, Cout) bf16, b: (1, Cout) f32,
    # o: (1, T, Cout) f32
    k = w_ref.shape[0]
    T, Cout = o_ref.shape[1], o_ref.shape[2]
    x = x_ref[0]                                           # (L, Cin)
    acc = jnp.zeros((T, Cout), jnp.float32)
    for tau in range(k):                                   # static tap unroll
        acc = acc + jnp.dot(x[tau:tau + T, :].astype(jnp.bfloat16),
                            w_ref[tau],
                            preferred_element_type=jnp.float32)
    o_ref[0] = acc + b_ref[...]


def conv1d_channels_last(x, w, b):
    """x: (B, L, Cin); w: (Cout, Cin, k) PyTorch layout; b: (Cout,)."""
    B, L, Cin = x.shape
    Cout, _, k = w.shape
    T = L - k + 1
    wt = jnp.transpose(w, (2, 1, 0)).astype(jnp.bfloat16)  # (k, Cin, Cout)
    return pl.pallas_call(
        _conv1d_kernel,
        out_shape=jax.ShapeDtypeStruct((B, T, Cout), jnp.float32),
        grid=(B,),
        in_specs=[pl.BlockSpec((1, L, Cin), lambda bi: (bi, 0, 0)),
                  pl.BlockSpec((k, Cin, Cout), lambda bi: (0, 0, 0)),
                  pl.BlockSpec((1, Cout), lambda bi: (0, 0))],
        out_specs=pl.BlockSpec((1, T, Cout), lambda bi: (bi, 0, 0)),
        compiler_params=pltpu.CompilerParams(
            dimension_semantics=("parallel",)),
    )(x, wt, b.reshape(1, Cout).astype(jnp.float32))


# --------------------- alignment-gated mean / max pooling --------------------

def _align_pool_kernel(feat_ref, align_ref, o_ref):
    feat = feat_ref[0]                    # (T_a, C) f32
    align = align_ref[0]                  # (T_s, T_a) in {0, 1}
    T_s, T_a = align.shape
    C = feat.shape[1]
    # mean over aligned frames: a single small MXU matmul
    num = jnp.dot(align, feat, preferred_element_type=jnp.float32)
    den = jnp.sum(align, axis=1, keepdims=True) + 1e-6
    mean = num / den
    # max over aligned frames, in bounded chunks along T_a so live data stays
    # O(T_s * chunk * C) instead of O(T_s * T_a * C).
    CHUNK = 16
    mx = jnp.full((T_s, C), -1e6, jnp.float32)
    for s in range(0, T_a, CHUNK):
        e = min(s + CHUNK, T_a)
        a_c = align[:, s:e]                                # (T_s, c)
        f_c = feat[s:e, :]                                 # (c, C)
        cand = jnp.where(a_c[:, :, None] > 0, f_c[None, :, :],
                         jnp.float32(-1e6))
        mx = jnp.maximum(mx, jnp.max(cand, axis=1))
    o_ref[0] = jnp.concatenate([mean, mx], axis=-1)


def align_pool(feat, align):
    """feat: (B, T_a, C), align: (B, T_s, T_a) -> (B, T_s, 2*C)."""
    B, T_a, C = feat.shape
    T_s = align.shape[1]
    return pl.pallas_call(
        _align_pool_kernel,
        out_shape=jax.ShapeDtypeStruct((B, T_s, 2 * C), jnp.float32),
        grid=(B,),
        in_specs=[pl.BlockSpec((1, T_a, C), lambda b: (b, 0, 0)),
                  pl.BlockSpec((1, T_s, T_a), lambda b: (b, 0, 0))],
        out_specs=pl.BlockSpec((1, T_s, 2 * C), lambda b: (b, 0, 0)),
        compiler_params=pltpu.CompilerParams(
            dimension_semantics=("parallel",)),
    )(feat, align)


# ------------------- fused bidirectional LSTM recurrence ---------------------

def _bilstm_kernel(xp_ref, len_ref, whh_ref, out_ref, h_ref, c_ref):
    # xp : (T, R, 4H) f32 — precomputed input projections; forward sequences
    #      occupy rows [0, R/2), time-reversed backward sequences [R/2, R).
    # len: (R, 1) f32 valid lengths (0 for padding rows).
    # whh: (2H, 4H) bf16 = [W_hh_fwd^T ; W_hh_bwd^T].
    # out: (T, R, H) f32.   h/c: (R, H) f32 VMEM scratch.
    T, R, H4 = xp_ref.shape
    H = H4 // 4
    nB = R // 2
    w = whh_ref[...]
    lens = len_ref[...]                                    # (R, 1)
    row = lax.broadcasted_iota(jnp.int32, (R, 1), 0)
    sel_f = (row < nB).astype(jnp.float32)                 # forward rows
    sel_b = 1.0 - sel_f                                    # backward rows
    h_ref[...] = jnp.zeros_like(h_ref)
    c_ref[...] = jnp.zeros_like(c_ref)

    def step(t, carry):
        h = h_ref[...]
        c = c_ref[...]
        # single dot for both directions: [h_f, 0]@[Wf;Wb] and [0, h_b]@[Wf;Wb]
        hs = jnp.concatenate([h * sel_f, h * sel_b], axis=1)       # (R, 2H)
        gates = xp_ref[t] + jnp.dot(hs.astype(jnp.bfloat16), w,
                                    preferred_element_type=jnp.float32)
        i = jax.nn.sigmoid(gates[:, 0:H])
        f = jax.nn.sigmoid(gates[:, H:2 * H])
        g = jnp.tanh(gates[:, 2 * H:3 * H])
        o = jax.nn.sigmoid(gates[:, 3 * H:4 * H])
        c_new = f * c + i * g
        h_new = o * jnp.tanh(c_new)
        m = (lens > t.astype(jnp.float32)).astype(jnp.float32)     # (R, 1)
        c_ref[...] = m * c_new + (1.0 - m) * c
        h_ref[...] = m * h_new + (1.0 - m) * h
        out_ref[t] = m * h_new        # packed-sequence: padded steps -> 0
        return carry

    lax.fori_loop(0, T, step, 0)


def bidirectional_lstm(x_btd, lengths, p):
    """x: (B, T, 512) -> (B, T, 2H) with pack_padded_sequence semantics."""
    B, T, D = x_btd.shape
    H = p['w_hh_f'].shape[1]
    ar = jnp.arange(T)[None, :]
    valid = ar < lengths[:, None]
    mask = valid.astype(jnp.float32)                        # (B, T)

    # per-sequence time reversal of the valid prefix (backward direction)
    rev_idx = jnp.where(valid, lengths[:, None] - 1 - ar, ar)
    x_rev = jnp.take_along_axis(x_btd, rev_idx[:, :, None], axis=1)

    # input projections: the hot matmuls, done once, tiled + bf16
    xp_f = matmul_bias(x_btd.reshape(B * T, D), p['w_ih_f'].T,
                       p['b_ih_f'] + p['b_hh_f']).reshape(B, T, 4 * H)
    xp_b = matmul_bias(x_rev.reshape(B * T, D), p['w_ih_b'].T,
                       p['b_ih_b'] + p['b_hh_b']).reshape(B, T, 4 * H)

    # stack directions along batch; pad so the sublane dim (R=2*Bp) is 8-aligned
    Bp = max(_round_up(B, 4), 4)
    R = 2 * Bp
    pad = ((0, Bp - B), (0, 0), (0, 0))
    xp = jnp.concatenate([jnp.pad(xp_f, pad), jnp.pad(xp_b, pad)], axis=0)
    xp = xp.transpose(1, 0, 2)                              # (T, R, 4H)

    lens_p = jnp.pad(lengths.astype(jnp.float32), (0, Bp - B))
    lens = jnp.concatenate([lens_p, lens_p]).reshape(R, 1)

    w_cat = jnp.concatenate([p['w_hh_f'].T, p['w_hh_b'].T],
                            axis=0).astype(jnp.bfloat16)    # (2H, 4H)

    out = pl.pallas_call(
        _bilstm_kernel,
        out_shape=jax.ShapeDtypeStruct((T, R, H), jnp.float32),
        scratch_shapes=[pltpu.VMEM((R, H), jnp.float32),
                        pltpu.VMEM((R, H), jnp.float32)],
        cost_estimate=pl.CostEstimate(
            flops=2 * T * R * (2 * H) * (4 * H),
            transcendentals=5 * T * R * H,
            bytes_accessed=4 * T * R * 4 * H + 4 * T * R * H + 2 * 2 * H * 4 * H),
    )(xp, lens, w_cat)
    # TODO(synk): for very long T, chunk xp over time (grid over T blocks)
    # instead of keeping the whole (T, R, 4H) slab resident in VMEM.

    h_f = out[:, :B, :].transpose(1, 0, 2)                  # (B, T, H)
    h_r = out[:, Bp:Bp + B, :].transpose(1, 0, 2)
    h_b = jnp.take_along_axis(h_r, rev_idx[:, :, None], axis=1)
    return jnp.concatenate([h_f, h_b], axis=-1), mask


# -------------------- masked temporal max + classifier -----------------------

def _maskmax_classify_kernel(x_ref, m_ref, w_ref, b_ref, o_ref):
    pooled = jnp.max(x_ref[...] - (1.0 - m_ref[...]) * 1e6, axis=1)  # (B, D)
    o_ref[...] = (jnp.dot(pooled.astype(jnp.bfloat16), w_ref[...],
                          preferred_element_type=jnp.float32) + b_ref[...])


def maskmax_classify(x, mask, w, b):
    B = x.shape[0]
    N = w.shape[1]
    Np = _round_up(N, 128)                    # lane-dense output, slice after
    wp = jnp.pad(w, ((0, 0), (0, Np - N))).astype(jnp.bfloat16)
    bp = jnp.pad(b.astype(jnp.float32), (0, Np - N)).reshape(1, Np)
    out = pl.pallas_call(
        _maskmax_classify_kernel,
        out_shape=jax.ShapeDtypeStruct((B, Np), jnp.float32),
    )(x, mask[:, :, None], wp, bp)
    return out[:, :N]


# ------------------------------- glue (JAX) ----------------------------------

def avgpool_last(x, k):
    """AvgPool2d((1, k), (1, 1)) over the last axis."""
    T = x.shape[-1] - k + 1
    return jnp.mean(jnp.stack([x[..., i:i + T] for i in range(k)], axis=-1),
                    axis=-1)


def init_params(key, cfg, vocab):
    D_a = cfg['acoustic']['embedding_dim']
    H_half = cfg['acoustic']['hidden_dim'] // 2    # 128
    H = 256
    ks = jax.random.split(key, 24)

    def lin(k, fan_in, shape):
        return (jax.random.uniform(k, shape, jnp.float32, -1.0, 1.0)
                / jnp.sqrt(float(fan_in)))

    p = {}
    # TODO(synk): pretrained BERT ('model_text_bert.pt') cannot be loaded here;
    # its last hidden state is emulated by a deterministic (vocab, 768) table.
    p['bert_embed'] = 0.02 * jax.random.normal(ks[0], (vocab, 768), jnp.float32)
    p['sem_lin_w'] = lin(ks[1], 768, (768, 256))
    p['sem_lin_b'] = lin(ks[2], 768, (256,))
    p['cnn1_w'] = lin(ks[3], D_a * 5, (64, D_a, 5))
    p['cnn1_b'] = lin(ks[4], D_a * 5, (64,))
    p['cnn2_w'] = lin(ks[5], 64 * 2, (128, 64, 2))
    p['cnn2_b'] = lin(ks[6], 64 * 2, (128,))
    p['cnn3_w'] = lin(ks[7], 128 * 2, (H_half, 128, 2))
    p['cnn3_b'] = lin(ks[8], 128 * 2, (H_half,))
    p['excit_w'] = lin(ks[9], 256, (256, 256))
    p['excit_b'] = lin(ks[10], 256, (256,))
    p['w_ih_f'] = lin(ks[11], H, (4 * H, 512))
    p['w_hh_f'] = lin(ks[12], H, (4 * H, H))
    p['b_ih_f'] = lin(ks[13], H, (4 * H,))
    p['b_hh_f'] = lin(ks[14], H, (4 * H,))
    p['w_ih_b'] = lin(ks[15], H, (4 * H, 512))
    p['w_hh_b'] = lin(ks[16], H, (4 * H, H))
    p['b_ih_b'] = lin(ks[17], H, (4 * H,))
    p['b_hh_b'] = lin(ks[18], H, (4 * H,))
    p['cls_w'] = lin(ks[19], 512, (512, 4))
    p['cls_b'] = lin(ks[20], 512, (4,))
    return p


def my_model2_forward(params, acoustic_input, acoustic_length, input_ids,
                      semantic_input, semantic_length, align_input):
    del acoustic_length, semantic_input   # unused by the BCE forward path
    B, T_sem = input_ids.shape

    # --- semantic branch (BERT last hidden state -> Linear(768, 256)) ---
    sem = params['bert_embed'][input_ids]                              # (B,T,768)
    sem = matmul_bias(sem.reshape(B * T_sem, 768), params['sem_lin_w'],
                      params['sem_lin_b']).reshape(B, T_sem, 256)

    # --- acoustic branch: Conv1d stack (tap-loop Pallas conv kernels) ---
    a = conv1d_channels_last(acoustic_input, params['cnn1_w'], params['cnn1_b'])
    a = conv1d_channels_last(a, params['cnn2_w'], params['cnn2_b'])
    a = conv1d_channels_last(a, params['cnn3_w'], params['cnn3_b'])    # (B,T_a,128)

    # alignment: AvgPool2d((1,5)) -> (1,2) -> (1,2), then > 0 mask
    al = avgpool_last(align_input, 5)
    al = avgpool_last(al, 2)
    al = avgpool_last(al, 2)                                           # (B,T_sem,T_a)
    al = (al > 0).astype(jnp.float32)

    # alignment-gated mean/max pooling (Pallas kernel), cat -> (B,T_sem,256)
    ac = align_pool(a, al)

    # --- excitation (sigmoid gate + residual fused into the matmul kernel) ---
    sem = matmul_bias(ac.reshape(B * T_sem, 256), params['excit_w'],
                      params['excit_b'],
                      residual_gate=sem.reshape(B * T_sem, 256)
                      ).reshape(B, T_sem, 256)

    # --- fusion + packed bidirectional LSTM (single Pallas recurrence) ---
    fuse = jnp.concatenate([sem, ac], axis=-1)                         # (B,T,512)
    fuse_out, mask = bidirectional_lstm(fuse, semantic_length, params)

    # --- masked temporal max + classifier ('BCE' branch) ---
    logits = maskmax_classify(fuse_out, mask, params['cls_w'], params['cls_b'])
    return logits                                                       # (B, 4)


# ---------------------------------- main -------------------------------------

if __name__ == "__main__":
    cfg = {'acoustic': {'embedding_dim': 40, 'hidden_dim': 256}}
    VOCAB = 100
    B, T_sem, L_a = 2, 8, 16
    D_a = cfg['acoustic']['embedding_dim']

    key = jax.random.PRNGKey(0)
    kp, k1, k2 = jax.random.split(key, 3)
    params = init_params(kp, cfg, VOCAB)

    acoustic_input = jax.random.normal(k1, (B, L_a, D_a), jnp.float32)
    input_ids = jax.random.randint(k2, (B, T_sem), 0, VOCAB)
    semantic_input = input_ids                       # only its shape is used
    semantic_length = jnp.array([T_sem, 5], dtype=jnp.int32)
    acoustic_length = jnp.array([L_a, L_a], dtype=jnp.int32)

    # deterministic monotone word->frame alignment (every word covers 4 frames)
    s_idx = jnp.arange(T_sem)[:, None]
    f_idx = jnp.arange(L_a)[None, :]
    align_input = ((f_idx >= 2 * s_idx) & (f_idx < 2 * s_idx + 4)
                   ).astype(jnp.float32)
    align_input = jnp.broadcast_to(align_input[None], (B, T_sem, L_a))

    fwd = jax.jit(my_model2_forward)
    logits = fwd(params, acoustic_input, acoustic_length, input_ids,
                 semantic_input, semantic_length, align_input)
    jax.block_until_ready(logits)
    assert logits.shape == (B, 4) and logits.dtype == jnp.float32
    print("KERNEL_OK")
</pallas_src>

<mosaic_0001>
module attributes {stable_mosaic.version = 11 : i64} {
  func.func @_conv1d_kernel(%arg0: i32, %arg1: memref<1x16x40xf32, #tpu.memory_space<vmem>>, %arg2: memref<5x40x64xbf16, #tpu.memory_space<vmem>>, %arg3: memref<1x64xf32, #tpu.memory_space<vmem>>, %arg4: memref<1x12x64xf32, #tpu.memory_space<vmem>>) attributes {dimension_semantics = [#tpu.dimension_semantics<parallel>], iteration_bounds = array<i64: 2>, scalar_prefetch = 0 : i64, scratch_operands = 0 : i64, tpu.core_type = #tpu.core_type<tc>, window_params = [{transform_indices = @transform_0, window_bounds = array<i64: 1, 16, 40>}, {pipeline_mode = #tpu.pipeline_mode<synchronous>, transform_indices = @transform_1, window_bounds = array<i64: 5, 40, 64>}, {pipeline_mode = #tpu.pipeline_mode<synchronous>, transform_indices = @transform_2, window_bounds = array<i64: 1, 64>}, {transform_indices = @transform_3, window_bounds = array<i64: 1, 12, 64>}]} {
    %c0 = arith.constant 0 : index
    %c0_0 = arith.constant 0 : index
    %c0_1 = arith.constant 0 : index
    %0 = vector.load %arg1[%c0, %c0_0, %c0_1] : memref<1x16x40xf32, #tpu.memory_space<vmem>>, vector<1x16x40xf32>
    %1 = vector.shape_cast %0 : vector<1x16x40xf32> to vector<16x40xf32>
    %cst = arith.constant 0.000000e+00 : f32
    %2 = vector.broadcast %cst : f32 to vector<12x64xf32>
    %3 = vector.extract_strided_slice %1 {offsets = [0, 0], sizes = [12, 40], strides = [1, 1]} : vector<16x40xf32> to vector<12x40xf32>
    %4 = arith.truncf %3 : vector<12x40xf32> to vector<12x40xbf16>
    %c0_2 = arith.constant 0 : index
    %c0_3 = arith.constant 0 : index
    %c0_4 = arith.constant 0 : index
    %5 = vector.load %arg2[%c0_2, %c0_3, %c0_4] : memref<5x40x64xbf16, #tpu.memory_space<vmem>>, vector<1x40x64xbf16>
    %6 = vector.shape_cast %5 : vector<1x40x64xbf16> to vector<40x64xbf16>
    %cst_5 = arith.constant dense<0.000000e+00> : vector<12x64xf32>
    %7 = tpu.matmul %4, %6, %cst_5 {dimension_numbers = #tpu.dot_dimension_numbers<[1], [0], [0], [1], [0, 0, 1, 1], [], []>} : vector<12x40xbf16>, vector<40x64xbf16>, vector<12x64xf32> -> vector<12x64xf32>
    %8 = arith.addf %2, %7 : vector<12x64xf32>
    %9 = vector.extract_strided_slice %1 {offsets = [1, 0], sizes = [12, 40], strides = [1, 1]} : vector<16x40xf32> to vector<12x40xf32>
    %10 = arith.truncf %9 : vector<12x40xf32> to vector<12x40xbf16>
    %c1 = arith.constant 1 : index
    %c0_6 = arith.constant 0 : index
    %c0_7 = arith.constant 0 : index
    %11 = vector.load %arg2[%c1, %c0_6, %c0_7] : memref<5x40x64xbf16, #tpu.memory_space<vmem>>, vector<1x40x64xbf16>
    %12 = vector.shape_cast %11 : vector<1x40x64xbf16> to vector<40x64xbf16>
    %cst_8 = arith.constant dense<0.000000e+00> : vector<12x64xf32>
    %13 = tpu.matmul %10, %12, %cst_8 {dimension_numbers = #tpu.dot_dimension_numbers<[1], [0], [0], [1], [0, 0, 1, 1], [], []>} : vector<12x40xbf16>, vector<40x64xbf16>, vector<12x64xf32> -> vector<12x64xf32>
    %14 = arith.addf %8, %13 : vector<12x64xf32>
    %15 = vector.extract_strided_slice %1 {offsets = [2, 0], sizes = [12, 40], strides = [1, 1]} : vector<16x40xf32> to vector<12x40xf32>
    %16 = arith.truncf %15 : vector<12x40xf32> to vector<12x40xbf16>
    %c2 = arith.constant 2 : index
    %c0_9 = arith.constant 0 : index
    %c0_10 = arith.constant 0 : index
    %17 = vector.load %arg2[%c2, %c0_9, %c0_10] : memref<5x40x64xbf16, #tpu.memory_space<vmem>>, vector<1x40x64xbf16>
    %18 = vector.shape_cast %17 : vector<1x40x64xbf16> to vector<40x64xbf16>
    %cst_11 = arith.constant dense<0.000000e+00> : vector<12x64xf32>
    %19 = tpu.matmul %16, %18, %cst_11 {dimension_numbers = #tpu.dot_dimension_numbers<[1], [0], [0], [1], [0, 0, 1, 1], [], []>} : vector<12x40xbf16>, vector<40x64xbf16>, vector<12x64xf32> -> vector<12x64xf32>
    %20 = arith.addf %14, %19 : vector<12x64xf32>
    %21 = vector.extract_strided_slice %1 {offsets = [3, 0], sizes = [12, 40], strides = [1, 1]} : vector<16x40xf32> to vector<12x40xf32>
    %22 = arith.truncf %21 : vector<12x40xf32> to vector<12x40xbf16>
    %c3 = arith.constant 3 : index
    %c0_12 = arith.constant 0 : index
    %c0_13 = arith.constant 0 : index
    %23 = vector.load %arg2[%c3, %c0_12, %c0_13] : memref<5x40x64xbf16, #tpu.memory_space<vmem>>, vector<1x40x64xbf16>
    %24 = vector.shape_cast %23 : vector<1x40x64xbf16> to vector<40x64xbf16>
    %cst_14 = arith.constant dense<0.000000e+00> : vector<12x64xf32>
    %25 = tpu.matmul %22, %24, %cst_14 {dimension_numbers = #tpu.dot_dimension_numbers<[1], [0], [0], [1], [0, 0, 1, 1], [], []>} : vector<12x40xbf16>, vector<40x64xbf16>, vector<12x64xf32> -> vector<12x64xf32>
    %26 = arith.addf %20, %25 : vector<12x64xf32>
    %27 = vector.extract_strided_slice %1 {offsets = [4, 0], sizes = [12, 40], strides = [1, 1]} : vector<16x40xf32> to vector<12x40xf32>
    %28 = arith.truncf %27 : vector<12x40xf32> to vector<12x40xbf16>
    %c4 = arith.constant 4 : index
    %c0_15 = arith.constant 0 : index
    %c0_16 = arith.constant 0 : index
    %29 = vector.load %arg2[%c4, %c0_15, %c0_16] : memref<5x40x64xbf16, #tpu.memory_space<vmem>>, vector<1x40x64xbf16>
    %30 = vector.shape_cast %29 : vector<1x40x64xbf16> to vector<40x64xbf16>
    %cst_17 = arith.constant dense<0.000000e+00> : vector<12x64xf32>
    %31 = tpu.matmul %28, %30, %cst_17 {dimension_numbers = #tpu.dot_dimension_numbers<[1], [0], [0], [1], [0, 0, 1, 1], [], []>} : vector<12x40xbf16>, vector<40x64xbf16>, vector<12x64xf32> -> vector<12x64xf32>
    %32 = arith.addf %26, %31 : vector<12x64xf32>
    %c0_18 = arith.constant 0 : index
    %c0_19 = arith.constant 0 : index
    %33 = vector.load %arg3[%c0_18, %c0_19] : memref<1x64xf32, #tpu.memory_space<vmem>>, vector<1x64xf32>
    %34 = vector.broadcast %33 : vector<1x64xf32> to vector<12x64xf32>
    %35 = arith.addf %32, %34 : vector<12x64xf32>
    %c0_20 = arith.constant 0 : index
    %c0_21 = arith.constant 0 : index
    %c0_22 = arith.constant 0 : index
    %36 = vector.load %arg4[%c0_20, %c0_21, %c0_22] : memref<1x12x64xf32, #tpu.memory_space<vmem>>, vector<1x12x64xf32>
    %37 = vector.shape_cast %36 : vector<1x12x64xf32> to vector<12x64xf32>
    %38 = vector.shape_cast %35 : vector<12x64xf32> to vector<1x12x64xf32>
    tpu.vector_store %arg4[%c0_20, %c0_21, %c0_22], %38 {strides = array<i32>} : memref<1x12x64xf32, #tpu.memory_space<vmem>>, vector<1x12x64xf32>,
    return
  }
  func.func @transform_0(%arg0: i32) -> (i32, i32, i32) {
    %c0_i32 = arith.constant 0 : i32
    %c0_i32_0 = arith.constant 0 : i32
    %c0_i32_1 = arith.constant 0 : i32
    return %arg0, %c0_i32, %c0_i32_0 : i32, i32, i32
  }
  func.func @transform_1(%arg0: i32) -> (i32, i32, i32) {
    %c0_i32 = arith.constant 0 : i32
    %c0_i32_0 = arith.constant 0 : i32
    %c0_i32_1 = arith.constant 0 : i32
    %c0_i32_2 = arith.constant 0 : i32
    return %c0_i32, %c0_i32_0, %c0_i32_1 : i32, i32, i32
  }
  func.func @transform_2(%arg0: i32) -> (i32, i32) {
    %c0_i32 = arith.constant 0 : i32
    %c0_i32_0 = arith.constant 0 : i32
    %c0_i32_1 = arith.constant 0 : i32
    return %c0_i32, %c0_i32_0 : i32, i32
  }
  func.func @transform_3(%arg0: i32) -> (i32, i32, i32) {
    %c0_i32 = arith.constant 0 : i32
    %c0_i32_0 = arith.constant 0 : i32
    %c0_i32_1 = arith.constant 0 : i32
    return %arg0, %c0_i32, %c0_i32_0 : i32, i32, i32
  }
}

module attributes {stable_mosaic.version = 11 : i64} {
  func.func @_conv1d_kernel(%arg0: i32, %arg1: memref<1x12x64xf32, #tpu.memory_space<vmem>>, %arg2: memref<2x64x128xbf16, #tpu.memory_space<vmem>>, %arg3: memref<1x128xf32, #tpu.memory_space<vmem>>, %arg4: memref<1x11x128xf32, #tpu.memory_space<vmem>>) attributes {dimension_semantics = [#tpu.dimension_semantics<parallel>], iteration_bounds = array<i64: 2>, scalar_prefetch = 0 : i64, scratch_operands = 0 : i64, tpu.core_type = #tpu.core_type<tc>, window_params = [{transform_indices = @transform_0, window_bounds = array<i64: 1, 12, 64>}, {pipeline_mode = #tpu.pipeline_mode<synchronous>, transform_indices = @transform_1, window_bounds = array<i64: 2, 64, 128>}, {pipeline_mode = #tpu.pipeline_mode<synchronous>, transform_indices = @transform_2, window_bounds = array<i64: 1, 128>}, {transform_indices = @transform_3, window_bounds = array<i64: 1, 11, 128>}]} {
    %c0 = arith.constant 0 : index
    %c0_0 = arith.constant 0 : index
    %c0_1 = arith.constant 0 : index
    %0 = vector.load %arg1[%c0, %c0_0, %c0_1] : memref<1x12x64xf32, #tpu.memory_space<vmem>>, vector<1x12x64xf32>
    %1 = vector.shape_cast %0 : vector<1x12x64xf32> to vector<12x64xf32>
    %cst = arith.constant 0.000000e+00 : f32
    %2 = vector.broadcast %cst : f32 to vector<11x128xf32>
    %3 = vector.extract_strided_slice %1 {offsets = [0, 0], sizes = [11, 64], strides = [1, 1]} : vector<12x64xf32> to vector<11x64xf32>
    %4 = arith.truncf %3 : vector<11x64xf32> to vector<11x64xbf16>
    %c0_2 = arith.constant 0 : index
    %c0_3 = arith.constant 0 : index
    %c0_4 = arith.constant 0 : index
    %5 = vector.load %arg2[%c0_2, %c0_3, %c0_4] : memref<2x64x128xbf16, #tpu.memory_space<vmem>>, vector<1x64x128xbf16>
    %6 = vector.shape_cast %5 : vector<1x64x128xbf16> to vector<64x128xbf16>
    %cst_5 = arith.constant dense<0.000000e+00> : vector<11x128xf32>
    %7 = tpu.matmul %4, %6, %cst_5 {dimension_numbers = #tpu.dot_dimension_numbers<[1], [0], [0], [1], [0, 0, 1, 1], [], []>} : vector<11x64xbf16>, vector<64x128xbf16>, vector<11x128xf32> -> vector<11x128xf32>
    %8 = arith.addf %2, %7 : vector<11x128xf32>
    %9 = vector.extract_strided_slice %1 {offsets = [1, 0], sizes = [11, 64], strides = [1, 1]} : vector<12x64xf32> to vector<11x64xf32>
    %10 = arith.truncf %9 : vector<11x64xf32> to vector<11x64xbf16>
    %c1 = arith.constant 1 : index
    %c0_6 = arith.constant 0 : index
    %c0_7 = arith.constant 0 : index
    %11 = vector.load %arg2[%c1, %c0_6, %c0_7] : memref<2x64x128xbf16, #tpu.memory_space<vmem>>, vector<1x64x128xbf16>
    %12 = vector.shape_cast %11 : vector<1x64x128xbf16> to vector<64x128xbf16>
    %cst_8 = arith.constant dense<0.000000e+00> : vector<11x128xf32>
    %13 = tpu.matmul %10, %12, %cst_8 {dimension_numbers = #tpu.dot_dimension_numbers<[1], [0], [0], [1], [0, 0, 1, 1], [], []>} : vector<11x64xbf16>, vector<64x128xbf16>, vector<11x128xf32> -> vector<11x128xf32>
    %14 = arith.addf %8, %13 : vector<11x128xf32>
    %c0_9 = arith.constant 0 : index
    %c0_10 = arith.constant 0 : index
    %15 = vector.load %arg3[%c0_9, %c0_10] : memref<1x128xf32, #tpu.memory_space<vmem>>, vector<1x128xf32>
    %16 = vector.broadcast %15 : vector<1x128xf32> to vector<11x128xf32>
    %17 = arith.addf %14, %16 : vector<11x128xf32>
    %c0_11 = arith.constant 0 : index
    %c0_12 = arith.constant 0 : index
    %c0_13 = arith.constant 0 : index
    %18 = vector.load %arg4[%c0_11, %c0_12, %c0_13] : memref<1x11x128xf32, #tpu.memory_space<vmem>>, vector<1x11x128xf32>
    %19 = vector.shape_cast %18 : vector<1x11x128xf32> to vector<11x128xf32>
    %20 = vector.shape_cast %17 : vector<11x128xf32> to vector<1x11x128xf32>
    tpu.vector_store %arg4[%c0_11, %c0_12, %c0_13], %20 {strides = array<i32>} : memref<1x11x128xf32, #tpu.memory_space<vmem>>, vector<1x11x128xf32>,
    return
  }
  func.func @transform_0(%arg0: i32) -> (i32, i32, i32) {
    %c0_i32 = arith.constant 0 : i32
    %c0_i32_0 = arith.constant 0 : i32
    %c0_i32_1 = arith.constant 0 : i32
    return %arg0, %c0_i32, %c0_i32_0 : i32, i32, i32
  }
  func.func @transform_1(%arg0: i32) -> (i32, i32, i32) {
    %c0_i32 = arith.constant 0 : i32
    %c0_i32_0 = arith.constant 0 : i32
    %c0_i32_1 = arith.constant 0 : i32
    %c0_i32_2 = arith.constant 0 : i32
    return %c0_i32, %c0_i32_0, %c0_i32_1 : i32, i32, i32
  }
  func.func @transform_2(%arg0: i32) -> (i32, i32) {
    %c0_i32 = arith.constant 0 : i32
    %c0_i32_0 = arith.constant 0 : i32
    %c0_i32_1 = arith.constant 0 : i32
    return %c0_i32, %c0_i32_0 : i32, i32
  }
  func.func @transform_3(%arg0: i32) -> (i32, i32, i32) {
    %c0_i32 = arith.constant 0 : i32
    %c0_i32_0 = arith.constant 0 : i32
    %c0_i32_1 = arith.constant 0 : i32
    return %arg0, %c0_i32, %c0_i32_0 : i32, i32, i32
  }
}

module attributes {stable_mosaic.version = 11 : i64} {
  func.func @_conv1d_kernel(%arg0: i32, %arg1: memref<1x11x128xf32, #tpu.memory_space<vmem>>, %arg2: memref<2x128x128xbf16, #tpu.memory_space<vmem>>, %arg3: memref<1x128xf32, #tpu.memory_space<vmem>>, %arg4: memref<1x10x128xf32, #tpu.memory_space<vmem>>) attributes {dimension_semantics = [#tpu.dimension_semantics<parallel>], iteration_bounds = array<i64: 2>, scalar_prefetch = 0 : i64, scratch_operands = 0 : i64, tpu.core_type = #tpu.core_type<tc>, window_params = [{transform_indices = @transform_0, window_bounds = array<i64: 1, 11, 128>}, {pipeline_mode = #tpu.pipeline_mode<synchronous>, transform_indices = @transform_1, window_bounds = array<i64: 2, 128, 128>}, {pipeline_mode = #tpu.pipeline_mode<synchronous>, transform_indices = @transform_2, window_bounds = array<i64: 1, 128>}, {transform_indices = @transform_3, window_bounds = array<i64: 1, 10, 128>}]} {
    %c0 = arith.constant 0 : index
    %c0_0 = arith.constant 0 : index
    %c0_1 = arith.constant 0 : index
    %0 = vector.load %arg1[%c0, %c0_0, %c0_1] : memref<1x11x128xf32, #tpu.memory_space<vmem>>, vector<1x11x128xf32>
    %1 = vector.shape_cast %0 : vector<1x11x128xf32> to vector<11x128xf32>
    %cst = arith.constant 0.000000e+00 : f32
    %2 = vector.broadcast %cst : f32 to vector<10x128xf32>
    %3 = vector.extract_strided_slice %1 {offsets = [0, 0], sizes = [10, 128], strides = [1, 1]} : vector<11x128xf32> to vector<10x128xf32>
    %4 = arith.truncf %3 : vector<10x128xf32> to vector<10x128xbf16>
    %c0_2 = arith.constant 0 : index
    %c0_3 = arith.constant 0 : index
    %c0_4 = arith.constant 0 : index
    %5 = vector.load %arg2[%c0_2, %c0_3, %c0_4] : memref<2x128x128xbf16, #tpu.memory_space<vmem>>, vector<1x128x128xbf16>
    %6 = vector.shape_cast %5 : vector<1x128x128xbf16> to vector<128x128xbf16>
    %cst_5 = arith.constant dense<0.000000e+00> : vector<10x128xf32>
    %7 = tpu.matmul %4, %6, %cst_5 {dimension_numbers = #tpu.dot_dimension_numbers<[1], [0], [0], [1], [0, 0, 1, 1], [], []>} : vector<10x128xbf16>, vector<128x128xbf16>, vector<10x128xf32> -> vector<10x128xf32>
    %8 = arith.addf %2, %7 : vector<10x128xf32>
    %9 = vector.extract_strided_slice %1 {offsets = [1, 0], sizes = [10, 128], strides = [1, 1]} : vector<11x128xf32> to vector<10x128xf32>
    %10 = arith.truncf %9 : vector<10x128xf32> to vector<10x128xbf16>
    %c1 = arith.constant 1 : index
    %c0_6 = arith.constant 0 : index
    %c0_7 = arith.constant 0 : index
    %11 = vector.load %arg2[%c1, %c0_6, %c0_7] : memref<2x128x128xbf16, #tpu.memory_space<vmem>>, vector<1x128x128xbf16>
    %12 = vector.shape_cast %11 : vector<1x128x128xbf16> to vector<128x128xbf16>
    %cst_8 = arith.constant dense<0.000000e+00> : vector<10x128xf32>
    %13 = tpu.matmul %10, %12, %cst_8 {dimension_numbers = #tpu.dot_dimension_numbers<[1], [0], [0], [1], [0, 0, 1, 1], [], []>} : vector<10x128xbf16>, vector<128x128xbf16>, vector<10x128xf32> -> vector<10x128xf32>
    %14 = arith.addf %8, %13 : vector<10x128xf32>
    %c0_9 = arith.constant 0 : index
    %c0_10 = arith.constant 0 : index
    %15 = vector.load %arg3[%c0_9, %c0_10] : memref<1x128xf32, #tpu.memory_space<vmem>>, vector<1x128xf32>
    %16 = vector.broadcast %15 : vector<1x128xf32> to vector<10x128xf32>
    %17 = arith.addf %14, %16 : vector<10x128xf32>
    %c0_11 = arith.constant 0 : index
    %c0_12 = arith.constant 0 : index
    %c0_13 = arith.constant 0 : index
    %18 = vector.load %arg4[%c0_11, %c0_12, %c0_13] : memref<1x10x128xf32, #tpu.memory_space<vmem>>, vector<1x10x128xf32>
    %19 = vector.shape_cast %18 : vector<1x10x128xf32> to vector<10x128xf32>
    %20 = vector.shape_cast %17 : vector<10x128xf32> to vector<1x10x128xf32>
    tpu.vector_store %arg4[%c0_11, %c0_12, %c0_13], %20 {strides = array<i32>} : memref<1x10x128xf32, #tpu.memory_space<vmem>>, vector<1x10x128xf32>,
    return
  }
  func.func @transform_0(%arg0: i32) -> (i32, i32, i32) {
    %c0_i32 = arith.constant 0 : i32
    %c0_i32_0 = arith.constant 0 : i32
    %c0_i32_1 = arith.constant 0 : i32
    return %arg0, %c0_i32, %c0_i32_0 : i32, i32, i32
  }
  func.func @transform_1(%arg0: i32) -> (i32, i32, i32) {
    %c0_i32 = arith.constant 0 : i32
    %c0_i32_0 = arith.constant 0 : i32
    %c0_i32_1 = arith.constant 0 : i32
    %c0_i32_2 = arith.constant 0 : i32
    return %c0_i32, %c0_i32_0, %c0_i32_1 : i32, i32, i32
  }
  func.func @transform_2(%arg0: i32) -> (i32, i32) {
    %c0_i32 = arith.constant 0 : i32
    %c0_i32_0 = arith.constant 0 : i32
    %c0_i32_1 = arith.constant 0 : i32
    return %c0_i32, %c0_i32_0 : i32, i32
  }
  func.func @transform_3(%arg0: i32) -> (i32, i32, i32) {
    %c0_i32 = arith.constant 0 : i32
    %c0_i32_0 = arith.constant 0 : i32
    %c0_i32_1 = arith.constant 0 : i32
    return %arg0, %c0_i32, %c0_i32_0 : i32, i32, i32
  }
}

module attributes {stable_mosaic.version = 11 : i64} {
  func.func @_align_pool_kernel(%arg0: i32, %arg1: memref<1x10x128xf32, #tpu.memory_space<vmem>>, %arg2: memref<1x8x10xf32, #tpu.memory_space<vmem>>, %arg3: memref<1x8x256xf32, #tpu.memory_space<vmem>>) attributes {dimension_semantics = [#tpu.dimension_semantics<parallel>], iteration_bounds = array<i64: 2>, scalar_prefetch = 0 : i64, scratch_operands = 0 : i64, tpu.core_type = #tpu.core_type<tc>, window_params = [{transform_indices = @transform_0, window_bounds = array<i64: 1, 10, 128>}, {transform_indices = @transform_1, window_bounds = array<i64: 1, 8, 10>}, {transform_indices = @transform_2, window_bounds = array<i64: 1, 8, 256>}]} {
    %c0 = arith.constant 0 : index
    %c0_0 = arith.constant 0 : index
    %c0_1 = arith.constant 0 : index
    %0 = vector.load %arg1[%c0, %c0_0, %c0_1] : memref<1x10x128xf32, #tpu.memory_space<vmem>>, vector<1x10x128xf32>
    %1 = vector.shape_cast %0 : vector<1x10x128xf32> to vector<10x128xf32>
    %c0_2 = arith.constant 0 : index
    %c0_3 = arith.constant 0 : index
    %c0_4 = arith.constant 0 : index
    %2 = vector.load %arg2[%c0_2, %c0_3, %c0_4] : memref<1x8x10xf32, #tpu.memory_space<vmem>>, vector<1x8x10xf32>
    %3 = vector.shape_cast %2 : vector<1x8x10xf32> to vector<8x10xf32>
    %cst = arith.constant dense<0.000000e+00> : vector<8x128xf32>
    %4 = tpu.matmul %3, %1, %cst {dimension_numbers = #tpu.dot_dimension_numbers<[1], [0], [0], [1], [0, 0, 1, 1], [], []>} : vector<8x10xf32>, vector<10x128xf32>, vector<8x128xf32> -> vector<8x128xf32>
    %cst_5 = arith.constant dense<0.000000e+00> : vector<8xf32>
    %5 = vector.multi_reduction <add>, %3, %cst_5 [1] : vector<8x10xf32> to vector<8xf32>
    %6 = vector.shape_cast %5 : vector<8xf32> to vector<8x1xf32>
    %cst_6 = arith.constant 9.99999997E-7 : f32
    %7 = vector.broadcast %cst_6 : f32 to vector<8x1xf32>
    %8 = arith.addf %6, %7 : vector<8x1xf32>
    %9 = vector.broadcast %8 : vector<8x1xf32> to vector<8x128xf32>
    %10 = arith.divf %4, %9 : vector<8x128xf32>
    %cst_7 = arith.constant -1.000000e+06 : f32
    %11 = vector.broadcast %cst_7 : f32 to vector<8x128xf32>
    %12 = vector.shape_cast %3 : vector<8x10xf32> to vector<8x10x1xf32>
    %cst_8 = arith.constant 0.000000e+00 : f32
    %13 = vector.broadcast %cst_8 : f32 to vector<8x10x1xf32>
    %14 = arith.cmpf ogt, %12, %13 : vector<8x10x1xf32>
    %15 = vector.shape_cast %1 : vector<10x128xf32> to vector<1x10x128xf32>
    %cst_9 = arith.constant -1.000000e+06 : f32
    %16 = vector.shape_cast %14 : vector<8x10x1xi1> to vector<8x10x1xi1>
    %17 = vector.broadcast %16 : vector<8x10x1xi1> to vector<8x10x128xi1>
    %18 = vector.shape_cast %15 : vector<1x10x128xf32> to vector<1x10x128xf32>
    %19 = vector.broadcast %18 : vector<1x10x128xf32> to vector<8x10x128xf32>
    %20 = vector.broadcast %cst_9 : f32 to vector<8x10x128xf32>
    %21 = arith.select %17, %19, %20 : vector<8x10x128xi1>, vector<8x10x128xf32>
    %cst_10 = arith.constant dense<0xFF800000> : vector<8x128xf32>
    %22 = vector.multi_reduction <maximumf>, %21, %cst_10 [1] : vector<8x10x128xf32> to vector<8x128xf32>
    %23 = arith.maximumf %11, %22 : vector<8x128xf32>
    %24 = tpu.concatenate %10, %23 in 1 : vector<8x128xf32>, vector<8x128xf32> -> vector<8x256xf32>
    %c0_11 = arith.constant 0 : index
    %c0_12 = arith.constant 0 : index
    %c0_13 = arith.constant 0 : index
    %25 = vector.load %arg3[%c0_11, %c0_12, %c0_13] : memref<1x8x256xf32, #tpu.memory_space<vmem>>, vector<1x8x256xf32>
    %26 = vector.shape_cast %25 : vector<1x8x256xf32> to vector<8x256xf32>
    %27 = vector.shape_cast %24 : vector<8x256xf32> to vector<1x8x256xf32>
    tpu.vector_store %arg3[%c0_11, %c0_12, %c0_13], %27 {strides = array<i32>} : memref<1x8x256xf32, #tpu.memory_space<vmem>>, vector<1x8x256xf32>,
    return
  }
  func.func @transform_0(%arg0: i32) -> (i32, i32, i32) {
    %c0_i32 = arith.constant 0 : i32
    %c0_i32_0 = arith.constant 0 : i32
    %c0_i32_1 = arith.constant 0 : i32
    return %arg0, %c0_i32, %c0_i32_0 : i32, i32, i32
  }
  func.func @transform_1(%arg0: i32) -> (i32, i32, i32) {
    %c0_i32 = arith.constant 0 : i32
    %c0_i32_0 = arith.constant 0 : i32
    %c0_i32_1 = arith.constant 0 : i32
    return %arg0, %c0_i32, %c0_i32_0 : i32, i32, i32
  }
  func.func @transform_2(%arg0: i32) -> (i32, i32, i32) {
    %c0_i32 = arith.constant 0 : i32
    %c0_i32_0 = arith.constant 0 : i32
    %c0_i32_1 = arith.constant 0 : i32
    return %arg0, %c0_i32, %c0_i32_0 : i32, i32, i32
  }
}

module attributes {stable_mosaic.version = 11 : i64} {
  func.func @_mm_kernel(%arg0: i32, %arg1: i32, %arg2: i32, %arg3: memref<16x768xbf16, #tpu.memory_space<vmem>>, %arg4: memref<768x256xbf16, #tpu.memory_space<vmem>>, %arg5: memref<1x256xf32, #tpu.memory_space<vmem>>, %arg6: memref<16x256xf32, #tpu.memory_space<vmem>>, %arg7: memref<16x256xf32, #tpu.memory_space<vmem>>) attributes {dimension_semantics = [#tpu.dimension_semantics<parallel>, #tpu.dimension_semantics<parallel>, #tpu.dimension_semantics<arbitrary>], iteration_bounds = array<i64: 1, 1, 1>, scalar_prefetch = 0 : i64, scratch_operands = 1 : i64, tpu.core_type = #tpu.core_type<tc>, window_params = [{transform_indices = @transform_0, window_bounds = array<i64: 16, 768>}, {transform_indices = @transform_1, window_bounds = array<i64: 768, 256>}, {transform_indices = @transform_2, window_bounds = array<i64: 1, 256>}, {transform_indices = @transform_3, window_bounds = array<i64: 16, 256>}]} {
    %c0_i32 = arith.constant 0 : i32
    %0 = arith.cmpi eq, %arg2, %c0_i32 : i32
    %1 = arith.extui %0 : i1 to i32
    %c0_i32_0 = arith.constant 0 : i32
    %2 = arith.cmpi ne, %1, %c0_i32_0 : i32
    scf.if %2 {
      %cst_10 = arith.constant 0.000000e+00 : f32
      %12 = vector.broadcast %cst_10 : f32 to vector<16x256xf32>
      %c0_11 = arith.constant 0 : index
      %c0_12 = arith.constant 0 : index
      %13 = vector.load %arg7[%c0_11, %c0_12] : memref<16x256xf32, #tpu.memory_space<vmem>>, vector<16x256xf32>
      tpu.vector_store %arg7[%c0_11, %c0_12], %12 {strides = array<i32>} : memref<16x256xf32, #tpu.memory_space<vmem>>, vector<16x256xf32>,
    } else {
    }
    %c0 = arith.constant 0 : index
    %c0_1 = arith.constant 0 : index
    %3 = vector.load %arg7[%c0, %c0_1] : memref<16x256xf32, #tpu.memory_space<vmem>>, vector<16x256xf32>
    %c0_2 = arith.constant 0 : index
    %c0_3 = arith.constant 0 : index
    %4 = vector.load %arg3[%c0_2, %c0_3] : memref<16x768xbf16, #tpu.memory_space<vmem>>, vector<16x768xbf16>
    %c0_4 = arith.constant 0 : index
    %c0_5 = arith.constant 0 : index
    %5 = vector.load %arg4[%c0_4, %c0_5] : memref<768x256xbf16, #tpu.memory_space<vmem>>, vector<768x256xbf16>
    %cst = arith.constant dense<0.000000e+00> : vector<16x256xf32>
    %6 = tpu.matmul %4, %5, %cst {dimension_numbers = #tpu.dot_dimension_numbers<[1], [0], [0], [1], [0, 0, 1, 1], [], []>} : vector<16x768xbf16>, vector<768x256xbf16>, vector<16x256xf32> -> vector<16x256xf32>
    %7 = arith.addf %3, %6 : vector<16x256xf32>
    %c0_6 = arith.constant 0 : index
    %c0_7 = arith.constant 0 : index
    %8 = vector.load %arg7[%c0_6, %c0_7] : memref<16x256xf32, #tpu.memory_space<vmem>>, vector<16x256xf32>
    tpu.vector_store %arg7[%c0_6, %c0_7], %7 {strides = array<i32>} : memref<16x256xf32, #tpu.memory_space<vmem>>, vector<16x256xf32>,
    %c0_i32_8 = arith.constant 0 : i32
    %9 = arith.cmpi eq, %arg2, %c0_i32_8 : i32
    %10 = arith.extui %9 : i1 to i32
    %c0_i32_9 = arith.constant 0 : i32
    %11 = arith.cmpi ne, %10, %c0_i32_9 : i32
    scf.if %11 {
      %c0_10 = arith.constant 0 : index
      %c0_11 = arith.constant 0 : index
      %12 = vector.load %arg7[%c0_10, %c0_11] : memref<16x256xf32, #tpu.memory_space<vmem>>, vector<16x256xf32>
      %c0_12 = arith.constant 0 : index
      %c0_13 = arith.constant 0 : index
      %13 = vector.load %arg5[%c0_12, %c0_13] : memref<1x256xf32, #tpu.memory_space<vmem>>, vector<1x256xf32>
      %14 = vector.broadcast %13 : vector<1x256xf32> to vector<16x256xf32>
      %15 = arith.addf %12, %14 : vector<16x256xf32>
      %c0_14 = arith.constant 0 : index
      %c0_15 = arith.constant 0 : index
      %16 = vector.load %arg6[%c0_14, %c0_15] : memref<16x256xf32, #tpu.memory_space<vmem>>, vector<16x256xf32>
      tpu.vector_store %arg6[%c0_14, %c0_15], %15 {strides = array<i32>} : memref<16x256xf32, #tpu.memory_space<vmem>>, vector<16x256xf32>,
    } else {
    }
    return
  }
  func.func @transform_0(%arg0: i32, %arg1: i32, %arg2: i32) -> (i32, i32) {
    %c0_i32 = arith.constant 0 : i32
    return %arg0, %arg2 : i32, i32
  }
  func.func @transform_1(%arg0: i32, %arg1: i32, %arg2: i32) -> (i32, i32) {
    %c0_i32 = arith.constant 0 : i32
    return %arg2, %arg1 : i32, i32
  }
  func.func @transform_2(%arg0: i32, %arg1: i32, %arg2: i32) -> (i32, i32) {
    %c0_i32 = arith.constant 0 : i32
    %c0_i32_0 = arith.constant 0 : i32
    return %c0_i32, %arg1 : i32, i32
  }
  func.func @transform_3(%arg0: i32, %arg1: i32, %arg2: i32) -> (i32, i32) {
    %c0_i32 = arith.constant 0 : i32
    return %arg0, %arg1 : i32, i32
  }
}

module attributes {stable_mosaic.version = 11 : i64} {
  func.func @_mm_gate_kernel(%arg0: i32, %arg1: i32, %arg2: i32, %arg3: memref<16x256xbf16, #tpu.memory_space<vmem>>, %arg4: memref<256x256xbf16, #tpu.memory_space<vmem>>, %arg5: memref<1x256xf32, #tpu.memory_space<vmem>>, %arg6: memref<16x256xf32, #tpu.memory_space<vmem>>, %arg7: memref<16x256xf32, #tpu.memory_space<vmem>>, %arg8: memref<16x256xf32, #tpu.memory_space<vmem>>) attributes {dimension_semantics = [#tpu.dimension_semantics<parallel>, #tpu.dimension_semantics<parallel>, #tpu.dimension_semantics<arbitrary>], iteration_bounds = array<i64: 1, 1, 1>, scalar_prefetch = 0 : i64, scratch_operands = 1 : i64, tpu.core_type = #tpu.core_type<tc>, window_params = [{transform_indices = @transform_0, window_bounds = array<i64: 16, 256>}, {transform_indices = @transform_1, window_bounds = array<i64: 256, 256>}, {transform_indices = @transform_2, window_bounds = array<i64: 1, 256>}, {transform_indices = @transform_3, window_bounds = array<i64: 16, 256>}, {transform_indices = @transform_4, window_bounds = array<i64: 16, 256>}]} {
    %c0_i32 = arith.constant 0 : i32
    %0 = arith.cmpi eq, %arg2, %c0_i32 : i32
    %1 = arith.extui %0 : i1 to i32
    %c0_i32_0 = arith.constant 0 : i32
    %2 = arith.cmpi ne, %1, %c0_i32_0 : i32
    scf.if %2 {
      %cst_10 = arith.constant 0.000000e+00 : f32
      %12 = vector.broadcast %cst_10 : f32 to vector<16x256xf32>
      %c0_11 = arith.constant 0 : index
      %c0_12 = arith.constant 0 : index
      %13 = vector.load %arg8[%c0_11, %c0_12] : memref<16x256xf32, #tpu.memory_space<vmem>>, vector<16x256xf32>
      tpu.vector_store %arg8[%c0_11, %c0_12], %12 {strides = array<i32>} : memref<16x256xf32, #tpu.memory_space<vmem>>, vector<16x256xf32>,
    } else {
    }
    %c0 = arith.constant 0 : index
    %c0_1 = arith.constant 0 : index
    %3 = vector.load %arg8[%c0, %c0_1] : memref<16x256xf32, #tpu.memory_space<vmem>>, vector<16x256xf32>
    %c0_2 = arith.constant 0 : index
    %c0_3 = arith.constant 0 : index
    %4 = vector.load %arg3[%c0_2, %c0_3] : memref<16x256xbf16, #tpu.memory_space<vmem>>, vector<16x256xbf16>
    %c0_4 = arith.constant 0 : index
    %c0_5 = arith.constant 0 : index
    %5 = vector.load %arg4[%c0_4, %c0_5] : memref<256x256xbf16, #tpu.memory_space<vmem>>, vector<256x256xbf16>
    %cst = arith.constant dense<0.000000e+00> : vector<16x256xf32>
    %6 = tpu.matmul %4, %5, %cst {dimension_numbers = #tpu.dot_dimension_numbers<[1], [0], [0], [1], [0, 0, 1, 1], [], []>} : vector<16x256xbf16>, vector<256x256xbf16>, vector<16x256xf32> -> vector<16x256xf32>
    %7 = arith.addf %3, %6 : vector<16x256xf32>
    %c0_6 = arith.constant 0 : index
    %c0_7 = arith.constant 0 : index
    %8 = vector.load %arg8[%c0_6, %c0_7] : memref<16x256xf32, #tpu.memory_space<vmem>>, vector<16x256xf32>
    tpu.vector_store %arg8[%c0_6, %c0_7], %7 {strides = array<i32>} : memref<16x256xf32, #tpu.memory_space<vmem>>, vector<16x256xf32>,
    %c0_i32_8 = arith.constant 0 : i32
    %9 = arith.cmpi eq, %arg2, %c0_i32_8 : i32
    %10 = arith.extui %9 : i1 to i32
    %c0_i32_9 = arith.constant 0 : i32
    %11 = arith.cmpi ne, %10, %c0_i32_9 : i32
    scf.if %11 {
      %c0_10 = arith.constant 0 : index
      %c0_11 = arith.constant 0 : index
      %12 = vector.load %arg6[%c0_10, %c0_11] : memref<16x256xf32, #tpu.memory_space<vmem>>, vector<16x256xf32>
      %c0_12 = arith.constant 0 : index
      %c0_13 = arith.constant 0 : index
      %13 = vector.load %arg8[%c0_12, %c0_13] : memref<16x256xf32, #tpu.memory_space<vmem>>, vector<16x256xf32>
      %c0_14 = arith.constant 0 : index
      %c0_15 = arith.constant 0 : index
      %14 = vector.load %arg5[%c0_14, %c0_15] : memref<1x256xf32, #tpu.memory_space<vmem>>, vector<1x256xf32>
      %15 = vector.broadcast %14 : vector<1x256xf32> to vector<16x256xf32>
      %16 = arith.addf %13, %15 : vector<16x256xf32>
      %17 = arith.negf %16 : vector<16x256xf32>
      %18 = math.exp %17 : vector<16x256xf32>
      %cst_16 = arith.constant 1.000000e+00 : f32
      %19 = vector.broadcast %cst_16 : f32 to vector<16x256xf32>
      %20 = arith.addf %19, %18 : vector<16x256xf32>
      %21 = arith.divf %19, %20 : vector<16x256xf32>
      %22 = arith.mulf %12, %21 : vector<16x256xf32>
      %23 = arith.addf %12, %22 : vector<16x256xf32>
      %c0_17 = arith.constant 0 : index
      %c0_18 = arith.constant 0 : index
      %24 = vector.load %arg7[%c0_17, %c0_18] : memref<16x256xf32, #tpu.memory_space<vmem>>, vector<16x256xf32>
      tpu.vector_store %arg7[%c0_17, %c0_18], %23 {strides = array<i32>} : memref<16x256xf32, #tpu.memory_space<vmem>>, vector<16x256xf32>,
    } else {
    }
    return
  }
  func.func @transform_0(%arg0: i32, %arg1: i32, %arg2: i32) -> (i32, i32) {
    %c0_i32 = arith.constant 0 : i32
    return %arg0, %arg2 : i32, i32
  }
  func.func @transform_1(%arg0: i32, %arg1: i32, %arg2: i32) -> (i32, i32) {
    %c0_i32 = arith.constant 0 : i32
    return %arg2, %arg1 : i32, i32
  }
  func.func @transform_2(%arg0: i32, %arg1: i32, %arg2: i32) -> (i32, i32) {
    %c0_i32 = arith.constant 0 : i32
    %c0_i32_0 = arith.constant 0 : i32
    return %c0_i32, %arg1 : i32, i32
  }
  func.func @transform_3(%arg0: i32, %arg1: i32, %arg2: i32) -> (i32, i32) {
    %c0_i32 = arith.constant 0 : i32
    return %arg0, %arg1 : i32, i32
  }
  func.func @transform_4(%arg0: i32, %arg1: i32, %arg2: i32) -> (i32, i32) {
    %c0_i32 = arith.constant 0 : i32
    return %arg0, %arg1 : i32, i32
  }
}

module attributes {stable_mosaic.version = 11 : i64} {
  func.func @_mm_kernel(%arg0: i32, %arg1: i32, %arg2: i32, %arg3: memref<16x512xbf16, #tpu.memory_space<vmem>>, %arg4: memref<512x256xbf16, #tpu.memory_space<vmem>>, %arg5: memref<1x256xf32, #tpu.memory_space<vmem>>, %arg6: memref<16x256xf32, #tpu.memory_space<vmem>>, %arg7: memref<16x256xf32, #tpu.memory_space<vmem>>) attributes {dimension_semantics = [#tpu.dimension_semantics<parallel>, #tpu.dimension_semantics<parallel>, #tpu.dimension_semantics<arbitrary>], iteration_bounds = array<i64: 1, 4, 1>, scalar_prefetch = 0 : i64, scratch_operands = 1 : i64, tpu.core_type = #tpu.core_type<tc>, window_params = [{transform_indices = @transform_0, window_bounds = array<i64: 16, 512>}, {transform_indices = @transform_1, window_bounds = array<i64: 512, 256>}, {transform_indices = @transform_2, window_bounds = array<i64: 1, 256>}, {transform_indices = @transform_3, window_bounds = array<i64: 16, 256>}]} {
    %c0_i32 = arith.constant 0 : i32
    %0 = arith.cmpi eq, %arg2, %c0_i32 : i32
    %1 = arith.extui %0 : i1 to i32
    %c0_i32_0 = arith.constant 0 : i32
    %2 = arith.cmpi ne, %1, %c0_i32_0 : i32
    scf.if %2 {
      %cst_10 = arith.constant 0.000000e+00 : f32
      %12 = vector.broadcast %cst_10 : f32 to vector<16x256xf32>
      %c0_11 = arith.constant 0 : index
      %c0_12 = arith.constant 0 : index
      %13 = vector.load %arg7[%c0_11, %c0_12] : memref<16x256xf32, #tpu.memory_space<vmem>>, vector<16x256xf32>
      tpu.vector_store %arg7[%c0_11, %c0_12], %12 {strides = array<i32>} : memref<16x256xf32, #tpu.memory_space<vmem>>, vector<16x256xf32>,
    } else {
    }
    %c0 = arith.constant 0 : index
    %c0_1 = arith.constant 0 : index
    %3 = vector.load %arg7[%c0, %c0_1] : memref<16x256xf32, #tpu.memory_space<vmem>>, vector<16x256xf32>
    %c0_2 = arith.constant 0 : index
    %c0_3 = arith.constant 0 : index
    %4 = vector.load %arg3[%c0_2, %c0_3] : memref<16x512xbf16, #tpu.memory_space<vmem>>, vector<16x512xbf16>
    %c0_4 = arith.constant 0 : index
    %c0_5 = arith.constant 0 : index
    %5 = vector.load %arg4[%c0_4, %c0_5] : memref<512x256xbf16, #tpu.memory_space<vmem>>, vector<512x256xbf16>
    %cst = arith.constant dense<0.000000e+00> : vector<16x256xf32>
    %6 = tpu.matmul %4, %5, %cst {dimension_numbers = #tpu.dot_dimension_numbers<[1], [0], [0], [1], [0, 0, 1, 1], [], []>} : vector<16x512xbf16>, vector<512x256xbf16>, vector<16x256xf32> -> vector<16x256xf32>
    %7 = arith.addf %3, %6 : vector<16x256xf32>
    %c0_6 = arith.constant 0 : index
    %c0_7 = arith.constant 0 : index
    %8 = vector.load %arg7[%c0_6, %c0_7] : memref<16x256xf32, #tpu.memory_space<vmem>>, vector<16x256xf32>
    tpu.vector_store %arg7[%c0_6, %c0_7], %7 {strides = array<i32>} : memref<16x256xf32, #tpu.memory_space<vmem>>, vector<16x256xf32>,
    %c0_i32_8 = arith.constant 0 : i32
    %9 = arith.cmpi eq, %arg2, %c0_i32_8 : i32
    %10 = arith.extui %9 : i1 to i32
    %c0_i32_9 = arith.constant 0 : i32
    %11 = arith.cmpi ne, %10, %c0_i32_9 : i32
    scf.if %11 {
      %c0_10 = arith.constant 0 : index
      %c0_11 = arith.constant 0 : index
      %12 = vector.load %arg7[%c0_10, %c0_11] : memref<16x256xf32, #tpu.memory_space<vmem>>, vector<16x256xf32>
      %c0_12 = arith.constant 0 : index
      %c0_13 = arith.constant 0 : index
      %13 = vector.load %arg5[%c0_12, %c0_13] : memref<1x256xf32, #tpu.memory_space<vmem>>, vector<1x256xf32>
      %14 = vector.broadcast %13 : vector<1x256xf32> to vector<16x256xf32>
      %15 = arith.addf %12, %14 : vector<16x256xf32>
      %c0_14 = arith.constant 0 : index
      %c0_15 = arith.constant 0 : index
      %16 = vector.load %arg6[%c0_14, %c0_15] : memref<16x256xf32, #tpu.memory_space<vmem>>, vector<16x256xf32>
      tpu.vector_store %arg6[%c0_14, %c0_15], %15 {strides = array<i32>} : memref<16x256xf32, #tpu.memory_space<vmem>>, vector<16x256xf32>,
    } else {
    }
    return
  }
  func.func @transform_0(%arg0: i32, %arg1: i32, %arg2: i32) -> (i32, i32) {
    %c0_i32 = arith.constant 0 : i32
    return %arg0, %arg2 : i32, i32
  }
  func.func @transform_1(%arg0: i32, %arg1: i32, %arg2: i32) -> (i32, i32) {
    %c0_i32 = arith.constant 0 : i32
    return %arg2, %arg1 : i32, i32
  }
  func.func @transform_2(%arg0: i32, %arg1: i32, %arg2: i32) -> (i32, i32) {
    %c0_i32 = arith.constant 0 : i32
    %c0_i32_0 = arith.constant 0 : i32
    return %c0_i32, %arg1 : i32, i32
  }
  func.func @transform_3(%arg0: i32, %arg1: i32, %arg2: i32) -> (i32, i32) {
    %c0_i32 = arith.constant 0 : i32
    return %arg0, %arg1 : i32, i32
  }
}

module attributes {stable_mosaic.version = 11 : i64} {
  func.func @_bilstm_kernel(%arg0: memref<8x8x1024xf32, #tpu.memory_space<vmem>>, %arg1: memref<8x1xf32, #tpu.memory_space<vmem>>, %arg2: memref<512x1024xbf16, #tpu.memory_space<vmem>>, %arg3: memref<8x8x256xf32, #tpu.memory_space<vmem>>, %arg4: memref<8x256xf32, #tpu.memory_space<vmem>>, %arg5: memref<8x256xf32, #tpu.memory_space<vmem>>) attributes {dimension_semantics = [], scalar_prefetch = 0 : i64, scratch_operands = 2 : i64, tpu.core_type = #tpu.core_type<tc>} {
    %c0 = arith.constant 0 : index
    %c0_0 = arith.constant 0 : index
    %0 = vector.load %arg2[%c0, %c0_0] : memref<512x1024xbf16, #tpu.memory_space<vmem>>, vector<512x1024xbf16>
    %c0_1 = arith.constant 0 : index
    %c0_2 = arith.constant 0 : index
    %1 = vector.load %arg1[%c0_1, %c0_2] : memref<8x1xf32, #tpu.memory_space<vmem>>, vector<8x1xf32>
    %2 = tpu.iota {dimensions = array<i32: 0>} : vector<8x1xi32>
    %c4_i32 = arith.constant 4 : i32
    %3 = vector.broadcast %c4_i32 : i32 to vector<8x1xi32>
    %4 = arith.cmpi slt, %2, %3 : vector<8x1xi32>
    %5 = arith.extui %4 : vector<8x1xi1> to vector<8x1xi32>
    %6 = arith.sitofp %5 : vector<8x1xi32> to vector<8x1xf32>
    %cst = arith.constant 1.000000e+00 : f32
    %7 = vector.broadcast %cst : f32 to vector<8x1xf32>
    %8 = arith.subf %7, %6 : vector<8x1xf32>
    %cst_3 = arith.constant 0.000000e+00 : f32
    %9 = vector.broadcast %cst_3 : f32 to vector<8x256xf32>
    %c0_4 = arith.constant 0 : index
    %c0_5 = arith.constant 0 : index
    %10 = vector.load %arg4[%c0_4, %c0_5] : memref<8x256xf32, #tpu.memory_space<vmem>>, vector<8x256xf32>
    tpu.vector_store %arg4[%c0_4, %c0_5], %9 {strides = array<i32>} : memref<8x256xf32, #tpu.memory_space<vmem>>, vector<8x256xf32>,
    %cst_6 = arith.constant 0.000000e+00 : f32
    %11 = vector.broadcast %cst_6 : f32 to vector<8x256xf32>
    %c0_7 = arith.constant 0 : index
    %c0_8 = arith.constant 0 : index
    %12 = vector.load %arg5[%c0_7, %c0_8] : memref<8x256xf32, #tpu.memory_space<vmem>>, vector<8x256xf32>
    tpu.vector_store %arg5[%c0_7, %c0_8], %11 {strides = array<i32>} : memref<8x256xf32, #tpu.memory_space<vmem>>, vector<8x256xf32>,
    %c0_i32 = arith.constant 0 : i32
    %c8_i32 = arith.constant 8 : i32
    %13 = arith.addi %c0_i32, %c8_i32 : i32
    %c1_i32 = arith.constant 1 : i32
    scf.for %arg6 = %c0_i32 to %13 step %c1_i32  : i32 {
      %c0_10 = arith.constant 0 : index
      %c0_11 = arith.constant 0 : index
      %14 = vector.load %arg4[%c0_10, %c0_11] : memref<8x256xf32, #tpu.memory_space<vmem>>, vector<8x256xf32>
      %c0_12 = arith.constant 0 : index
      %c0_13 = arith.constant 0 : index
      %15 = vector.load %arg5[%c0_12, %c0_13] : memref<8x256xf32, #tpu.memory_space<vmem>>, vector<8x256xf32>
      %16 = vector.broadcast %6 : vector<8x1xf32> to vector<8x256xf32>
      %17 = arith.mulf %14, %16 : vector<8x256xf32>
      %18 = vector.broadcast %8 : vector<8x1xf32> to vector<8x256xf32>
      %19 = arith.mulf %14, %18 : vector<8x256xf32>
      %20 = tpu.concatenate %17, %19 in 1 : vector<8x256xf32>, vector<8x256xf32> -> vector<8x512xf32>
      %21 = arith.index_cast %arg6 : i32 to index
      %c0_14 = arith.constant 0 : index
      %c0_15 = arith.constant 0 : index
      %22 = vector.load %arg0[%21, %c0_14, %c0_15] : memref<8x8x1024xf32, #tpu.memory_space<vmem>>, vector<1x8x1024xf32>
      %23 = vector.shape_cast %22 : vector<1x8x1024xf32> to vector<8x1024xf32>
      %24 = arith.truncf %20 : vector<8x512xf32> to vector<8x512xbf16>
      %cst_16 = arith.constant dense<0.000000e+00> : vector<8x1024xf32>
      %25 = tpu.matmul %24, %0, %cst_16 {dimension_numbers = #tpu.dot_dimension_numbers<[1], [0], [0], [1], [0, 0, 1, 1], [], []>} : vector<8x512xbf16>, vector<512x1024xbf16>, vector<8x1024xf32> -> vector<8x1024xf32>
      %26 = arith.addf %23, %25 : vector<8x1024xf32>
      %27 = vector.extract_strided_slice %26 {offsets = [0, 0], sizes = [8, 256], strides = [1, 1]} : vector<8x1024xf32> to vector<8x256xf32>
      %28 = arith.negf %27 : vector<8x256xf32>
      %29 = math.exp %28 : vector<8x256xf32>
      %cst_17 = arith.constant 1.000000e+00 : f32
      %30 = vector.broadcast %cst_17 : f32 to vector<8x256xf32>
      %31 = arith.addf %30, %29 : vector<8x256xf32>
      %32 = arith.divf %30, %31 : vector<8x256xf32>
      %33 = vector.extract_strided_slice %26 {offsets = [0, 256], sizes = [8, 256], strides = [1, 1]} : vector<8x1024xf32> to vector<8x256xf32>
      %34 = arith.negf %33 : vector<8x256xf32>
      %35 = math.exp %34 : vector<8x256xf32>
      %cst_18 = arith.constant 1.000000e+00 : f32
      %36 = vector.broadcast %cst_18 : f32 to vector<8x256xf32>
      %37 = arith.addf %36, %35 : vector<8x256xf32>
      %38 = arith.divf %36, %37 : vector<8x256xf32>
      %39 = vector.extract_strided_slice %26 {offsets = [0, 512], sizes = [8, 256], strides = [1, 1]} : vector<8x1024xf32> to vector<8x256xf32>
      %40 = math.tanh %39 : vector<8x256xf32>
      %41 = vector.extract_strided_slice %26 {offsets = [0, 768], sizes = [8, 256], strides = [1, 1]} : vector<8x1024xf32> to vector<8x256xf32>
      %42 = arith.negf %41 : vector<8x256xf32>
      %43 = math.exp %42 : vector<8x256xf32>
      %cst_19 = arith.constant 1.000000e+00 : f32
      %44 = vector.broadcast %cst_19 : f32 to vector<8x256xf32>
      %45 = arith.addf %44, %43 : vector<8x256xf32>
      %46 = arith.divf %44, %45 : vector<8x256xf32>
      %47 = arith.mulf %38, %15 : vector<8x256xf32>
      %48 = arith.mulf %32, %40 : vector<8x256xf32>
      %49 = arith.addf %47, %48 : vector<8x256xf32>
      %50 = math.tanh %49 : vector<8x256xf32>
      %51 = arith.mulf %46, %50 : vector<8x256xf32>
      %52 = arith.sitofp %arg6 : i32 to f32
      %53 = vector.broadcast %52 : f32 to vector<8x1xf32>
      %54 = arith.cmpf ogt, %1, %53 : vector<8x1xf32>
      %55 = arith.extui %54 : vector<8x1xi1> to vector<8x1xi32>
      %56 = arith.sitofp %55 : vector<8x1xi32> to vector<8x1xf32>
      %57 = vector.broadcast %56 : vector<8x1xf32> to vector<8x256xf32>
      %58 = arith.mulf %57, %49 : vector<8x256xf32>
      %cst_20 = arith.constant 1.000000e+00 : f32
      %59 = vector.broadcast %cst_20 : f32 to vector<8x1xf32>
      %60 = arith.subf %59, %56 : vector<8x1xf32>
      %61 = vector.broadcast %60 : vector<8x1xf32> to vector<8x256xf32>
      %62 = arith.mulf %61, %15 : vector<8x256xf32>
      %63 = arith.addf %58, %62 : vector<8x256xf32>
      %c0_21 = arith.constant 0 : index
      %c0_22 = arith.constant 0 : index
      %64 = vector.load %arg5[%c0_21, %c0_22] : memref<8x256xf32, #tpu.memory_space<vmem>>, vector<8x256xf32>
      tpu.vector_store %arg5[%c0_21, %c0_22], %63 {strides = array<i32>} : memref<8x256xf32, #tpu.memory_space<vmem>>, vector<8x256xf32>,
      %65 = vector.broadcast %56 : vector<8x1xf32> to vector<8x256xf32>
      %66 = arith.mulf %65, %51 : vector<8x256xf32>
      %cst_23 = arith.constant 1.000000e+00 : f32
      %67 = vector.broadcast %cst_23 : f32 to vector<8x1xf32>
      %68 = arith.subf %67, %56 : vector<8x1xf32>
      %69 = vector.broadcast %68 : vector<8x1xf32> to vector<8x256xf32>
      %70 = arith.mulf %69, %14 : vector<8x256xf32>
      %71 = arith.addf %66, %70 : vector<8x256xf32>
      %c0_24 = arith.constant 0 : index
      %c0_25 = arith.constant 0 : index
      %72 = vector.load %arg4[%c0_24, %c0_25] : memref<8x256xf32, #tpu.memory_space<vmem>>, vector<8x256xf32>
      tpu.vector_store %arg4[%c0_24, %c0_25], %71 {strides = array<i32>} : memref<8x256xf32, #tpu.memory_space<vmem>>, vector<8x256xf32>,
      %73 = vector.broadcast %56 : vector<8x1xf32> to vector<8x256xf32>
      %74 = arith.mulf %73, %51 : vector<8x256xf32>
      %75 = arith.index_cast %arg6 : i32 to index
      %c0_26 = arith.constant 0 : index
      %c0_27 = arith.constant 0 : index
      %76 = vector.load %arg3[%75, %c0_26, %c0_27] : memref<8x8x256xf32, #tpu.memory_space<vmem>>, vector<1x8x256xf32>
      %77 = vector.shape_cast %76 : vector<1x8x256xf32> to vector<8x256xf32>
      %78 = vector.shape_cast %74 : vector<8x256xf32> to vector<1x8x256xf32>
      tpu.vector_store %arg3[%75, %c0_26, %c0_27], %78 {strides = array<i32>} : memref<8x8x256xf32, #tpu.memory_space<vmem>>, vector<1x8x256xf32>,
    }
    %c8_i32_9 = arith.constant 8 : i32
    return
  }
}

module attributes {stable_mosaic.version = 11 : i64} {
  func.func @_maskmax_classify_kernel(%arg0: memref<2x8x512xf32, #tpu.memory_space<vmem>>, %arg1: memref<2x8x1xf32, #tpu.memory_space<vmem>>, %arg2: memref<512x128xbf16, #tpu.memory_space<vmem>>, %arg3: memref<1x128xf32, #tpu.memory_space<vmem>>, %arg4: memref<2x128xf32, #tpu.memory_space<vmem>>) attributes {dimension_semantics = [], scalar_prefetch = 0 : i64, scratch_operands = 0 : i64, tpu.core_type = #tpu.core_type<tc>} {
    %c0 = arith.constant 0 : index
    %c0_0 = arith.constant 0 : index
    %c0_1 = arith.constant 0 : index
    %0 = vector.load %arg0[%c0, %c0_0, %c0_1] : memref<2x8x512xf32, #tpu.memory_space<vmem>>, vector<2x8x512xf32>
    %c0_2 = arith.constant 0 : index
    %c0_3 = arith.constant 0 : index
    %c0_4 = arith.constant 0 : index
    %1 = vector.load %arg1[%c0_2, %c0_3, %c0_4] : memref<2x8x1xf32, #tpu.memory_space<vmem>>, vector<2x8x1xf32>
    %cst = arith.constant 1.000000e+00 : f32
    %2 = vector.broadcast %cst : f32 to vector<2x8x1xf32>
    %3 = arith.subf %2, %1 : vector<2x8x1xf32>
    %cst_5 = arith.constant 1.000000e+06 : f32
    %4 = vector.broadcast %cst_5 : f32 to vector<2x8x1xf32>
    %5 = arith.mulf %3, %4 : vector<2x8x1xf32>
    %6 = vector.broadcast %5 : vector<2x8x1xf32> to vector<2x8x512xf32>
    %7 = arith.subf %0, %6 : vector<2x8x512xf32>
    %cst_6 = arith.constant dense<0xFF800000> : vector<2x512xf32>
    %8 = vector.multi_reduction <maximumf>, %7, %cst_6 [1] : vector<2x8x512xf32> to vector<2x512xf32>
    %9 = arith.truncf %8 : vector<2x512xf32> to vector<2x512xbf16>
    %c0_7 = arith.constant 0 : index
    %c0_8 = arith.constant 0 : index
    %10 = vector.load %arg2[%c0_7, %c0_8] : memref<512x128xbf16, #tpu.memory_space<vmem>>, vector<512x128xbf16>
    %cst_9 = arith.constant dense<0.000000e+00> : vector<2x128xf32>
    %11 = tpu.matmul %9, %10, %cst_9 {dimension_numbers = #tpu.dot_dimension_numbers<[1], [0], [0], [1], [0, 0, 1, 1], [], []>} : vector<2x512xbf16>, vector<512x128xbf16>, vector<2x128xf32> -> vector<2x128xf32>
    %c0_10 = arith.constant 0 : index
    %c0_11 = arith.constant 0 : index
    %12 = vector.load %arg3[%c0_10, %c0_11] : memref<1x128xf32, #tpu.memory_space<vmem>>, vector<1x128xf32>
    %13 = vector.broadcast %12 : vector<1x128xf32> to vector<2x128xf32>
    %14 = arith.addf %11, %13 : vector<2x128xf32>
    %c0_12 = arith.constant 0 : index
    %c0_13 = arith.constant 0 : index
    %15 = vector.load %arg4[%c0_12, %c0_13] : memref<2x128xf32, #tpu.memory_space<vmem>>, vector<2x128xf32>
    tpu.vector_store %arg4[%c0_12, %c0_13], %14 {strides = array<i32>} : memref<2x128xf32, #tpu.memory_space<vmem>>, vector<2x128xf32>,
    return
  }
}

</mosaic_0001>

<bundles_post_ra>
// kernel: my_model2_forward.12
= control target key start
LH: loop header
LB: loop body
LE: loop exit
PB: predicated region body
PF: predicated region fallthrough
CT: control target
= control target key end

     0   :  { %8 = vsyncpa [#allocation3], 0  ;;  %s519_s12 = smov 0   ;;  %s570_s0 = inlined_call_operand.vmem [shape: f32[2,12,64], index: 0, kind: input, shape index: {}]   ;;  %s571_s1 = inlined_call_operand.vmem [shape: bf16[2,64,128], index: 1, kind: input, shape index: {}]   ;;  %s572_s2 = inlined_call_operand.hbm [shape: f32[1,128], index: 2, kind: input, shape index: {}]   ;;  %s573_s3 = inlined_call_operand.vmem [shape: f32[2,11,128], index: 3, kind: output, shape index: {}]  }
   0x1 LB: > { %s371_s13 = sadd.s32 4294967295, %s496_s12   ;;  %p373_p0 = scmp.ge.s32.totalorder %s496_s12, 1  ;;  %s496_s12 = sphi %s519_s12, %s14_s12  }
   0x2   : > { %p113_p1 = scmp.lt.s32.totalorder %s496_s12, 3  ;;  %s128_s16 = sshll.u32 %s572_s2, 4  ;;  %s129_s16 = int_to_ptr.hbm [resolvable:$true] %s128_s16 }
   0x3   : > { %p444_p3 = scmp.eq.s32.totalorder %s371_s13, 0  ;;  %s498_s17 = smov [#allocation2]  }
   0x4   : > { %p114_p2 = pnand %p373_p0, %p113_p1  ;;  %s130_s18 = sshll.u32 %s498_s17, 4  ;;  %s131_s18 = int_to_ptr.vmem [resolvable:$true] %s130_s18 }
   0x6   : > { %p440_p4 = pneg %p114_p2  ;;  %151 = sbr.rel (%p114_p2) target bundleno = 168 (0xa8), region = 32 }
   0x8   : > { %p441_p5 = pnand %p444_p3, %p440_p4 }
   0xa   : > { %443 = dma.hbm_to_vmem [thread:$0]  (!%p441_p5), %s129_s16, 16, %s131_s18, [#allocation3]  }
   0xb   : > { %491 = dma.done.wait (%p444_p3), [#allocation3], 16  }
   0xc   : > { %493 = vsyncadd (%p444_p3), [#allocation3], 4294967280  ;;  %p176_p6 = scmp.lt.s32.totalorder %s371_s13, 1  ;;  %v435_v0 = vld [vmem:[%s571_s1 + $0x38] sm:$0xff]  ;;  %v434_v2 = vld [vmem:[%s571_s1 + $0x30] sm:$0xff]  ;;  %vm238_vm0 = vcmask 523264  }
   0xd   : > { %v431_v1 = vld [vmem:[%s571_s1 + $0x18] sm:$0xff]  ;;  %246 = vmatpush.bf16.msra.mxu0 %v435_v0  ;;  %v430_v3 = vld [vmem:[%s571_s1 + $0x10] sm:$0xff]  ;;  %v433_v7 = vld [vmem:[%s571_s1 + $0x28] sm:$0xff] }
   0xe   : > { %s575_s13 = smov (!%p176_p6, %s371_s13), 1  ;;  %286 = vmatpush.bf16.msra.mxu1 %v431_v1  ;;  %v429_v8 = vld [vmem:[%s571_s1 + $0x8] sm:$0xff]  ;;  %v432_v12 = vld [vmem:[%s571_s1 + $0x20] sm:$0xff] }
   0xf   : > { %s426_s19 = sshll.u32 %s575_s13, 4  ;;  %v428_v13 = vld [vmem:[%s571_s1] sm:$0xff] }
  0x10   : > { %s180_s22 = scalar_lea.vmem %s570_s0, %s426_s19  ;;  %v455_v15 = vld [vmem:[#allocation2] ss:$0 sm:$0xff]  ;;  %s185_s16 = scalar_lea.vmem %s573_s3, %s426_s19 }
  0x11   : > { %v187_v4 = vld [vmem:[%s180_s22] sm:$0xff]  ;;  %v188_v5 = vld [vmem:[%s180_s22 + $0x8] sm:$0xf]  ;;  %247 = vmatpush.bf16.msra.mxu0 %v434_v2 }
  0x12   : > { %v189_v6 = vpack.c.bf16 %v188_v5, %v187_v4  ;;  %287 = vmatpush.bf16.msra.mxu1 %v430_v3 }
  0x14   : > { %v210_v9 = vshll.u32 %v189_v6, 16  ;;  %v208_v10 = vshrl.u32 %v189_v6, 16 }
  0x15   : > { %248 = vmatpush.bf16.msra.mxu0 %v433_v7 }
  0x16   : > { %v212_v11 = vrot.slane %v210_v9, 1  ;;  %288 = vmatpush.bf16.msra.mxu1 %v429_v8 }
  0x18   : > { %v213_v14 = vor.u32 %v212_v11, %v208_v10 }
  0x19   : > { %249 = vmatpush.bf16.msra.mxu0 %v432_v12 }
  0x1a   : > { %289 = vmatpush.bf16.msra.mxu1 %v428_v13 }
  0x1c   : > { %406 = vmatmul.msk.bf16.vlgmr.msra.gmra.mxu0 %vm238_vm0, %v213_v14 }
  0x1d   : > { %423 = vmatmul.msk.bf16.vlgmr.msra.gmra.mxu1 %vm238_vm0, %v189_v6 }
  0x99   : > { %v251_v16 = vpop.f32.mrf.mxu0 }
  0x9a   : > { %v291_v17 = vpop.f32.mrf.mxu1 }
  0x9b   : > { %v292_v18 = vadd.f32 %v291_v17, %v251_v16 }
  0x9d   : > { %v300_v19 = vadd.f32 %v455_v15, %v292_v18 }
  0x9f   : > { %302 = vst [vmem:[%s185_s16] sm:$0xff] %v300_v19 }
  0xa1   : > { %v253_v20 = vpop.f32.mrf.mxu0 }
  0xa2   : > { %v293_v21 = vpop.f32.mrf.mxu1 }
  0xa3   : > { %v294_v22 = vadd.f32 %v293_v21, %v253_v20 }
  0xa5   : > { %v301_v23 = vadd.f32 %v455_v15, %v294_v22 }
  0xa7   : > { %303 = vst [vmem:[%s185_s16 + $0x8] sm:$0x7] %v301_v23 }
  0xa8 PF: > { %s14_s12 = sadd.s32 1, %s496_s12  }
  0xa9   : > { %p11_p7 = scmp.ge.s32.totalorder %s14_s12, 4  }
  0xab   :  { %13 = sbr.rel (!%p11_p7) target bundleno = 1 (0x1), region = 68 }
  0xb0   :  { %325 = vsyncpa [#allocation3], 1 }
  0xb1   :  { %327 = vsyncpa [#allocation3 + $0x1], 1 }

// kernel: my_model2_forward.11
= control target key start
LH: loop header
LB: loop body
LE: loop exit
PB: predicated region body
PF: predicated region fallthrough
CT: control target
= control target key end

     0   :  { %8 = vsyncpa [#allocation3], 0  ;;  %s949_s0 = inlined_call_operand.hbm [shape: f32[2,16,40], index: 0, kind: input, shape index: {}]   ;;  %s950_s1 = inlined_call_operand.vmem [shape: bf16[5,40,64], index: 1, kind: input, shape index: {}]   ;;  %s951_s2 = inlined_call_operand.hbm [shape: f32[1,64], index: 2, kind: input, shape index: {}]   ;;  %s952_s3 = inlined_call_operand.vmem [shape: f32[2,12,64], index: 3, kind: output, shape index: {}]  }
   0x1   :  { %10 = vsyncpa [#allocation3 + $0x1], 0 }
   0x2   :  { %11 = vsyncpa [#allocation5], 0  ;;  %s790_s12 = smov 0   ;;  %s792_s13 = smov 0  }
   0x3   :  { %s794_s14 = smov 0   ;;  %s796_s15 = smov 0  }
   0x4 LB: > { %s809_s16 = sadd.s32 4294967295, %s765_s15   ;;  %s812_s17 = sadd.s32 1, %s765_s15   ;;  %s765_s15 = sphi %s796_s15, %s960_s15   ;;  %s761_s14 = sphi %s794_s14, %s959_s14   ;;  %s757_s13 = sphi %s792_s13, %s958_s13   ;;  %s753_s12 = sphi %s790_s12, %s957_s12  }
   0x5   : > { %s21_s18 = ssub.s32 %s765_s15, %s812_s17  ;;  %s24_s19 = sadd.s32 1, %s761_s14 }
   0x6   : > { %p22_p0 = scmp.eq.s32.totalorder %s21_s18, 0  ;;  %p31_p1 = scmp.ne.s32.totalorder %s761_s14, %s757_s13 }
   0x7   : > { %p32_p2 = scmp.eq.s32.totalorder %s765_s15, 0  ;;  %p37_p3 = scmp.ne.s32.totalorder %s757_s13, %s753_s12 }
   0x8   : > { %s822_s20 = scalar_select %p22_p0, %s761_s14, %s24_s19  }
   0x9   : > { %p824_p4 = por %p32_p2, %p31_p1  ;;  %p38_p5 = scmp.eq.s32.totalorder %s809_s16, 0 }
   0xa   : > { %p524_p6 = scmp.ge.s32.totalorder %s765_s15, 1  ;;  %p116_p7 = scmp.lt.s32.totalorder %s765_s15, 3 }
   0xb   : > { %p833_p8 = por %p38_p5, %p37_p3  ;;  %s131_s26 = sshll.u32 %s951_s2, 4  ;;  %s132_s26 = int_to_ptr.hbm [resolvable:$true] %s131_s26 }
   0xc   : > { %p837_p9 = pnand %p524_p6, %p116_p7  ;;  %s767_s27 = smov [#allocation4]  }
   0xd   : > { %s133_s28 = sshll.u32 %s767_s27, 4  ;;  %p629_p12 = scmp.lt.s32.totalorder %s765_s15, 2  ;;  %s134_s28 = int_to_ptr.vmem [resolvable:$true] %s133_s28 }
   0xe   : > { %p620_p10 = pneg %p837_p9  ;;  %s144_s29 = sand.u32 1, %s761_s14  }
   0xf   : > { %s602_s30 = sshll.u32 %s765_s15, 4  ;;  %p853_p13 = pnand %p629_p12, %p824_p4 }
  0x10   : > { %p621_p11 = pnand %p620_p10, %p38_p5  ;;  %s527_s5 = sshll.u32 %s144_s29, 4 }
  0x11   : > { %s153_s8 = scalar_lea.hbm %s949_s0, %s602_s30  ;;  %s148_s10 = scalar_lea.vmem [#allocation2], %s527_s5 }
  0x12   : > { %623 = dma.hbm_to_vmem [thread:$0]  (!%p621_p11), %s132_s26, 16, %s134_s28, [#allocation5]  }
  0x13   : > { %s154_s9 = sshll.u32 %s153_s8, 4  ;;  %s156_s11 = sshll.u32 %s148_s10, 4  ;;  %s155_s9 = int_to_ptr.hbm [resolvable:$true] %s154_s9  ;;  %s157_s11 = int_to_ptr.vmem [resolvable:$true] %s156_s11 }
  0x14   : > { %s145_s12 = scalar_lea.sflag [#allocation3], %s144_s29  ;;  %s697_s18 = sshra.s32 %s155_s9, 4  ;;  %s698_s18 = int_to_ptr.hbm [resolvable:$true] %s697_s18 }
  0x15   : > { %s699_s15 = scalar_lea.hbm %s698_s18, 16  ;;  %p701_p1 = pneg %p853_p13 }
  0x16   : > { %p700_p0 = scmp.ne.s32.totalorder %s698_s18, %s699_s15  ;;  %s704_s24 = scalar_lea.hbm %s949_s0, 32 }
  0x17   : > { %p705_p4 = scmp.lt.s32.totalorder %s698_s18, %s949_s0  ;;  %p706_p6 = scmp.lt.s32.totalorder %s704_s24, %s699_s15 }
  0x18   : > { %p702_p2 = pnand %p701_p1, %p700_p0 }
  0x19   : > { %p707_p7 = por %p706_p6, %p705_p4 }
  0x1a   : > { %p703_p3 = pneg %p702_p2 }
  0x1c   : > { %p708_p10 = pnand %p707_p7, %p703_p3 }
  0x1e   : > { %711 = shalt.err (!%p708_p10)
}
  0x1f   : > { %s768_s27 = smov 128   ;;  %s769_s28 = smov 8  }
  0x20   : > { %627 = dma.hbm_to_vmem [thread:$0]  (!%p853_p13), %s155_s9, 256, %s157_s11, %s145_s12, %s768_s27, %s768_s27, %s769_s28  }
  0x21   : > { %168 = sbr.rel (%p837_p9) target bundleno = 213 (0xd5), region = 32  ;;  %s170_s29 = sand.u32 (!%p837_p9), 1, %s757_s13  }
  0x22   : > { %s531_s30 = sshll.u32 (!%p837_p9), %s170_s29, 4  ;;  %s171_s5 = scalar_lea.sflag (!%p837_p9), [#allocation3], %s170_s29 }
  0x23   : > { %s174_s6 = scalar_lea.vmem (!%p837_p9), [#allocation2], %s531_s30 }
  0x26   : > { %744 = dma.done.wait (%p833_p8), %s171_s5, 256  }
  0x27   : > { %746 = vsyncadd (%p833_p8), %s171_s5, 4294967040 }
  0x28   : > { %748 = dma.done.wait (%p38_p5), [#allocation5], 16  }
  0x29   : > { %750 = vsyncadd (%p38_p5), [#allocation5], 4294967280  ;;  %v539_v0 = vld [vmem:[%s950_s1 + $0x24] sm:$0xf]  ;;  %v216_v1 = vld [vmem:[%s950_s1 + $0x10] sm:$0xf] }
  0x2a   : > { %v562_v2 = vld [vmem:[%s950_s1 + $0x38] sm:$0xf]  ;;  %v239_v3 = vunpack.c.l.b16 %v539_v0  ;;  %v276_v4 = vunpack.c.l.b16 %v216_v1  ;;  %v576_v6 = vld [vmem:[%s950_s1 + $0x4c] sm:$0xf]  ;;  %vm249_vm0 = vcmask 1043456   ;;  %v209_v12 = vld [vmem:[%s174_s6] sm:$0xff] }
  0x2b   : > { %v318_v5 = vunpack.c.l.b16 %v562_v2  ;;  %v364_v7 = vunpack.c.l.b16 %v576_v6  ;;  %v210_v13 = vld [vmem:[%s174_s6 + $0x8] sm:$0xff]  ;;  %v590_v14 = vld [vmem:[%s950_s1 + $0x60] sm:$0xf]  ;;  %v609_v23 = vld [vmem:[%s950_s1 + $0x30] sm:$0xff]  ;;  %vm245_vm1 = vcmask 326656   ;;  %p203_p5 = scmp.lt.s32.totalorder %s809_s16, 1 }
  0x2c   : > { %v242_v8 = vpack.c.b16 %v239_v3, %v239_v3  ;;  %v279_v9 = vpack.c.b16 %v276_v4, %v276_v4  ;;  %v211_v18 = vpack.c.bf16 %v210_v13, %v209_v12  ;;  %v607_v20 = vld [vmem:[%s950_s1 + $0x1c] sm:$0xff]  ;;  %v605_v21 = vld [vmem:[%s950_s1 + $0x8] sm:$0xff]  ;;  %v408_v22 = vunpack.c.l.b16 %v590_v14  ;;  %v606_v29 = vld [vmem:[%s950_s1 + $0x14] sm:$0xff] }
  0x2d   : > { %v321_v10 = vpack.c.b16 %v318_v5, %v318_v5  ;;  %v367_v11 = vpack.c.b16 %v364_v7, %v364_v7  ;;  %v611_v24 = vld [vmem:[%s950_s1 + $0x44] sm:$0xff]  ;;  %v610_v34 = vld [vmem:[%s950_s1 + $0x3c] sm:$0xff]  ;;  %v612_v40 = vld [vmem:[%s950_s1 + $0x50] sm:$0xff]  ;;  %s962_s16 = smov (!%p203_p5, %s809_s16), 1  ;;  %vm442_vm2 = vcmask 523264   ;;  %vm444_vm3 = vcmask 519168  }
  0x2e   : > { %v251_v15 = vsel %vm249_vm0, %v242_v8, 0  ;;  %v285_v16 = vsel %vm249_vm0, %v279_v9, 0  ;;  %v224_v25 = vshrl.u32 %v211_v18, 16  ;;  %v226_v26 = vshll.u32 %v211_v18, 16  ;;  %v604_v30 = vld [vmem:[%s950_s1] sm:$0xff]  ;;  %v608_v33 = vld [vmem:[%s950_s1 + $0x28] sm:$0xff] }
  0x2f   : > { %v328_v17 = vsel %vm249_vm0, %v321_v10, 0  ;;  %258 = vmatpush.bf16.msra.mxu0 %v251_v15  ;;  %292 = vmatpush.bf16.msra.mxu1 %v285_v16  ;;  %v374_v19 = vsel %vm249_vm0, %v367_v11, 0  ;;  %v411_v28 = vpack.c.b16 %v408_v22, %v408_v22  ;;  %v308_v37 = vrot.slane %v211_v18, 1  ;;  %v613_v39 = vld [vmem:[%s950_s1 + $0x58] sm:$0xff]  ;;  %s603_s12 = sshll.u32 %s962_s16, 4 }
  0x30   : > { %335 = vmatpush.bf16.msra.mxu2 %v328_v17  ;;  %381 = vmatpush.bf16.msra.mxu3 %v374_v19  ;;  %v228_v27 = vrot.slane %v226_v26, 1  ;;  %v352_v31 = vrot.slane %v224_v25, 1  ;;  %v353_v32 = vrot.slane %v226_v26, 2  ;;  %v398_v41 = vrot.slane %v211_v18, 2  ;;  %v666_v51 = vld [vmem:[#allocation4] ss:$0 sm:$0xff]  ;;  %s207_s19 = scalar_lea.vmem %s952_s3, %s603_s12 }
  0x31   : > { %v418_v36 = vsel %vm249_vm0, %v411_v28, 0 }
  0x32   : > { %v229_v35 = vor.u32 %v228_v27, %v224_v25  ;;  %v354_v38 = vor.u32 %v353_v32, %v352_v31 }
  0x33   : > { %259 = vmatpush.bf16.msra.mxu0 %v607_v20  ;;  %293 = vmatpush.bf16.msra.mxu1 %v605_v21 }
  0x34   : > { %336 = vmatpush.bf16.msra.mxu2 %v609_v23  ;;  %382 = vmatpush.bf16.msra.mxu3 %v611_v24 }
  0x37   : > { %260 = vmatpush.bf16.msra.mxu0 %v606_v29  ;;  %294 = vmatpush.bf16.msra.mxu1 %v604_v30 }
  0x38   : > { %337 = vmatpush.bf16.msra.mxu2 %v608_v33  ;;  %383 = vmatpush.bf16.msra.mxu3 %v610_v34 }
  0x3a   : > { %548 = vmatmul.msk.bf16.vlgmr.msra.gmra.mxu0 %vm245_vm1, %v229_v35  ;;  %557 = vmatmul.msk.bf16.vlgmr.msra.gmra.mxu1 %vm245_vm1, %v211_v18 }
  0x3b   : > { %425 = vmatpush.bf16.msrb.mxu0 %v418_v36  ;;  %571 = vmatmul.msk.bf16.vlgmr.msra.gmra.mxu2 %vm245_vm1, %v308_v37 }
  0x3c   : > { %585 = vmatmul.msk.bf16.vlgmr.msra.gmra.mxu3 %vm245_vm1, %v354_v38 }
  0x3f   : > { %426 = vmatpush.bf16.msrb.mxu0 %v613_v39 }
  0x43   : > { %427 = vmatpush.bf16.msrb.mxu0 %v612_v40 }
  0x4a   : > { %599 = vmatmul.msk.bf16.vlgmr.msrb.gmra.mxu0 %vm245_vm1, %v398_v41 }
  0xb7   : > { %v262_v42 = vpop.f32.mrf.mxu0  ;;  %v296_v43 = vpop.f32.mrf.mxu1 }
  0xb8   : > { %v297_v46 = vadd.f32 %v296_v43, %v262_v42 }
  0xbe   : > { %v339_v44 = vpop.f32.mrf.mxu2 }
  0xbf   : > { %v264_v45 = vpop.f32.mrf.mxu0  ;;  %v344_v47 = vadd.f32 %v339_v44, %v297_v46  ;;  %v385_v48 = vpop.f32.mrf.mxu3 }
  0xc0   : > { %v298_v49 = vpop.f32.mrf.mxu1 }
  0xc1   : > { %v390_v50 = vadd.f32 %v385_v48, %v344_v47  ;;  %v299_v54 = vadd.f32 %v298_v49, %v264_v45 }
  0xc6   : > { %v341_v52 = vpop.f32.mrf.mxu2 }
  0xc7   : > { %v429_v53 = vpop.f32.mrf.mxu0  ;;  %v345_v56 = vadd.f32 %v341_v52, %v299_v54  ;;  %v387_v58 = vpop.f32.mrf.mxu3 }
  0xc8   : > { %v434_v55 = vadd.f32 %v429_v53, %v390_v50 }
  0xc9   : > { %v391_v59 = vadd.f32 %v387_v58, %v345_v56 }
  0xca   : > { %v440_v57 = vadd.f32 %v666_v51, %v434_v55 }
  0xcc   : > { %443 = vst.msk [vmem:[%s207_s19] sm:$0xff] %vm442_vm2, %v440_v57 }
  0xcf   : > { %v431_v60 = vpop.f32.mrf.mxu0 }
  0xd0   : > { %v435_v61 = vadd.f32 %v431_v60, %v391_v59 }
  0xd2   : > { %v441_v62 = vadd.f32 %v666_v51, %v435_v61 }
  0xd4   : > { %445 = vst.msk [vmem:[%s207_s19 + $0x8] sm:$0xf] %vm444_vm3, %v441_v62 }
  0xd5 PF: > { %p14_p8 = scmp.ge.s32.totalorder %s812_s17, 4   ;;  %s957_s12 = smov %s757_s13 }
  0xd6   : > { %s958_s13 = smov %s761_s14  ;;  %s959_s14 = smov %s822_s20 }
  0xd7   : > { %s960_s15 = smov %s812_s17  ;;  %16 = sbr.rel (!%p14_p8) target bundleno = 4 (0x4), region = 80 }
  0xdc   :  { %467 = vsyncpa [#allocation3], 1 }
  0xdd   :  { %469 = vsyncpa [#allocation3 + $0x1], 1 }
  0xde   :  { %470 = vsyncpa [#allocation5], 1 }

// kernel: my_model2_forward.13
= control target key start
LH: loop header
LB: loop body
LE: loop exit
PB: predicated region body
PF: predicated region fallthrough
CT: control target
= control target key end

     0   :  { %8 = vsyncpa [#allocation3], 0  ;;  %s623_s12 = smov 0   ;;  %s698_s0 = inlined_call_operand.vmem [shape: f32[2,11,128], index: 0, kind: input, shape index: {}]   ;;  %s699_s1 = inlined_call_operand.vmem [shape: bf16[2,128,128], index: 1, kind: input, shape index: {}]   ;;  %s700_s2 = inlined_call_operand.hbm [shape: f32[1,128], index: 2, kind: input, shape index: {}]   ;;  %s701_s3 = inlined_call_operand.vmem [shape: f32[2,10,128], index: 3, kind: output, shape index: {}]  }
   0x1 LB: > { %s429_s13 = sadd.s32 4294967295, %s600_s12   ;;  %p431_p0 = scmp.ge.s32.totalorder %s600_s12, 1  ;;  %s600_s12 = sphi %s623_s12, %s14_s12  }
   0x2   : > { %p113_p1 = scmp.lt.s32.totalorder %s600_s12, 3  ;;  %s128_s16 = sshll.u32 %s700_s2, 4  ;;  %s129_s16 = int_to_ptr.hbm [resolvable:$true] %s128_s16 }
   0x3   : > { %p548_p3 = scmp.eq.s32.totalorder %s429_s13, 0  ;;  %s602_s17 = smov [#allocation2]  }
   0x4   : > { %p114_p2 = pnand %p431_p0, %p113_p1  ;;  %s130_s18 = sshll.u32 %s602_s17, 4  ;;  %s131_s18 = int_to_ptr.vmem [resolvable:$true] %s130_s18 }
   0x6   : > { %p544_p4 = pneg %p114_p2  ;;  %151 = sbr.rel (%p114_p2) target bundleno = 184 (0xb8), region = 32 }
   0x8   : > { %p545_p5 = pnand %p548_p3, %p544_p4 }
   0xa   : > { %547 = dma.hbm_to_vmem [thread:$0]  (!%p545_p5), %s129_s16, 16, %s131_s18, [#allocation3]  }
   0xb   : > { %595 = dma.done.wait (%p548_p3), [#allocation3], 16  }
   0xc   : > { %597 = vsyncadd (%p548_p3), [#allocation3], 4294967280  ;;  %v539_v0 = vld [vmem:[%s699_s1 + $0x78] sm:$0xff]  ;;  %p176_p6 = scmp.lt.s32.totalorder %s429_s13, 1  ;;  %v538_v2 = vld [vmem:[%s699_s1 + $0x70] sm:$0xff] }
   0xd   : > { %v531_v1 = vld [vmem:[%s699_s1 + $0x38] sm:$0xff]  ;;  %278 = vmatpush.bf16.msra.mxu0 %v539_v0  ;;  %v530_v3 = vld [vmem:[%s699_s1 + $0x30] sm:$0xff]  ;;  %v537_v4 = vld [vmem:[%s699_s1 + $0x68] sm:$0xff] }
   0xe   : > { %340 = vmatpush.bf16.msra.mxu1 %v531_v1  ;;  %s703_s13 = smov (!%p176_p6, %s429_s13), 1  ;;  %v529_v5 = vld [vmem:[%s699_s1 + $0x28] sm:$0xff]  ;;  %v536_v6 = vld [vmem:[%s699_s1 + $0x60] sm:$0xff]  ;;  %v535_v8 = vld [vmem:[%s699_s1 + $0x58] sm:$0xff] }
   0xf   : > { %s522_s4 = sshll.u32 %s703_s13, 4  ;;  %v528_v7 = vld [vmem:[%s699_s1 + $0x20] sm:$0xff]  ;;  %v527_v9 = vld [vmem:[%s699_s1 + $0x18] sm:$0xff]  ;;  %v534_v13 = vld [vmem:[%s699_s1 + $0x50] sm:$0xff] }
  0x10   : > { %s180_s11 = scalar_lea.vmem %s698_s0, %s522_s4  ;;  %v526_v14 = vld [vmem:[%s699_s1 + $0x10] sm:$0xff]  ;;  %v533_v16 = vld [vmem:[%s699_s1 + $0x48] sm:$0xff]  ;;  %v532_v20 = vld [vmem:[%s699_s1 + $0x40] sm:$0xff]  ;;  %s185_s6 = scalar_lea.vmem %s701_s3, %s522_s4 }
  0x11   : > { %279 = vmatpush.bf16.msra.mxu0 %v538_v2  ;;  %v186_v10 = vld [vmem:[%s180_s11] sm:$0xff]  ;;  %v187_v11 = vld [vmem:[%s180_s11 + $0x8] sm:$0x7] }
  0x12   : > { %341 = vmatpush.bf16.msra.mxu1 %v530_v3  ;;  %v188_v12 = vpack.c.bf16 %v187_v11, %v186_v10  ;;  %v525_v17 = vld [vmem:[%s699_s1 + $0x8] sm:$0xff]  ;;  %v524_v21 = vld [vmem:[%s699_s1] sm:$0xff] }
  0x13   : > { %v559_v23 = vld [vmem:[#allocation2] ss:$0 sm:$0xff] }
  0x14   : > { %v225_v15 = vshll.u32 %v188_v12, 16  ;;  %v223_v18 = vshrl.u32 %v188_v12, 16 }
  0x15   : > { %280 = vmatpush.bf16.msra.mxu0 %v537_v4 }
  0x16   : > { %342 = vmatpush.bf16.msra.mxu1 %v529_v5  ;;  %v227_v19 = vrot.slane %v225_v15, 1 }
  0x18   : > { %v228_v22 = vor.u32 %v227_v19, %v223_v18 }
  0x19   : > { %281 = vmatpush.bf16.msra.mxu0 %v536_v6 }
  0x1a   : > { %343 = vmatpush.bf16.msra.mxu1 %v528_v7 }
  0x1d   : > { %282 = vmatpush.bf16.msra.mxu0 %v535_v8 }
  0x1e   : > { %344 = vmatpush.bf16.msra.mxu1 %v527_v9 }
  0x21   : > { %283 = vmatpush.bf16.msra.mxu0 %v534_v13 }
  0x22   : > { %345 = vmatpush.bf16.msra.mxu1 %v526_v14 }
  0x25   : > { %284 = vmatpush.bf16.msra.mxu0 %v533_v16 }
  0x26   : > { %346 = vmatpush.bf16.msra.mxu1 %v525_v17 }
  0x29   : > { %285 = vmatpush.bf16.msra.mxu0 %v532_v20 }
  0x2a   : > { %347 = vmatpush.bf16.msra.mxu1 %v524_v21 }
  0x2c   : > { %286 = vmatmul.bf16.vlgmr.msra.gmra.mxu0 %v228_v22 }
  0x2d   : > { %348 = vmatmul.bf16.vlgmr.msra.gmra.mxu1 %v188_v12 }
  0xa9   : > { %v287_v24 = vpop.f32.mrf.mxu0 }
  0xaa   : > { %v349_v25 = vpop.f32.mrf.mxu1 }
  0xab   : > { %v350_v26 = vadd.f32 %v349_v25, %v287_v24 }
  0xad   : > { %v358_v27 = vadd.f32 %v559_v23, %v350_v26 }
  0xaf   : > { %360 = vst [vmem:[%s185_s6] sm:$0xff] %v358_v27 }
  0xb1   : > { %v289_v28 = vpop.f32.mrf.mxu0 }
  0xb2   : > { %v351_v29 = vpop.f32.mrf.mxu1 }
  0xb3   : > { %v352_v30 = vadd.f32 %v351_v29, %v289_v28 }
  0xb5   : > { %v359_v31 = vadd.f32 %v559_v23, %v352_v30 }
  0xb7   : > { %361 = vst [vmem:[%s185_s6 + $0x8] sm:$0x3] %v359_v31 }
  0xb8 PF: > { %s14_s12 = sadd.s32 1, %s600_s12  }
  0xb9   : > { %p11_p7 = scmp.ge.s32.totalorder %s14_s12, 4  }
  0xbb   :  { %13 = sbr.rel (!%p11_p7) target bundleno = 1 (0x1), region = 68 }
  0xc0   :  { %383 = vsyncpa [#allocation3], 1 }
  0xc1   :  { %385 = vsyncpa [#allocation3 + $0x1], 1 }

// kernel: my_model2_forward.14
= control target key start
LH: loop header
LB: loop body
LE: loop exit
PB: predicated region body
PF: predicated region fallthrough
CT: control target
= control target key end

     0   :  { %s601_s9 = smov 0   ;;  %s666_s0 = inlined_call_operand.vmem [shape: f32[2,10,128], index: 0, kind: input, shape index: {}]   ;;  %s667_s1 = inlined_call_operand.vmem [shape: f32[2,8,10], index: 1, kind: input, shape index: {}]   ;;  %s668_s2 = inlined_call_operand.vmem [shape: f32[2,8,256], index: 2, kind: output, shape index: {}]  }
   0x1 LB: > { %s543_s10 = sadd.s32 4294967295, %s584_s9   ;;  %p547_p0 = scmp.ge.s32.totalorder %s584_s9, 1  ;;  %s584_s9 = sphi %s601_s9, %s12_s9  }
   0x2   : > { %p121_p1 = scmp.lt.s32.totalorder %s584_s9, 3 }
   0x4   : > { %p122_p2 = pnand %p547_p0, %p121_p1 }
   0x5   : > { %p147_p3 = scmp.lt.s32.totalorder (!%p122_p2), %s543_s10, 1 }
   0x6   : > { %125 = sbr.rel (%p122_p2) target bundleno = 231 (0xe7), region = 28 }
   0xb   : > { %v212_v0 = vlaneseq  ;;  %s670_s10 = smov (!%p147_p3, %s543_s10), 1  ;;  %vm164_vm0 = vcmask 80896   ;;  %vm168_vm1 = vcmask 1041408  }
   0xc   : > { %s550_s11 = sshll.u32 %s670_s10, 3  ;;  %s557_s15 = sshll.u32 %s670_s10, 4 }
   0xd   : > { %v213_v1 = vshrl.u32 %v212_v0, 7  ;;  %s155_s14 = scalar_lea.vmem %s667_s1, %s550_s11  ;;  %s151_s18 = scalar_lea.vmem %s666_s0, %s557_s15 }
   0xe   : > { %v163_v2 = vld [vmem:[%s155_s14] sm:$0xff]  ;;  %v622_v6 = vld [vmem:[%s151_s18 + $0x8] sm:$0x3]  ;;  %s635_s21 = scalar_lea.vmem %s668_s2, %s557_s15 }
   0xf   : > { %569 = vset.pattern.permute.xlu2 %v213_v1  ;;  %568 = vset.pattern.permute.xlu1 %v213_v1  ;;  %v192_v3 = vsel %vm164_vm0, %v163_v2, 0.0  ;;  %v237_v4 = vperm.slane %v163_v2, 2  ;;  %v224_v5 = vperm.slane %v163_v2, 1  ;;  %v624_v7 = vld [vmem:[%s151_s18] sm:$0xff]  ;;  %v220_v8 = vadd.s32 8, %v213_v1 }
  0x10   : > { %567 = vset.pattern.permute.xlu0 %v213_v1  ;;  %553 = vmatpush.msk.msra.mxu0 %vm168_vm1, %v622_v6  ;;  %v211_v9 = vperm.slane %v163_v2, 0  ;;  %v250_v10 = vperm.slane %v163_v2, 3  ;;  %v289_v11 = vperm.slane %v163_v2, 6  ;;  %v263_v12 = vperm.slane %v163_v2, 4 }
  0x11   : > { %193 = vadd.xlane.f32.xlu0 %v192_v3  ;;  %v276_v13 = vperm.slane %v163_v2, 5  ;;  %v302_v14 = vperm.slane %v163_v2, 7 }
  0x12   : > { %187 = vmatpush.msra.mxu0 %v624_v7 }
  0x13   : > { %554 = vmatmul.msk.f32.vlgmr.msra.gmra.mxu0 %vm164_vm0, %v163_v2 }
  0x17   : > { %242 = vperm.xlu2 %569, %v237_v4   ;;  %229 = vperm.xlu1 %568, %v224_v5  }
  0x1f   : > { %571 = vset.pattern.permute.xlu2 %v220_v8  ;;  %570 = vset.pattern.permute.xlu1 %v220_v8 }
  0x25   : > { %216 = vperm.xlu0 %567, %v211_v9  }
  0x27   : > { %235 = vperm.xlu2 %571, %v224_v5   ;;  %222 = vperm.xlu1 %570, %v211_v9  }
  0x2d   : > { %294 = vperm.xlu0 %567, %v289_v11  }
  0x2f   : > { %261 = vperm.xlu2 %571, %v250_v10   ;;  %248 = vperm.xlu1 %570, %v237_v4  }
  0x35   : > { %575 = vset.pattern.permute.xlu0 %v220_v8 }
  0x37   : > { %274 = vperm.xlu2 %571, %v263_v12   ;;  %572 = vset.pattern.permute.xlu1 %v213_v1 }
  0x3f   : > { %287 = vperm.xlu2 %571, %v276_v13   ;;  %255 = vperm.xlu1 %572, %v250_v10  }
  0x47   : > { %300 = vperm.xlu2 %571, %v289_v11   ;;  %268 = vperm.xlu1 %572, %v263_v12  }
  0x4f   : > { %281 = vperm.xlu1 %572, %v276_v13   ;;  %574 = vset.pattern.permute.xlu2 %v213_v1 }
  0x57   : > { %573 = vset.pattern.permute.xlu1 %v220_v8  ;;  %307 = vperm.xlu2 %574, %v302_v14  }
  0x5f   : > { %313 = vperm.xlu1 %573, %v302_v14  }
  0x71   : > { %v243_v17 = vpop.permute.xlu2 %242 }
  0x72   : > { %vm319_vm14 = vcmp.gt.f32.partialorder %v243_v17, 0.0 }
  0x73   : > { %v367_v52 = vsel %vm319_vm14, %v624_v7, -1000000.0 }
  0x81   : > { %v236_v19 = vpop.permute.xlu2 %235 }
  0x82   : > { %vm318_vm7 = vcmp.gt.f32.partialorder %v236_v19, 0.0 }
  0x83   : > { %v366_v40 = vsel %vm318_vm7, %v622_v6, -1000000.0  ;;  %vm459_vm7 = vcmask 1041409  }
  0x84   : > { %v194_v15 = vpop.xlane.xlu0 %193  ;;  %v387_v46 = vsel %vm168_vm1, %v366_v40, -inf }
  0x85   : > { %v195_v16 = vadd.f32 1e-06, %v194_v15 }
  0x87   : > { %576 = vrcp.f32 %v195_v16  ;;  %v207_v24 = vand.u32 2147483648, %v195_v16  ;;  %vm201_vm2 = vweird.f32 %v195_v16  ;;  %v205_v26 = vand.u32 2147483647, %v195_v16 }
  0x89   : > { %v230_v22 = vpop.permute.xlu1 %229  ;;  %v208_v27 = vor.u32 1.1754944e-38, %v207_v24  ;;  %v262_v29 = vpop.permute.xlu2 %261  ;;  %vm206_vm5 = vcmp.eq.f32.partialorder %v205_v26, 8.507059e+37 }
  0x8a   : > { %vm322_vm10 = vcmp.gt.f32.partialorder %v262_v29, 0.0  ;;  %vm317_vm11 = vcmp.gt.f32.partialorder %v230_v22, 0.0 }
  0x8b   : > { %v370_v47 = vsel %vm322_vm10, %v622_v6, -1000000.0  ;;  %v365_v48 = vsel %vm317_vm11, %v624_v7, -1000000.0  ;;  %vm467_vm10 = vcmask 1045509   ;;  %vm469_vm11 = vcmask 1046534  }
  0x8c   : > { %v403_v56 = vsel %vm168_vm1, %v370_v47, -inf  ;;  %v388_v57 = vmax.f32 %v365_v48, %v387_v46 }
  0x8d   : > { %v577_v18 = vpop.eup %576 }
  0x8e   : > { %v197_v20 = vmul.f32 %v577_v18, %v195_v16  ;;  %vm202_vm3 = vweird.f32 %v577_v18  ;;  %v389_v2 = vrot.slane %v388_v57, 4 }
  0x8f   : > { %vm203_vm4 = vmor %vm201_vm2, %vm202_vm3 }
  0x90   : > { %v198_v21 = vsub.f32 1.0, %v197_v20  ;;  %v189_v30 = vpop.f32.mrf.mxu0  ;;  %v390_v17 = vmax.f32 %v388_v57, %v389_v2 }
  0x91   : > { %v275_v34 = vpop.permute.xlu2 %274 }
  0x92   : > { %v199_v23 = vmul.f32 %v577_v18, %v198_v21  ;;  %vm324_vm12 = vcmp.gt.f32.partialorder %v275_v34, 0.0  ;;  %v391_v24 = vrot.slane %v390_v17, 2 }
  0x93   : > { %v372_v50 = vsel %vm324_vm12, %v622_v6, -1000000.0  ;;  %vm471_vm12 = vcmask 1047559  }
  0x94   : > { %v200_v25 = vadd.f32 %v577_v18, %v199_v23  ;;  %v411_v59 = vsel %vm168_vm1, %v372_v50, -inf }
  0x96   : > { %v204_v28 = vsel %vm203_vm4, %v577_v18, %v200_v25 }
  0x97   : > { %v209_v31 = vsel %vm206_vm5, %v208_v27, %v204_v28  ;;  %v217_v38 = vpop.permute.xlu0 %216 }
  0x98   : > { %v210_v32 = vmul.f32 %v209_v31, %v189_v30  ;;  %vm315_vm9 = vcmp.gt.f32.partialorder %v217_v38, 0.0 }
  0x99   : > { %v223_v33 = vpop.permute.xlu1 %222  ;;  %v288_v36 = vpop.permute.xlu2 %287  ;;  %v363_v44 = vsel %vm315_vm9, %v624_v7, -1000000.0  ;;  %vm465_vm9 = vcmask 1044484  }
  0x9a   : > { %474 = vst [vmem:[%s635_s21] sm:$0xff] %v210_v32  ;;  %vm316_vm6 = vcmp.gt.f32.partialorder %v223_v33, 0.0  ;;  %vm326_vm0 = vcmp.gt.f32.partialorder %v288_v36, 0.0  ;;  %v392_v32 = vmax.f32 %v390_v17, %v391_v24 }
  0x9b   : > { %v364_v39 = vsel %vm316_vm6, %v622_v6, -1000000.0  ;;  %v374_v60 = vsel %vm326_vm0, %v622_v6, -1000000.0 }
  0x9c   : > { %v379_v43 = vsel %vm168_vm1, %v364_v39, -inf  ;;  %v419_v3 = vsel %vm168_vm1, %v374_v60, -inf }
  0x9d   : > { %v380_v53 = vmax.f32 %v363_v44, %v379_v43 }
  0x9f   : > { %v295_v54 = vpop.permute.xlu0 %294  ;;  %v381_v0 = vrot.slane %v380_v53, 4 }
  0xa0   : > { %vm327_vm3 = vcmp.gt.f32.partialorder %v295_v54, 0.0 }
  0xa1   : > { %v249_v35 = vpop.permute.xlu1 %248  ;;  %v301_v45 = vpop.permute.xlu2 %300  ;;  %v375_v8 = vsel %vm327_vm3, %v624_v7, -1000000.0  ;;  %v382_v13 = vmax.f32 %v380_v53, %v381_v0 }
  0xa2   : > { %vm320_vm8 = vcmp.gt.f32.partialorder %v249_v35, 0.0  ;;  %vm328_vm2 = vcmp.gt.f32.partialorder %v301_v45, 0.0 }
  0xa3   : > { %v368_v41 = vsel %vm320_vm8, %v622_v6, -1000000.0  ;;  %v376_v62 = vsel %vm328_vm2, %v622_v6, -1000000.0  ;;  %v383_v20 = vrot.slane %v382_v13, 2  ;;  %vm461_vm8 = vcmask 1042434  }
  0xa4   : > { %v395_v49 = vsel %vm168_vm1, %v368_v41, -inf  ;;  %v427_v5 = vsel %vm168_vm1, %v376_v62, -inf  ;;  %v393_v41 = vrot.slane %v392_v32, 1 }
  0xa5   : > { %v396_v58 = vmax.f32 %v367_v52, %v395_v49  ;;  %v428_v15 = vmax.f32 %v375_v8, %v427_v5  ;;  %v384_v28 = vmax.f32 %v382_v13, %v383_v20 }
  0xa7   : > { %v397_v4 = vrot.slane %v396_v58, 4  ;;  %v429_v23 = vrot.slane %v428_v15, 4  ;;  %v385_v35 = vrot.slane %v384_v28, 1 }
  0xa9   : > { %v398_v14 = vmax.f32 %v396_v58, %v397_v4  ;;  %v430_v31 = vmax.f32 %v428_v15, %v429_v23  ;;  %v386_v46 = vmax.f32 %v384_v28, %v385_v35 }
  0xab   : > { %v399_v22 = vrot.slane %v398_v14, 2  ;;  %v431_v39 = vrot.slane %v430_v31, 2 }
  0xad   : > { %v400_v30 = vmax.f32 %v398_v14, %v399_v22  ;;  %v432_v50 = vmax.f32 %v430_v31, %v431_v39 }
  0xaf   : > { %v401_v38 = vrot.slane %v400_v30, 1  ;;  %v433_v58 = vrot.slane %v432_v50, 1 }
  0xb1   : > { %v256_v37 = vpop.permute.xlu1 %255  ;;  %v308_v27 = vpop.permute.xlu2 %307  ;;  %v402_v49 = vmax.f32 %v400_v30, %v401_v38  ;;  %v434_v2 = vmax.f32 %v432_v50, %v433_v58 }
  0xb2   : > { %vm321_vm13 = vcmp.gt.f32.partialorder %v256_v37, 0.0  ;;  %vm329_vm5 = vcmp.gt.f32.partialorder %v308_v27, 0.0 }
  0xb3   : > { %v369_v51 = vsel %vm321_vm13, %v624_v7, -1000000.0  ;;  %v377_v40 = vsel %vm329_vm5, %v624_v7, -1000000.0 }
  0xb4   : > { %v404_v61 = vmax.f32 %v369_v51, %v403_v56  ;;  %v394_v51 = vmax.f32 %v392_v32, %v393_v41 }
  0xb6   : > { %v405_v9 = vrot.slane %v404_v61, 4 }
  0xb8   : > { %v406_v18 = vmax.f32 %v404_v61, %v405_v9 }
  0xb9   : > { %v269_v42 = vpop.permute.xlu1 %268 }
  0xba   : > { %vm323_vm15 = vcmp.gt.f32.partialorder %v269_v42, 0.0  ;;  %v407_v25 = vrot.slane %v406_v18, 2 }
  0xbb   : > { %v371_v55 = vsel %vm323_vm15, %v624_v7, -1000000.0 }
  0xbc   : > { %v412_v63 = vmax.f32 %v371_v55, %v411_v59  ;;  %v408_v33 = vmax.f32 %v406_v18, %v407_v25  ;;  %v443_v55 = vmax.f32 %v386_v46, -1000000.0  ;;  %v444_v59 = vmax.f32 %v394_v51, -1000000.0 }
  0xbe   : > { %v413_v11 = vrot.slane %v412_v63, 4  ;;  %v409_v42 = vrot.slane %v408_v33, 1  ;;  %v460_v62 = vsel %vm459_vm7, %v444_v59, %v443_v55 }
  0xc0   : > { %v414_v19 = vmax.f32 %v412_v63, %v413_v11  ;;  %v410_v52 = vmax.f32 %v408_v33, %v409_v42 }
  0xc1   : > { %v282_v1 = vpop.permute.xlu1 %281 }
  0xc2   : > { %vm325_vm4 = vcmp.gt.f32.partialorder %v282_v1, 0.0  ;;  %v415_v26 = vrot.slane %v414_v19, 2 }
  0xc3   : > { %v373_v10 = vsel %vm325_vm4, %v624_v7, -1000000.0  ;;  %v445_v7 = vmax.f32 %v402_v49, -1000000.0 }
  0xc4   : > { %v420_v12 = vmax.f32 %v373_v10, %v419_v3  ;;  %v416_v34 = vmax.f32 %v414_v19, %v415_v26  ;;  %v449_v10 = vmax.f32 %v434_v2, -1000000.0 }
  0xc5   : > { %v462_v1 = vsel %vm461_vm8, %v445_v7, %v460_v62 }
  0xc6   : > { %v421_v16 = vrot.slane %v420_v12, 4  ;;  %v417_v44 = vrot.slane %v416_v34, 1 }
  0xc8   : > { %v422_v21 = vmax.f32 %v420_v12, %v421_v16  ;;  %v418_v54 = vmax.f32 %v416_v34, %v417_v44 }
  0xca   : > { %v423_v29 = vrot.slane %v422_v21, 2  ;;  %v447_v61 = vmax.f32 %v418_v54, -1000000.0 }
  0xcc   : > { %v424_v36 = vmax.f32 %v422_v21, %v423_v29 }
  0xce   : > { %v425_v47 = vrot.slane %v424_v36, 1 }
  0xd0   : > { %v426_v56 = vmax.f32 %v424_v36, %v425_v47 }
  0xd1   : > { %v314_v37 = vpop.permute.xlu1 %313 }
  0xd2   : > { %vm330_vm6 = vcmp.gt.f32.partialorder %v314_v37, 0.0  ;;  %v448_v63 = vmax.f32 %v426_v56, -1000000.0 }
  0xd3   : > { %v378_v43 = vsel %vm330_vm6, %v622_v6, -1000000.0  ;;  %v446_v6 = vmax.f32 %v410_v52, -1000000.0 }
  0xd4   : > { %v435_v45 = vsel %vm168_vm1, %v378_v43, -inf  ;;  %vm463_vm1 = vcmask 1043459  }
  0xd5   : > { %v436_v48 = vmax.f32 %v377_v40, %v435_v45  ;;  %v464_v3 = vsel %vm463_vm1, %v446_v6, %v462_v1 }
  0xd6   : > { %v466_v5 = vsel %vm465_vm9, %v447_v61, %v464_v3 }
  0xd7   : > { %v437_v53 = vrot.slane %v436_v48, 4  ;;  %v468_v8 = vsel %vm467_vm10, %v448_v63, %v466_v5 }
  0xd8   : > { %v470_v12 = vsel %vm469_vm11, %v449_v10, %v468_v8 }
  0xd9   : > { %v438_v57 = vmax.f32 %v436_v48, %v437_v53 }
  0xdb   : > { %v439_v60 = vrot.slane %v438_v57, 2 }
  0xdd   : > { %v440_v0 = vmax.f32 %v438_v57, %v439_v60 }
  0xdf   : > { %v441_v4 = vrot.slane %v440_v0, 1 }
  0xe1   : > { %v442_v9 = vmax.f32 %v440_v0, %v441_v4 }
  0xe3   : > { %v450_v11 = vmax.f32 %v442_v9, -1000000.0 }
  0xe5   : > { %v472_v13 = vsel %vm471_vm12, %v450_v11, %v470_v12 }
  0xe6   : > { %475 = vst [vmem:[%s635_s21 + $0x8] sm:$0xff] %v472_v13 }
  0xe7 PF: > { %s12_s9 = sadd.s32 1, %s584_s9  }
  0xe8   : > { %p9_p4 = scmp.ge.s32.totalorder %s12_s9, 4  }
  0xea   :  { %11 = sbr.rel (!%p9_p4) target bundleno = 1 (0x1), region = 61 }

// kernel: my_model2_forward.15
= control target key start
LH: loop header
LB: loop body
LE: loop exit
PB: predicated region body
PF: predicated region fallthrough
CT: control target
= control target key end

     0   :  { %s856_s1 = inlined_call_operand.vmem [shape: bf16[256,256], index: 1, kind: input, shape index: {}]   ;;  %s857_s0 = inlined_call_operand.vmem [shape: bf16[16,256], index: 0, kind: input, shape index: {}]   ;;  %s858_s2 = inlined_call_operand.vmem [shape: f32[1,256], index: 2, kind: input, shape index: {}]   ;;  %s859_s3 = inlined_call_operand.vmem [shape: f32[16,256], index: 3, kind: input, shape index: {}]   ;;  %s860_s4 = inlined_call_operand.vmem [shape: f32[16,256], index: 4, kind: output, shape index: {}]  }
   0x1   :  { %v476_v0 = vld [vmem:[%s856_s1 + $0x70] sm:$0xf]  ;;  %v567_v1 = vld [vmem:[%s856_s1 + $0x74] sm:$0xf0]  ;;  %v566_v5 = vld [vmem:[%s856_s1 + $0x74] sm:$0xf] }
   0x2   :  { %v540_v2 = vld [vmem:[%s856_s1 + $0xf0] sm:$0xf]  ;;  %v477_v3 = vor.u32 %v567_v1, %v476_v0  ;;  %v583_v4 = vld [vmem:[%s856_s1 + $0xf4] sm:$0xf0]  ;;  %v478_v6 = vld [vmem:[%s856_s1 + $0x78] sm:$0xf0] }
   0x3   :  { %v541_v7 = vor.u32 %v583_v4, %v540_v2  ;;  %v481_v8 = vor.u32 %v566_v5, %v478_v6  ;;  %v582_v9 = vld [vmem:[%s856_s1 + $0xf4] sm:$0xf]  ;;  %v542_v10 = vld [vmem:[%s856_s1 + $0xf8] sm:$0xf0]  ;;  %v468_v11 = vld [vmem:[%s856_s1 + $0x60] sm:$0xf] }
   0x4   :  { %233 = vmatpush.bf16.msra.mxu0 %v477_v3  ;;  %v545_v12 = vor.u32 %v582_v9, %v542_v10  ;;  %v565_v13 = vld [vmem:[%s856_s1 + $0x64] sm:$0xf0]  ;;  %v532_v14 = vld [vmem:[%s856_s1 + $0xe0] sm:$0xf]  ;;  %v564_v18 = vld [vmem:[%s856_s1 + $0x64] sm:$0xf] }
   0x5   :  { %v581_v15 = vld [vmem:[%s856_s1 + $0xe4] sm:$0xf0]  ;;  %247 = vmatpush.bf16.msra.mxu1 %v541_v7  ;;  %261 = vmatpush.bf16.msra.mxu2 %v481_v8  ;;  %v469_v16 = vor.u32 %v565_v13, %v468_v11  ;;  %v470_v19 = vld [vmem:[%s856_s1 + $0x68] sm:$0xf0]  ;;  %v580_v20 = vld [vmem:[%s856_s1 + $0xe4] sm:$0xf] }
   0x6   :  { %v533_v17 = vor.u32 %v581_v15, %v532_v14  ;;  %275 = vmatpush.bf16.msra.mxu3 %v545_v12  ;;  %v473_v21 = vor.u32 %v564_v18, %v470_v19  ;;  %v534_v22 = vld [vmem:[%s856_s1 + $0xe8] sm:$0xf0]  ;;  %v460_v23 = vld [vmem:[%s856_s1 + $0x50] sm:$0xf]  ;;  %v563_v24 = vld [vmem:[%s856_s1 + $0x54] sm:$0xf0] }
   0x7   :  { %v537_v25 = vor.u32 %v580_v20, %v534_v22  ;;  %v524_v26 = vld [vmem:[%s856_s1 + $0xd0] sm:$0xf]  ;;  %v579_v27 = vld [vmem:[%s856_s1 + $0xd4] sm:$0xf0]  ;;  %v562_v28 = vld [vmem:[%s856_s1 + $0x54] sm:$0xf]  ;;  %v461_v29 = vor.u32 %v563_v24, %v460_v23 }
   0x8   :  { %234 = vmatpush.bf16.msra.mxu0 %v469_v16  ;;  %v462_v30 = vld [vmem:[%s856_s1 + $0x58] sm:$0xf0]  ;;  %v578_v31 = vld [vmem:[%s856_s1 + $0xd4] sm:$0xf]  ;;  %v525_v33 = vor.u32 %v579_v27, %v524_v26  ;;  %v452_v35 = vld [vmem:[%s856_s1 + $0x40] sm:$0xf] }
   0x9   :  { %v526_v32 = vld [vmem:[%s856_s1 + $0xd8] sm:$0xf0]  ;;  %248 = vmatpush.bf16.msra.mxu1 %v533_v17  ;;  %262 = vmatpush.bf16.msra.mxu2 %v473_v21  ;;  %v465_v34 = vor.u32 %v562_v28, %v462_v30  ;;  %v561_v36 = vld [vmem:[%s856_s1 + $0x44] sm:$0xf0]  ;;  %v516_v37 = vld [vmem:[%s856_s1 + $0xc0] sm:$0xf] }
   0xa   :  { %276 = vmatpush.bf16.msra.mxu3 %v537_v25  ;;  %v529_v38 = vor.u32 %v578_v31, %v526_v32  ;;  %v577_v39 = vld [vmem:[%s856_s1 + $0xc4] sm:$0xf0]  ;;  %v560_v40 = vld [vmem:[%s856_s1 + $0x44] sm:$0xf]  ;;  %v454_v41 = vld [vmem:[%s856_s1 + $0x48] sm:$0xf0]  ;;  %v453_v44 = vor.u32 %v561_v36, %v452_v35 }
   0xb   :  { %v576_v42 = vld [vmem:[%s856_s1 + $0xc4] sm:$0xf]  ;;  %v518_v43 = vld [vmem:[%s856_s1 + $0xc8] sm:$0xf0]  ;;  %v517_v45 = vor.u32 %v577_v39, %v516_v37  ;;  %v457_v46 = vor.u32 %v560_v40, %v454_v41  ;;  %v444_v47 = vld [vmem:[%s856_s1 + $0x30] sm:$0xf] }
   0xc   :  { %235 = vmatpush.bf16.msra.mxu0 %v461_v29  ;;  %v559_v48 = vld [vmem:[%s856_s1 + $0x34] sm:$0xf0]  ;;  %v508_v49 = vld [vmem:[%s856_s1 + $0xb0] sm:$0xf]  ;;  %v521_v50 = vor.u32 %v576_v42, %v518_v43  ;;  %v558_v52 = vld [vmem:[%s856_s1 + $0x34] sm:$0xf] }
   0xd   :  { %249 = vmatpush.bf16.msra.mxu1 %v525_v33  ;;  %263 = vmatpush.bf16.msra.mxu2 %v465_v34  ;;  %v575_v51 = vld [vmem:[%s856_s1 + $0xb4] sm:$0xf0]  ;;  %v446_v53 = vld [vmem:[%s856_s1 + $0x38] sm:$0xf0]  ;;  %v574_v54 = vld [vmem:[%s856_s1 + $0xb4] sm:$0xf]  ;;  %v445_v56 = vor.u32 %v559_v48, %v444_v47 }
   0xe   :  { %277 = vmatpush.bf16.msra.mxu3 %v529_v38  ;;  %v510_v55 = vld [vmem:[%s856_s1 + $0xb8] sm:$0xf0]  ;;  %v509_v57 = vor.u32 %v575_v51, %v508_v49  ;;  %v449_v58 = vor.u32 %v558_v52, %v446_v53  ;;  %v436_v59 = vld [vmem:[%s856_s1 + $0x20] sm:$0xf]  ;;  %v557_v60 = vld [vmem:[%s856_s1 + $0x24] sm:$0xf0] }
   0xf   :  { %v500_v61 = vld [vmem:[%s856_s1 + $0xa0] sm:$0xf]  ;;  %v513_v62 = vor.u32 %v574_v54, %v510_v55  ;;  %v573_v63 = vld [vmem:[%s856_s1 + $0xa4] sm:$0xf0]  ;;  %v556_v0 = vld [vmem:[%s856_s1 + $0x24] sm:$0xf]  ;;  %v437_v4 = vor.u32 %v557_v60, %v436_v59 }
  0x10   :  { %236 = vmatpush.bf16.msra.mxu0 %v453_v44  ;;  %v438_v1 = vld [vmem:[%s856_s1 + $0x28] sm:$0xf0]  ;;  %v572_v2 = vld [vmem:[%s856_s1 + $0xa4] sm:$0xf]  ;;  %v501_v5 = vor.u32 %v573_v63, %v500_v61  ;;  %v428_v7 = vld [vmem:[%s856_s1 + $0x10] sm:$0xf] }
  0x11   :  { %250 = vmatpush.bf16.msra.mxu1 %v517_v45  ;;  %264 = vmatpush.bf16.msra.mxu2 %v457_v46  ;;  %v502_v3 = vld [vmem:[%s856_s1 + $0xa8] sm:$0xf0]  ;;  %v441_v6 = vor.u32 %v556_v0, %v438_v1  ;;  %v555_v8 = vld [vmem:[%s856_s1 + $0x14] sm:$0xf0]  ;;  %v492_v9 = vld [vmem:[%s856_s1 + $0x90] sm:$0xf] }
  0x12   :  { %278 = vmatpush.bf16.msra.mxu3 %v521_v50  ;;  %v505_v10 = vor.u32 %v572_v2, %v502_v3  ;;  %v571_v11 = vld [vmem:[%s856_s1 + $0x94] sm:$0xf0]  ;;  %v554_v12 = vld [vmem:[%s856_s1 + $0x14] sm:$0xf]  ;;  %v430_v13 = vld [vmem:[%s856_s1 + $0x18] sm:$0xf0]  ;;  %v429_v16 = vor.u32 %v555_v8, %v428_v7 }
  0x13   :  { %v570_v14 = vld [vmem:[%s856_s1 + $0x94] sm:$0xf]  ;;  %v494_v15 = vld [vmem:[%s856_s1 + $0x98] sm:$0xf0]  ;;  %v493_v17 = vor.u32 %v571_v11, %v492_v9  ;;  %v433_v18 = vor.u32 %v554_v12, %v430_v13  ;;  %v420_v19 = vld [vmem:[%s856_s1] sm:$0xf] }
  0x14   :  { %237 = vmatpush.bf16.msra.mxu0 %v445_v56  ;;  %v553_v20 = vld [vmem:[%s856_s1 + $0x4] sm:$0xf0]  ;;  %v484_v21 = vld [vmem:[%s856_s1 + $0x80] sm:$0xf]  ;;  %v497_v22 = vor.u32 %v570_v14, %v494_v15  ;;  %v552_v24 = vld [vmem:[%s856_s1 + $0x4] sm:$0xf] }
  0x15   :  { %251 = vmatpush.bf16.msra.mxu1 %v509_v57  ;;  %265 = vmatpush.bf16.msra.mxu2 %v449_v58  ;;  %v569_v23 = vld [vmem:[%s856_s1 + $0x84] sm:$0xf0]  ;;  %v422_v25 = vld [vmem:[%s856_s1 + $0x8] sm:$0xf0]  ;;  %v568_v26 = vld [vmem:[%s856_s1 + $0x84] sm:$0xf]  ;;  %v421_v28 = vor.u32 %v553_v20, %v420_v19 }
  0x16   :  { %279 = vmatpush.bf16.msra.mxu3 %v513_v62  ;;  %v486_v27 = vld [vmem:[%s856_s1 + $0x88] sm:$0xf0]  ;;  %v412_v29 = vld [vmem:[%s857_s0] sm:$0xf]  ;;  %v551_v30 = vld [vmem:[%s857_s0 + $0x4] sm:$0xf0]  ;;  %v485_v31 = vor.u32 %v569_v23, %v484_v21  ;;  %v425_v32 = vor.u32 %v552_v24, %v422_v25 }
  0x17   :  { %v550_v33 = vld [vmem:[%s857_s0 + $0x4] sm:$0xf]  ;;  %v414_v34 = vld [vmem:[%s857_s0 + $0x8] sm:$0xf0]  ;;  %v489_v35 = vor.u32 %v568_v26, %v486_v27  ;;  %v413_v36 = vor.u32 %v551_v30, %v412_v29  ;;  %v308_v38 = vld [vmem:[%s858_s2] sm:$0x3] }
  0x18   :  { %238 = vmatpush.bf16.msra.mxu0 %v437_v4  ;;  %v417_v37 = vor.u32 %v550_v33, %v414_v34  ;;  %v310_v40 = vperm.slane %v308_v38, 0  ;;  %v311_v46 = vperm.slane %v308_v38, 1  ;;  %v300_v12 = vld [vmem:[%s859_s3] sm:$0xff] }
  0x19   :  { %252 = vmatpush.bf16.msra.mxu1 %v501_v5  ;;  %266 = vmatpush.bf16.msra.mxu2 %v441_v6 }
  0x1a   :  { %280 = vmatpush.bf16.msra.mxu3 %v505_v10 }
  0x1c   :  { %239 = vmatpush.bf16.msra.mxu0 %v429_v16 }
  0x1d   :  { %253 = vmatpush.bf16.msra.mxu1 %v493_v17  ;;  %267 = vmatpush.bf16.msra.mxu2 %v433_v18 }
  0x1e   :  { %281 = vmatpush.bf16.msra.mxu3 %v497_v22 }
  0x20   :  { %240 = vmatpush.bf16.msra.mxu0 %v421_v28 }
  0x21   :  { %254 = vmatpush.bf16.msra.mxu1 %v485_v31  ;;  %268 = vmatpush.bf16.msra.mxu2 %v425_v32  ;;  %v301_v31 = vld [vmem:[%s859_s3 + $0x8] sm:$0xff] }
  0x22   :  { %282 = vmatpush.bf16.msra.mxu3 %v489_v35  ;;  %v302_v35 = vld [vmem:[%s859_s3 + $0x10] sm:$0xff] }
  0x23   :  { %241 = vmatmul.bf16.vlgmr.msra.gmra.mxu0 %v413_v36 }
  0x24   :  { %255 = vmatmul.bf16.vlgmr.msra.gmra.mxu1 %v417_v37  ;;  %269 = vmatmul.bf16.vlgmr.msra.gmra.mxu2 %v413_v36 }
  0x25   :  { %283 = vmatmul.bf16.vlgmr.msra.gmra.mxu3 %v417_v37 }
  0xa0   :  { %v242_v39 = vpop.f32.mrf.mxu0 }
  0xa1   :  { %v256_v41 = vpop.f32.mrf.mxu1 }
  0xa2   :  { %v257_v42 = vadd.f32 %v256_v41, %v242_v39 }
  0xa4   :  { %v314_v43 = vadd.f32 %v310_v40, %v257_v42 }
  0xa6   :  { %v546_v44 = vmul.f32 -1.442695, %v314_v43 }
  0xa7   :  { %v270_v45 = vpop.f32.mrf.mxu2 }
  0xa8   :  { %584 = vpow2.f32 %v546_v44  ;;  %v284_v47 = vpop.f32.mrf.mxu3  ;;  %v244_v48 = vpop.f32.mrf.mxu0 }
  0xa9   :  { %v285_v49 = vadd.f32 %v284_v47, %v270_v45  ;;  %v258_v50 = vpop.f32.mrf.mxu1 }
  0xaa   :  { %v259_v51 = vadd.f32 %v258_v50, %v244_v48 }
  0xab   :  { %v315_v52 = vadd.f32 %v311_v46, %v285_v49 }
  0xac   :  { %v316_v53 = vadd.f32 %v310_v40, %v259_v51  ;;  %v303_v51 = vld [vmem:[%s859_s3 + $0x18] sm:$0xff] }
  0xad   :  { %v547_v54 = vmul.f32 -1.442695, %v315_v52 }
  0xae   :  { %v585_v55 = vpop.eup %584  ;;  %v548_v56 = vmul.f32 -1.442695, %v316_v53 }
  0xaf   :  { %v330_v57 = vadd.f32 1.0, %v585_v55  ;;  %586 = vpow2.f32 %v547_v54  ;;  %v272_v58 = vpop.f32.mrf.mxu2 }
  0xb0   :  { %588 = vpow2.f32 %v548_v56  ;;  %v286_v59 = vpop.f32.mrf.mxu3 }
  0xb1   :  { %590 = vrcp.f32 %v330_v57  ;;  %v287_v60 = vadd.f32 %v286_v59, %v272_v58  ;;  %v345_v6 = vand.u32 2147483648, %v330_v57  ;;  %vm339_vm0 = vweird.f32 %v330_v57 }
  0xb2   :  { %v343_v8 = vand.u32 2147483647, %v330_v57 }
  0xb3   :  { %v317_v61 = vadd.f32 %v311_v46, %v287_v60  ;;  %v346_v13 = vor.u32 1.1754944e-38, %v345_v6 }
  0xb4   :  { %vm344_vm3 = vcmp.eq.f32.partialorder %v343_v8, 8.507059e+37 }
  0xb5   :  { %v587_v62 = vpop.eup %586  ;;  %v549_v1 = vmul.f32 -1.442695, %v317_v61 }
  0xb6   :  { %v589_v63 = vpop.eup %588  ;;  %v331_v0 = vadd.f32 1.0, %v587_v62 }
  0xb7   :  { %v591_v2 = vpop.eup %590  ;;  %v332_v3 = vadd.f32 1.0, %v589_v63 }
  0xb8   :  { %v335_v4 = vmul.f32 %v591_v2, %v330_v57  ;;  %592 = vrcp.f32 %v331_v0  ;;  %vm340_vm1 = vweird.f32 %v591_v2  ;;  %v358_v22 = vand.u32 2147483647, %v331_v0 }
  0xb9   :  { %594 = vrcp.f32 %v332_v3  ;;  %vm341_vm2 = vmor %vm339_vm0, %vm340_vm1  ;;  %v360_v23 = vand.u32 2147483648, %v331_v0  ;;  %v375_v26 = vand.u32 2147483648, %v332_v3  ;;  %v373_v29 = vand.u32 2147483647, %v332_v3 }
  0xba   :  { %v336_v5 = vsub.f32 1.0, %v335_v4  ;;  %596 = vpow2.f32 %v549_v1  ;;  %vm354_vm6 = vweird.f32 %v331_v0  ;;  %vm369_vm8 = vweird.f32 %v332_v3 }
  0xbb   :  { %v361_v32 = vor.u32 1.1754944e-38, %v360_v23  ;;  %vm359_vm9 = vcmp.eq.f32.partialorder %v358_v22, 8.507059e+37  ;;  %v376_v36 = vor.u32 1.1754944e-38, %v375_v26  ;;  %vm374_vm11 = vcmp.eq.f32.partialorder %v373_v29, 8.507059e+37 }
  0xbc   :  { %v337_v7 = vmul.f32 %v591_v2, %v336_v5 }
  0xbe   :  { %v593_v9 = vpop.eup %592  ;;  %v338_v10 = vadd.f32 %v591_v2, %v337_v7 }
  0xbf   :  { %v595_v11 = vpop.eup %594  ;;  %v350_v14 = vmul.f32 %v593_v9, %v331_v0  ;;  %vm355_vm4 = vweird.f32 %v593_v9 }
  0xc0   :  { %v597_v15 = vpop.eup %596  ;;  %v342_v16 = vsel %vm341_vm2, %v591_v2, %v338_v10  ;;  %v365_v17 = vmul.f32 %v595_v11, %v332_v3  ;;  %vm370_vm5 = vweird.f32 %v595_v11  ;;  %vm356_vm7 = vmor %vm354_vm6, %vm355_vm4 }
  0xc1   :  { %v347_v18 = vsel %vm344_vm3, %v346_v13, %v342_v16  ;;  %v351_v19 = vsub.f32 1.0, %v350_v14  ;;  %v333_v20 = vadd.f32 1.0, %v597_v15  ;;  %vm371_vm10 = vmor %vm369_vm8, %vm370_vm5 }
  0xc2   :  { %v394_v21 = vmul.f32 %v347_v18, %v300_v12  ;;  %v366_v24 = vsub.f32 1.0, %v365_v17 }
  0xc3   :  { %v352_v25 = vmul.f32 %v593_v9, %v351_v19  ;;  %598 = vrcp.f32 %v333_v20  ;;  %v390_v47 = vand.u32 2147483648, %v333_v20  ;;  %v388_v49 = vand.u32 2147483647, %v333_v20 }
  0xc4   :  { %v398_v27 = vadd.f32 %v394_v21, %v300_v12  ;;  %v367_v28 = vmul.f32 %v595_v11, %v366_v24  ;;  %vm384_vm13 = vweird.f32 %v333_v20 }
  0xc5   :  { %v353_v30 = vadd.f32 %v593_v9, %v352_v25  ;;  %v391_v52 = vor.u32 1.1754944e-38, %v390_v47  ;;  %vm389_vm15 = vcmp.eq.f32.partialorder %v388_v49, 8.507059e+37 }
  0xc6   :  { %402 = vst [vmem:[%s860_s4] sm:$0xff] %v398_v27  ;;  %v368_v33 = vadd.f32 %v595_v11, %v367_v28 }
  0xc7   :  { %v357_v34 = vsel %vm356_vm7, %v593_v9, %v353_v30 }
  0xc8   :  { %v362_v37 = vsel %vm359_vm9, %v361_v32, %v357_v34  ;;  %v372_v38 = vsel %vm371_vm10, %v595_v11, %v368_v33 }
  0xc9   :  { %v599_v39 = vpop.eup %598  ;;  %v395_v40 = vmul.f32 %v362_v37, %v301_v31  ;;  %v377_v41 = vsel %vm374_vm11, %v376_v36, %v372_v38 }
  0xca   :  { %v396_v42 = vmul.f32 %v377_v41, %v302_v35  ;;  %v380_v43 = vmul.f32 %v599_v39, %v333_v20  ;;  %vm385_vm12 = vweird.f32 %v599_v39 }
  0xcb   :  { %v399_v44 = vadd.f32 %v395_v40, %v301_v31  ;;  %vm386_vm14 = vmor %vm384_vm13, %vm385_vm12 }
  0xcc   :  { %v400_v45 = vadd.f32 %v396_v42, %v302_v35  ;;  %v381_v46 = vsub.f32 1.0, %v380_v43 }
  0xcd   :  { %403 = vst [vmem:[%s860_s4 + $0x8] sm:$0xff] %v399_v44 }
  0xce   :  { %404 = vst [vmem:[%s860_s4 + $0x10] sm:$0xff] %v400_v45  ;;  %v382_v48 = vmul.f32 %v599_v39, %v381_v46 }
  0xd0   :  { %v383_v50 = vadd.f32 %v599_v39, %v382_v48 }
  0xd2   :  { %v387_v53 = vsel %vm386_vm14, %v599_v39, %v383_v50 }
  0xd3   :  { %v392_v54 = vsel %vm389_vm15, %v391_v52, %v387_v53 }
  0xd4   :  { %v397_v55 = vmul.f32 %v392_v54, %v303_v51 }
  0xd6   :  { %v401_v56 = vadd.f32 %v397_v55, %v303_v51 }
  0xd8   :  { %405 = vst [vmem:[%s860_s4 + $0x18] sm:$0xff] %v401_v56 }

// kernel: my_model2_forward.10
= control target key start
LH: loop header
LB: loop body
LE: loop exit
PB: predicated region body
PF: predicated region fallthrough
CT: control target
= control target key end

     0   :  { %8 = vsyncpa [#allocation4], 0  ;;  %s1391_s15 = smov [#allocation3]   ;;  %s2063_s0 = inlined_call_operand.vmem [shape: bf16[16,768], index: 0, kind: input, shape index: {}]   ;;  %s2064_s1 = inlined_call_operand.vmem [shape: bf16[768,256], index: 1, kind: input, shape index: {}]   ;;  %s2065_s2 = inlined_call_operand.hbm [shape: f32[1,256], index: 2, kind: input, shape index: {}]   ;;  %s2066_s3 = inlined_call_operand.vmem [shape: f32[16,256], index: 3, kind: output, shape index: {}]  }
   0x1   :  { %s18_s14 = sshll.u32 %s2065_s2, 4  ;;  %s20_s16 = sshll.u32 %s1391_s15, 4  ;;  %s19_s14 = int_to_ptr.hbm [resolvable:$true] %s18_s14  ;;  %s21_s16 = int_to_ptr.vmem [resolvable:$true] %s20_s16 }
   0x2   :  { %23 = dma.hbm_to_vmem [thread:$0]  %s19_s14, 32, %s21_s16, [#allocation4]  }
   0x3   :  { %1389 = dma.done.wait [#allocation4], 32  }
   0x4   :  { %1390 = vsyncadd [#allocation4], 4294967264  ;;  %v936_v0 = vld [vmem:[%s2064_s1 + $0x70] sm:$0xf]  ;;  %v1283_v1 = vld [vmem:[%s2064_s1 + $0x74] sm:$0xf0] }
   0x5   :  { %v1000_v2 = vld [vmem:[%s2064_s1 + $0xf0] sm:$0xf]  ;;  %v937_v3 = vor.u32 %v1283_v1, %v936_v0  ;;  %v1299_v4 = vld [vmem:[%s2064_s1 + $0xf4] sm:$0xf0]  ;;  %v928_v11 = vld [vmem:[%s2064_s1 + $0x60] sm:$0xf] }
   0x6   :  { %v1064_v5 = vld [vmem:[%s2064_s1 + $0x170] sm:$0xf]  ;;  %v1315_v6 = vld [vmem:[%s2064_s1 + $0x174] sm:$0xf0]  ;;  %v1001_v7 = vor.u32 %v1299_v4, %v1000_v2  ;;  %v1281_v13 = vld [vmem:[%s2064_s1 + $0x64] sm:$0xf0] }
   0x7   :  { %v1065_v8 = vor.u32 %v1315_v6, %v1064_v5  ;;  %v1128_v9 = vld [vmem:[%s2064_s1 + $0x1f0] sm:$0xf]  ;;  %v1331_v10 = vld [vmem:[%s2064_s1 + $0x1f4] sm:$0xf0]  ;;  %652 = vmatpush.bf16.msra.mxu0 %v937_v3  ;;  %v992_v14 = vld [vmem:[%s2064_s1 + $0xe0] sm:$0xf]  ;;  %v929_v16 = vor.u32 %v1281_v13, %v928_v11 }
   0x8   :  { %v1129_v12 = vor.u32 %v1331_v10, %v1128_v9  ;;  %v1297_v15 = vld [vmem:[%s2064_s1 + $0xe4] sm:$0xf0]  ;;  %666 = vmatpush.bf16.msra.mxu1 %v1001_v7  ;;  %v1056_v18 = vld [vmem:[%s2064_s1 + $0x160] sm:$0xf]  ;;  %v920_v23 = vld [vmem:[%s2064_s1 + $0x50] sm:$0xf] }
   0x9   :  { %680 = vmatpush.bf16.msra.mxu2 %v1065_v8  ;;  %v993_v17 = vor.u32 %v1297_v15, %v992_v14  ;;  %v1313_v19 = vld [vmem:[%s2064_s1 + $0x164] sm:$0xf0]  ;;  %v1120_v20 = vld [vmem:[%s2064_s1 + $0x1e0] sm:$0xf]  ;;  %v1279_v24 = vld [vmem:[%s2064_s1 + $0x54] sm:$0xf0] }
   0xa   :  { %694 = vmatpush.bf16.msra.mxu3 %v1129_v12  ;;  %v1057_v21 = vor.u32 %v1313_v19, %v1056_v18  ;;  %v1329_v22 = vld [vmem:[%s2064_s1 + $0x1e4] sm:$0xf0]  ;;  %v984_v26 = vld [vmem:[%s2064_s1 + $0xd0] sm:$0xf]  ;;  %v1295_v27 = vld [vmem:[%s2064_s1 + $0xd4] sm:$0xf0]  ;;  %v921_v29 = vor.u32 %v1279_v24, %v920_v23 }
   0xb   :  { %v1121_v25 = vor.u32 %v1329_v22, %v1120_v20  ;;  %v1048_v28 = vld [vmem:[%s2064_s1 + $0x150] sm:$0xf]  ;;  %653 = vmatpush.bf16.msra.mxu0 %v929_v16  ;;  %v1311_v30 = vld [vmem:[%s2064_s1 + $0x154] sm:$0xf0]  ;;  %v985_v33 = vor.u32 %v1295_v27, %v984_v26  ;;  %v912_v35 = vld [vmem:[%s2064_s1 + $0x40] sm:$0xf] }
   0xc   :  { %v1112_v31 = vld [vmem:[%s2064_s1 + $0x1d0] sm:$0xf]  ;;  %v1327_v32 = vld [vmem:[%s2064_s1 + $0x1d4] sm:$0xf0]  ;;  %667 = vmatpush.bf16.msra.mxu1 %v993_v17  ;;  %v1049_v34 = vor.u32 %v1311_v30, %v1048_v28  ;;  %v1277_v36 = vld [vmem:[%s2064_s1 + $0x44] sm:$0xf0] }
   0xd   :  { %681 = vmatpush.bf16.msra.mxu2 %v1057_v21  ;;  %v976_v37 = vld [vmem:[%s2064_s1 + $0xc0] sm:$0xf]  ;;  %v1113_v38 = vor.u32 %v1327_v32, %v1112_v31  ;;  %v1293_v39 = vld [vmem:[%s2064_s1 + $0xc4] sm:$0xf0]  ;;  %v913_v44 = vor.u32 %v1277_v36, %v912_v35  ;;  %v904_v47 = vld [vmem:[%s2064_s1 + $0x30] sm:$0xf] }
   0xe   :  { %695 = vmatpush.bf16.msra.mxu3 %v1121_v25  ;;  %v1040_v40 = vld [vmem:[%s2064_s1 + $0x140] sm:$0xf]  ;;  %v1309_v41 = vld [vmem:[%s2064_s1 + $0x144] sm:$0xf0]  ;;  %v977_v45 = vor.u32 %v1293_v39, %v976_v37  ;;  %v1275_v48 = vld [vmem:[%s2064_s1 + $0x34] sm:$0xf0] }
   0xf   :  { %v1104_v42 = vld [vmem:[%s2064_s1 + $0x1c0] sm:$0xf]  ;;  %v1325_v43 = vld [vmem:[%s2064_s1 + $0x1c4] sm:$0xf0]  ;;  %654 = vmatpush.bf16.msra.mxu0 %v921_v29  ;;  %v1041_v46 = vor.u32 %v1309_v41, %v1040_v40  ;;  %v968_v49 = vld [vmem:[%s2064_s1 + $0xb0] sm:$0xf]  ;;  %v905_v56 = vor.u32 %v1275_v48, %v904_v47 }
  0x10   :  { %668 = vmatpush.bf16.msra.mxu1 %v985_v33  ;;  %v1105_v50 = vor.u32 %v1325_v43, %v1104_v42  ;;  %v1291_v51 = vld [vmem:[%s2064_s1 + $0xb4] sm:$0xf0]  ;;  %v1032_v52 = vld [vmem:[%s2064_s1 + $0x130] sm:$0xf]  ;;  %v896_v59 = vld [vmem:[%s2064_s1 + $0x20] sm:$0xf] }
  0x11   :  { %682 = vmatpush.bf16.msra.mxu2 %v1049_v34  ;;  %v1307_v53 = vld [vmem:[%s2064_s1 + $0x134] sm:$0xf0]  ;;  %v1096_v54 = vld [vmem:[%s2064_s1 + $0x1b0] sm:$0xf]  ;;  %v969_v57 = vor.u32 %v1291_v51, %v968_v49  ;;  %v1273_v60 = vld [vmem:[%s2064_s1 + $0x24] sm:$0xf0] }
  0x12   :  { %696 = vmatpush.bf16.msra.mxu3 %v1113_v38  ;;  %v1323_v55 = vld [vmem:[%s2064_s1 + $0x1b4] sm:$0xf0]  ;;  %v1033_v58 = vor.u32 %v1307_v53, %v1032_v52  ;;  %v960_v61 = vld [vmem:[%s2064_s1 + $0xa0] sm:$0xf]  ;;  %v1289_v63 = vld [vmem:[%s2064_s1 + $0xa4] sm:$0xf0]  ;;  %v897_v4 = vor.u32 %v1273_v60, %v896_v59 }
  0x13   :  { %655 = vmatpush.bf16.msra.mxu0 %v913_v44  ;;  %v1097_v62 = vor.u32 %v1323_v55, %v1096_v54  ;;  %v1024_v0 = vld [vmem:[%s2064_s1 + $0x120] sm:$0xf]  ;;  %v1305_v1 = vld [vmem:[%s2064_s1 + $0x124] sm:$0xf0]  ;;  %v961_v5 = vor.u32 %v1289_v63, %v960_v61  ;;  %v888_v7 = vld [vmem:[%s2064_s1 + $0x10] sm:$0xf] }
  0x14   :  { %669 = vmatpush.bf16.msra.mxu1 %v977_v45  ;;  %v1088_v2 = vld [vmem:[%s2064_s1 + $0x1a0] sm:$0xf]  ;;  %v1321_v3 = vld [vmem:[%s2064_s1 + $0x1a4] sm:$0xf0]  ;;  %v1025_v6 = vor.u32 %v1305_v1, %v1024_v0  ;;  %v1271_v8 = vld [vmem:[%s2064_s1 + $0x14] sm:$0xf0] }
  0x15   :  { %683 = vmatpush.bf16.msra.mxu2 %v1041_v46  ;;  %v952_v9 = vld [vmem:[%s2064_s1 + $0x90] sm:$0xf]  ;;  %v1089_v10 = vor.u32 %v1321_v3, %v1088_v2  ;;  %v1287_v11 = vld [vmem:[%s2064_s1 + $0x94] sm:$0xf0]  ;;  %v889_v16 = vor.u32 %v1271_v8, %v888_v7  ;;  %v880_v17 = vld [vmem:[%s2064_s1] sm:$0xf] }
  0x16   :  { %697 = vmatpush.bf16.msra.mxu3 %v1105_v50  ;;  %v1016_v12 = vld [vmem:[%s2064_s1 + $0x110] sm:$0xf]  ;;  %v1303_v13 = vld [vmem:[%s2064_s1 + $0x114] sm:$0xf0]  ;;  %v1269_v18 = vld [vmem:[%s2064_s1 + $0x4] sm:$0xf0]  ;;  %v953_v19 = vor.u32 %v1287_v11, %v952_v9 }
  0x17   :  { %656 = vmatpush.bf16.msra.mxu0 %v905_v56  ;;  %v1080_v14 = vld [vmem:[%s2064_s1 + $0x190] sm:$0xf]  ;;  %v1319_v15 = vld [vmem:[%s2064_s1 + $0x194] sm:$0xf0]  ;;  %v1017_v20 = vor.u32 %v1303_v13, %v1016_v12  ;;  %v944_v21 = vld [vmem:[%s2064_s1 + $0x80] sm:$0xf]  ;;  %v881_v31 = vor.u32 %v1269_v18, %v880_v17 }
  0x18   :  { %670 = vmatpush.bf16.msra.mxu1 %v969_v57  ;;  %v1285_v22 = vld [vmem:[%s2064_s1 + $0x84] sm:$0xf0]  ;;  %v1008_v23 = vld [vmem:[%s2064_s1 + $0x100] sm:$0xf]  ;;  %v1081_v24 = vor.u32 %v1319_v15, %v1080_v14  ;;  %v1192_v28 = vld [vmem:[%s2064_s1 + $0x270] sm:$0xf] }
  0x19   :  { %684 = vmatpush.bf16.msra.mxu2 %v1033_v58  ;;  %v1301_v25 = vld [vmem:[%s2064_s1 + $0x104] sm:$0xf0]  ;;  %v1072_v26 = vld [vmem:[%s2064_s1 + $0x180] sm:$0xf]  ;;  %v1347_v29 = vld [vmem:[%s2064_s1 + $0x274] sm:$0xf0]  ;;  %v945_v35 = vor.u32 %v1285_v22, %v944_v21 }
  0x1a   :  { %698 = vmatpush.bf16.msra.mxu3 %v1097_v62  ;;  %v1317_v27 = vld [vmem:[%s2064_s1 + $0x184] sm:$0xf0]  ;;  %v1256_v30 = vld [vmem:[%s2064_s1 + $0x2f0] sm:$0xf]  ;;  %v1363_v32 = vld [vmem:[%s2064_s1 + $0x2f4] sm:$0xf0]  ;;  %v1009_v36 = vor.u32 %v1301_v25, %v1008_v23  ;;  %v1193_v40 = vor.u32 %v1347_v29, %v1192_v28 }
  0x1b   :  { %657 = vmatpush.bf16.msra.mxu0 %v897_v4  ;;  %v1282_v33 = vld [vmem:[%s2064_s1 + $0x74] sm:$0xf]  ;;  %v938_v34 = vld [vmem:[%s2064_s1 + $0x78] sm:$0xf0]  ;;  %v1073_v39 = vor.u32 %v1317_v27, %v1072_v26  ;;  %v1184_v41 = vld [vmem:[%s2064_s1 + $0x260] sm:$0xf]  ;;  %v1257_v43 = vor.u32 %v1363_v32, %v1256_v30 }
  0x1c   :  { %671 = vmatpush.bf16.msra.mxu1 %v961_v5  ;;  %v1298_v37 = vld [vmem:[%s2064_s1 + $0xf4] sm:$0xf]  ;;  %v1002_v38 = vld [vmem:[%s2064_s1 + $0xf8] sm:$0xf0]  ;;  %v1345_v42 = vld [vmem:[%s2064_s1 + $0x264] sm:$0xf0]  ;;  %v941_v44 = vor.u32 %v1282_v33, %v938_v34 }
  0x1d   :  { %685 = vmatpush.bf16.msra.mxu2 %v1025_v6  ;;  %v1248_v45 = vld [vmem:[%s2064_s1 + $0x2e0] sm:$0xf]  ;;  %v1361_v46 = vld [vmem:[%s2064_s1 + $0x2e4] sm:$0xf0]  ;;  %v1280_v47 = vld [vmem:[%s2064_s1 + $0x64] sm:$0xf]  ;;  %v1005_v48 = vor.u32 %v1298_v37, %v1002_v38  ;;  %v1185_v55 = vor.u32 %v1345_v42, %v1184_v41 }
  0x1e   :  { %699 = vmatpush.bf16.msra.mxu3 %v1089_v10  ;;  %v930_v49 = vld [vmem:[%s2064_s1 + $0x68] sm:$0xf0]  ;;  %v1296_v50 = vld [vmem:[%s2064_s1 + $0xe4] sm:$0xf]  ;;  %v1176_v52 = vld [vmem:[%s2064_s1 + $0x250] sm:$0xf]  ;;  %v1249_v60 = vor.u32 %v1361_v46, %v1248_v45 }
  0x1f   :  { %658 = vmatpush.bf16.msra.mxu0 %v889_v16  ;;  %v994_v51 = vld [vmem:[%s2064_s1 + $0xe8] sm:$0xf0]  ;;  %v856_v53 = vld [vmem:[%s2063_s0] sm:$0xf]  ;;  %v1265_v54 = vld [vmem:[%s2063_s0 + $0x14] sm:$0xf0]  ;;  %v933_v61 = vor.u32 %v1280_v47, %v930_v49 }
  0x20   :  { %672 = vmatpush.bf16.msra.mxu1 %v953_v19  ;;  %v1343_v56 = vld [vmem:[%s2064_s1 + $0x254] sm:$0xf0]  ;;  %v1240_v57 = vld [vmem:[%s2064_s1 + $0x2d0] sm:$0xf]  ;;  %v1673_v59 = vor.u32 %v1265_v54, %v856_v53  ;;  %v1278_v62 = vld [vmem:[%s2064_s1 + $0x54] sm:$0xf]  ;;  %v997_v1 = vor.u32 %v1296_v50, %v994_v51 }
  0x21   :  { %686 = vmatpush.bf16.msra.mxu2 %v1017_v20  ;;  %v1359_v58 = vld [vmem:[%s2064_s1 + $0x2d4] sm:$0xf0]  ;;  %v922_v63 = vld [vmem:[%s2064_s1 + $0x58] sm:$0xf0]  ;;  %v1294_v0 = vld [vmem:[%s2064_s1 + $0xd4] sm:$0xf]  ;;  %v1177_v9 = vor.u32 %v1343_v56, %v1176_v52 }
  0x22   :  { %700 = vmatpush.bf16.msra.mxu3 %v1081_v24  ;;  %v986_v2 = vld [vmem:[%s2064_s1 + $0xd8] sm:$0xf0]  ;;  %v1262_v3 = vld [vmem:[%s2063_s0 + $0x4] sm:$0xf]  ;;  %v864_v6 = vld [vmem:[%s2063_s0 + $0x8] sm:$0xf]  ;;  %v1241_v12 = vor.u32 %v1359_v58, %v1240_v57  ;;  %v925_v13 = vor.u32 %v1278_v62, %v922_v63 }
  0x23   :  { %659 = vmatpush.bf16.msra.mxu0 %v881_v31  ;;  %v858_v4 = vld [vmem:[%s2063_s0 + $0x18] sm:$0xf0]  ;;  %v1266_v7 = vld [vmem:[%s2063_s0 + $0x1c] sm:$0xf0]  ;;  %v1263_v8 = vld [vmem:[%s2063_s0 + $0xc] sm:$0xf]  ;;  %v989_v18 = vor.u32 %v1294_v0, %v986_v2 }
  0x24   :  { %673 = vmatpush.bf16.msra.mxu1 %v945_v35  ;;  %v1694_v5 = vor.u32 %v1262_v3, %v858_v4  ;;  %v1705_v10 = vor.u32 %v1266_v7, %v864_v6  ;;  %v866_v11 = vld [vmem:[%s2063_s0 + $0x20] sm:$0xf0]  ;;  %v1168_v14 = vld [vmem:[%s2064_s1 + $0x240] sm:$0xf]  ;;  %v1341_v15 = vld [vmem:[%s2064_s1 + $0x244] sm:$0xf0] }
  0x25   :  { %687 = vmatpush.bf16.msra.mxu2 %v1009_v36  ;;  %v1232_v16 = vld [vmem:[%s2064_s1 + $0x2c0] sm:$0xf]  ;;  %v1719_v17 = vor.u32 %v1263_v8, %v866_v11  ;;  %v1357_v19 = vld [vmem:[%s2064_s1 + $0x2c4] sm:$0xf0]  ;;  %v1276_v20 = vld [vmem:[%s2064_s1 + $0x44] sm:$0xf]  ;;  %v1169_v24 = vor.u32 %v1341_v15, %v1168_v14 }
  0x26   :  { %701 = vmatpush.bf16.msra.mxu3 %v1073_v39  ;;  %660 = vmatmul.bf16.vlgmr.msra.gmra.mxu0 %v1673_v59  ;;  %v914_v21 = vld [vmem:[%s2064_s1 + $0x48] sm:$0xf0]  ;;  %v1292_v22 = vld [vmem:[%s2064_s1 + $0xc4] sm:$0xf]  ;;  %v1233_v25 = vor.u32 %v1357_v19, %v1232_v16  ;;  %v1160_v27 = vld [vmem:[%s2064_s1 + $0x230] sm:$0xf] }
  0x27   :  { %708 = vmatpush.bf16.msrb.mxu0 %v1193_v40  ;;  %674 = vmatmul.bf16.vlgmr.msra.gmra.mxu1 %v1694_v5  ;;  %v978_v23 = vld [vmem:[%s2064_s1 + $0xc8] sm:$0xf0]  ;;  %v917_v26 = vor.u32 %v1276_v20, %v914_v21  ;;  %v1339_v28 = vld [vmem:[%s2064_s1 + $0x234] sm:$0xf0]  ;;  %v1224_v29 = vld [vmem:[%s2064_s1 + $0x2b0] sm:$0xf] }
  0x28   :  { %722 = vmatpush.bf16.msrb.mxu1 %v1257_v43  ;;  %688 = vmatmul.bf16.vlgmr.msra.gmra.mxu2 %v1705_v10  ;;  %v981_v30 = vor.u32 %v1292_v22, %v978_v23  ;;  %v1355_v31 = vld [vmem:[%s2064_s1 + $0x2b4] sm:$0xf0]  ;;  %v1274_v32 = vld [vmem:[%s2064_s1 + $0x34] sm:$0xf]  ;;  %v906_v33 = vld [vmem:[%s2064_s1 + $0x38] sm:$0xf0]  ;;  %v1161_v36 = vor.u32 %v1339_v28, %v1160_v27 }
  0x29   :  { %736 = vmatpush.bf16.msrb.mxu2 %v941_v44  ;;  %702 = vmatmul.bf16.vlgmr.msra.gmra.mxu3 %v1719_v17  ;;  %v1290_v34 = vld [vmem:[%s2064_s1 + $0xb4] sm:$0xf]  ;;  %v970_v35 = vld [vmem:[%s2064_s1 + $0xb8] sm:$0xf0]  ;;  %v1225_v37 = vor.u32 %v1355_v31, %v1224_v29  ;;  %v909_v38 = vor.u32 %v1274_v32, %v906_v33  ;;  %v1152_v39 = vld [vmem:[%s2064_s1 + $0x220] sm:$0xf] }
  0x2a   :  { %750 = vmatpush.bf16.msrb.mxu3 %v1005_v48  ;;  %v1337_v40 = vld [vmem:[%s2064_s1 + $0x224] sm:$0xf0]  ;;  %v1216_v41 = vld [vmem:[%s2064_s1 + $0x2a0] sm:$0xf]  ;;  %v973_v42 = vor.u32 %v1290_v34, %v970_v35  ;;  %v1272_v44 = vld [vmem:[%s2064_s1 + $0x24] sm:$0xf] }
  0x2b   :  { %709 = vmatpush.bf16.msrb.mxu0 %v1185_v55  ;;  %v1353_v43 = vld [vmem:[%s2064_s1 + $0x2a4] sm:$0xf0]  ;;  %v898_v45 = vld [vmem:[%s2064_s1 + $0x28] sm:$0xf0]  ;;  %v1288_v46 = vld [vmem:[%s2064_s1 + $0xa4] sm:$0xf]  ;;  %v1153_v48 = vor.u32 %v1337_v40, %v1152_v39 }
  0x2c   :  { %723 = vmatpush.bf16.msrb.mxu1 %v1249_v60  ;;  %v962_v47 = vld [vmem:[%s2064_s1 + $0xa8] sm:$0xf0]  ;;  %v1217_v49 = vor.u32 %v1353_v43, %v1216_v41  ;;  %v901_v50 = vor.u32 %v1272_v44, %v898_v45  ;;  %v1144_v51 = vld [vmem:[%s2064_s1 + $0x210] sm:$0xf]  ;;  %v1335_v52 = vld [vmem:[%s2064_s1 + $0x214] sm:$0xf0] }
  0x2d   :  { %737 = vmatpush.bf16.msrb.mxu2 %v933_v61  ;;  %v1208_v53 = vld [vmem:[%s2064_s1 + $0x290] sm:$0xf]  ;;  %v965_v54 = vor.u32 %v1288_v46, %v962_v47  ;;  %v1351_v55 = vld [vmem:[%s2064_s1 + $0x294] sm:$0xf0]  ;;  %v1270_v56 = vld [vmem:[%s2064_s1 + $0x14] sm:$0xf]  ;;  %v1145_v61 = vor.u32 %v1335_v52, %v1144_v51 }
  0x2e   :  { %751 = vmatpush.bf16.msrb.mxu3 %v997_v1  ;;  %v890_v57 = vld [vmem:[%s2064_s1 + $0x18] sm:$0xf0]  ;;  %v1286_v58 = vld [vmem:[%s2064_s1 + $0x94] sm:$0xf]  ;;  %v1136_v62 = vld [vmem:[%s2064_s1 + $0x200] sm:$0xf]  ;;  %v1209_v1 = vor.u32 %v1351_v55, %v1208_v53 }
  0x2f   :  { %710 = vmatpush.bf16.msrb.mxu0 %v1177_v9  ;;  %v954_v60 = vld [vmem:[%s2064_s1 + $0x98] sm:$0xf0]  ;;  %v1333_v63 = vld [vmem:[%s2064_s1 + $0x204] sm:$0xf0]  ;;  %v1200_v0 = vld [vmem:[%s2064_s1 + $0x280] sm:$0xf]  ;;  %v893_v2 = vor.u32 %v1270_v56, %v890_v57 }
  0x30   :  { %724 = vmatpush.bf16.msrb.mxu1 %v1241_v12  ;;  %v1349_v3 = vld [vmem:[%s2064_s1 + $0x284] sm:$0xf0]  ;;  %v1268_v4 = vld [vmem:[%s2064_s1 + $0x4] sm:$0xf]  ;;  %v882_v6 = vld [vmem:[%s2064_s1 + $0x8] sm:$0xf0]  ;;  %v957_v7 = vor.u32 %v1286_v58, %v954_v60  ;;  %v1137_v15 = vor.u32 %v1333_v63, %v1136_v62 }
  0x31   :  { %738 = vmatpush.bf16.msrb.mxu2 %v925_v13  ;;  %v1284_v8 = vld [vmem:[%s2064_s1 + $0x84] sm:$0xf]  ;;  %v946_v9 = vld [vmem:[%s2064_s1 + $0x88] sm:$0xf0]  ;;  %v1314_v11 = vld [vmem:[%s2064_s1 + $0x174] sm:$0xf]  ;;  %v1201_v20 = vor.u32 %v1349_v3, %v1200_v0  ;;  %v885_v21 = vor.u32 %v1268_v4, %v882_v6 }
  0x32   :  { %752 = vmatpush.bf16.msrb.mxu3 %v989_v18  ;;  %v1066_v12 = vld [vmem:[%s2064_s1 + $0x178] sm:$0xf0]  ;;  %v1330_v13 = vld [vmem:[%s2064_s1 + $0x1f4] sm:$0xf]  ;;  %v872_v23 = vld [vmem:[%s2063_s0 + $0x10] sm:$0xf] }
  0x33   :  { %711 = vmatpush.bf16.msrb.mxu0 %v1169_v24  ;;  %v1130_v14 = vld [vmem:[%s2064_s1 + $0x1f8] sm:$0xf0]  ;;  %v1346_v16 = vld [vmem:[%s2064_s1 + $0x274] sm:$0xf]  ;;  %v1267_v24 = vld [vmem:[%s2063_s0 + $0x24] sm:$0xf0] }
  0x34   :  { %725 = vmatpush.bf16.msrb.mxu1 %v1233_v25  ;;  %v1194_v18 = vld [vmem:[%s2064_s1 + $0x278] sm:$0xf0]  ;;  %v1362_v19 = vld [vmem:[%s2064_s1 + $0x2f4] sm:$0xf]  ;;  %v949_v25 = vor.u32 %v1284_v8, %v946_v9  ;;  %v874_v28 = vld [vmem:[%s2063_s0 + $0x28] sm:$0xf0]  ;;  %v1133_v29 = vor.u32 %v1330_v13, %v1130_v14  ;;  %v1880_v35 = vor.u32 %v1267_v24, %v872_v23 }
  0x35   :  { %739 = vmatpush.bf16.msrb.mxu2 %v917_v26  ;;  %v1258_v22 = vld [vmem:[%s2064_s1 + $0x2f8] sm:$0xf0]  ;;  %v1069_v26 = vor.u32 %v1314_v11, %v1066_v12  ;;  %v1264_v27 = vld [vmem:[%s2063_s0 + $0x14] sm:$0xf]  ;;  %v1312_v31 = vld [vmem:[%s2064_s1 + $0x164] sm:$0xf] }
  0x36   :  { %753 = vmatpush.bf16.msrb.mxu3 %v981_v30  ;;  %v1197_v30 = vor.u32 %v1346_v16, %v1194_v18  ;;  %v1058_v32 = vld [vmem:[%s2064_s1 + $0x168] sm:$0xf0]  ;;  %v1328_v33 = vld [vmem:[%s2064_s1 + $0x1e4] sm:$0xf]  ;;  %v1261_v34 = vor.u32 %v1362_v19, %v1258_v22  ;;  %v1891_v39 = vor.u32 %v1264_v27, %v874_v28  ;;  %v1310_v45 = vld [vmem:[%s2064_s1 + $0x154] sm:$0xf] }
  0x37   :  { %712 = vmatpush.bf16.msrb.mxu0 %v1161_v36  ;;  %v1122_v36 = vld [vmem:[%s2064_s1 + $0x1e8] sm:$0xf0]  ;;  %v1360_v40 = vld [vmem:[%s2064_s1 + $0x2e4] sm:$0xf]  ;;  %v1050_v46 = vld [vmem:[%s2064_s1 + $0x158] sm:$0xf0] }
  0x38   :  { %726 = vmatpush.bf16.msrb.mxu1 %v1225_v37  ;;  %v1344_v37 = vld [vmem:[%s2064_s1 + $0x264] sm:$0xf]  ;;  %v1250_v41 = vld [vmem:[%s2064_s1 + $0x2e8] sm:$0xf0]  ;;  %v1125_v43 = vor.u32 %v1328_v33, %v1122_v36  ;;  %v1326_v47 = vld [vmem:[%s2064_s1 + $0x1d4] sm:$0xf] }
  0x39   :  { %740 = vmatpush.bf16.msrb.mxu2 %v909_v38  ;;  %v1186_v38 = vld [vmem:[%s2064_s1 + $0x268] sm:$0xf0]  ;;  %v1178_v51 = vld [vmem:[%s2064_s1 + $0x258] sm:$0xf0]  ;;  %v1358_v52 = vld [vmem:[%s2064_s1 + $0x2d4] sm:$0xf] }
  0x3a   :  { %754 = vmatpush.bf16.msrb.mxu3 %v973_v42  ;;  %v1061_v42 = vor.u32 %v1312_v31, %v1058_v32  ;;  %v1189_v44 = vor.u32 %v1344_v37, %v1186_v38  ;;  %v1242_v53 = vld [vmem:[%s2064_s1 + $0x2d8] sm:$0xf0]  ;;  %v1042_v57 = vld [vmem:[%s2064_s1 + $0x148] sm:$0xf0]  ;;  %v1324_v58 = vld [vmem:[%s2064_s1 + $0x1c4] sm:$0xf] }
  0x3b   :  { %713 = vmatpush.bf16.msrb.mxu0 %v1153_v48  ;;  %v1253_v48 = vor.u32 %v1360_v40, %v1250_v41  ;;  %v1245_v60 = vor.u32 %v1358_v52, %v1242_v53  ;;  %v1170_v62 = vld [vmem:[%s2064_s1 + $0x248] sm:$0xf0]  ;;  %v1356_v63 = vld [vmem:[%s2064_s1 + $0x2c4] sm:$0xf]  ;;  %v1306_v4 = vld [vmem:[%s2064_s1 + $0x134] sm:$0xf] }
  0x3c   :  { %727 = vmatpush.bf16.msrb.mxu1 %v1217_v49  ;;  %v1114_v49 = vld [vmem:[%s2064_s1 + $0x1d8] sm:$0xf0]  ;;  %v1234_v0 = vld [vmem:[%s2064_s1 + $0x2c8] sm:$0xf0]  ;;  %v1338_v11 = vld [vmem:[%s2064_s1 + $0x234] sm:$0xf] }
  0x3d   :  { %741 = vmatpush.bf16.msrb.mxu2 %v901_v50  ;;  %v1342_v50 = vld [vmem:[%s2064_s1 + $0x254] sm:$0xf]  ;;  %v1117_v55 = vor.u32 %v1326_v47, %v1114_v49  ;;  %v1034_v6 = vld [vmem:[%s2064_s1 + $0x138] sm:$0xf0]  ;;  %v1237_v8 = vor.u32 %v1356_v63, %v1234_v0  ;;  %v1304_v19 = vld [vmem:[%s2064_s1 + $0x124] sm:$0xf] }
  0x3e   :  { %755 = vmatpush.bf16.msrb.mxu3 %v965_v54  ;;  %v1053_v54 = vor.u32 %v1310_v45, %v1050_v46  ;;  %v1181_v56 = vor.u32 %v1342_v50, %v1178_v51  ;;  %v1098_v9 = vld [vmem:[%s2064_s1 + $0x1b8] sm:$0xf0]  ;;  %v1354_v13 = vld [vmem:[%s2064_s1 + $0x2b4] sm:$0xf]  ;;  %v1090_v23 = vld [vmem:[%s2064_s1 + $0x1a8] sm:$0xf0] }
  0x3f   :  { %714 = vmatpush.bf16.msrb.mxu0 %v1145_v61  ;;  %v1340_v61 = vld [vmem:[%s2064_s1 + $0x244] sm:$0xf]  ;;  %v1162_v12 = vld [vmem:[%s2064_s1 + $0x238] sm:$0xf0]  ;;  %v1218_v27 = vld [vmem:[%s2064_s1 + $0x2a8] sm:$0xf0] }
  0x40   :  { %728 = vmatpush.bf16.msrb.mxu1 %v1209_v1  ;;  %v1173_v3 = vor.u32 %v1340_v61, %v1170_v62  ;;  %v1226_v14 = vld [vmem:[%s2064_s1 + $0x2b8] sm:$0xf0]  ;;  %v1165_v18 = vor.u32 %v1338_v11, %v1162_v12  ;;  %v1336_v24 = vld [vmem:[%s2064_s1 + $0x224] sm:$0xf]  ;;  %v1302_v31 = vld [vmem:[%s2064_s1 + $0x114] sm:$0xf] }
  0x41   :  { %742 = vmatpush.bf16.msrb.mxu2 %v893_v2  ;;  %v1229_v22 = vor.u32 %v1354_v13, %v1226_v14  ;;  %v1018_v32 = vld [vmem:[%s2064_s1 + $0x118] sm:$0xf0]  ;;  %v1318_v33 = vld [vmem:[%s2064_s1 + $0x194] sm:$0xf]  ;;  %v1300_v45 = vld [vmem:[%s2064_s1 + $0x104] sm:$0xf] }
  0x42   :  { %756 = vmatpush.bf16.msrb.mxu3 %v957_v7  ;;  %v1322_v7 = vld [vmem:[%s2064_s1 + $0x1b4] sm:$0xf]  ;;  %v1082_v36 = vld [vmem:[%s2064_s1 + $0x198] sm:$0xf0]  ;;  %v1010_v46 = vld [vmem:[%s2064_s1 + $0x108] sm:$0xf0] }
  0x43   :  { %715 = vmatpush.bf16.msrb.mxu0 %v1137_v15  ;;  %v1037_v15 = vor.u32 %v1306_v4, %v1034_v6  ;;  %v1101_v16 = vor.u32 %v1322_v7, %v1098_v9  ;;  %v1334_v37 = vld [vmem:[%s2064_s1 + $0x214] sm:$0xf]  ;;  %v1146_v38 = vld [vmem:[%s2064_s1 + $0x218] sm:$0xf0]  ;;  %v1316_v47 = vld [vmem:[%s2064_s1 + $0x184] sm:$0xf] }
  0x44   :  { %729 = vmatpush.bf16.msrb.mxu1 %v1201_v20  ;;  %v1026_v20 = vld [vmem:[%s2064_s1 + $0x128] sm:$0xf0]  ;;  %v1350_v40 = vld [vmem:[%s2064_s1 + $0x294] sm:$0xf]  ;;  %v1210_v41 = vld [vmem:[%s2064_s1 + $0x298] sm:$0xf0] }
  0x45   :  { %743 = vmatpush.bf16.msrb.mxu2 %v885_v21  ;;  %v1320_v21 = vld [vmem:[%s2064_s1 + $0x1a4] sm:$0xf]  ;;  %v1029_v28 = vor.u32 %v1304_v19, %v1026_v20  ;;  %v1074_v49 = vld [vmem:[%s2064_s1 + $0x188] sm:$0xf0] }
  0x46   :  { %757 = vmatpush.bf16.msrb.mxu3 %v949_v25  ;;  %716 = vmatmul.bf16.vlgmr.msrb.gmra.mxu0 %v1880_v35  ;;  %v1154_v25 = vld [vmem:[%s2064_s1 + $0x228] sm:$0xf0]  ;;  %v1332_v50 = vld [vmem:[%s2064_s1 + $0x204] sm:$0xf] }
  0x47   :  { %764 = vmatpush.bf16.msra.mxu0 %v1069_v26  ;;  %730 = vmatmul.bf16.vlgmr.msrb.gmra.mxu1 %v1891_v39  ;;  %v1352_v26 = vld [vmem:[%s2064_s1 + $0x2a4] sm:$0xf]  ;;  %v1138_v51 = vld [vmem:[%s2064_s1 + $0x208] sm:$0xf0] }
  0x48   :  { %778 = vmatpush.bf16.msra.mxu1 %v1133_v29  ;;  %744 = vmatmul.bf16.vlgmr.msrb.gmra.mxu2 %v1673_v59  ;;  %v1308_v59 = vld [vmem:[%s2064_s1 + $0x144] sm:$0xf]  ;;  %v1093_v29 = vor.u32 %v1320_v21, %v1090_v23  ;;  %v1202_v53 = vld [vmem:[%s2064_s1 + $0x288] sm:$0xf0] }
  0x49   :  { %792 = vmatpush.bf16.msra.mxu2 %v1197_v30  ;;  %758 = vmatmul.bf16.vlgmr.msrb.gmra.mxu3 %v1694_v5  ;;  %v1106_v5 = vld [vmem:[%s2064_s1 + $0x1c8] sm:$0xf0]  ;;  %v1045_v1 = vor.u32 %v1308_v59, %v1042_v57  ;;  %v1157_v30 = vor.u32 %v1336_v24, %v1154_v25  ;;  %v1348_v52 = vld [vmem:[%s2064_s1 + $0x284] sm:$0xf] }
  0x4a   :  { %806 = vmatpush.bf16.msra.mxu3 %v1261_v34  ;;  %v1109_v2 = vor.u32 %v1324_v58, %v1106_v5  ;;  %v1221_v34 = vor.u32 %v1352_v26, %v1218_v27  ;;  %v1205_v59 = vor.u32 %v1348_v52, %v1202_v53 }
  0x4b   :  { %765 = vmatpush.bf16.msra.mxu0 %v1061_v42  ;;  %v1021_v42 = vor.u32 %v1302_v31, %v1018_v32 }
  0x4c   :  { %779 = vmatpush.bf16.msra.mxu1 %v1125_v43  ;;  %v1085_v43 = vor.u32 %v1318_v33, %v1082_v36 }
  0x4d   :  { %793 = vmatpush.bf16.msra.mxu2 %v1189_v44  ;;  %v1149_v44 = vor.u32 %v1334_v37, %v1146_v38 }
  0x4e   :  { %807 = vmatpush.bf16.msra.mxu3 %v1253_v48  ;;  %v1213_v48 = vor.u32 %v1350_v40, %v1210_v41 }
  0x4f   :  { %766 = vmatpush.bf16.msra.mxu0 %v1053_v54  ;;  %v1013_v54 = vor.u32 %v1300_v45, %v1010_v46 }
  0x50   :  { %780 = vmatpush.bf16.msra.mxu1 %v1117_v55  ;;  %v1077_v55 = vor.u32 %v1316_v47, %v1074_v49 }
  0x51   :  { %794 = vmatpush.bf16.msra.mxu2 %v1181_v56  ;;  %v1141_v56 = vor.u32 %v1332_v50, %v1138_v51 }
  0x52   :  { %808 = vmatpush.bf16.msra.mxu3 %v1245_v60 }
  0x53   :  { %767 = vmatpush.bf16.msra.mxu0 %v1045_v1 }
  0x54   :  { %781 = vmatpush.bf16.msra.mxu1 %v1109_v2  ;;  %v835_v2 = vld [vmem:[#allocation3] sm:$0x3] }
  0x55   :  { %795 = vmatpush.bf16.msra.mxu2 %v1173_v3  ;;  %v838_v31 = vperm.slane %v835_v2, 1 }
  0x56   :  { %809 = vmatpush.bf16.msra.mxu3 %v1237_v8 }
  0x57   :  { %768 = vmatpush.bf16.msra.mxu0 %v1037_v15 }
  0x58   :  { %782 = vmatpush.bf16.msra.mxu1 %v1101_v16 }
  0x59   :  { %796 = vmatpush.bf16.msra.mxu2 %v1165_v18 }
  0x5a   :  { %810 = vmatpush.bf16.msra.mxu3 %v1229_v22 }
  0x5b   :  { %769 = vmatpush.bf16.msra.mxu0 %v1029_v28 }
  0x5c   :  { %783 = vmatpush.bf16.msra.mxu1 %v1093_v29 }
  0x5d   :  { %797 = vmatpush.bf16.msra.mxu2 %v1157_v30 }
  0x5e   :  { %811 = vmatpush.bf16.msra.mxu3 %v1221_v34 }
  0x5f   :  { %770 = vmatpush.bf16.msra.mxu0 %v1021_v42 }
  0x60   :  { %784 = vmatpush.bf16.msra.mxu1 %v1085_v43 }
  0x61   :  { %798 = vmatpush.bf16.msra.mxu2 %v1149_v44 }
  0x62   :  { %812 = vmatpush.bf16.msra.mxu3 %v1213_v48 }
  0x63   :  { %771 = vmatpush.bf16.msra.mxu0 %v1013_v54 }
  0x64   :  { %785 = vmatpush.bf16.msra.mxu1 %v1077_v55 }
  0x65   :  { %799 = vmatpush.bf16.msra.mxu2 %v1141_v56 }
  0x66   :  { %813 = vmatpush.bf16.msra.mxu3 %v1205_v59  ;;  %772 = vmatmul.bf16.vlgmr.msra.gmra.mxu0 %v1705_v10 }
  0x67   :  { %786 = vmatmul.bf16.vlgmr.msra.gmra.mxu1 %v1719_v17  ;;  %v837_v17 = vperm.slane %v835_v2, 0 }
  0x68   :  { %800 = vmatmul.bf16.vlgmr.msra.gmra.mxu2 %v1880_v35 }
  0x69   :  { %814 = vmatmul.bf16.vlgmr.msra.gmra.mxu3 %v1891_v39 }
  0xa3   :  { %v661_v57 = vpop.f32.mrf.mxu0 }
  0xa4   :  { %v675_v58 = vpop.f32.mrf.mxu1 }
  0xa5   :  { %v676_v60 = vadd.f32 %v675_v58, %v661_v57 }
  0xab   :  { %v663_v5 = vpop.f32.mrf.mxu0  ;;  %v689_v61 = vpop.f32.mrf.mxu2 }
  0xac   :  { %v677_v62 = vpop.f32.mrf.mxu1  ;;  %v690_v63 = vadd.f32 %v689_v61, %v676_v60  ;;  %v703_v0 = vpop.f32.mrf.mxu3 }
  0xad   :  { %v678_v3 = vadd.f32 %v677_v62, %v663_v5 }
  0xae   :  { %v704_v1 = vadd.f32 %v703_v0, %v690_v63 }
  0xb3   :  { %v691_v6 = vpop.f32.mrf.mxu2 }
  0xb4   :  { %v692_v8 = vadd.f32 %v691_v6, %v678_v3  ;;  %v705_v9 = vpop.f32.mrf.mxu3 }
  0xb6   :  { %v706_v11 = vadd.f32 %v705_v9, %v692_v8 }
  0xc3   :  { %v717_v4 = vpop.f32.mrf.mxu0 }
  0xc4   :  { %v718_v10 = vadd.f32 %v717_v4, %v704_v1  ;;  %v731_v7 = vpop.f32.mrf.mxu1 }
  0xc6   :  { %v732_v35 = vadd.f32 %v731_v7, %v718_v10 }
  0xc8   :  { %v841_v39 = vadd.f32 %v837_v17, %v732_v35 }
  0xca   :  { %845 = vst [vmem:[%s2066_s3] sm:$0xff] %v841_v39 }
  0xcb   :  { %v719_v12 = vpop.f32.mrf.mxu0  ;;  %v745_v18 = vpop.f32.mrf.mxu2 }
  0xcc   :  { %v720_v13 = vadd.f32 %v719_v12, %v706_v11  ;;  %v733_v14 = vpop.f32.mrf.mxu1  ;;  %v759_v19 = vpop.f32.mrf.mxu3 }
  0xcd   :  { %v760_v21 = vadd.f32 %v759_v19, %v745_v18 }
  0xce   :  { %v734_v15 = vadd.f32 %v733_v14, %v720_v13 }
  0xd0   :  { %v843_v16 = vadd.f32 %v837_v17, %v734_v15 }
  0xd2   :  { %847 = vst [vmem:[%s2066_s3 + $0x10] sm:$0xff] %v843_v16 }
  0xd3   :  { %v747_v20 = vpop.f32.mrf.mxu2 }
  0xd4   :  { %v761_v22 = vpop.f32.mrf.mxu3 }
  0xd5   :  { %v762_v28 = vadd.f32 %v761_v22, %v747_v20 }
  0xe3   :  { %v773_v23 = vpop.f32.mrf.mxu0 }
  0xe4   :  { %v774_v24 = vadd.f32 %v773_v23, %v760_v21  ;;  %v787_v25 = vpop.f32.mrf.mxu1 }
  0xe6   :  { %v788_v26 = vadd.f32 %v787_v25, %v774_v24 }
  0xeb   :  { %v801_v27 = vpop.f32.mrf.mxu2  ;;  %v775_v32 = vpop.f32.mrf.mxu0 }
  0xec   :  { %v802_v29 = vadd.f32 %v801_v27, %v788_v26  ;;  %v815_v30 = vpop.f32.mrf.mxu3  ;;  %v776_v34 = vadd.f32 %v775_v32, %v762_v28  ;;  %v789_v37 = vpop.f32.mrf.mxu1 }
  0xee   :  { %v816_v33 = vadd.f32 %v815_v30, %v802_v29  ;;  %v790_v38 = vadd.f32 %v789_v37, %v776_v34 }
  0xf0   :  { %v842_v36 = vadd.f32 %v838_v31, %v816_v33 }
  0xf2   :  { %846 = vst [vmem:[%s2066_s3 + $0x8] sm:$0xff] %v842_v36 }
  0xf3   :  { %v803_v40 = vpop.f32.mrf.mxu2 }
  0xf4   :  { %v804_v41 = vadd.f32 %v803_v40, %v790_v38  ;;  %v817_v42 = vpop.f32.mrf.mxu3 }
  0xf6   :  { %v818_v43 = vadd.f32 %v817_v42, %v804_v41 }
  0xf8   :  { %v844_v44 = vadd.f32 %v838_v31, %v818_v43 }
  0xfa   :  { %848 = vst [vmem:[%s2066_s3 + $0x18] sm:$0xff] %v844_v44 }
  0xfb   :  { %853 = vsyncpa [#allocation4], 1 }

// kernel: my_model2_forward.17
= control target key start
LH: loop header
LB: loop body
LE: loop exit
PB: predicated region body
PF: predicated region fallthrough
CT: control target
= control target key end

     0   :  { %s1703_s12 = smov 0   ;;  %s1705_s13 = smov 0   ;;  %s2095_s0 = inlined_call_operand.vmem [shape: bf16[16,512], index: 0, kind: input, shape index: {}]   ;;  %s2096_s1 = inlined_call_operand.vmem [shape: bf16[512,1024], index: 1, kind: input, shape index: {}]   ;;  %s2097_s2 = inlined_call_operand.vmem [shape: f32[1,1024], index: 2, kind: input, shape index: {}]   ;;  %s2098_s3 = inlined_call_operand.vmem [shape: f32[16,1024], index: 3, kind: output, shape index: {}]  }
   0x1   :  { %s1707_s14 = smov 0   ;;  %s1709_s15 = smov 0  }
   0x2   :  { %s1711_s16 = smov 0  }
   0x3 LB: > { %s28_s17 = sadd.s32 1, %s1677_s15  ;;  %s1244_s18 = sadd.s32 4294967295, %s1681_s16   ;;  %s1681_s16 = sphi %s1711_s16, %s13_s16   ;;  %s1677_s15 = sphi %s1709_s15, %s2103_s15   ;;  %s1673_s14 = sphi %s1707_s14, %s2102_s14   ;;  %s1669_s13 = sphi %s1705_s13, %s2101_s13   ;;  %s1665_s12 = sphi %s1703_s12, %s2100_s12  }
   0x4   : > { %p30_p0 = scmp.ge.s32.totalorder %s28_s17, 4  ;;  %p76_p1 = scmp.ne.s32.totalorder %s1669_s13, %s1665_s12 }
   0x5   : > { %p77_p2 = scmp.eq.s32.totalorder %s1681_s16, 0  ;;  %p134_p4 = scmp.eq.s32.totalorder %s1244_s18, 3 }
   0x6   : > { %s2105_s17 = smov (%p30_p0, %s28_s17), 0  ;;  %s69_s20 = sadd.s32 1, %s1669_s13 }
   0x7   : > { %p78_p3 = por %p77_p2, %p76_p1  ;;  %s65_s19 = ssub.s32 %s1677_s15, %s2105_s17 }
   0x8   : > { %p67_p5 = scmp.eq.s32.totalorder %s65_s19, 0  ;;  %p1738_p6 = por %p134_p4, %p76_p1 }
   0x9   : > { %p1248_p7 = scmp.ge.s32.totalorder %s1681_s16, 4 }
   0xa   : > { %s1743_s22 = scalar_select %p67_p5, %s1669_s13, %s69_s20  }
   0xb   : > { %171 = sbr.rel (%p1248_p7) target bundleno = 84 (0x54), region = 20 }
  0x10   : > { %174 = sbr.rel (!%p78_p3) target bundleno = 84 (0x54), region = 24  ;;  %s176_s23 = sand.u32 (%p78_p3), 1, %s1669_s13  }
  0x11   : > { %s1533_s24 = sshll.u32 (%p78_p3), %s1677_s15, 3  ;;  %s1249_s25 = sshll.u32 (%p78_p3), %s176_s23, 9 }
  0x12   : > { %s1751_s28 = scalar_lea.vmem (%p78_p3), %s2096_s1, %s1533_s24  ;;  %s1756_s29 = scalar_lea.vmem (%p78_p3), [#allocation3], %s1249_s25 }
  0x13   : > { %v339_v0 = vld [vmem:[%s1751_s28] sm:$0xff] (%p78_p3) }
  0x14   : > { %v341_v1 = vld [vmem:[%s1751_s28 + $0x20] sm:$0xff] (%p78_p3)  ;;  %340 = vst [vmem:[%s1756_s29] sm:$0xff] (%p78_p3), %v339_v0 }
  0x15   : > { %v343_v2 = vld [vmem:[%s1751_s28 + $0x40] sm:$0xff]  ;;  %342 = vst [vmem:[%s1756_s29 + $0x8] sm:$0xff] %v341_v1 }
  0x16   : > { %v345_v3 = vld [vmem:[%s1751_s28 + $0x60] sm:$0xff]  ;;  %344 = vst [vmem:[%s1756_s29 + $0x10] sm:$0xff] %v343_v2 }
  0x17   : > { %v347_v4 = vld [vmem:[%s1751_s28 + $0x80] sm:$0xff]  ;;  %346 = vst [vmem:[%s1756_s29 + $0x18] sm:$0xff] %v345_v3 }
  0x18   : > { %v349_v5 = vld [vmem:[%s1751_s28 + $0xa0] sm:$0xff]  ;;  %348 = vst [vmem:[%s1756_s29 + $0x20] sm:$0xff] %v347_v4 }
  0x19   : > { %v351_v6 = vld [vmem:[%s1751_s28 + $0xc0] sm:$0xff]  ;;  %350 = vst [vmem:[%s1756_s29 + $0x28] sm:$0xff] %v349_v5 }
  0x1a   : > { %v353_v7 = vld [vmem:[%s1751_s28 + $0xe0] sm:$0xff]  ;;  %352 = vst [vmem:[%s1756_s29 + $0x30] sm:$0xff] %v351_v6 }
  0x1b   : > { %v355_v8 = vld [vmem:[%s1751_s28 + $0x100] sm:$0xff]  ;;  %354 = vst [vmem:[%s1756_s29 + $0x38] sm:$0xff] %v353_v7 }
  0x1c   : > { %v357_v9 = vld [vmem:[%s1751_s28 + $0x120] sm:$0xff]  ;;  %356 = vst [vmem:[%s1756_s29 + $0x40] sm:$0xff] %v355_v8 }
  0x1d   : > { %v359_v10 = vld [vmem:[%s1751_s28 + $0x140] sm:$0xff]  ;;  %358 = vst [vmem:[%s1756_s29 + $0x48] sm:$0xff] %v357_v9 }
  0x1e   : > { %v361_v11 = vld [vmem:[%s1751_s28 + $0x160] sm:$0xff]  ;;  %360 = vst [vmem:[%s1756_s29 + $0x50] sm:$0xff] %v359_v10 }
  0x1f   : > { %v363_v12 = vld [vmem:[%s1751_s28 + $0x180] sm:$0xff]  ;;  %362 = vst [vmem:[%s1756_s29 + $0x58] sm:$0xff] %v361_v11 }
  0x20   : > { %v365_v13 = vld [vmem:[%s1751_s28 + $0x1a0] sm:$0xff]  ;;  %364 = vst [vmem:[%s1756_s29 + $0x60] sm:$0xff] %v363_v12 }
  0x21   : > { %v367_v14 = vld [vmem:[%s1751_s28 + $0x1c0] sm:$0xff]  ;;  %366 = vst [vmem:[%s1756_s29 + $0x68] sm:$0xff] %v365_v13 }
  0x22   : > { %v369_v15 = vld [vmem:[%s1751_s28 + $0x1e0] sm:$0xff]  ;;  %368 = vst [vmem:[%s1756_s29 + $0x70] sm:$0xff] %v367_v14 }
  0x23   : > { %v371_v16 = vld [vmem:[%s1751_s28 + $0x200] sm:$0xff]  ;;  %370 = vst [vmem:[%s1756_s29 + $0x78] sm:$0xff] %v369_v15 }
  0x24   : > { %v373_v17 = vld [vmem:[%s1751_s28 + $0x220] sm:$0xff]  ;;  %372 = vst [vmem:[%s1756_s29 + $0x80] sm:$0xff] %v371_v16 }
  0x25   : > { %v375_v18 = vld [vmem:[%s1751_s28 + $0x240] sm:$0xff]  ;;  %374 = vst [vmem:[%s1756_s29 + $0x88] sm:$0xff] %v373_v17 }
  0x26   : > { %v377_v19 = vld [vmem:[%s1751_s28 + $0x260] sm:$0xff]  ;;  %376 = vst [vmem:[%s1756_s29 + $0x90] sm:$0xff] %v375_v18 }
  0x27   : > { %v379_v20 = vld [vmem:[%s1751_s28 + $0x280] sm:$0xff]  ;;  %378 = vst [vmem:[%s1756_s29 + $0x98] sm:$0xff] %v377_v19 }
  0x28   : > { %v381_v21 = vld [vmem:[%s1751_s28 + $0x2a0] sm:$0xff]  ;;  %380 = vst [vmem:[%s1756_s29 + $0xa0] sm:$0xff] %v379_v20 }
  0x29   : > { %v383_v22 = vld [vmem:[%s1751_s28 + $0x2c0] sm:$0xff]  ;;  %382 = vst [vmem:[%s1756_s29 + $0xa8] sm:$0xff] %v381_v21 }
  0x2a   : > { %v385_v23 = vld [vmem:[%s1751_s28 + $0x2e0] sm:$0xff]  ;;  %384 = vst [vmem:[%s1756_s29 + $0xb0] sm:$0xff] %v383_v22 }
  0x2b   : > { %v387_v24 = vld [vmem:[%s1751_s28 + $0x300] sm:$0xff]  ;;  %386 = vst [vmem:[%s1756_s29 + $0xb8] sm:$0xff] %v385_v23 }
  0x2c   : > { %v389_v25 = vld [vmem:[%s1751_s28 + $0x320] sm:$0xff]  ;;  %388 = vst [vmem:[%s1756_s29 + $0xc0] sm:$0xff] %v387_v24 }
  0x2d   : > { %v391_v26 = vld [vmem:[%s1751_s28 + $0x340] sm:$0xff]  ;;  %390 = vst [vmem:[%s1756_s29 + $0xc8] sm:$0xff] %v389_v25 }
  0x2e   : > { %v393_v27 = vld [vmem:[%s1751_s28 + $0x360] sm:$0xff]  ;;  %392 = vst [vmem:[%s1756_s29 + $0xd0] sm:$0xff] %v391_v26 }
  0x2f   : > { %v395_v28 = vld [vmem:[%s1751_s28 + $0x380] sm:$0xff]  ;;  %394 = vst [vmem:[%s1756_s29 + $0xd8] sm:$0xff] %v393_v27 }
  0x30   : > { %v397_v29 = vld [vmem:[%s1751_s28 + $0x3a0] sm:$0xff]  ;;  %396 = vst [vmem:[%s1756_s29 + $0xe0] sm:$0xff] %v395_v28 }
  0x31   : > { %v399_v30 = vld [vmem:[%s1751_s28 + $0x3c0] sm:$0xff]  ;;  %398 = vst [vmem:[%s1756_s29 + $0xe8] sm:$0xff] %v397_v29 }
  0x32   : > { %v401_v31 = vld [vmem:[%s1751_s28 + $0x3e0] sm:$0xff]  ;;  %400 = vst [vmem:[%s1756_s29 + $0xf0] sm:$0xff] %v399_v30 }
  0x33   : > { %v403_v32 = vld [vmem:[%s1751_s28 + $0x400] sm:$0xff]  ;;  %402 = vst [vmem:[%s1756_s29 + $0xf8] sm:$0xff] %v401_v31 }
  0x34   : > { %v405_v33 = vld [vmem:[%s1751_s28 + $0x420] sm:$0xff]  ;;  %404 = vst [vmem:[%s1756_s29 + $0x100] sm:$0xff] %v403_v32 }
  0x35   : > { %v407_v34 = vld [vmem:[%s1751_s28 + $0x440] sm:$0xff]  ;;  %406 = vst [vmem:[%s1756_s29 + $0x108] sm:$0xff] %v405_v33 }
  0x36   : > { %v409_v35 = vld [vmem:[%s1751_s28 + $0x460] sm:$0xff]  ;;  %408 = vst [vmem:[%s1756_s29 + $0x110] sm:$0xff] %v407_v34 }
  0x37   : > { %v411_v36 = vld [vmem:[%s1751_s28 + $0x480] sm:$0xff]  ;;  %410 = vst [vmem:[%s1756_s29 + $0x118] sm:$0xff] %v409_v35 }
  0x38   : > { %v413_v37 = vld [vmem:[%s1751_s28 + $0x4a0] sm:$0xff]  ;;  %412 = vst [vmem:[%s1756_s29 + $0x120] sm:$0xff] %v411_v36 }
  0x39   : > { %v415_v38 = vld [vmem:[%s1751_s28 + $0x4c0] sm:$0xff]  ;;  %414 = vst [vmem:[%s1756_s29 + $0x128] sm:$0xff] %v413_v37 }
  0x3a   : > { %v417_v39 = vld [vmem:[%s1751_s28 + $0x4e0] sm:$0xff]  ;;  %416 = vst [vmem:[%s1756_s29 + $0x130] sm:$0xff] %v415_v38 }
  0x3b   : > { %v419_v40 = vld [vmem:[%s1751_s28 + $0x500] sm:$0xff]  ;;  %418 = vst [vmem:[%s1756_s29 + $0x138] sm:$0xff] %v417_v39 }
  0x3c   : > { %v421_v41 = vld [vmem:[%s1751_s28 + $0x520] sm:$0xff]  ;;  %420 = vst [vmem:[%s1756_s29 + $0x140] sm:$0xff] %v419_v40 }
  0x3d   : > { %v423_v42 = vld [vmem:[%s1751_s28 + $0x540] sm:$0xff]  ;;  %422 = vst [vmem:[%s1756_s29 + $0x148] sm:$0xff] %v421_v41 }
  0x3e   : > { %v425_v43 = vld [vmem:[%s1751_s28 + $0x560] sm:$0xff]  ;;  %424 = vst [vmem:[%s1756_s29 + $0x150] sm:$0xff] %v423_v42 }
  0x3f   : > { %v427_v44 = vld [vmem:[%s1751_s28 + $0x580] sm:$0xff]  ;;  %426 = vst [vmem:[%s1756_s29 + $0x158] sm:$0xff] %v425_v43 }
  0x40   : > { %v429_v45 = vld [vmem:[%s1751_s28 + $0x5a0] sm:$0xff]  ;;  %428 = vst [vmem:[%s1756_s29 + $0x160] sm:$0xff] %v427_v44 }
  0x41   : > { %v431_v46 = vld [vmem:[%s1751_s28 + $0x5c0] sm:$0xff]  ;;  %430 = vst [vmem:[%s1756_s29 + $0x168] sm:$0xff] %v429_v45 }
  0x42   : > { %v433_v47 = vld [vmem:[%s1751_s28 + $0x5e0] sm:$0xff]  ;;  %432 = vst [vmem:[%s1756_s29 + $0x170] sm:$0xff] %v431_v46 }
  0x43   : > { %v435_v48 = vld [vmem:[%s1751_s28 + $0x600] sm:$0xff]  ;;  %434 = vst [vmem:[%s1756_s29 + $0x178] sm:$0xff] %v433_v47 }
  0x44   : > { %v437_v49 = vld [vmem:[%s1751_s28 + $0x620] sm:$0xff]  ;;  %436 = vst [vmem:[%s1756_s29 + $0x180] sm:$0xff] %v435_v48 }
  0x45   : > { %v439_v50 = vld [vmem:[%s1751_s28 + $0x640] sm:$0xff]  ;;  %438 = vst [vmem:[%s1756_s29 + $0x188] sm:$0xff] %v437_v49 }
  0x46   : > { %v441_v51 = vld [vmem:[%s1751_s28 + $0x660] sm:$0xff]  ;;  %440 = vst [vmem:[%s1756_s29 + $0x190] sm:$0xff] %v439_v50 }
  0x47   : > { %v443_v52 = vld [vmem:[%s1751_s28 + $0x680] sm:$0xff]  ;;  %442 = vst [vmem:[%s1756_s29 + $0x198] sm:$0xff] %v441_v51 }
  0x48   : > { %v445_v53 = vld [vmem:[%s1751_s28 + $0x6a0] sm:$0xff]  ;;  %444 = vst [vmem:[%s1756_s29 + $0x1a0] sm:$0xff] %v443_v52 }
  0x49   : > { %v447_v54 = vld [vmem:[%s1751_s28 + $0x6c0] sm:$0xff]  ;;  %446 = vst [vmem:[%s1756_s29 + $0x1a8] sm:$0xff] %v445_v53 }
  0x4a   : > { %v449_v55 = vld [vmem:[%s1751_s28 + $0x6e0] sm:$0xff]  ;;  %448 = vst [vmem:[%s1756_s29 + $0x1b0] sm:$0xff] %v447_v54 }
  0x4b   : > { %v451_v56 = vld [vmem:[%s1751_s28 + $0x700] sm:$0xff]  ;;  %450 = vst [vmem:[%s1756_s29 + $0x1b8] sm:$0xff] %v449_v55 }
  0x4c   : > { %v453_v57 = vld [vmem:[%s1751_s28 + $0x720] sm:$0xff]  ;;  %452 = vst [vmem:[%s1756_s29 + $0x1c0] sm:$0xff] %v451_v56 }
  0x4d   : > { %v455_v58 = vld [vmem:[%s1751_s28 + $0x740] sm:$0xff]  ;;  %454 = vst [vmem:[%s1756_s29 + $0x1c8] sm:$0xff] %v453_v57 }
  0x4e   : > { %v457_v59 = vld [vmem:[%s1751_s28 + $0x760] sm:$0xff]  ;;  %456 = vst [vmem:[%s1756_s29 + $0x1d0] sm:$0xff] %v455_v58 }
  0x4f   : > { %v459_v60 = vld [vmem:[%s1751_s28 + $0x780] sm:$0xff]  ;;  %458 = vst [vmem:[%s1756_s29 + $0x1d8] sm:$0xff] %v457_v59 }
  0x50   : > { %v461_v61 = vld [vmem:[%s1751_s28 + $0x7a0] sm:$0xff]  ;;  %460 = vst [vmem:[%s1756_s29 + $0x1e0] sm:$0xff] %v459_v60 }
  0x51   : > { %v463_v62 = vld [vmem:[%s1751_s28 + $0x7c0] sm:$0xff]  ;;  %462 = vst [vmem:[%s1756_s29 + $0x1e8] sm:$0xff] %v461_v61 }
  0x52   : > { %v465_v63 = vld [vmem:[%s1751_s28 + $0x7e0] sm:$0xff]  ;;  %464 = vst [vmem:[%s1756_s29 + $0x1f0] sm:$0xff] %v463_v62 }
  0x53   : > { %466 = vst [vmem:[%s1756_s29 + $0x1f8] sm:$0xff] %v465_v63 }
  0x54 PF: > { %p1252_p8 = scmp.ge.s32.totalorder %s1681_s16, 1  ;;  %p479_p9 = scmp.lt.s32.totalorder %s1681_s16, 5 }
  0x56   : > { %p480_p10 = pnand %p1252_p8, %p479_p9 }
  0x57   : > { %s486_s30 = sand.u32 (!%p480_p10), 1, %s1665_s12  }
  0x58   : > { %483 = sbr.rel (%p480_p10) target bundleno = 316 (0x13c), region = 66  ;;  %s1253_s4 = sshll.u32 (!%p480_p10), %s486_s30, 9 }
  0x59   : > { %s1888_s5 = scalar_lea.vmem (!%p480_p10), [#allocation3], %s1253_s4  ;;  %s1255_s4 = sshll.u32 (!%p480_p10), %s1673_s14, 1 }
  0x5a   : > { %p537_p11 = scmp.lt.s32.totalorder (!%p480_p10), %s1255_s4, 7  ;;  %s1254_s8 = sshll.u32 (!%p480_p10), %s486_s30, 5 }
  0x5b   : > { %s2064_s9 = scalar_lea.vmem (!%p480_p10), [#allocation4], %s1254_s8 }
  0x5d   : > { %v1330_v0 = vld [vmem:[%s1888_s5 + $0x70] sm:$0xf]  ;;  %v1553_v1 = vld [vmem:[%s1888_s5 + $0x74] sm:$0xf0]  ;;  %v1322_v11 = vld [vmem:[%s1888_s5 + $0x60] sm:$0xf] }
  0x5e   : > { %v1394_v2 = vld [vmem:[%s1888_s5 + $0xf0] sm:$0xf]  ;;  %v1331_v3 = vor.u32 %v1553_v1, %v1330_v0  ;;  %v1569_v4 = vld [vmem:[%s1888_s5 + $0xf4] sm:$0xf0]  ;;  %v1551_v13 = vld [vmem:[%s1888_s5 + $0x64] sm:$0xf0] }
  0x5f   : > { %v1458_v5 = vld [vmem:[%s1888_s5 + $0x170] sm:$0xf]  ;;  %v1585_v6 = vld [vmem:[%s1888_s5 + $0x174] sm:$0xf0]  ;;  %v1395_v7 = vor.u32 %v1569_v4, %v1394_v2  ;;  %v1386_v14 = vld [vmem:[%s1888_s5 + $0xe0] sm:$0xf]  ;;  %v1323_v16 = vor.u32 %v1551_v13, %v1322_v11 }
  0x60   : > { %v1459_v8 = vor.u32 %v1585_v6, %v1458_v5  ;;  %v1522_v9 = vld [vmem:[%s1888_s5 + $0x1f0] sm:$0xf]  ;;  %v1601_v10 = vld [vmem:[%s1888_s5 + $0x1f4] sm:$0xf0]  ;;  %963 = vmatpush.bf16.msra.mxu0 %v1331_v3  ;;  %v1567_v15 = vld [vmem:[%s1888_s5 + $0xe4] sm:$0xf0] }
  0x61   : > { %v1523_v12 = vor.u32 %v1601_v10, %v1522_v9  ;;  %977 = vmatpush.bf16.msra.mxu1 %v1395_v7  ;;  %v1387_v17 = vor.u32 %v1567_v15, %v1386_v14  ;;  %v1450_v18 = vld [vmem:[%s1888_s5 + $0x160] sm:$0xf]  ;;  %v1583_v19 = vld [vmem:[%s1888_s5 + $0x164] sm:$0xf0]  ;;  %v1314_v23 = vld [vmem:[%s1888_s5 + $0x50] sm:$0xf] }
  0x62   : > { %991 = vmatpush.bf16.msra.mxu2 %v1459_v8  ;;  %v1514_v20 = vld [vmem:[%s1888_s5 + $0x1e0] sm:$0xf]  ;;  %v1451_v21 = vor.u32 %v1583_v19, %v1450_v18  ;;  %v1599_v22 = vld [vmem:[%s1888_s5 + $0x1e4] sm:$0xf0]  ;;  %v1549_v24 = vld [vmem:[%s1888_s5 + $0x54] sm:$0xf0] }
  0x63   : > { %1005 = vmatpush.bf16.msra.mxu3 %v1523_v12  ;;  %v1515_v25 = vor.u32 %v1599_v22, %v1514_v20  ;;  %v1378_v26 = vld [vmem:[%s1888_s5 + $0xd0] sm:$0xf]  ;;  %v1565_v27 = vld [vmem:[%s1888_s5 + $0xd4] sm:$0xf0]  ;;  %v1315_v29 = vor.u32 %v1549_v24, %v1314_v23  ;;  %v1306_v35 = vld [vmem:[%s1888_s5 + $0x40] sm:$0xf] }
  0x64   : > { %v1442_v28 = vld [vmem:[%s1888_s5 + $0x150] sm:$0xf]  ;;  %964 = vmatpush.bf16.msra.mxu0 %v1323_v16  ;;  %v1581_v30 = vld [vmem:[%s1888_s5 + $0x154] sm:$0xf0]  ;;  %v1379_v33 = vor.u32 %v1565_v27, %v1378_v26  ;;  %v1547_v36 = vld [vmem:[%s1888_s5 + $0x44] sm:$0xf0] }
  0x65   : > { %v1506_v31 = vld [vmem:[%s1888_s5 + $0x1d0] sm:$0xf]  ;;  %v1597_v32 = vld [vmem:[%s1888_s5 + $0x1d4] sm:$0xf0]  ;;  %978 = vmatpush.bf16.msra.mxu1 %v1387_v17  ;;  %v1443_v34 = vor.u32 %v1581_v30, %v1442_v28  ;;  %v1370_v37 = vld [vmem:[%s1888_s5 + $0xc0] sm:$0xf]  ;;  %v1307_v44 = vor.u32 %v1547_v36, %v1306_v35 }
  0x66   : > { %992 = vmatpush.bf16.msra.mxu2 %v1451_v21  ;;  %v1507_v38 = vor.u32 %v1597_v32, %v1506_v31  ;;  %v1563_v39 = vld [vmem:[%s1888_s5 + $0xc4] sm:$0xf0]  ;;  %v1434_v40 = vld [vmem:[%s1888_s5 + $0x140] sm:$0xf]  ;;  %v1298_v47 = vld [vmem:[%s1888_s5 + $0x30] sm:$0xf] }
  0x67   : > { %1006 = vmatpush.bf16.msra.mxu3 %v1515_v25  ;;  %v1579_v41 = vld [vmem:[%s1888_s5 + $0x144] sm:$0xf0]  ;;  %v1498_v42 = vld [vmem:[%s1888_s5 + $0x1c0] sm:$0xf]  ;;  %v1371_v45 = vor.u32 %v1563_v39, %v1370_v37  ;;  %v1545_v48 = vld [vmem:[%s1888_s5 + $0x34] sm:$0xf0] }
  0x68   : > { %v1595_v43 = vld [vmem:[%s1888_s5 + $0x1c4] sm:$0xf0]  ;;  %965 = vmatpush.bf16.msra.mxu0 %v1315_v29  ;;  %v1435_v46 = vor.u32 %v1579_v41, %v1434_v40  ;;  %v1362_v49 = vld [vmem:[%s1888_s5 + $0xb0] sm:$0xf]  ;;  %v1561_v51 = vld [vmem:[%s1888_s5 + $0xb4] sm:$0xf0]  ;;  %v1299_v56 = vor.u32 %v1545_v48, %v1298_v47 }
  0x69   : > { %979 = vmatpush.bf16.msra.mxu1 %v1379_v33  ;;  %v1499_v50 = vor.u32 %v1595_v43, %v1498_v42  ;;  %v1426_v52 = vld [vmem:[%s1888_s5 + $0x130] sm:$0xf]  ;;  %v1577_v53 = vld [vmem:[%s1888_s5 + $0x134] sm:$0xf0]  ;;  %v1363_v57 = vor.u32 %v1561_v51, %v1362_v49  ;;  %v1290_v59 = vld [vmem:[%s1888_s5 + $0x20] sm:$0xf] }
  0x6a   : > { %993 = vmatpush.bf16.msra.mxu2 %v1443_v34  ;;  %v1490_v54 = vld [vmem:[%s1888_s5 + $0x1b0] sm:$0xf]  ;;  %v1593_v55 = vld [vmem:[%s1888_s5 + $0x1b4] sm:$0xf0]  ;;  %v1427_v58 = vor.u32 %v1577_v53, %v1426_v52  ;;  %v1543_v60 = vld [vmem:[%s1888_s5 + $0x24] sm:$0xf0] }
  0x6b   : > { %1007 = vmatpush.bf16.msra.mxu3 %v1507_v38  ;;  %v1354_v61 = vld [vmem:[%s1888_s5 + $0xa0] sm:$0xf]  ;;  %v1491_v62 = vor.u32 %v1593_v55, %v1490_v54  ;;  %v1559_v63 = vld [vmem:[%s1888_s5 + $0xa4] sm:$0xf0]  ;;  %v1291_v4 = vor.u32 %v1543_v60, %v1290_v59  ;;  %v1282_v7 = vld [vmem:[%s1888_s5 + $0x10] sm:$0xf] }
  0x6c   : > { %966 = vmatpush.bf16.msra.mxu0 %v1307_v44  ;;  %v1418_v0 = vld [vmem:[%s1888_s5 + $0x120] sm:$0xf]  ;;  %v1575_v1 = vld [vmem:[%s1888_s5 + $0x124] sm:$0xf0]  ;;  %v1355_v5 = vor.u32 %v1559_v63, %v1354_v61  ;;  %v1541_v8 = vld [vmem:[%s1888_s5 + $0x14] sm:$0xf0] }
  0x6d   : > { %980 = vmatpush.bf16.msra.mxu1 %v1371_v45  ;;  %v1482_v2 = vld [vmem:[%s1888_s5 + $0x1a0] sm:$0xf]  ;;  %v1591_v3 = vld [vmem:[%s1888_s5 + $0x1a4] sm:$0xf0]  ;;  %v1419_v6 = vor.u32 %v1575_v1, %v1418_v0  ;;  %v1346_v9 = vld [vmem:[%s1888_s5 + $0x90] sm:$0xf]  ;;  %v1283_v17 = vor.u32 %v1541_v8, %v1282_v7 }
  0x6e   : > { %994 = vmatpush.bf16.msra.mxu2 %v1435_v46  ;;  %v1483_v10 = vor.u32 %v1591_v3, %v1482_v2  ;;  %v1557_v11 = vld [vmem:[%s1888_s5 + $0x94] sm:$0xf0]  ;;  %v1410_v12 = vld [vmem:[%s1888_s5 + $0x110] sm:$0xf]  ;;  %v1274_v16 = vld [vmem:[%s1888_s5] sm:$0xf] }
  0x6f   : > { %1008 = vmatpush.bf16.msra.mxu3 %v1499_v50  ;;  %v1573_v13 = vld [vmem:[%s1888_s5 + $0x114] sm:$0xf0]  ;;  %v1474_v14 = vld [vmem:[%s1888_s5 + $0x190] sm:$0xf]  ;;  %v1539_v18 = vld [vmem:[%s1888_s5 + $0x4] sm:$0xf0]  ;;  %v1347_v21 = vor.u32 %v1557_v11, %v1346_v9 }
  0x70   : > { %967 = vmatpush.bf16.msra.mxu0 %v1299_v56  ;;  %v1589_v15 = vld [vmem:[%s1888_s5 + $0x194] sm:$0xf0]  ;;  %v1338_v19 = vld [vmem:[%s1888_s5 + $0x80] sm:$0xf]  ;;  %v1555_v20 = vld [vmem:[%s1888_s5 + $0x84] sm:$0xf0]  ;;  %v1411_v22 = vor.u32 %v1573_v13, %v1410_v12  ;;  %v1275_v33 = vor.u32 %v1539_v18, %v1274_v16 }
  0x71   : > { %981 = vmatpush.bf16.msra.mxu1 %v1363_v57  ;;  %v1402_v23 = vld [vmem:[%s1888_s5 + $0x100] sm:$0xf]  ;;  %v1571_v24 = vld [vmem:[%s1888_s5 + $0x104] sm:$0xf0]  ;;  %v1475_v26 = vor.u32 %v1589_v15, %v1474_v14  ;;  %v1552_v28 = vld [vmem:[%s1888_s5 + $0x74] sm:$0xf]  ;;  %v1339_v37 = vor.u32 %v1555_v20, %v1338_v19 }
  0x72   : > { %995 = vmatpush.bf16.msra.mxu2 %v1427_v58  ;;  %v1466_v25 = vld [vmem:[%s1888_s5 + $0x180] sm:$0xf]  ;;  %v1587_v27 = vld [vmem:[%s1888_s5 + $0x184] sm:$0xf0]  ;;  %v1332_v29 = vld [vmem:[%s1888_s5 + $0x78] sm:$0xf0]  ;;  %v1403_v38 = vor.u32 %v1571_v24, %v1402_v23 }
  0x73   : > { %1009 = vmatpush.bf16.msra.mxu3 %v1491_v62  ;;  %v1568_v30 = vld [vmem:[%s1888_s5 + $0xf4] sm:$0xf]  ;;  %v1396_v31 = vld [vmem:[%s1888_s5 + $0xf8] sm:$0xf0]  ;;  %v1550_v39 = vld [vmem:[%s1888_s5 + $0x64] sm:$0xf]  ;;  %v1467_v43 = vor.u32 %v1587_v27, %v1466_v25  ;;  %v1335_v44 = vor.u32 %v1552_v28, %v1332_v29 }
  0x74   : > { %968 = vmatpush.bf16.msra.mxu0 %v1291_v4  ;;  %v1584_v32 = vld [vmem:[%s1888_s5 + $0x174] sm:$0xf]  ;;  %v1460_v34 = vld [vmem:[%s1888_s5 + $0x178] sm:$0xf0]  ;;  %v1324_v40 = vld [vmem:[%s1888_s5 + $0x68] sm:$0xf0]  ;;  %v1399_v49 = vor.u32 %v1568_v30, %v1396_v31 }
  0x75   : > { %982 = vmatpush.bf16.msra.mxu1 %v1355_v5  ;;  %v1600_v35 = vld [vmem:[%s1888_s5 + $0x1f4] sm:$0xf]  ;;  %v1524_v36 = vld [vmem:[%s1888_s5 + $0x1f8] sm:$0xf0]  ;;  %v1266_v41 = vld [vmem:[%s2095_s0 + $0x8] sm:$0xf]  ;;  %v1463_v50 = vor.u32 %v1584_v32, %v1460_v34  ;;  %v1327_v63 = vor.u32 %v1550_v39, %v1324_v40 }
  0x76   : > { %996 = vmatpush.bf16.msra.mxu2 %v1419_v6  ;;  %v1537_v42 = vld [vmem:[%s2095_s0 + $0x14] sm:$0xf0]  ;;  %v1566_v45 = vld [vmem:[%s1888_s5 + $0xe4] sm:$0xf]  ;;  %v1388_v46 = vld [vmem:[%s1888_s5 + $0xe8] sm:$0xf0]  ;;  %v1527_v54 = vor.u32 %v1600_v35, %v1524_v36 }
  0x77   : > { %1010 = vmatpush.bf16.msra.mxu3 %v1483_v10  ;;  %v1582_v47 = vld [vmem:[%s1888_s5 + $0x164] sm:$0xf]  ;;  %v1452_v48 = vld [vmem:[%s1888_s5 + $0x168] sm:$0xf0]  ;;  %v1268_v52 = vld [vmem:[%s2095_s0 + $0x18] sm:$0xf0]  ;;  %v1983_v55 = vor.u32 %v1537_v42, %v1266_v41  ;;  %v1391_v1 = vor.u32 %v1566_v45, %v1388_v46 }
  0x78   : > { %969 = vmatpush.bf16.msra.mxu0 %v1283_v17  ;;  %v1535_v51 = vld [vmem:[%s2095_s0 + $0xc] sm:$0xf]  ;;  %v1258_v53 = vld [vmem:[%s2095_s0] sm:$0xf]  ;;  %v1536_v56 = vld [vmem:[%s2095_s0 + $0xc] sm:$0xf0]  ;;  %v1455_v2 = vor.u32 %v1582_v47, %v1452_v48 }
  0x79   : > { %983 = vmatpush.bf16.msra.mxu1 %v1347_v21  ;;  %v1534_v57 = vld [vmem:[%s2095_s0 + $0x4] sm:$0xf]  ;;  %v1260_v58 = vld [vmem:[%s2095_s0 + $0x10] sm:$0xf0]  ;;  %v1516_v60 = vld [vmem:[%s1888_s5 + $0x1e8] sm:$0xf0]  ;;  %v1996_v61 = vor.u32 %v1535_v51, %v1268_v52  ;;  %v1998_v62 = vor.u32 %v1536_v56, %v1258_v53 }
  0x7a   : > { %997 = vmatpush.bf16.msra.mxu2 %v1411_v22  ;;  %v1598_v59 = vld [vmem:[%s1888_s5 + $0x1e4] sm:$0xf]  ;;  %v2000_v0 = vor.u32 %v1534_v57, %v1260_v58  ;;  %v1548_v3 = vld [vmem:[%s1888_s5 + $0x54] sm:$0xf]  ;;  %v1316_v4 = vld [vmem:[%s1888_s5 + $0x58] sm:$0xf0] }
  0x7b   : > { %1011 = vmatpush.bf16.msra.mxu3 %v1475_v26  ;;  %v1564_v5 = vld [vmem:[%s1888_s5 + $0xd4] sm:$0xf]  ;;  %v1519_v6 = vor.u32 %v1598_v59, %v1516_v60  ;;  %v1380_v7 = vld [vmem:[%s1888_s5 + $0xd8] sm:$0xf0]  ;;  %v1319_v12 = vor.u32 %v1548_v3, %v1316_v4  ;;  %v1546_v15 = vld [vmem:[%s1888_s5 + $0x44] sm:$0xf] }
  0x7c   : > { %970 = vmatpush.bf16.msra.mxu0 %v1275_v33  ;;  %v1580_v8 = vld [vmem:[%s1888_s5 + $0x154] sm:$0xf]  ;;  %v1444_v9 = vld [vmem:[%s1888_s5 + $0x158] sm:$0xf0]  ;;  %v1383_v13 = vor.u32 %v1564_v5, %v1380_v7  ;;  %v1308_v16 = vld [vmem:[%s1888_s5 + $0x48] sm:$0xf0] }
  0x7d   : > { %984 = vmatpush.bf16.msra.mxu1 %v1339_v37  ;;  %v1596_v10 = vld [vmem:[%s1888_s5 + $0x1d4] sm:$0xf]  ;;  %v1508_v11 = vld [vmem:[%s1888_s5 + $0x1d8] sm:$0xf0]  ;;  %v1447_v14 = vor.u32 %v1580_v8, %v1444_v9  ;;  %v1562_v17 = vld [vmem:[%s1888_s5 + $0xc4] sm:$0xf]  ;;  %v1311_v24 = vor.u32 %v1546_v15, %v1308_v16 }
  0x7e   : > { %998 = vmatpush.bf16.msra.mxu2 %v1403_v38  ;;  %v1511_v18 = vor.u32 %v1596_v10, %v1508_v11  ;;  %v1372_v19 = vld [vmem:[%s1888_s5 + $0xc8] sm:$0xf0]  ;;  %v1578_v20 = vld [vmem:[%s1888_s5 + $0x144] sm:$0xf]  ;;  %v1544_v27 = vld [vmem:[%s1888_s5 + $0x34] sm:$0xf] }
  0x7f   : > { %1012 = vmatpush.bf16.msra.mxu3 %v1467_v43  ;;  %971 = vmatmul.bf16.vlgmr.msra.gmra.mxu0 %v1998_v62  ;;  %v1436_v21 = vld [vmem:[%s1888_s5 + $0x148] sm:$0xf0]  ;;  %v1594_v22 = vld [vmem:[%s1888_s5 + $0x1c4] sm:$0xf]  ;;  %v1375_v25 = vor.u32 %v1562_v17, %v1372_v19  ;;  %v1300_v28 = vld [vmem:[%s1888_s5 + $0x38] sm:$0xf0] }
  0x80   : > { %1019 = vmatpush.bf16.msrb.mxu0 %v1335_v44  ;;  %985 = vmatmul.bf16.vlgmr.msra.gmra.mxu1 %v2000_v0  ;;  %v1500_v23 = vld [vmem:[%s1888_s5 + $0x1c8] sm:$0xf0]  ;;  %v1439_v26 = vor.u32 %v1578_v20, %v1436_v21  ;;  %v1560_v29 = vld [vmem:[%s1888_s5 + $0xb4] sm:$0xf]  ;;  %v1364_v31 = vld [vmem:[%s1888_s5 + $0xb8] sm:$0xf0]  ;;  %v1303_v36 = vor.u32 %v1544_v27, %v1300_v28 }
  0x81   : > { %1033 = vmatpush.bf16.msrb.mxu1 %v1399_v49  ;;  %999 = vmatmul.bf16.vlgmr.msra.gmra.mxu2 %v1983_v55  ;;  %v1503_v30 = vor.u32 %v1594_v22, %v1500_v23  ;;  %v1576_v32 = vld [vmem:[%s1888_s5 + $0x134] sm:$0xf]  ;;  %v1428_v33 = vld [vmem:[%s1888_s5 + $0x138] sm:$0xf0]  ;;  %v1367_v37 = vor.u32 %v1560_v29, %v1364_v31  ;;  %v1542_v39 = vld [vmem:[%s1888_s5 + $0x24] sm:$0xf] }
  0x82   : > { %1047 = vmatpush.bf16.msrb.mxu2 %v1463_v50  ;;  %1013 = vmatmul.bf16.vlgmr.msra.gmra.mxu3 %v1996_v61  ;;  %v1592_v34 = vld [vmem:[%s1888_s5 + $0x1b4] sm:$0xf]  ;;  %v1492_v35 = vld [vmem:[%s1888_s5 + $0x1b8] sm:$0xf0]  ;;  %v1431_v38 = vor.u32 %v1576_v32, %v1428_v33  ;;  %v1292_v40 = vld [vmem:[%s1888_s5 + $0x28] sm:$0xf0] }
  0x83   : > { %1061 = vmatpush.bf16.msrb.mxu3 %v1527_v54  ;;  %v1558_v41 = vld [vmem:[%s1888_s5 + $0xa4] sm:$0xf]  ;;  %v1495_v42 = vor.u32 %v1592_v34, %v1492_v35  ;;  %v1356_v43 = vld [vmem:[%s1888_s5 + $0xa8] sm:$0xf0]  ;;  %v1295_v48 = vor.u32 %v1542_v39, %v1292_v40  ;;  %v1540_v51 = vld [vmem:[%s1888_s5 + $0x14] sm:$0xf] }
  0x84   : > { %1020 = vmatpush.bf16.msrb.mxu0 %v1327_v63  ;;  %v1574_v44 = vld [vmem:[%s1888_s5 + $0x124] sm:$0xf]  ;;  %v1420_v45 = vld [vmem:[%s1888_s5 + $0x128] sm:$0xf0]  ;;  %v1359_v49 = vor.u32 %v1558_v41, %v1356_v43  ;;  %v1284_v52 = vld [vmem:[%s1888_s5 + $0x18] sm:$0xf0] }
  0x85   : > { %1034 = vmatpush.bf16.msrb.mxu1 %v1391_v1  ;;  %v1590_v46 = vld [vmem:[%s1888_s5 + $0x1a4] sm:$0xf]  ;;  %v1484_v47 = vld [vmem:[%s1888_s5 + $0x1a8] sm:$0xf0]  ;;  %v1423_v50 = vor.u32 %v1574_v44, %v1420_v45  ;;  %v1556_v53 = vld [vmem:[%s1888_s5 + $0x94] sm:$0xf]  ;;  %v1287_v63 = vor.u32 %v1540_v51, %v1284_v52 }
  0x86   : > { %1048 = vmatpush.bf16.msrb.mxu2 %v1455_v2  ;;  %v1487_v54 = vor.u32 %v1590_v46, %v1484_v47  ;;  %v1348_v56 = vld [vmem:[%s1888_s5 + $0x98] sm:$0xf0]  ;;  %v1572_v57 = vld [vmem:[%s1888_s5 + $0x114] sm:$0xf]  ;;  %v1538_v3 = vld [vmem:[%s1888_s5 + $0x4] sm:$0xf] }
  0x87   : > { %1062 = vmatpush.bf16.msrb.mxu3 %v1519_v6  ;;  %v1412_v58 = vld [vmem:[%s1888_s5 + $0x118] sm:$0xf0]  ;;  %v1588_v59 = vld [vmem:[%s1888_s5 + $0x194] sm:$0xf]  ;;  %v1351_v1 = vor.u32 %v1556_v53, %v1348_v56  ;;  %v1276_v4 = vld [vmem:[%s1888_s5 + $0x8] sm:$0xf0] }
  0x88   : > { %1021 = vmatpush.bf16.msrb.mxu0 %v1319_v12  ;;  %v1476_v60 = vld [vmem:[%s1888_s5 + $0x198] sm:$0xf0]  ;;  %v1415_v2 = vor.u32 %v1572_v57, %v1412_v58  ;;  %v1554_v5 = vld [vmem:[%s1888_s5 + $0x84] sm:$0xf]  ;;  %v1340_v7 = vld [vmem:[%s1888_s5 + $0x88] sm:$0xf0]  ;;  %v1279_v12 = vor.u32 %v1538_v3, %v1276_v4 }
  0x89   : > { %1035 = vmatpush.bf16.msrb.mxu1 %v1383_v13  ;;  %v1479_v6 = vor.u32 %v1588_v59, %v1476_v60  ;;  %v1570_v8 = vld [vmem:[%s1888_s5 + $0x104] sm:$0xf]  ;;  %v1404_v9 = vld [vmem:[%s1888_s5 + $0x108] sm:$0xf0]  ;;  %v1343_v13 = vor.u32 %v1554_v5, %v1340_v7  ;;  %s2107_s4 = smov (!%p537_p11, %s1255_s4), 7  ;;  %s1602_s12 = sshll.u32 (%p1738_p6), %s1673_s14, 4 }
  0x8a   : > { %1049 = vmatpush.bf16.msrb.mxu2 %v1447_v14  ;;  %v1586_v10 = vld [vmem:[%s1888_s5 + $0x184] sm:$0xf]  ;;  %v1468_v11 = vld [vmem:[%s1888_s5 + $0x188] sm:$0xf0]  ;;  %v1407_v14 = vor.u32 %v1570_v8, %v1404_v9  ;;  %s539_s7 = scalar_lea.vmem %s2097_s2, %s2107_s4  ;;  %s1116_s11 = scalar_lea.vmem (%p1738_p6), %s2098_s3, %s1602_s12 }
  0x8b   : > { %1063 = vmatpush.bf16.msrb.mxu3 %v1511_v18  ;;  %v1471_v15 = vor.u32 %v1586_v10, %v1468_v11  ;;  %v1090_v19 = vld [vmem:[%s539_s7] sm:$0x3] }
  0x8c   : > { %1022 = vmatpush.bf16.msrb.mxu0 %v1311_v24 }
  0x8d   : > { %1036 = vmatpush.bf16.msrb.mxu1 %v1375_v25 }
  0x8e   : > { %1050 = vmatpush.bf16.msrb.mxu2 %v1439_v26 }
  0x8f   : > { %1064 = vmatpush.bf16.msrb.mxu3 %v1503_v30 }
  0x90   : > { %1023 = vmatpush.bf16.msrb.mxu0 %v1303_v36  ;;  %v1093_v36 = vperm.slane %v1090_v19, 1 }
  0x91   : > { %1037 = vmatpush.bf16.msrb.mxu1 %v1367_v37 }
  0x92   : > { %1051 = vmatpush.bf16.msrb.mxu2 %v1431_v38 }
  0x93   : > { %1065 = vmatpush.bf16.msrb.mxu3 %v1495_v42 }
  0x94   : > { %1024 = vmatpush.bf16.msrb.mxu0 %v1295_v48 }
  0x95   : > { %1038 = vmatpush.bf16.msrb.mxu1 %v1359_v49 }
  0x96   : > { %1052 = vmatpush.bf16.msrb.mxu2 %v1423_v50 }
  0x97   : > { %1066 = vmatpush.bf16.msrb.mxu3 %v1487_v54 }
  0x98   : > { %1025 = vmatpush.bf16.msrb.mxu0 %v1287_v63 }
  0x99   : > { %1039 = vmatpush.bf16.msrb.mxu1 %v1351_v1 }
  0x9a   : > { %1053 = vmatpush.bf16.msrb.mxu2 %v1415_v2 }
  0x9b   : > { %1067 = vmatpush.bf16.msrb.mxu3 %v1479_v6 }
  0x9c   : > { %1026 = vmatpush.bf16.msrb.mxu0 %v1279_v12 }
  0x9d   : > { %1040 = vmatpush.bf16.msrb.mxu1 %v1343_v13 }
  0x9e   : > { %1054 = vmatpush.bf16.msrb.mxu2 %v1407_v14 }
  0x9f   : > { %1068 = vmatpush.bf16.msrb.mxu3 %v1471_v15  ;;  %1027 = vmatmul.bf16.vlgmr.msrb.gmra.mxu0 %v1998_v62 }
  0xa0   : > { %1041 = vmatmul.bf16.vlgmr.msrb.gmra.mxu1 %v2000_v0  ;;  %v1092_v0 = vperm.slane %v1090_v19, 0 }
  0xa1   : > { %1055 = vmatmul.bf16.vlgmr.msrb.gmra.mxu2 %v1983_v55 }
  0xa2   : > { %1069 = vmatmul.bf16.vlgmr.msrb.gmra.mxu3 %v1996_v61 }
  0xfc   : > { %v972_v16 = vpop.f32.mrf.mxu0 }
  0xfd   : > { %v986_v17 = vpop.f32.mrf.mxu1 }
  0xfe   : > { %v987_v18 = vadd.f32 %v986_v17, %v972_v16 }
 0x104   : > { %v1000_v20 = vpop.f32.mrf.mxu2  ;;  %v974_v22 = vpop.f32.mrf.mxu0 }
 0x105   : > { %v1001_v21 = vadd.f32 %v1000_v20, %v987_v18  ;;  %v1014_v62 = vpop.f32.mrf.mxu3  ;;  %v988_v61 = vpop.f32.mrf.mxu1 }
 0x106   : > { %v989_v24 = vadd.f32 %v988_v61, %v974_v22 }
 0x107   : > { %v1015_v55 = vadd.f32 %v1014_v62, %v1001_v21 }
 0x109   : > { %v1096_v23 = vadd.f32 %v1092_v0, %v1015_v55 }
 0x10b   : > { %1100 = vst [vmem:[%s2064_s9] sm:$0xff] %v1096_v23 }
 0x10c   : > { %v1002_v25 = vpop.f32.mrf.mxu2 }
 0x10d   : > { %v1003_v26 = vadd.f32 %v1002_v25, %v989_v24  ;;  %v1016_v27 = vpop.f32.mrf.mxu3 }
 0x10f   : > { %v1017_v28 = vadd.f32 %v1016_v27, %v1003_v26 }
 0x111   : > { %v1098_v29 = vadd.f32 %v1092_v0, %v1017_v28 }
 0x112   : > { %v1129_v47 = vld [vmem:[%s2064_s9] sm:$0xff] (%p1738_p6) }
 0x113   : > { %1102 = vst [vmem:[%s2064_s9 + $0x10] sm:$0xff] %v1098_v29 }
 0x114   : > { %1130 = vst [vmem:[%s1116_s11] sm:$0xff] (%p1738_p6), %v1129_v47 }
 0x11a   : > { %v1133_v49 = vld [vmem:[%s2064_s9 + $0x10] sm:$0xff] (%p1738_p6) }
 0x11b   : > { %1134 = vst [vmem:[%s1116_s11 + $0x40] sm:$0xff] (%p1738_p6), %v1133_v49 }
 0x11c   : > { %v1028_v30 = vpop.f32.mrf.mxu0 }
 0x11d   : > { %v1042_v31 = vpop.f32.mrf.mxu1 }
 0x11e   : > { %v1043_v32 = vadd.f32 %v1042_v31, %v1028_v30 }
 0x124   : > { %v1056_v33 = vpop.f32.mrf.mxu2  ;;  %v1030_v38 = vpop.f32.mrf.mxu0 }
 0x125   : > { %v1057_v34 = vadd.f32 %v1056_v33, %v1043_v32  ;;  %v1070_v35 = vpop.f32.mrf.mxu3  ;;  %v1044_v39 = vpop.f32.mrf.mxu1 }
 0x126   : > { %v1045_v41 = vadd.f32 %v1044_v39, %v1030_v38 }
 0x127   : > { %v1071_v37 = vadd.f32 %v1070_v35, %v1057_v34 }
 0x129   : > { %v1097_v40 = vadd.f32 %v1093_v36, %v1071_v37 }
 0x12b   : > { %1101 = vst [vmem:[%s2064_s9 + $0x8] sm:$0xff] %v1097_v40 }
 0x12c   : > { %v1058_v42 = vpop.f32.mrf.mxu2 }
 0x12d   : > { %v1059_v43 = vadd.f32 %v1058_v42, %v1045_v41  ;;  %v1072_v44 = vpop.f32.mrf.mxu3 }
 0x12f   : > { %v1073_v45 = vadd.f32 %v1072_v44, %v1059_v43  ;;  %1110 = sbr.rel (!%p1738_p6) target bundleno = 316 (0x13c), region = 82 }
 0x131   : > { %v1099_v46 = vadd.f32 %v1093_v36, %v1073_v45 }
 0x132   : > { %v1131_v48 = vld [vmem:[%s2064_s9 + $0x8] sm:$0xff] (%p1738_p6) }
 0x133   : > { %1103 = vst [vmem:[%s2064_s9 + $0x18] sm:$0xff] %v1099_v46 }
 0x134   : > { %1132 = vst [vmem:[%s1116_s11 + $0x8] sm:$0xff] %v1131_v48 }
 0x13a   : > { %v1135_v50 = vld [vmem:[%s2064_s9 + $0x18] sm:$0xff] }
 0x13b   : > { %1136 = vst [vmem:[%s1116_s11 + $0x48] sm:$0xff] %v1135_v50 }
 0x13c PF: > { %s13_s16 = sadd.s32 1, %s1681_s16   ;;  %s2100_s12 = smov %s1669_s13 }
 0x13d   : > { %p10_p12 = scmp.ge.s32.totalorder %s13_s16, 6   ;;  %s2101_s13 = smov %s1743_s22 }
 0x13e   : > { %s2102_s14 = smov %s1677_s15  ;;  %s2103_s15 = smov %s2105_s17 }
 0x13f   :  { %12 = sbr.rel (!%p10_p12) target bundleno = 3 (0x3), region = 142 }

// kernel: my_model2_forward.18
= control target key start
LH: loop header
LB: loop body
LE: loop exit
PB: predicated region body
PF: predicated region fallthrough
CT: control target
= control target key end

     0   :  { %s6129_s12 = smov 0   ;;  %s6763_s0 = inlined_call_operand.vmem [shape: f32[8,8,1024], index: 0, kind: input, shape index: {}]   ;;  %s6764_s2 = inlined_call_operand.vmem [shape: bf16[512,1024], index: 2, kind: input, shape index: {}]   ;;  %s6765_s3 = inlined_call_operand.vmem [shape: f32[8,8,256], index: 3, kind: output, shape index: {}]   ;;  %s6766_s1 = inlined_call_operand.vmem [shape: f32[8,1], index: 1, kind: input, shape index: {}]  }
   0x1   :  { %v3564_v0 = vld [vmem:[%s6764_s2 + $0x4] sm:$0xf]  ;;  %v3569_v1 = vld [vmem:[%s6764_s2] sm:$0xf]  ;;  %v3574_v2 = vld [vmem:[%s6764_s2 + $0xc] sm:$0xf] }
   0x2   :  { %6769 = vst [vmem:[#allocation4_spill] sm:$0xff] %v3564_v0  ;;  %v3579_v3 = vld [vmem:[%s6764_s2 + $0x8] sm:$0xf]  ;;  %v3584_v4 = vld [vmem:[%s6764_s2 + $0x14] sm:$0xf] }
   0x3   :  { %6770 = vst [vmem:[#allocation5_spill] sm:$0xff] %v3569_v1  ;;  %v3589_v5 = vld [vmem:[%s6764_s2 + $0x10] sm:$0xf]  ;;  %v3594_v6 = vld [vmem:[%s6764_s2 + $0x1c] sm:$0xf] }
   0x4   :  { %6771 = vst [vmem:[#allocation6_spill] sm:$0xff] %v3574_v2  ;;  %v3599_v7 = vld [vmem:[%s6764_s2 + $0x18] sm:$0xf]  ;;  %v3604_v8 = vld [vmem:[%s6764_s2 + $0x20] sm:$0xf0] }
   0x5   :  { %6772 = vst [vmem:[#allocation7_spill] sm:$0xff] %v3579_v3  ;;  %v3609_v9 = vld [vmem:[%s6764_s2 + $0x1c] sm:$0xf0]  ;;  %v3614_v10 = vld [vmem:[%s6764_s2 + $0x28] sm:$0xf0] }
   0x6   :  { %6773 = vst [vmem:[#allocation8_spill] sm:$0xff] %v3584_v4  ;;  %v3619_v11 = vld [vmem:[%s6764_s2 + $0x24] sm:$0xf0]  ;;  %v3624_v12 = vld [vmem:[%s6764_s2 + $0x30] sm:$0xf0] }
   0x7   :  { %6774 = vst [vmem:[#allocation9_spill] sm:$0xff] %v3589_v5  ;;  %v3629_v13 = vld [vmem:[%s6764_s2 + $0x2c] sm:$0xf0]  ;;  %v3634_v14 = vld [vmem:[%s6764_s2 + $0x38] sm:$0xf0] }
   0x8   :  { %6775 = vst [vmem:[#allocation10_spill] sm:$0xff] %v3594_v6  ;;  %v3639_v15 = vld [vmem:[%s6764_s2 + $0x34] sm:$0xf0]  ;;  %v3644_v16 = vld [vmem:[%s6764_s2 + $0x44] sm:$0xf] }
   0x9   :  { %6776 = vst [vmem:[#allocation11_spill] sm:$0xff] %v3599_v7  ;;  %v3649_v17 = vld [vmem:[%s6764_s2 + $0x40] sm:$0xf]  ;;  %v3654_v18 = vld [vmem:[%s6764_s2 + $0x4c] sm:$0xf] }
   0xa   :  { %6777 = vst [vmem:[#allocation12_spill] sm:$0xff] %v3604_v8  ;;  %v3659_v19 = vld [vmem:[%s6764_s2 + $0x48] sm:$0xf]  ;;  %v3664_v20 = vld [vmem:[%s6764_s2 + $0x54] sm:$0xf] }
   0xb   :  { %6778 = vst [vmem:[#allocation13_spill] sm:$0xff] %v3609_v9  ;;  %v3669_v21 = vld [vmem:[%s6764_s2 + $0x50] sm:$0xf]  ;;  %v3674_v22 = vld [vmem:[%s6764_s2 + $0x5c] sm:$0xf]  ;;  %v3538_v9 = vmov 0.0  }
   0xc   :  { %6779 = vst [vmem:[#allocation14_spill] sm:$0xff] %v3614_v10  ;;  %v3679_v23 = vld [vmem:[%s6764_s2 + $0x58] sm:$0xf]  ;;  %v3684_v24 = vld [vmem:[%s6764_s2 + $0x60] sm:$0xf0] }
   0xd   :  { %6780 = vst [vmem:[#allocation15_spill] sm:$0xff] %v3619_v11  ;;  %v3689_v25 = vld [vmem:[%s6764_s2 + $0x5c] sm:$0xf0]  ;;  %v3694_v26 = vld [vmem:[%s6764_s2 + $0x68] sm:$0xf0] }
   0xe   :  { %6781 = vst [vmem:[#allocation16_spill] sm:$0xff] %v3624_v12  ;;  %v3699_v27 = vld [vmem:[%s6764_s2 + $0x64] sm:$0xf0]  ;;  %v3704_v28 = vld [vmem:[%s6764_s2 + $0x70] sm:$0xf0] }
   0xf   :  { %6782 = vst [vmem:[#allocation17_spill] sm:$0xff] %v3629_v13  ;;  %v3709_v29 = vld [vmem:[%s6764_s2 + $0x6c] sm:$0xf0]  ;;  %v3714_v30 = vld [vmem:[%s6764_s2 + $0x78] sm:$0xf0] }
  0x10   :  { %6783 = vst [vmem:[#allocation18_spill] sm:$0xff] %v3634_v14  ;;  %v3719_v31 = vld [vmem:[%s6764_s2 + $0x74] sm:$0xf0]  ;;  %v3724_v32 = vld [vmem:[%s6764_s2 + $0x84] sm:$0xf] }
  0x11   :  { %6784 = vst [vmem:[#allocation19_spill] sm:$0xff] %v3639_v15  ;;  %v3729_v33 = vld [vmem:[%s6764_s2 + $0x80] sm:$0xf]  ;;  %v3734_v34 = vld [vmem:[%s6764_s2 + $0x8c] sm:$0xf] }
  0x12   :  { %6785 = vst [vmem:[#allocation20_spill] sm:$0xff] %v3644_v16  ;;  %v3739_v35 = vld [vmem:[%s6764_s2 + $0x88] sm:$0xf]  ;;  %v3744_v36 = vld [vmem:[%s6764_s2 + $0x94] sm:$0xf] }
  0x13   :  { %6786 = vst [vmem:[#allocation21_spill] sm:$0xff] %v3649_v17  ;;  %v3749_v37 = vld [vmem:[%s6764_s2 + $0x90] sm:$0xf]  ;;  %v3754_v38 = vld [vmem:[%s6764_s2 + $0x9c] sm:$0xf] }
  0x14   :  { %6787 = vst [vmem:[#allocation22_spill] sm:$0xff] %v3654_v18  ;;  %v3759_v39 = vld [vmem:[%s6764_s2 + $0x98] sm:$0xf]  ;;  %v3764_v40 = vld [vmem:[%s6764_s2 + $0xa0] sm:$0xf0] }
  0x15   :  { %6788 = vst [vmem:[#allocation23_spill] sm:$0xff] %v3659_v19  ;;  %v3769_v41 = vld [vmem:[%s6764_s2 + $0x9c] sm:$0xf0]  ;;  %v3774_v42 = vld [vmem:[%s6764_s2 + $0xa8] sm:$0xf0] }
  0x16   :  { %6789 = vst [vmem:[#allocation24_spill] sm:$0xff] %v3664_v20  ;;  %v3779_v43 = vld [vmem:[%s6764_s2 + $0xa4] sm:$0xf0]  ;;  %v3784_v44 = vld [vmem:[%s6764_s2 + $0xb0] sm:$0xf0] }
  0x17   :  { %6790 = vst [vmem:[#allocation25_spill] sm:$0xff] %v3669_v21  ;;  %v3789_v45 = vld [vmem:[%s6764_s2 + $0xac] sm:$0xf0]  ;;  %v3794_v46 = vld [vmem:[%s6764_s2 + $0xb8] sm:$0xf0] }
  0x18   :  { %6791 = vst [vmem:[#allocation26_spill] sm:$0xff] %v3674_v22  ;;  %v3799_v47 = vld [vmem:[%s6764_s2 + $0xb4] sm:$0xf0]  ;;  %v3804_v48 = vld [vmem:[%s6764_s2 + $0xc4] sm:$0xf] }
  0x19   :  { %6792 = vst [vmem:[#allocation27_spill] sm:$0xff] %v3679_v23  ;;  %v3809_v49 = vld [vmem:[%s6764_s2 + $0xc0] sm:$0xf]  ;;  %v3814_v50 = vld [vmem:[%s6764_s2 + $0xcc] sm:$0xf] }
  0x1a   :  { %6793 = vst [vmem:[#allocation28_spill] sm:$0xff] %v3684_v24  ;;  %v3819_v51 = vld [vmem:[%s6764_s2 + $0xc8] sm:$0xf]  ;;  %v3824_v52 = vld [vmem:[%s6764_s2 + $0xd4] sm:$0xf] }
  0x1b   :  { %6794 = vst [vmem:[#allocation29_spill] sm:$0xff] %v3689_v25  ;;  %v3829_v53 = vld [vmem:[%s6764_s2 + $0xd0] sm:$0xf]  ;;  %v3834_v54 = vld [vmem:[%s6764_s2 + $0xdc] sm:$0xf] }
  0x1c   :  { %6795 = vst [vmem:[#allocation30_spill] sm:$0xff] %v3694_v26  ;;  %v3839_v55 = vld [vmem:[%s6764_s2 + $0xd8] sm:$0xf]  ;;  %v3844_v56 = vld [vmem:[%s6764_s2 + $0xe0] sm:$0xf0] }
  0x1d   :  { %6796 = vst [vmem:[#allocation31_spill] sm:$0xff] %v3699_v27  ;;  %v3849_v57 = vld [vmem:[%s6764_s2 + $0xdc] sm:$0xf0]  ;;  %v3854_v58 = vld [vmem:[%s6764_s2 + $0xe8] sm:$0xf0] }
  0x1e   :  { %6797 = vst [vmem:[#allocation32_spill] sm:$0xff] %v3704_v28  ;;  %v3859_v59 = vld [vmem:[%s6764_s2 + $0xe4] sm:$0xf0]  ;;  %v3864_v60 = vld [vmem:[%s6764_s2 + $0xf0] sm:$0xf0] }
  0x1f   :  { %6798 = vst [vmem:[#allocation33_spill] sm:$0xff] %v3709_v29  ;;  %v3869_v61 = vld [vmem:[%s6764_s2 + $0xec] sm:$0xf0]  ;;  %v3874_v62 = vld [vmem:[%s6764_s2 + $0xf8] sm:$0xf0] }
  0x20   :  { %6799 = vst [vmem:[#allocation34_spill] sm:$0xff] %v3714_v30  ;;  %v3879_v63 = vld [vmem:[%s6764_s2 + $0xf4] sm:$0xf0]  ;;  %v3884_v6 = vld [vmem:[%s6764_s2 + $0x104] sm:$0xf] }
  0x21   :  { %6800 = vst [vmem:[#allocation35_spill] sm:$0xff] %v3719_v31  ;;  %v3889_v14 = vld [vmem:[%s6764_s2 + $0x100] sm:$0xf]  ;;  %v3894_v22 = vld [vmem:[%s6764_s2 + $0x10c] sm:$0xf] }
  0x22   :  { %6801 = vst [vmem:[#allocation36_spill] sm:$0xff] %v3724_v32  ;;  %v3899_v30 = vld [vmem:[%s6764_s2 + $0x108] sm:$0xf]  ;;  %v3924_v15 = vld [vmem:[%s6764_s2 + $0x120] sm:$0xf0] }
  0x23   :  { %6802 = vst [vmem:[#allocation37_spill] sm:$0xff] %v3734_v34  ;;  %v3929_v7 = vld [vmem:[%s6764_s2 + $0x11c] sm:$0xf0]  ;;  %v3934_v31 = vld [vmem:[%s6764_s2 + $0x128] sm:$0xf0] }
  0x24   :  { %6803 = vst [vmem:[#allocation38_spill] sm:$0xff] %v3739_v35  ;;  %v3944_v23 = vld [vmem:[%s6764_s2 + $0x130] sm:$0xf0]  ;;  %v3974_v4 = vld [vmem:[%s6764_s2 + $0x14c] sm:$0xf] }
  0x25   :  { %6804 = vst [vmem:[#allocation39_spill] sm:$0xff] %v3744_v36  ;;  %v3989_v12 = vld [vmem:[%s6764_s2 + $0x150] sm:$0xf]  ;;  %v3994_v20 = vld [vmem:[%s6764_s2 + $0x15c] sm:$0xf] }
  0x26   :  { %6805 = vst [vmem:[#allocation40_spill] sm:$0xff] %v3749_v37  ;;  %v3999_v28 = vld [vmem:[%s6764_s2 + $0x158] sm:$0xf]  ;;  %v4004_v36 = vld [vmem:[%s6764_s2 + $0x160] sm:$0xf0] }
  0x27   :  { %6806 = vst [vmem:[#allocation41_spill] sm:$0xff] %v3754_v38  ;;  %v3904_v38 = vld [vmem:[%s6764_s2 + $0x114] sm:$0xf]  ;;  %v4054_v13 = vld [vmem:[%s6764_s2 + $0x18c] sm:$0xf] }
  0x28   :  { %6807 = vst [vmem:[#allocation42_spill] sm:$0xff] %v3759_v39  ;;  %v3954_v39 = vld [vmem:[%s6764_s2 + $0x138] sm:$0xf0]  ;;  %v4069_v5 = vld [vmem:[%s6764_s2 + $0x190] sm:$0xf] }
  0x29   :  { %6808 = vst [vmem:[#allocation43_spill] sm:$0xff] %v3764_v40  ;;  %v4074_v29 = vld [vmem:[%s6764_s2 + $0x19c] sm:$0xf]  ;;  %v4079_v21 = vld [vmem:[%s6764_s2 + $0x198] sm:$0xf] }
  0x2a   :  { %6809 = vst [vmem:[#allocation44_spill] sm:$0xff] %v3774_v42  ;;  %v4094_v37 = vld [vmem:[%s6764_s2 + $0x1a8] sm:$0xf0]  ;;  %v4164_v2 = vld [vmem:[%s6764_s2 + $0x1e0] sm:$0xf0] }
  0x2b   :  { %6810 = vst [vmem:[#allocation45_spill] sm:$0xff] %v3779_v43  ;;  %v4189_v10 = vld [vmem:[%s6764_s2 + $0x1ec] sm:$0xf0]  ;;  %v4194_v18 = vld [vmem:[%s6764_s2 + $0x1f8] sm:$0xf0] }
  0x2c   :  { %6811 = vst [vmem:[#allocation46_spill] sm:$0xff] %v3784_v44  ;;  %v4009_v44 = vld [vmem:[%s6764_s2 + $0x15c] sm:$0xf0]  ;;  %v4199_v26 = vld [vmem:[%s6764_s2 + $0x1f4] sm:$0xf0] }
  0x2d   :  { %6812 = vst [vmem:[#allocation47_spill] sm:$0xff] %v3789_v45  ;;  %v4084_v45 = vld [vmem:[%s6764_s2 + $0x1a0] sm:$0xf0]  ;;  %v4229_v42 = vld [vmem:[%s6764_s2 + $0x210] sm:$0xf] }
  0x2e   :  { %6813 = vst [vmem:[#allocation48_spill] sm:$0xff] %v3794_v46  ;;  %v3909_v46 = vld [vmem:[%s6764_s2 + $0x110] sm:$0xf]  ;;  %v4204_v34 = vld [vmem:[%s6764_s2 + $0x204] sm:$0xf] }
  0x2f   :  { %6814 = vst [vmem:[#allocation49_spill] sm:$0xff] %v3799_v47  ;;  %v3949_v47 = vld [vmem:[%s6764_s2 + $0x12c] sm:$0xf0]  ;;  %v4394_v11 = vld [vmem:[%s6764_s2 + $0x29c] sm:$0xf] }
  0x30   :  { %6815 = vst [vmem:[#allocation50_spill] sm:$0xff] %v3804_v48  ;;  %v4404_v3 = vld [vmem:[%s6764_s2 + $0x2a0] sm:$0xf0]  ;;  %v4469_v19 = vld [vmem:[%s6764_s2 + $0x2d0] sm:$0xf] }
  0x31   :  { %6816 = vst [vmem:[#allocation51_spill] sm:$0xff] %v3814_v50  ;;  %v4234_v50 = vld [vmem:[%s6764_s2 + $0x21c] sm:$0xf]  ;;  %v4444_v27 = vld [vmem:[%s6764_s2 + $0x2c4] sm:$0xf] }
  0x32   :  { %6817 = vst [vmem:[#allocation52_spill] sm:$0xff] %v3819_v51  ;;  %v4509_v43 = vld [vmem:[%s6764_s2 + $0x2ec] sm:$0xf0]  ;;  %v4514_v35 = vld [vmem:[%s6764_s2 + $0x2f8] sm:$0xf0] }
  0x33   :  { %6818 = vst [vmem:[#allocation53_spill] sm:$0xff] %v3824_v52  ;;  %v4014_v52 = vld [vmem:[%s6764_s2 + $0x168] sm:$0xf0]  ;;  %v4564_v51 = vld [vmem:[%s6764_s2 + $0x320] sm:$0xf0] }
  0x34   :  { %6819 = vst [vmem:[#allocation54_spill] sm:$0xff] %v3829_v53  ;;  %v4114_v53 = vld [vmem:[%s6764_s2 + $0x1b8] sm:$0xf0]  ;;  %v4829_v8 = vld [vmem:[%s6764_s2 + $0x3ec] sm:$0xf0] }
  0x35   :  { %6820 = vst [vmem:[#allocation55_spill] sm:$0xff] %v3834_v54  ;;  %v3914_v54 = vld [vmem:[%s6764_s2 + $0x11c] sm:$0xf]  ;;  %v5109_v40 = vld [vmem:[%s6764_s2 + $0x4d0] sm:$0xf] }
  0x36   :  { %6821 = vst [vmem:[#allocation56_spill] sm:$0xff] %v3839_v55  ;;  %v3964_v55 = vld [vmem:[%s6764_s2 + $0x144] sm:$0xf]  ;;  %v4794_v0 = vld [vmem:[%s6764_s2 + $0x3dc] sm:$0xf] }
  0x37   :  { %6822 = vst [vmem:[#allocation57_spill] sm:$0xff] %v3844_v56  ;;  %v4914_v16 = vld [vmem:[%s6764_s2 + $0x438] sm:$0xf0]  ;;  %v5229_v56 = vld [vmem:[%s6764_s2 + $0x52c] sm:$0xf0] }
  0x38   :  { %6823 = vst [vmem:[#allocation58_spill] sm:$0xff] %v3854_v58  ;;  %v4244_v58 = vld [vmem:[%s6764_s2 + $0x220] sm:$0xf0]  ;;  %v4954_v24 = vld [vmem:[%s6764_s2 + $0x45c] sm:$0xf] }
  0x39   :  { %6824 = vst [vmem:[#allocation59_spill] sm:$0xff] %v3859_v59  ;;  %v4554_v59 = vld [vmem:[%s6764_s2 + $0x31c] sm:$0xf] }
  0x3a   :  { %6825 = vst [vmem:[#allocation60_spill] sm:$0xff] %v3864_v60  ;;  %v4029_v60 = vld [vmem:[%s6764_s2 + $0x16c] sm:$0xf0]  ;;  %v5074_v32 = vld [vmem:[%s6764_s2 + $0x4b8] sm:$0xf0] }
  0x3b   :  { %6826 = vst [vmem:[#allocation61_spill] sm:$0xff] %v3869_v61  ;;  %v4109_v61 = vld [vmem:[%s6764_s2 + $0x1ac] sm:$0xf0]  ;;  %v5194_v48 = vld [vmem:[%s6764_s2 + $0x51c] sm:$0xf] }
  0x3c   :  { %6827 = vst [vmem:[#allocation62_spill] sm:$0xff] %v3874_v62  ;;  %v3919_v62 = vld [vmem:[%s6764_s2 + $0x118] sm:$0xf] }
  0x3d   :  { %6828 = vst [vmem:[#allocation63_spill] sm:$0xff] %v3879_v63  ;;  %v3959_v63 = vld [vmem:[%s6764_s2 + $0x134] sm:$0xf0] }
  0x3e   :  { %6829 = vst [vmem:[#allocation64_spill] sm:$0xff] %v3884_v6  ;;  %v5314_v6 = vld [vmem:[%s6764_s2 + $0x578] sm:$0xf0] }
  0x3f   :  { %6830 = vst [vmem:[#allocation65_spill] sm:$0xff] %v3889_v14 }
  0x40   :  { %6831 = vst [vmem:[#allocation66_spill] sm:$0xff] %v3894_v22  ;;  %v4269_v22 = vld [vmem:[%s6764_s2 + $0x22c] sm:$0xf0] }
  0x41   :  { %6832 = vst [vmem:[#allocation67_spill] sm:$0xff] %v3899_v30  ;;  %v4629_v30 = vld [vmem:[%s6764_s2 + $0x350] sm:$0xf] }
  0x42   :  { %6833 = vst [vmem:[#allocation68_spill] sm:$0xff] %v3904_v38  ;;  %v4034_v38 = vld [vmem:[%s6764_s2 + $0x178] sm:$0xf0] }
  0x43   :  { %6834 = vst [vmem:[#allocation69_spill] sm:$0xff] %v3909_v46  ;;  %v4124_v46 = vld [vmem:[%s6764_s2 + $0x1c4] sm:$0xf] }
  0x44   :  { %6835 = vst [vmem:[#allocation70_spill] sm:$0xff] %v3914_v54  ;;  %v3939_v54 = vld [vmem:[%s6764_s2 + $0x124] sm:$0xf0] }
  0x45   :  { %6836 = vst [vmem:[#allocation71_spill] sm:$0xff] %v3919_v62  ;;  %v3969_v62 = vld [vmem:[%s6764_s2 + $0x140] sm:$0xf] }
  0x46   :  { %6837 = vst [vmem:[#allocation72_spill] sm:$0xff] %v3924_v15  ;;  %v5349_v15 = vld [vmem:[%s6764_s2 + $0x590] sm:$0xf] }
  0x47   :  { %6838 = vst [vmem:[#allocation73_spill] sm:$0xff] %v3929_v7 }
  0x48   :  { %6839 = vst [vmem:[#allocation74_spill] sm:$0xff] %v3934_v31  ;;  %v4274_v31 = vld [vmem:[%s6764_s2 + $0x238] sm:$0xf0] }
  0x49   :  { %6840 = vst [vmem:[#allocation75_spill] sm:$0xff] %v3939_v54  ;;  %v4594_v54 = vld [vmem:[%s6764_s2 + $0x338] sm:$0xf0] }
  0x4a   :  { %6841 = vst [vmem:[#allocation76_spill] sm:$0xff] %v3944_v23  ;;  %v4039_v23 = vld [vmem:[%s6764_s2 + $0x174] sm:$0xf0] }
  0x4b   :  { %6842 = vst [vmem:[#allocation77_spill] sm:$0xff] %v3949_v47  ;;  %v4119_v47 = vld [vmem:[%s6764_s2 + $0x1b4] sm:$0xf0] }
  0x4c   :  { %6843 = vst [vmem:[#allocation78_spill] sm:$0xff] %v3954_v39  ;;  %v3979_v39 = vld [vmem:[%s6764_s2 + $0x148] sm:$0xf] }
  0x4d   :  { %6844 = vst [vmem:[#allocation79_spill] sm:$0xff] %v3959_v63  ;;  %v3984_v63 = vld [vmem:[%s6764_s2 + $0x154] sm:$0xf] }
  0x4e   :  { %6845 = vst [vmem:[#allocation80_spill] sm:$0xff] %v3964_v55  ;;  %v5434_v55 = vld [vmem:[%s6764_s2 + $0x5dc] sm:$0xf] }
  0x4f   :  { %6846 = vst [vmem:[#allocation81_spill] sm:$0xff] %v3974_v4  ;;  %v4284_v4 = vld [vmem:[%s6764_s2 + $0x244] sm:$0xf] }
  0x50   :  { %6847 = vst [vmem:[#allocation82_spill] sm:$0xff] %v3979_v39  ;;  %v4669_v39 = vld [vmem:[%s6764_s2 + $0x36c] sm:$0xf0] }
  0x51   :  { %6848 = vst [vmem:[#allocation83_spill] sm:$0xff] %v3984_v63  ;;  %v4044_v63 = vld [vmem:[%s6764_s2 + $0x184] sm:$0xf] }
  0x52   :  { %6849 = vst [vmem:[#allocation84_spill] sm:$0xff] %v3989_v12  ;;  %v4149_v12 = vld [vmem:[%s6764_s2 + $0x1d0] sm:$0xf] }
  0x53   :  { %6850 = vst [vmem:[#allocation85_spill] sm:$0xff] %v3994_v20  ;;  %v4019_v20 = vld [vmem:[%s6764_s2 + $0x164] sm:$0xf0] }
  0x54   :  { %6851 = vst [vmem:[#allocation86_spill] sm:$0xff] %v3999_v28  ;;  %v4024_v28 = vld [vmem:[%s6764_s2 + $0x170] sm:$0xf0] }
  0x55   :  { %6852 = vst [vmem:[#allocation87_spill] sm:$0xff] %v4004_v36  ;;  %v5469_v36 = vld [vmem:[%s6764_s2 + $0x5ec] sm:$0xf0] }
  0x56   :  { %6853 = vst [vmem:[#allocation88_spill] sm:$0xff] %v4014_v52  ;;  %v4309_v52 = vld [vmem:[%s6764_s2 + $0x250] sm:$0xf] }
  0x57   :  { %6854 = vst [vmem:[#allocation89_spill] sm:$0xff] %v4019_v20  ;;  %v4634_v20 = vld [vmem:[%s6764_s2 + $0x35c] sm:$0xf] }
  0x58   :  { %6855 = vst [vmem:[#allocation90_spill] sm:$0xff] %v4024_v28  ;;  %v4049_v28 = vld [vmem:[%s6764_s2 + $0x180] sm:$0xf] }
  0x59   :  { %6856 = vst [vmem:[#allocation91_spill] sm:$0xff] %v4029_v60  ;;  %v4134_v60 = vld [vmem:[%s6764_s2 + $0x1cc] sm:$0xf] }
  0x5a   :  { %6857 = vst [vmem:[#allocation92_spill] sm:$0xff] %v4034_v38  ;;  %v4059_v38 = vld [vmem:[%s6764_s2 + $0x188] sm:$0xf] }
  0x5b   :  { %6858 = vst [vmem:[#allocation93_spill] sm:$0xff] %v4039_v23  ;;  %v4064_v23 = vld [vmem:[%s6764_s2 + $0x194] sm:$0xf] }
  0x5c   :  { %6859 = vst [vmem:[#allocation94_spill] sm:$0xff] %v4044_v63  ;;  %v5634_v63 = vld [vmem:[%s6764_s2 + $0x678] sm:$0xf0] }
  0x5d   :  { %6860 = vst [vmem:[#allocation95_spill] sm:$0xff] %v4054_v13  ;;  %v4314_v13 = vld [vmem:[%s6764_s2 + $0x25c] sm:$0xf] }
  0x5e   :  { %6861 = vst [vmem:[#allocation96_spill] sm:$0xff] %v4059_v38  ;;  %v4709_v38 = vld [vmem:[%s6764_s2 + $0x390] sm:$0xf] }
  0x5f   :  { %6862 = vst [vmem:[#allocation97_spill] sm:$0xff] %v4064_v23  ;;  %v4089_v23 = vld [vmem:[%s6764_s2 + $0x19c] sm:$0xf0] }
  0x60   :  { %6863 = vst [vmem:[#allocation98_spill] sm:$0xff] %v4069_v5  ;;  %v4159_v5 = vld [vmem:[%s6764_s2 + $0x1d8] sm:$0xf] }
  0x61   :  { %6864 = vst [vmem:[#allocation99_spill] sm:$0xff] %v4074_v29  ;;  %v4099_v29 = vld [vmem:[%s6764_s2 + $0x1a4] sm:$0xf0] }
  0x62   :  { %6865 = vst [vmem:[#allocation100_spill] sm:$0xff] %v4079_v21  ;;  %v4104_v21 = vld [vmem:[%s6764_s2 + $0x1b0] sm:$0xf0] }
  0x63   :  { %6866 = vst [vmem:[#allocation101_spill] sm:$0xff] %v4084_v45  ;;  %v5674_v45 = vld [vmem:[%s6764_s2 + $0x69c] sm:$0xf] }
  0x64   :  { %6867 = vst [vmem:[#allocation102_spill] sm:$0xff] %v4089_v23 }
  0x65   :  { %6868 = vst [vmem:[#allocation103_spill] sm:$0xff] %v4094_v37  ;;  %v4324_v37 = vld [vmem:[%s6764_s2 + $0x260] sm:$0xf0] }
  0x66   :  { %6869 = vst [vmem:[#allocation104_spill] sm:$0xff] %v4099_v29  ;;  %v4674_v29 = vld [vmem:[%s6764_s2 + $0x378] sm:$0xf0] }
  0x67   :  { %6870 = vst [vmem:[#allocation105_spill] sm:$0xff] %v4104_v21  ;;  %v4129_v21 = vld [vmem:[%s6764_s2 + $0x1c0] sm:$0xf] }
  0x68   :  { %6871 = vst [vmem:[#allocation106_spill] sm:$0xff] %v4109_v61  ;;  %v4154_v61 = vld [vmem:[%s6764_s2 + $0x1dc] sm:$0xf] }
  0x69   :  { %6872 = vst [vmem:[#allocation107_spill] sm:$0xff] %v4114_v53  ;;  %v4139_v53 = vld [vmem:[%s6764_s2 + $0x1c8] sm:$0xf] }
  0x6a   :  { %6873 = vst [vmem:[#allocation108_spill] sm:$0xff] %v4119_v47  ;;  %v4144_v47 = vld [vmem:[%s6764_s2 + $0x1d4] sm:$0xf] }
  0x6b   :  { %6874 = vst [vmem:[#allocation109_spill] sm:$0xff] %v4124_v46  ;;  %v5874_v46 = vld [vmem:[%s6764_s2 + $0x738] sm:$0xf0] }
  0x6c   :  { %6875 = vst [vmem:[#allocation110_spill] sm:$0xff] %v4129_v21 }
  0x6d   :  { %6876 = vst [vmem:[#allocation111_spill] sm:$0xff] %v4134_v60  ;;  %v4349_v60 = vld [vmem:[%s6764_s2 + $0x26c] sm:$0xf0] }
  0x6e   :  { %6877 = vst [vmem:[#allocation112_spill] sm:$0xff] %v4139_v53  ;;  %v4749_v53 = vld [vmem:[%s6764_s2 + $0x3ac] sm:$0xf0] }
  0x6f   :  { %6878 = vst [vmem:[#allocation113_spill] sm:$0xff] %v4144_v47  ;;  %v4169_v47 = vld [vmem:[%s6764_s2 + $0x1dc] sm:$0xf0] }
  0x70   :  { %6879 = vst [vmem:[#allocation114_spill] sm:$0xff] %v4149_v12  ;;  %v4174_v12 = vld [vmem:[%s6764_s2 + $0x1e8] sm:$0xf0] }
  0x71   :  { %6880 = vst [vmem:[#allocation115_spill] sm:$0xff] %v4154_v61  ;;  %v4179_v61 = vld [vmem:[%s6764_s2 + $0x1e4] sm:$0xf0] }
  0x72   :  { %6881 = vst [vmem:[#allocation116_spill] sm:$0xff] %v4159_v5  ;;  %v4184_v5 = vld [vmem:[%s6764_s2 + $0x1f0] sm:$0xf0] }
  0x73   :  { %6882 = vst [vmem:[#allocation117_spill] sm:$0xff] %v4164_v2  ;;  %v5914_v2 = vld [vmem:[%s6764_s2 + $0x75c] sm:$0xf] }
  0x74   :  { %6883 = vst [vmem:[#allocation118_spill] sm:$0xff] %v4174_v12  ;;  %v4354_v12 = vld [vmem:[%s6764_s2 + $0x278] sm:$0xf0] }
  0x75   :  { %6884 = vst [vmem:[#allocation119_spill] sm:$0xff] %v4179_v61  ;;  %v4714_v61 = vld [vmem:[%s6764_s2 + $0x39c] sm:$0xf] }
  0x76   :  { %6885 = vst [vmem:[#allocation120_spill] sm:$0xff] %v4184_v5  ;;  %v4209_v5 = vld [vmem:[%s6764_s2 + $0x200] sm:$0xf] }
  0x77   :  { %6886 = vst [vmem:[#allocation121_spill] sm:$0xff] %v4189_v10  ;;  %v4214_v10 = vld [vmem:[%s6764_s2 + $0x20c] sm:$0xf] }
  0x78   :  { %6887 = vst [vmem:[#allocation122_spill] sm:$0xff] %v4194_v18  ;;  %v4219_v18 = vld [vmem:[%s6764_s2 + $0x208] sm:$0xf] }
  0x79   :  { %6888 = vst [vmem:[#allocation123_spill] sm:$0xff] %v4199_v26  ;;  %v4224_v26 = vld [vmem:[%s6764_s2 + $0x214] sm:$0xf] }
  0x7a   :  { %6889 = vst [vmem:[#allocation124_spill] sm:$0xff] %v4204_v34  ;;  %v4754_v34 = vld [vmem:[%s6764_s2 + $0x3b8] sm:$0xf0] }
  0x7b   :  { %6890 = vst [vmem:[#allocation125_spill] sm:$0xff] %v4209_v5  ;;  %v6114_v5 = vld [vmem:[%s6764_s2 + $0x7f8] sm:$0xf0] }
  0x7c   :  { %6891 = vst [vmem:[#allocation126_spill] sm:$0xff] %v4214_v10  ;;  %v4239_v10 = vld [vmem:[%s6764_s2 + $0x218] sm:$0xf] }
  0x7d   :  { %6892 = vst [vmem:[#allocation127_spill] sm:$0xff] %v4219_v18  ;;  %v4389_v18 = vld [vmem:[%s6764_s2 + $0x290] sm:$0xf] }
  0x7e   :  { %6893 = vst [vmem:[#allocation128_spill] sm:$0xff] %v4224_v26  ;;  %v4249_v26 = vld [vmem:[%s6764_s2 + $0x21c] sm:$0xf0] }
  0x7f   :  { %6894 = vst [vmem:[#allocation129_spill] sm:$0xff] %v4229_v42  ;;  %v4254_v42 = vld [vmem:[%s6764_s2 + $0x228] sm:$0xf0] }
  0x80   :  { %6895 = vst [vmem:[#allocation130_spill] sm:$0xff] %v4234_v50  ;;  %v4259_v50 = vld [vmem:[%s6764_s2 + $0x224] sm:$0xf0] }
  0x81   :  { %6896 = vst [vmem:[#allocation131_spill] sm:$0xff] %v4239_v10  ;;  %v4264_v10 = vld [vmem:[%s6764_s2 + $0x230] sm:$0xf0] }
  0x82   :  { %6897 = vst [vmem:[#allocation132_spill] sm:$0xff] %v4244_v58  ;;  %v4789_v58 = vld [vmem:[%s6764_s2 + $0x3d0] sm:$0xf] }
  0x83   :  { %6898 = vst [vmem:[#allocation133_spill] sm:$0xff] %v4249_v26  ;;  %v6089_v26 = vld [vmem:[%s6764_s2 + $0x7dc] sm:$0xf0] }
  0x84   :  { %6899 = vst [vmem:[#allocation134_spill] sm:$0xff] %v4254_v42  ;;  %v4279_v42 = vld [vmem:[%s6764_s2 + $0x234] sm:$0xf0] }
  0x85   :  { %6900 = vst [vmem:[#allocation135_spill] sm:$0xff] %v4259_v50  ;;  %v4364_v50 = vld [vmem:[%s6764_s2 + $0x284] sm:$0xf] }
  0x86   :  { %6901 = vst [vmem:[#allocation136_spill] sm:$0xff] %v4264_v10  ;;  %v4289_v10 = vld [vmem:[%s6764_s2 + $0x240] sm:$0xf] }
  0x87   :  { %6902 = vst [vmem:[#allocation137_spill] sm:$0xff] %v4269_v22  ;;  %v4294_v22 = vld [vmem:[%s6764_s2 + $0x24c] sm:$0xf] }
  0x88   :  { %6903 = vst [vmem:[#allocation138_spill] sm:$0xff] %v4274_v31  ;;  %v4299_v31 = vld [vmem:[%s6764_s2 + $0x248] sm:$0xf] }
  0x89   :  { %6904 = vst [vmem:[#allocation139_spill] sm:$0xff] %v4279_v42  ;;  %v4304_v42 = vld [vmem:[%s6764_s2 + $0x254] sm:$0xf] }
  0x8a   :  { %6905 = vst [vmem:[#allocation140_spill] sm:$0xff] %v4284_v4  ;;  %v4834_v4 = vld [vmem:[%s6764_s2 + $0x3f8] sm:$0xf0] }
  0x8b   :  { %6906 = vst [vmem:[#allocation141_spill] sm:$0xff] %v4289_v10 }
  0x8c   :  { %6907 = vst [vmem:[#allocation142_spill] sm:$0xff] %v4294_v22  ;;  %v4319_v22 = vld [vmem:[%s6764_s2 + $0x258] sm:$0xf] }
  0x8d   :  { %6908 = vst [vmem:[#allocation143_spill] sm:$0xff] %v4299_v31  ;;  %v4434_v31 = vld [vmem:[%s6764_s2 + $0x2b8] sm:$0xf0] }
  0x8e   :  { %6909 = vst [vmem:[#allocation144_spill] sm:$0xff] %v4304_v42  ;;  %v4329_v42 = vld [vmem:[%s6764_s2 + $0x25c] sm:$0xf0] }
  0x8f   :  { %6910 = vst [vmem:[#allocation145_spill] sm:$0xff] %v4309_v52  ;;  %v4334_v52 = vld [vmem:[%s6764_s2 + $0x268] sm:$0xf0] }
  0x90   :  { %6911 = vst [vmem:[#allocation146_spill] sm:$0xff] %v4314_v13  ;;  %v4339_v13 = vld [vmem:[%s6764_s2 + $0x264] sm:$0xf0] }
  0x91   :  { %6912 = vst [vmem:[#allocation147_spill] sm:$0xff] %v4319_v22  ;;  %v4344_v22 = vld [vmem:[%s6764_s2 + $0x270] sm:$0xf0] }
  0x92   :  { %6913 = vst [vmem:[#allocation148_spill] sm:$0xff] %v4324_v37  ;;  %v4874_v37 = vld [vmem:[%s6764_s2 + $0x41c] sm:$0xf] }
  0x93   :  { %6914 = vst [vmem:[#allocation149_spill] sm:$0xff] %v4334_v52  ;;  %v4359_v52 = vld [vmem:[%s6764_s2 + $0x274] sm:$0xf0] }
  0x94   :  { %6915 = vst [vmem:[#allocation150_spill] sm:$0xff] %v4339_v13  ;;  %v4429_v13 = vld [vmem:[%s6764_s2 + $0x2ac] sm:$0xf0] }
  0x95   :  { %6916 = vst [vmem:[#allocation151_spill] sm:$0xff] %v4344_v22  ;;  %v4369_v22 = vld [vmem:[%s6764_s2 + $0x280] sm:$0xf] }
  0x96   :  { %6917 = vst [vmem:[#allocation152_spill] sm:$0xff] %v4349_v60  ;;  %v4374_v60 = vld [vmem:[%s6764_s2 + $0x28c] sm:$0xf] }
  0x97   :  { %6918 = vst [vmem:[#allocation153_spill] sm:$0xff] %v4354_v12  ;;  %v4379_v12 = vld [vmem:[%s6764_s2 + $0x288] sm:$0xf] }
  0x98   :  { %6919 = vst [vmem:[#allocation154_spill] sm:$0xff] %v4359_v52  ;;  %v4384_v52 = vld [vmem:[%s6764_s2 + $0x294] sm:$0xf] }
  0x99   :  { %6920 = vst [vmem:[#allocation155_spill] sm:$0xff] %v4364_v50  ;;  %v4994_v50 = vld [vmem:[%s6764_s2 + $0x478] sm:$0xf0] }
  0x9a   :  { %6921 = vst [vmem:[#allocation156_spill] sm:$0xff] %v4369_v22 }
  0x9b   :  { %6922 = vst [vmem:[#allocation157_spill] sm:$0xff] %v4374_v60  ;;  %v4399_v60 = vld [vmem:[%s6764_s2 + $0x298] sm:$0xf] }
  0x9c   :  { %6923 = vst [vmem:[#allocation158_spill] sm:$0xff] %v4379_v12  ;;  %v4484_v12 = vld [vmem:[%s6764_s2 + $0x2e0] sm:$0xf0] }
  0x9d   :  { %6924 = vst [vmem:[#allocation159_spill] sm:$0xff] %v4384_v52  ;;  %v4409_v52 = vld [vmem:[%s6764_s2 + $0x29c] sm:$0xf0] }
  0x9e   :  { %6925 = vst [vmem:[#allocation160_spill] sm:$0xff] %v4389_v18  ;;  %v4414_v18 = vld [vmem:[%s6764_s2 + $0x2a8] sm:$0xf0] }
  0x9f   :  { %6926 = vst [vmem:[#allocation161_spill] sm:$0xff] %v4394_v11  ;;  %v4419_v11 = vld [vmem:[%s6764_s2 + $0x2a4] sm:$0xf0] }
  0xa0   :  { %6927 = vst [vmem:[#allocation162_spill] sm:$0xff] %v4399_v60  ;;  %v4424_v60 = vld [vmem:[%s6764_s2 + $0x2b0] sm:$0xf0] }
  0xa1   :  { %6928 = vst [vmem:[#allocation163_spill] sm:$0xff] %v4404_v3  ;;  %v5034_v3 = vld [vmem:[%s6764_s2 + $0x49c] sm:$0xf] }
  0xa2   :  { %6929 = vst [vmem:[#allocation164_spill] sm:$0xff] %v4414_v18  ;;  %v4439_v18 = vld [vmem:[%s6764_s2 + $0x2b4] sm:$0xf0] }
  0xa3   :  { %6930 = vst [vmem:[#allocation165_spill] sm:$0xff] %v4419_v11  ;;  %v4474_v11 = vld [vmem:[%s6764_s2 + $0x2dc] sm:$0xf] }
  0xa4   :  { %6931 = vst [vmem:[#allocation166_spill] sm:$0xff] %v4424_v60  ;;  %v4449_v60 = vld [vmem:[%s6764_s2 + $0x2c0] sm:$0xf] }
  0xa5   :  { %6932 = vst [vmem:[#allocation167_spill] sm:$0xff] %v4429_v13  ;;  %v4454_v13 = vld [vmem:[%s6764_s2 + $0x2cc] sm:$0xf] }
  0xa6   :  { %6933 = vst [vmem:[#allocation168_spill] sm:$0xff] %v4434_v31  ;;  %v4459_v31 = vld [vmem:[%s6764_s2 + $0x2c8] sm:$0xf] }
  0xa7   :  { %6934 = vst [vmem:[#allocation169_spill] sm:$0xff] %v4439_v18  ;;  %v4464_v18 = vld [vmem:[%s6764_s2 + $0x2d4] sm:$0xf] }
  0xa8   :  { %6935 = vst [vmem:[#allocation170_spill] sm:$0xff] %v4444_v27  ;;  %v5154_v27 = vld [vmem:[%s6764_s2 + $0x4f8] sm:$0xf0] }
  0xa9   :  { %6936 = vst [vmem:[#allocation171_spill] sm:$0xff] %v4454_v13  ;;  %v4479_v13 = vld [vmem:[%s6764_s2 + $0x2d8] sm:$0xf] }
  0xaa   :  { %6937 = vst [vmem:[#allocation172_spill] sm:$0xff] %v4459_v31  ;;  %v4549_v31 = vld [vmem:[%s6764_s2 + $0x310] sm:$0xf] }
  0xab   :  { %6938 = vst [vmem:[#allocation173_spill] sm:$0xff] %v4464_v18  ;;  %v4489_v18 = vld [vmem:[%s6764_s2 + $0x2dc] sm:$0xf0] }
  0xac   :  { %6939 = vst [vmem:[#allocation174_spill] sm:$0xff] %v4469_v19  ;;  %v4494_v19 = vld [vmem:[%s6764_s2 + $0x2e8] sm:$0xf0] }
  0xad   :  { %6940 = vst [vmem:[#allocation175_spill] sm:$0xff] %v4474_v11  ;;  %v4499_v11 = vld [vmem:[%s6764_s2 + $0x2e4] sm:$0xf0] }
  0xae   :  { %6941 = vst [vmem:[#allocation176_spill] sm:$0xff] %v4479_v13  ;;  %v4504_v13 = vld [vmem:[%s6764_s2 + $0x2f0] sm:$0xf0] }
  0xaf   :  { %6942 = vst [vmem:[#allocation177_spill] sm:$0xff] %v4484_v12  ;;  %v5189_v12 = vld [vmem:[%s6764_s2 + $0x510] sm:$0xf] }
  0xb0   :  { %6943 = vst [vmem:[#allocation178_spill] sm:$0xff] %v4489_v18 }
  0xb1   :  { %6944 = vst [vmem:[#allocation179_spill] sm:$0xff] %v4494_v19  ;;  %v4519_v19 = vld [vmem:[%s6764_s2 + $0x2f4] sm:$0xf0] }
  0xb2   :  { %6945 = vst [vmem:[#allocation180_spill] sm:$0xff] %v4499_v11  ;;  %v4524_v11 = vld [vmem:[%s6764_s2 + $0x304] sm:$0xf] }
  0xb3   :  { %6946 = vst [vmem:[#allocation181_spill] sm:$0xff] %v4504_v13  ;;  %v4529_v13 = vld [vmem:[%s6764_s2 + $0x300] sm:$0xf] }
  0xb4   :  { %6947 = vst [vmem:[#allocation182_spill] sm:$0xff] %v4509_v43  ;;  %v4534_v43 = vld [vmem:[%s6764_s2 + $0x30c] sm:$0xf] }
  0xb5   :  { %6948 = vst [vmem:[#allocation183_spill] sm:$0xff] %v4514_v35  ;;  %v4539_v35 = vld [vmem:[%s6764_s2 + $0x308] sm:$0xf] }
  0xb6   :  { %6949 = vst [vmem:[#allocation184_spill] sm:$0xff] %v4519_v19  ;;  %v4544_v19 = vld [vmem:[%s6764_s2 + $0x314] sm:$0xf] }
  0xb7   :  { %6950 = vst [vmem:[#allocation185_spill] sm:$0xff] %v4524_v11  ;;  %v5274_v11 = vld [vmem:[%s6764_s2 + $0x55c] sm:$0xf] }
  0xb8   :  { %6951 = vst [vmem:[#allocation186_spill] sm:$0xff] %v4529_v13 }
  0xb9   :  { %6952 = vst [vmem:[#allocation187_spill] sm:$0xff] %v4534_v43  ;;  %v4559_v43 = vld [vmem:[%s6764_s2 + $0x318] sm:$0xf] }
  0xba   :  { %6953 = vst [vmem:[#allocation188_spill] sm:$0xff] %v4539_v35  ;;  %v4589_v35 = vld [vmem:[%s6764_s2 + $0x32c] sm:$0xf0] }
  0xbb   :  { %6954 = vst [vmem:[#allocation189_spill] sm:$0xff] %v4544_v19  ;;  %v4569_v19 = vld [vmem:[%s6764_s2 + $0x31c] sm:$0xf0] }
  0xbc   :  { %6955 = vst [vmem:[#allocation190_spill] sm:$0xff] %v4549_v31  ;;  %v4574_v31 = vld [vmem:[%s6764_s2 + $0x328] sm:$0xf0] }
  0xbd   :  { %6956 = vst [vmem:[#allocation191_spill] sm:$0xff] %v4554_v59  ;;  %v4579_v59 = vld [vmem:[%s6764_s2 + $0x324] sm:$0xf0] }
  0xbe   :  { %6957 = vst [vmem:[#allocation192_spill] sm:$0xff] %v4559_v43  ;;  %v4584_v43 = vld [vmem:[%s6764_s2 + $0x330] sm:$0xf0] }
  0xbf   :  { %6958 = vst [vmem:[#allocation193_spill] sm:$0xff] %v4564_v51  ;;  %v5309_v51 = vld [vmem:[%s6764_s2 + $0x56c] sm:$0xf0] }
  0xc0   :  { %6959 = vst [vmem:[#allocation194_spill] sm:$0xff] %v4569_v19 }
  0xc1   :  { %6960 = vst [vmem:[#allocation195_spill] sm:$0xff] %v4574_v31  ;;  %v4599_v31 = vld [vmem:[%s6764_s2 + $0x334] sm:$0xf0] }
  0xc2   :  { %6961 = vst [vmem:[#allocation196_spill] sm:$0xff] %v4579_v59  ;;  %v4604_v59 = vld [vmem:[%s6764_s2 + $0x344] sm:$0xf] }
  0xc3   :  { %6962 = vst [vmem:[#allocation197_spill] sm:$0xff] %v4584_v43  ;;  %v4609_v43 = vld [vmem:[%s6764_s2 + $0x340] sm:$0xf] }
  0xc4   :  { %6963 = vst [vmem:[#allocation198_spill] sm:$0xff] %v4589_v35  ;;  %v4614_v35 = vld [vmem:[%s6764_s2 + $0x34c] sm:$0xf] }
  0xc5   :  { %6964 = vst [vmem:[#allocation199_spill] sm:$0xff] %v4594_v54  ;;  %v4619_v54 = vld [vmem:[%s6764_s2 + $0x348] sm:$0xf] }
  0xc6   :  { %6965 = vst [vmem:[#allocation200_spill] sm:$0xff] %v4599_v31  ;;  %v4624_v31 = vld [vmem:[%s6764_s2 + $0x354] sm:$0xf] }
  0xc7   :  { %6966 = vst [vmem:[#allocation201_spill] sm:$0xff] %v4604_v59  ;;  %v5394_v59 = vld [vmem:[%s6764_s2 + $0x5b8] sm:$0xf0] }
  0xc8   :  { %6967 = vst [vmem:[#allocation202_spill] sm:$0xff] %v4614_v35  ;;  %v4639_v35 = vld [vmem:[%s6764_s2 + $0x358] sm:$0xf] }
  0xc9   :  { %6968 = vst [vmem:[#allocation203_spill] sm:$0xff] %v4619_v54  ;;  %v4644_v54 = vld [vmem:[%s6764_s2 + $0x360] sm:$0xf0] }
  0xca   :  { %6969 = vst [vmem:[#allocation204_spill] sm:$0xff] %v4624_v31  ;;  %v4649_v31 = vld [vmem:[%s6764_s2 + $0x35c] sm:$0xf0] }
  0xcb   :  { %6970 = vst [vmem:[#allocation205_spill] sm:$0xff] %v4629_v30  ;;  %v4654_v30 = vld [vmem:[%s6764_s2 + $0x368] sm:$0xf0] }
  0xcc   :  { %6971 = vst [vmem:[#allocation206_spill] sm:$0xff] %v4634_v20  ;;  %v4659_v20 = vld [vmem:[%s6764_s2 + $0x364] sm:$0xf0] }
  0xcd   :  { %6972 = vst [vmem:[#allocation207_spill] sm:$0xff] %v4639_v35  ;;  %v4664_v35 = vld [vmem:[%s6764_s2 + $0x370] sm:$0xf0] }
  0xce   :  { %6973 = vst [vmem:[#allocation208_spill] sm:$0xff] %v4644_v54  ;;  %v5429_v54 = vld [vmem:[%s6764_s2 + $0x5d0] sm:$0xf] }
  0xcf   :  { %6974 = vst [vmem:[#allocation209_spill] sm:$0xff] %v4654_v30  ;;  %v4679_v30 = vld [vmem:[%s6764_s2 + $0x374] sm:$0xf0] }
  0xd0   :  { %6975 = vst [vmem:[#allocation210_spill] sm:$0xff] %v4659_v20  ;;  %v4684_v20 = vld [vmem:[%s6764_s2 + $0x384] sm:$0xf] }
  0xd1   :  { %6976 = vst [vmem:[#allocation211_spill] sm:$0xff] %v4664_v35  ;;  %v4689_v35 = vld [vmem:[%s6764_s2 + $0x380] sm:$0xf] }
  0xd2   :  { %6977 = vst [vmem:[#allocation212_spill] sm:$0xff] %v4669_v39  ;;  %v4694_v39 = vld [vmem:[%s6764_s2 + $0x38c] sm:$0xf] }
  0xd3   :  { %6978 = vst [vmem:[#allocation213_spill] sm:$0xff] %v4674_v29  ;;  %v4699_v29 = vld [vmem:[%s6764_s2 + $0x388] sm:$0xf] }
  0xd4   :  { %6979 = vst [vmem:[#allocation214_spill] sm:$0xff] %v4679_v30  ;;  %v4704_v30 = vld [vmem:[%s6764_s2 + $0x394] sm:$0xf] }
  0xd5   :  { %6980 = vst [vmem:[#allocation215_spill] sm:$0xff] %v4684_v20  ;;  %v5554_v20 = vld [vmem:[%s6764_s2 + $0x638] sm:$0xf0] }
  0xd6   :  { %6981 = vst [vmem:[#allocation216_spill] sm:$0xff] %v4694_v39  ;;  %v4719_v39 = vld [vmem:[%s6764_s2 + $0x398] sm:$0xf] }
  0xd7   :  { %6982 = vst [vmem:[#allocation217_spill] sm:$0xff] %v4699_v29  ;;  %v4724_v29 = vld [vmem:[%s6764_s2 + $0x3a0] sm:$0xf0] }
  0xd8   :  { %6983 = vst [vmem:[#allocation218_spill] sm:$0xff] %v4704_v30  ;;  %v4729_v30 = vld [vmem:[%s6764_s2 + $0x39c] sm:$0xf0] }
  0xd9   :  { %6984 = vst [vmem:[#allocation219_spill] sm:$0xff] %v4709_v38  ;;  %v4734_v38 = vld [vmem:[%s6764_s2 + $0x3a8] sm:$0xf0] }
  0xda   :  { %6985 = vst [vmem:[#allocation220_spill] sm:$0xff] %v4714_v61  ;;  %v4739_v61 = vld [vmem:[%s6764_s2 + $0x3a4] sm:$0xf0] }
  0xdb   :  { %6986 = vst [vmem:[#allocation221_spill] sm:$0xff] %v4719_v39  ;;  %v4744_v39 = vld [vmem:[%s6764_s2 + $0x3b0] sm:$0xf0] }
  0xdc   :  { %6987 = vst [vmem:[#allocation222_spill] sm:$0xff] %v4724_v29  ;;  %v5594_v29 = vld [vmem:[%s6764_s2 + $0x65c] sm:$0xf] }
  0xdd   :  { %6988 = vst [vmem:[#allocation223_spill] sm:$0xff] %v4734_v38  ;;  %v4759_v38 = vld [vmem:[%s6764_s2 + $0x3b4] sm:$0xf0] }
  0xde   :  { %6989 = vst [vmem:[#allocation224_spill] sm:$0xff] %v4739_v61  ;;  %v4764_v61 = vld [vmem:[%s6764_s2 + $0x3c4] sm:$0xf] }
  0xdf   :  { %6990 = vst [vmem:[#allocation225_spill] sm:$0xff] %v4744_v39  ;;  %v4769_v39 = vld [vmem:[%s6764_s2 + $0x3c0] sm:$0xf] }
  0xe0   :  { %6991 = vst [vmem:[#allocation226_spill] sm:$0xff] %v4749_v53  ;;  %v4774_v53 = vld [vmem:[%s6764_s2 + $0x3cc] sm:$0xf] }
  0xe1   :  { %6992 = vst [vmem:[#allocation227_spill] sm:$0xff] %v4754_v34  ;;  %v4779_v34 = vld [vmem:[%s6764_s2 + $0x3c8] sm:$0xf] }
  0xe2   :  { %6993 = vst [vmem:[#allocation228_spill] sm:$0xff] %v4759_v38  ;;  %v4784_v38 = vld [vmem:[%s6764_s2 + $0x3d4] sm:$0xf] }
  0xe3   :  { %6994 = vst [vmem:[#allocation229_spill] sm:$0xff] %v4764_v61  ;;  %v5794_v61 = vld [vmem:[%s6764_s2 + $0x6f8] sm:$0xf0] }
  0xe4   :  { %6995 = vst [vmem:[#allocation230_spill] sm:$0xff] %v4774_v53  ;;  %v4799_v53 = vld [vmem:[%s6764_s2 + $0x3d8] sm:$0xf] }
  0xe5   :  { %6996 = vst [vmem:[#allocation231_spill] sm:$0xff] %v4779_v34  ;;  %v4804_v34 = vld [vmem:[%s6764_s2 + $0x3e0] sm:$0xf0] }
  0xe6   :  { %6997 = vst [vmem:[#allocation232_spill] sm:$0xff] %v4784_v38  ;;  %v4809_v38 = vld [vmem:[%s6764_s2 + $0x3dc] sm:$0xf0] }
  0xe7   :  { %6998 = vst [vmem:[#allocation233_spill] sm:$0xff] %v4789_v58  ;;  %v4814_v58 = vld [vmem:[%s6764_s2 + $0x3e8] sm:$0xf0] }
  0xe8   :  { %6999 = vst [vmem:[#allocation234_spill] sm:$0xff] %v4794_v0  ;;  %v4819_v0 = vld [vmem:[%s6764_s2 + $0x3e4] sm:$0xf0] }
  0xe9   :  { %7000 = vst [vmem:[#allocation235_spill] sm:$0xff] %v4799_v53  ;;  %v4824_v53 = vld [vmem:[%s6764_s2 + $0x3f0] sm:$0xf0] }
  0xea   :  { %7001 = vst [vmem:[#allocation236_spill] sm:$0xff] %v4804_v34  ;;  %v5834_v34 = vld [vmem:[%s6764_s2 + $0x71c] sm:$0xf] }
  0xeb   :  { %7002 = vst [vmem:[#allocation237_spill] sm:$0xff] %v4809_v38 }
  0xec   :  { %7003 = vst [vmem:[#allocation238_spill] sm:$0xff] %v4814_v58  ;;  %v4839_v58 = vld [vmem:[%s6764_s2 + $0x3f4] sm:$0xf0] }
  0xed   :  { %7004 = vst [vmem:[#allocation239_spill] sm:$0xff] %v4819_v0  ;;  %v4844_v0 = vld [vmem:[%s6764_s2 + $0x404] sm:$0xf] }
  0xee   :  { %7005 = vst [vmem:[#allocation240_spill] sm:$0xff] %v4824_v53  ;;  %v4849_v53 = vld [vmem:[%s6764_s2 + $0x400] sm:$0xf] }
  0xef   :  { %7006 = vst [vmem:[#allocation241_spill] sm:$0xff] %v4829_v8  ;;  %v4854_v8 = vld [vmem:[%s6764_s2 + $0x40c] sm:$0xf] }
  0xf0   :  { %7007 = vst [vmem:[#allocation242_spill] sm:$0xff] %v4834_v4  ;;  %v4859_v4 = vld [vmem:[%s6764_s2 + $0x408] sm:$0xf] }
  0xf1   :  { %7008 = vst [vmem:[#allocation243_spill] sm:$0xff] %v4839_v58  ;;  %v4864_v58 = vld [vmem:[%s6764_s2 + $0x414] sm:$0xf] }
  0xf2   :  { %7009 = vst [vmem:[#allocation244_spill] sm:$0xff] %v4844_v0  ;;  %v4869_v0 = vld [vmem:[%s6764_s2 + $0x410] sm:$0xf] }
  0xf3   :  { %7010 = vst [vmem:[#allocation245_spill] sm:$0xff] %v4849_v53  ;;  %v6069_v53 = vld [vmem:[%s6764_s2 + $0x7d0] sm:$0xf] }
  0xf4   :  { %7011 = vst [vmem:[#allocation246_spill] sm:$0xff] %v4854_v8  ;;  %v4879_v8 = vld [vmem:[%s6764_s2 + $0x418] sm:$0xf] }
  0xf5   :  { %7012 = vst [vmem:[#allocation247_spill] sm:$0xff] %v4859_v4  ;;  %v4884_v4 = vld [vmem:[%s6764_s2 + $0x420] sm:$0xf0] }
  0xf6   :  { %7013 = vst [vmem:[#allocation248_spill] sm:$0xff] %v4864_v58  ;;  %v4889_v58 = vld [vmem:[%s6764_s2 + $0x41c] sm:$0xf0] }
  0xf7   :  { %7014 = vst [vmem:[#allocation249_spill] sm:$0xff] %v4869_v0  ;;  %v4894_v0 = vld [vmem:[%s6764_s2 + $0x428] sm:$0xf0] }
  0xf8   :  { %7015 = vst [vmem:[#allocation250_spill] sm:$0xff] %v4874_v37  ;;  %v4899_v37 = vld [vmem:[%s6764_s2 + $0x424] sm:$0xf0] }
  0xf9   :  { %7016 = vst [vmem:[#allocation251_spill] sm:$0xff] %v4879_v8  ;;  %v4904_v8 = vld [vmem:[%s6764_s2 + $0x430] sm:$0xf0] }
  0xfa   :  { %7017 = vst [vmem:[#allocation252_spill] sm:$0xff] %v4884_v4  ;;  %v4909_v4 = vld [vmem:[%s6764_s2 + $0x42c] sm:$0xf0] }
  0xfb   :  { %7018 = vst [vmem:[#allocation253_spill] sm:$0xff] %v4889_v58  ;;  %v6034_v58 = vld [vmem:[%s6764_s2 + $0x7b8] sm:$0xf0] }
  0xfc   :  { %7019 = vst [vmem:[#allocation254_spill] sm:$0xff] %v4894_v0  ;;  %v4919_v0 = vld [vmem:[%s6764_s2 + $0x434] sm:$0xf0] }
  0xfd   :  { %7020 = vst [vmem:[#allocation255_spill] sm:$0xff] %v4899_v37  ;;  %v4924_v37 = vld [vmem:[%s6764_s2 + $0x444] sm:$0xf] }
  0xfe   :  { %7021 = vst [vmem:[#allocation256_spill] sm:$0xff] %v4904_v8  ;;  %v4929_v8 = vld [vmem:[%s6764_s2 + $0x440] sm:$0xf] }
  0xff   :  { %7022 = vst [vmem:[#allocation257_spill] sm:$0xff] %v4909_v4  ;;  %v4934_v4 = vld [vmem:[%s6764_s2 + $0x44c] sm:$0xf] }
 0x100   :  { %7023 = vst [vmem:[#allocation258_spill] sm:$0xff] %v4914_v16  ;;  %v4939_v16 = vld [vmem:[%s6764_s2 + $0x448] sm:$0xf] }
 0x101   :  { %7024 = vst [vmem:[#allocation259_spill] sm:$0xff] %v4919_v0  ;;  %v4944_v0 = vld [vmem:[%s6764_s2 + $0x454] sm:$0xf] }
 0x102   :  { %7025 = vst [vmem:[#allocation260_spill] sm:$0xff] %v4924_v37  ;;  %v4949_v37 = vld [vmem:[%s6764_s2 + $0x450] sm:$0xf] }
 0x103   :  { %7026 = vst [vmem:[#allocation261_spill] sm:$0xff] %v4929_v8 }
 0x104   :  { %7027 = vst [vmem:[#allocation262_spill] sm:$0xff] %v4934_v4  ;;  %v4959_v4 = vld [vmem:[%s6764_s2 + $0x458] sm:$0xf] }
 0x105   :  { %7028 = vst [vmem:[#allocation263_spill] sm:$0xff] %v4939_v16  ;;  %v4964_v16 = vld [vmem:[%s6764_s2 + $0x460] sm:$0xf0] }
 0x106   :  { %7029 = vst [vmem:[#allocation264_spill] sm:$0xff] %v4944_v0  ;;  %v4969_v0 = vld [vmem:[%s6764_s2 + $0x45c] sm:$0xf0] }
 0x107   :  { %7030 = vst [vmem:[#allocation265_spill] sm:$0xff] %v4949_v37  ;;  %v4974_v37 = vld [vmem:[%s6764_s2 + $0x468] sm:$0xf0] }
 0x108   :  { %7031 = vst [vmem:[#allocation266_spill] sm:$0xff] %v4954_v24  ;;  %v4979_v24 = vld [vmem:[%s6764_s2 + $0x464] sm:$0xf0] }
 0x109   :  { %7032 = vst [vmem:[#allocation267_spill] sm:$0xff] %v4959_v4  ;;  %v4984_v4 = vld [vmem:[%s6764_s2 + $0x470] sm:$0xf0] }
 0x10a   :  { %7033 = vst [vmem:[#allocation268_spill] sm:$0xff] %v4964_v16  ;;  %v4989_v16 = vld [vmem:[%s6764_s2 + $0x46c] sm:$0xf0] }
 0x10b   :  { %7034 = vst [vmem:[#allocation269_spill] sm:$0xff] %v4969_v0 }
 0x10c   :  { %7035 = vst [vmem:[#allocation270_spill] sm:$0xff] %v4974_v37  ;;  %v4999_v37 = vld [vmem:[%s6764_s2 + $0x474] sm:$0xf0] }
 0x10d   :  { %7036 = vst [vmem:[#allocation271_spill] sm:$0xff] %v4979_v24  ;;  %v5004_v24 = vld [vmem:[%s6764_s2 + $0x484] sm:$0xf] }
 0x10e   :  { %7037 = vst [vmem:[#allocation272_spill] sm:$0xff] %v4984_v4  ;;  %v5009_v4 = vld [vmem:[%s6764_s2 + $0x480] sm:$0xf] }
 0x10f   :  { %7038 = vst [vmem:[#allocation273_spill] sm:$0xff] %v4989_v16  ;;  %v5014_v16 = vld [vmem:[%s6764_s2 + $0x48c] sm:$0xf] }
 0x110   :  { %7039 = vst [vmem:[#allocation274_spill] sm:$0xff] %v4994_v50  ;;  %v5019_v50 = vld [vmem:[%s6764_s2 + $0x488] sm:$0xf] }
 0x111   :  { %7040 = vst [vmem:[#allocation275_spill] sm:$0xff] %v4999_v37  ;;  %v5024_v37 = vld [vmem:[%s6764_s2 + $0x494] sm:$0xf] }
 0x112   :  { %7041 = vst [vmem:[#allocation276_spill] sm:$0xff] %v5004_v24  ;;  %v5029_v24 = vld [vmem:[%s6764_s2 + $0x490] sm:$0xf] }
 0x113   :  { %7042 = vst [vmem:[#allocation277_spill] sm:$0xff] %v5009_v4 }
 0x114   :  { %7043 = vst [vmem:[#allocation278_spill] sm:$0xff] %v5014_v16  ;;  %v5039_v16 = vld [vmem:[%s6764_s2 + $0x498] sm:$0xf] }
 0x115   :  { %7044 = vst [vmem:[#allocation279_spill] sm:$0xff] %v5019_v50  ;;  %v5044_v50 = vld [vmem:[%s6764_s2 + $0x4a0] sm:$0xf0] }
 0x116   :  { %7045 = vst [vmem:[#allocation280_spill] sm:$0xff] %v5024_v37  ;;  %v5049_v37 = vld [vmem:[%s6764_s2 + $0x49c] sm:$0xf0] }
 0x117   :  { %7046 = vst [vmem:[#allocation281_spill] sm:$0xff] %v5029_v24  ;;  %v5054_v24 = vld [vmem:[%s6764_s2 + $0x4a8] sm:$0xf0] }
 0x118   :  { %7047 = vst [vmem:[#allocation282_spill] sm:$0xff] %v5034_v3  ;;  %v5059_v3 = vld [vmem:[%s6764_s2 + $0x4a4] sm:$0xf0] }
 0x119   :  { %7048 = vst [vmem:[#allocation283_spill] sm:$0xff] %v5039_v16  ;;  %v5064_v16 = vld [vmem:[%s6764_s2 + $0x4b0] sm:$0xf0] }
 0x11a   :  { %7049 = vst [vmem:[#allocation284_spill] sm:$0xff] %v5044_v50  ;;  %v5069_v50 = vld [vmem:[%s6764_s2 + $0x4ac] sm:$0xf0] }
 0x11b   :  { %7050 = vst [vmem:[#allocation285_spill] sm:$0xff] %v5054_v24  ;;  %v5079_v24 = vld [vmem:[%s6764_s2 + $0x4b4] sm:$0xf0] }
 0x11c   :  { %7051 = vst [vmem:[#allocation286_spill] sm:$0xff] %v5059_v3  ;;  %v5084_v3 = vld [vmem:[%s6764_s2 + $0x4c4] sm:$0xf] }
 0x11d   :  { %7052 = vst [vmem:[#allocation287_spill] sm:$0xff] %v5064_v16  ;;  %v5089_v16 = vld [vmem:[%s6764_s2 + $0x4c0] sm:$0xf] }
 0x11e   :  { %7053 = vst [vmem:[#allocation288_spill] sm:$0xff] %v5069_v50  ;;  %v5094_v50 = vld [vmem:[%s6764_s2 + $0x4cc] sm:$0xf] }
 0x11f   :  { %7054 = vst [vmem:[#allocation289_spill] sm:$0xff] %v5074_v32  ;;  %v5099_v32 = vld [vmem:[%s6764_s2 + $0x4c8] sm:$0xf] }
 0x120   :  { %7055 = vst [vmem:[#allocation290_spill] sm:$0xff] %v5079_v24  ;;  %v5104_v24 = vld [vmem:[%s6764_s2 + $0x4d4] sm:$0xf] }
 0x121   :  { %7056 = vst [vmem:[#allocation291_spill] sm:$0xff] %v5084_v3  ;;  %v5114_v3 = vld [vmem:[%s6764_s2 + $0x4dc] sm:$0xf] }
 0x122   :  { %7057 = vst [vmem:[#allocation292_spill] sm:$0xff] %v5089_v16 }
 0x123   :  { %7058 = vst [vmem:[#allocation293_spill] sm:$0xff] %v5094_v50  ;;  %v5119_v50 = vld [vmem:[%s6764_s2 + $0x4d8] sm:$0xf] }
 0x124   :  { %7059 = vst [vmem:[#allocation294_spill] sm:$0xff] %v5099_v32  ;;  %v5124_v32 = vld [vmem:[%s6764_s2 + $0x4e0] sm:$0xf0] }
 0x125   :  { %7060 = vst [vmem:[#allocation295_spill] sm:$0xff] %v5104_v24  ;;  %v5129_v24 = vld [vmem:[%s6764_s2 + $0x4dc] sm:$0xf0] }
 0x126   :  { %7061 = vst [vmem:[#allocation296_spill] sm:$0xff] %v5109_v40  ;;  %v5134_v40 = vld [vmem:[%s6764_s2 + $0x4e8] sm:$0xf0] }
 0x127   :  { %7062 = vst [vmem:[#allocation297_spill] sm:$0xff] %v5114_v3  ;;  %v5139_v3 = vld [vmem:[%s6764_s2 + $0x4e4] sm:$0xf0] }
 0x128   :  { %7063 = vst [vmem:[#allocation298_spill] sm:$0xff] %v5119_v50  ;;  %v5144_v50 = vld [vmem:[%s6764_s2 + $0x4f0] sm:$0xf0] }
 0x129   :  { %7064 = vst [vmem:[#allocation299_spill] sm:$0xff] %v5124_v32  ;;  %v5149_v32 = vld [vmem:[%s6764_s2 + $0x4ec] sm:$0xf0] }
 0x12a   :  { %7065 = vst [vmem:[#allocation300_spill] sm:$0xff] %v5129_v24 }
 0x12b   :  { %7066 = vst [vmem:[#allocation301_spill] sm:$0xff] %v5134_v40  ;;  %v5159_v40 = vld [vmem:[%s6764_s2 + $0x4f4] sm:$0xf0] }
 0x12c   :  { %7067 = vst [vmem:[#allocation302_spill] sm:$0xff] %v5139_v3  ;;  %v5164_v3 = vld [vmem:[%s6764_s2 + $0x504] sm:$0xf] }
 0x12d   :  { %7068 = vst [vmem:[#allocation303_spill] sm:$0xff] %v5144_v50  ;;  %v5169_v50 = vld [vmem:[%s6764_s2 + $0x500] sm:$0xf] }
 0x12e   :  { %7069 = vst [vmem:[#allocation304_spill] sm:$0xff] %v5149_v32  ;;  %v5174_v32 = vld [vmem:[%s6764_s2 + $0x50c] sm:$0xf] }
 0x12f   :  { %7070 = vst [vmem:[#allocation305_spill] sm:$0xff] %v5154_v27  ;;  %v5179_v27 = vld [vmem:[%s6764_s2 + $0x508] sm:$0xf] }
 0x130   :  { %7071 = vst [vmem:[#allocation306_spill] sm:$0xff] %v5159_v40  ;;  %v5184_v40 = vld [vmem:[%s6764_s2 + $0x514] sm:$0xf] }
 0x131   :  { %7072 = vst [vmem:[#allocation307_spill] sm:$0xff] %v5164_v3  ;;  %v5234_v3 = vld [vmem:[%s6764_s2 + $0x538] sm:$0xf0] }
 0x132   :  { %7073 = vst [vmem:[#allocation308_spill] sm:$0xff] %v5174_v32  ;;  %v5199_v32 = vld [vmem:[%s6764_s2 + $0x518] sm:$0xf] }
 0x133   :  { %7074 = vst [vmem:[#allocation309_spill] sm:$0xff] %v5179_v27  ;;  %v5204_v27 = vld [vmem:[%s6764_s2 + $0x520] sm:$0xf0] }
 0x134   :  { %7075 = vst [vmem:[#allocation310_spill] sm:$0xff] %v5184_v40  ;;  %v5209_v40 = vld [vmem:[%s6764_s2 + $0x51c] sm:$0xf0] }
 0x135   :  { %7076 = vst [vmem:[#allocation311_spill] sm:$0xff] %v5189_v12  ;;  %v5214_v12 = vld [vmem:[%s6764_s2 + $0x528] sm:$0xf0] }
 0x136   :  { %7077 = vst [vmem:[#allocation312_spill] sm:$0xff] %v5194_v48  ;;  %v5219_v48 = vld [vmem:[%s6764_s2 + $0x524] sm:$0xf0] }
 0x137   :  { %7078 = vst [vmem:[#allocation313_spill] sm:$0xff] %v5199_v32  ;;  %v5224_v32 = vld [vmem:[%s6764_s2 + $0x530] sm:$0xf0] }
 0x138   :  { %7079 = vst [vmem:[#allocation314_spill] sm:$0xff] %v5204_v27  ;;  %v5269_v27 = vld [vmem:[%s6764_s2 + $0x550] sm:$0xf] }
 0x139   :  { %7080 = vst [vmem:[#allocation315_spill] sm:$0xff] %v5214_v12  ;;  %v5239_v12 = vld [vmem:[%s6764_s2 + $0x534] sm:$0xf0] }
 0x13a   :  { %7081 = vst [vmem:[#allocation316_spill] sm:$0xff] %v5219_v48  ;;  %v5244_v48 = vld [vmem:[%s6764_s2 + $0x544] sm:$0xf] }
 0x13b   :  { %7082 = vst [vmem:[#allocation317_spill] sm:$0xff] %v5224_v32  ;;  %v5249_v32 = vld [vmem:[%s6764_s2 + $0x540] sm:$0xf] }
 0x13c   :  { %7083 = vst [vmem:[#allocation318_spill] sm:$0xff] %v5229_v56  ;;  %v5254_v56 = vld [vmem:[%s6764_s2 + $0x54c] sm:$0xf] }
 0x13d   :  { %7084 = vst [vmem:[#allocation319_spill] sm:$0xff] %v5234_v3  ;;  %v5259_v3 = vld [vmem:[%s6764_s2 + $0x548] sm:$0xf] }
 0x13e   :  { %7085 = vst [vmem:[#allocation320_spill] sm:$0xff] %v5239_v12  ;;  %v5264_v12 = vld [vmem:[%s6764_s2 + $0x554] sm:$0xf] }
 0x13f   :  { %7086 = vst [vmem:[#allocation321_spill] sm:$0xff] %v5244_v48  ;;  %v5354_v48 = vld [vmem:[%s6764_s2 + $0x59c] sm:$0xf] }
 0x140   :  { %7087 = vst [vmem:[#allocation322_spill] sm:$0xff] %v5254_v56  ;;  %v5279_v56 = vld [vmem:[%s6764_s2 + $0x558] sm:$0xf] }
 0x141   :  { %7088 = vst [vmem:[#allocation323_spill] sm:$0xff] %v5259_v3  ;;  %v5284_v3 = vld [vmem:[%s6764_s2 + $0x560] sm:$0xf0] }
 0x142   :  { %7089 = vst [vmem:[#allocation324_spill] sm:$0xff] %v5264_v12  ;;  %v5289_v12 = vld [vmem:[%s6764_s2 + $0x55c] sm:$0xf0] }
 0x143   :  { %7090 = vst [vmem:[#allocation325_spill] sm:$0xff] %v5269_v27  ;;  %v5294_v27 = vld [vmem:[%s6764_s2 + $0x568] sm:$0xf0] }
 0x144   :  { %7091 = vst [vmem:[#allocation326_spill] sm:$0xff] %v5274_v11  ;;  %v5299_v11 = vld [vmem:[%s6764_s2 + $0x564] sm:$0xf0] }
 0x145   :  { %7092 = vst [vmem:[#allocation327_spill] sm:$0xff] %v5279_v56  ;;  %v5304_v56 = vld [vmem:[%s6764_s2 + $0x570] sm:$0xf0] }
 0x146   :  { %7093 = vst [vmem:[#allocation328_spill] sm:$0xff] %v5284_v3  ;;  %v5389_v3 = vld [vmem:[%s6764_s2 + $0x5ac] sm:$0xf0] }
 0x147   :  { %7094 = vst [vmem:[#allocation329_spill] sm:$0xff] %v5289_v12 }
 0x148   :  { %7095 = vst [vmem:[#allocation330_spill] sm:$0xff] %v5294_v27  ;;  %v5319_v27 = vld [vmem:[%s6764_s2 + $0x574] sm:$0xf0] }
 0x149   :  { %7096 = vst [vmem:[#allocation331_spill] sm:$0xff] %v5299_v11  ;;  %v5324_v11 = vld [vmem:[%s6764_s2 + $0x584] sm:$0xf] }
 0x14a   :  { %7097 = vst [vmem:[#allocation332_spill] sm:$0xff] %v5304_v56  ;;  %v5329_v56 = vld [vmem:[%s6764_s2 + $0x580] sm:$0xf] }
 0x14b   :  { %7098 = vst [vmem:[#allocation333_spill] sm:$0xff] %v5309_v51  ;;  %v5334_v51 = vld [vmem:[%s6764_s2 + $0x58c] sm:$0xf] }
 0x14c   :  { %7099 = vst [vmem:[#allocation334_spill] sm:$0xff] %v5314_v6  ;;  %v5339_v6 = vld [vmem:[%s6764_s2 + $0x588] sm:$0xf] }
 0x14d   :  { %7100 = vst [vmem:[#allocation335_spill] sm:$0xff] %v5319_v27  ;;  %v5344_v27 = vld [vmem:[%s6764_s2 + $0x594] sm:$0xf] }
 0x14e   :  { %7101 = vst [vmem:[#allocation336_spill] sm:$0xff] %v5324_v11  ;;  %v5474_v11 = vld [vmem:[%s6764_s2 + $0x5f8] sm:$0xf0] }
 0x14f   :  { %7102 = vst [vmem:[#allocation337_spill] sm:$0xff] %v5334_v51  ;;  %v5359_v51 = vld [vmem:[%s6764_s2 + $0x598] sm:$0xf] }
 0x150   :  { %7103 = vst [vmem:[#allocation338_spill] sm:$0xff] %v5339_v6  ;;  %v5364_v6 = vld [vmem:[%s6764_s2 + $0x5a0] sm:$0xf0] }
 0x151   :  { %7104 = vst [vmem:[#allocation339_spill] sm:$0xff] %v5344_v27  ;;  %v5369_v27 = vld [vmem:[%s6764_s2 + $0x59c] sm:$0xf0] }
 0x152   :  { %7105 = vst [vmem:[#allocation340_spill] sm:$0xff] %v5349_v15  ;;  %v5374_v15 = vld [vmem:[%s6764_s2 + $0x5a8] sm:$0xf0] }
 0x153   :  { %7106 = vst [vmem:[#allocation341_spill] sm:$0xff] %v5354_v48  ;;  %v5379_v48 = vld [vmem:[%s6764_s2 + $0x5a4] sm:$0xf0] }
 0x154   :  { %7107 = vst [vmem:[#allocation342_spill] sm:$0xff] %v5359_v51  ;;  %v5384_v51 = vld [vmem:[%s6764_s2 + $0x5b0] sm:$0xf0] }
 0x155   :  { %7108 = vst [vmem:[#allocation343_spill] sm:$0xff] %v5364_v6  ;;  %v5514_v6 = vld [vmem:[%s6764_s2 + $0x61c] sm:$0xf] }
 0x156   :  { %7109 = vst [vmem:[#allocation344_spill] sm:$0xff] %v5369_v27 }
 0x157   :  { %7110 = vst [vmem:[#allocation345_spill] sm:$0xff] %v5374_v15  ;;  %v5399_v15 = vld [vmem:[%s6764_s2 + $0x5b4] sm:$0xf0] }
 0x158   :  { %7111 = vst [vmem:[#allocation346_spill] sm:$0xff] %v5379_v48  ;;  %v5404_v48 = vld [vmem:[%s6764_s2 + $0x5c4] sm:$0xf] }
 0x159   :  { %7112 = vst [vmem:[#allocation347_spill] sm:$0xff] %v5384_v51  ;;  %v5409_v51 = vld [vmem:[%s6764_s2 + $0x5c0] sm:$0xf] }
 0x15a   :  { %7113 = vst [vmem:[#allocation348_spill] sm:$0xff] %v5389_v3  ;;  %v5414_v3 = vld [vmem:[%s6764_s2 + $0x5cc] sm:$0xf] }
 0x15b   :  { %7114 = vst [vmem:[#allocation349_spill] sm:$0xff] %v5394_v59  ;;  %v5419_v59 = vld [vmem:[%s6764_s2 + $0x5c8] sm:$0xf] }
 0x15c   :  { %7115 = vst [vmem:[#allocation350_spill] sm:$0xff] %v5399_v15  ;;  %v5424_v15 = vld [vmem:[%s6764_s2 + $0x5d4] sm:$0xf] }
 0x15d   :  { %7116 = vst [vmem:[#allocation351_spill] sm:$0xff] %v5404_v48  ;;  %v5714_v48 = vld [vmem:[%s6764_s2 + $0x6b8] sm:$0xf0] }
 0x15e   :  { %7117 = vst [vmem:[#allocation352_spill] sm:$0xff] %v5414_v3  ;;  %v5439_v3 = vld [vmem:[%s6764_s2 + $0x5d8] sm:$0xf] }
 0x15f   :  { %7118 = vst [vmem:[#allocation353_spill] sm:$0xff] %v5419_v59  ;;  %v5444_v59 = vld [vmem:[%s6764_s2 + $0x5e0] sm:$0xf0] }
 0x160   :  { %7119 = vst [vmem:[#allocation354_spill] sm:$0xff] %v5424_v15  ;;  %v5449_v15 = vld [vmem:[%s6764_s2 + $0x5dc] sm:$0xf0] }
 0x161   :  { %7120 = vst [vmem:[#allocation355_spill] sm:$0xff] %v5429_v54  ;;  %v5454_v54 = vld [vmem:[%s6764_s2 + $0x5e8] sm:$0xf0] }
 0x162   :  { %7121 = vst [vmem:[#allocation356_spill] sm:$0xff] %v5434_v55  ;;  %v5459_v55 = vld [vmem:[%s6764_s2 + $0x5e4] sm:$0xf0] }
 0x163   :  { %7122 = vst [vmem:[#allocation357_spill] sm:$0xff] %v5439_v3  ;;  %v5464_v3 = vld [vmem:[%s6764_s2 + $0x5f0] sm:$0xf0] }
 0x164   :  { %7123 = vst [vmem:[#allocation358_spill] sm:$0xff] %v5444_v59  ;;  %v5754_v59 = vld [vmem:[%s6764_s2 + $0x6dc] sm:$0xf] }
 0x165   :  { %7124 = vst [vmem:[#allocation359_spill] sm:$0xff] %v5449_v15 }
 0x166   :  { %7125 = vst [vmem:[#allocation360_spill] sm:$0xff] %v5454_v54  ;;  %v5479_v54 = vld [vmem:[%s6764_s2 + $0x5f4] sm:$0xf0] }
 0x167   :  { %7126 = vst [vmem:[#allocation361_spill] sm:$0xff] %v5459_v55  ;;  %v5484_v55 = vld [vmem:[%s6764_s2 + $0x604] sm:$0xf] }
 0x168   :  { %7127 = vst [vmem:[#allocation362_spill] sm:$0xff] %v5464_v3  ;;  %v5489_v3 = vld [vmem:[%s6764_s2 + $0x600] sm:$0xf] }
 0x169   :  { %7128 = vst [vmem:[#allocation363_spill] sm:$0xff] %v5469_v36  ;;  %v5494_v36 = vld [vmem:[%s6764_s2 + $0x60c] sm:$0xf] }
 0x16a   :  { %7129 = vst [vmem:[#allocation364_spill] sm:$0xff] %v5474_v11  ;;  %v5499_v11 = vld [vmem:[%s6764_s2 + $0x608] sm:$0xf] }
 0x16b   :  { %7130 = vst [vmem:[#allocation365_spill] sm:$0xff] %v5479_v54  ;;  %v5504_v54 = vld [vmem:[%s6764_s2 + $0x614] sm:$0xf] }
 0x16c   :  { %7131 = vst [vmem:[#allocation366_spill] sm:$0xff] %v5484_v55  ;;  %v5509_v55 = vld [vmem:[%s6764_s2 + $0x610] sm:$0xf] }
 0x16d   :  { %7132 = vst [vmem:[#allocation367_spill] sm:$0xff] %v5489_v3  ;;  %v5994_v3 = vld [vmem:[%s6764_s2 + $0x79c] sm:$0xf] }
 0x16e   :  { %7133 = vst [vmem:[#allocation368_spill] sm:$0xff] %v5494_v36  ;;  %v5519_v36 = vld [vmem:[%s6764_s2 + $0x618] sm:$0xf] }
 0x16f   :  { %7134 = vst [vmem:[#allocation369_spill] sm:$0xff] %v5499_v11  ;;  %v5524_v11 = vld [vmem:[%s6764_s2 + $0x620] sm:$0xf0] }
 0x170   :  { %7135 = vst [vmem:[#allocation370_spill] sm:$0xff] %v5504_v54  ;;  %v5529_v54 = vld [vmem:[%s6764_s2 + $0x61c] sm:$0xf0] }
 0x171   :  { %7136 = vst [vmem:[#allocation371_spill] sm:$0xff] %v5509_v55  ;;  %v5534_v55 = vld [vmem:[%s6764_s2 + $0x628] sm:$0xf0] }
 0x172   :  { %7137 = vst [vmem:[#allocation372_spill] sm:$0xff] %v5514_v6  ;;  %v5539_v6 = vld [vmem:[%s6764_s2 + $0x624] sm:$0xf0] }
 0x173   :  { %7138 = vst [vmem:[#allocation373_spill] sm:$0xff] %v5519_v36  ;;  %v5544_v36 = vld [vmem:[%s6764_s2 + $0x630] sm:$0xf0] }
 0x174   :  { %7139 = vst [vmem:[#allocation374_spill] sm:$0xff] %v5524_v11  ;;  %v5549_v11 = vld [vmem:[%s6764_s2 + $0x62c] sm:$0xf0] }
 0x175   :  { %7140 = vst [vmem:[#allocation375_spill] sm:$0xff] %v5529_v54  ;;  %v5954_v54 = vld [vmem:[%s6764_s2 + $0x778] sm:$0xf0] }
 0x176   :  { %7141 = vst [vmem:[#allocation376_spill] sm:$0xff] %v5534_v55  ;;  %v5559_v55 = vld [vmem:[%s6764_s2 + $0x634] sm:$0xf0] }
 0x177   :  { %7142 = vst [vmem:[#allocation377_spill] sm:$0xff] %v5539_v6  ;;  %v5564_v6 = vld [vmem:[%s6764_s2 + $0x644] sm:$0xf] }
 0x178   :  { %7143 = vst [vmem:[#allocation378_spill] sm:$0xff] %v5544_v36  ;;  %v5569_v36 = vld [vmem:[%s6764_s2 + $0x640] sm:$0xf] }
 0x179   :  { %7144 = vst [vmem:[#allocation379_spill] sm:$0xff] %v5549_v11  ;;  %v5574_v11 = vld [vmem:[%s6764_s2 + $0x64c] sm:$0xf] }
 0x17a   :  { %7145 = vst [vmem:[#allocation380_spill] sm:$0xff] %v5554_v20  ;;  %v5579_v20 = vld [vmem:[%s6764_s2 + $0x648] sm:$0xf] }
 0x17b   :  { %7146 = vst [vmem:[#allocation381_spill] sm:$0xff] %v5559_v55  ;;  %v5584_v55 = vld [vmem:[%s6764_s2 + $0x654] sm:$0xf] }
 0x17c   :  { %7147 = vst [vmem:[#allocation382_spill] sm:$0xff] %v5564_v6  ;;  %v5589_v6 = vld [vmem:[%s6764_s2 + $0x650] sm:$0xf] }
 0x17d   :  { %7148 = vst [vmem:[#allocation383_spill] sm:$0xff] %v5574_v11  ;;  %v5599_v11 = vld [vmem:[%s6764_s2 + $0x658] sm:$0xf] }
 0x17e   :  { %7149 = vst [vmem:[#allocation384_spill] sm:$0xff] %v5579_v20  ;;  %v5604_v20 = vld [vmem:[%s6764_s2 + $0x660] sm:$0xf0] }
 0x17f   :  { %7150 = vst [vmem:[#allocation385_spill] sm:$0xff] %v5584_v55  ;;  %v5609_v55 = vld [vmem:[%s6764_s2 + $0x65c] sm:$0xf0] }
 0x180   :  { %7151 = vst [vmem:[#allocation386_spill] sm:$0xff] %v5589_v6  ;;  %v5614_v6 = vld [vmem:[%s6764_s2 + $0x668] sm:$0xf0] }
 0x181   :  { %7152 = vst [vmem:[#allocation387_spill] sm:$0xff] %v5594_v29  ;;  %v5619_v29 = vld [vmem:[%s6764_s2 + $0x664] sm:$0xf0] }
 0x182   :  { %7153 = vst [vmem:[#allocation388_spill] sm:$0xff] %v5599_v11  ;;  %v5624_v11 = vld [vmem:[%s6764_s2 + $0x670] sm:$0xf0] }
 0x183   :  { %7154 = vst [vmem:[#allocation389_spill] sm:$0xff] %v5604_v20  ;;  %v5629_v20 = vld [vmem:[%s6764_s2 + $0x66c] sm:$0xf0] }
 0x184   :  { %7155 = vst [vmem:[#allocation390_spill] sm:$0xff] %v5614_v6  ;;  %v5639_v6 = vld [vmem:[%s6764_s2 + $0x674] sm:$0xf0] }
 0x185   :  { %7156 = vst [vmem:[#allocation391_spill] sm:$0xff] %v5619_v29  ;;  %v5644_v29 = vld [vmem:[%s6764_s2 + $0x684] sm:$0xf] }
 0x186   :  { %7157 = vst [vmem:[#allocation392_spill] sm:$0xff] %v5624_v11  ;;  %v5649_v11 = vld [vmem:[%s6764_s2 + $0x680] sm:$0xf] }
 0x187   :  { %7158 = vst [vmem:[#allocation393_spill] sm:$0xff] %v5629_v20  ;;  %v5654_v20 = vld [vmem:[%s6764_s2 + $0x68c] sm:$0xf] }
 0x188   :  { %7159 = vst [vmem:[#allocation394_spill] sm:$0xff] %v5634_v63  ;;  %v5659_v63 = vld [vmem:[%s6764_s2 + $0x688] sm:$0xf] }
 0x189   :  { %7160 = vst [vmem:[#allocation395_spill] sm:$0xff] %v5639_v6  ;;  %v5664_v6 = vld [vmem:[%s6764_s2 + $0x694] sm:$0xf] }
 0x18a   :  { %7161 = vst [vmem:[#allocation396_spill] sm:$0xff] %v5644_v29  ;;  %v5669_v29 = vld [vmem:[%s6764_s2 + $0x690] sm:$0xf] }
 0x18b   :  { %7162 = vst [vmem:[#allocation397_spill] sm:$0xff] %v5649_v11 }
 0x18c   :  { %7163 = vst [vmem:[#allocation398_spill] sm:$0xff] %v5654_v20  ;;  %v5679_v20 = vld [vmem:[%s6764_s2 + $0x698] sm:$0xf] }
 0x18d   :  { %7164 = vst [vmem:[#allocation399_spill] sm:$0xff] %v5659_v63  ;;  %v5684_v63 = vld [vmem:[%s6764_s2 + $0x6a0] sm:$0xf0] }
 0x18e   :  { %7165 = vst [vmem:[#allocation400_spill] sm:$0xff] %v5664_v6  ;;  %v5689_v6 = vld [vmem:[%s6764_s2 + $0x69c] sm:$0xf0] }
 0x18f   :  { %7166 = vst [vmem:[#allocation401_spill] sm:$0xff] %v5669_v29  ;;  %v5694_v29 = vld [vmem:[%s6764_s2 + $0x6a8] sm:$0xf0] }
 0x190   :  { %7167 = vst [vmem:[#allocation402_spill] sm:$0xff] %v5674_v45  ;;  %v5699_v45 = vld [vmem:[%s6764_s2 + $0x6a4] sm:$0xf0] }
 0x191   :  { %7168 = vst [vmem:[#allocation403_spill] sm:$0xff] %v5679_v20  ;;  %v5704_v20 = vld [vmem:[%s6764_s2 + $0x6b0] sm:$0xf0] }
 0x192   :  { %7169 = vst [vmem:[#allocation404_spill] sm:$0xff] %v5684_v63  ;;  %v5709_v63 = vld [vmem:[%s6764_s2 + $0x6ac] sm:$0xf0] }
 0x193   :  { %7170 = vst [vmem:[#allocation405_spill] sm:$0xff] %v5689_v6 }
 0x194   :  { %7171 = vst [vmem:[#allocation406_spill] sm:$0xff] %v5694_v29  ;;  %v5719_v29 = vld [vmem:[%s6764_s2 + $0x6b4] sm:$0xf0] }
 0x195   :  { %7172 = vst [vmem:[#allocation407_spill] sm:$0xff] %v5699_v45  ;;  %v5724_v45 = vld [vmem:[%s6764_s2 + $0x6c4] sm:$0xf] }
 0x196   :  { %7173 = vst [vmem:[#allocation408_spill] sm:$0xff] %v5704_v20  ;;  %v5729_v20 = vld [vmem:[%s6764_s2 + $0x6c0] sm:$0xf] }
 0x197   :  { %7174 = vst [vmem:[#allocation409_spill] sm:$0xff] %v5709_v63  ;;  %v5734_v63 = vld [vmem:[%s6764_s2 + $0x6cc] sm:$0xf] }
 0x198   :  { %7175 = vst [vmem:[#allocation410_spill] sm:$0xff] %v5714_v48  ;;  %v5739_v48 = vld [vmem:[%s6764_s2 + $0x6c8] sm:$0xf] }
 0x199   :  { %7176 = vst [vmem:[#allocation411_spill] sm:$0xff] %v5719_v29  ;;  %v5744_v29 = vld [vmem:[%s6764_s2 + $0x6d4] sm:$0xf] }
 0x19a   :  { %7177 = vst [vmem:[#allocation412_spill] sm:$0xff] %v5724_v45  ;;  %v5749_v45 = vld [vmem:[%s6764_s2 + $0x6d0] sm:$0xf] }
 0x19b   :  { %7178 = vst [vmem:[#allocation413_spill] sm:$0xff] %v5729_v20 }
 0x19c   :  { %7179 = vst [vmem:[#allocation414_spill] sm:$0xff] %v5734_v63  ;;  %v5759_v63 = vld [vmem:[%s6764_s2 + $0x6d8] sm:$0xf] }
 0x19d   :  { %7180 = vst [vmem:[#allocation415_spill] sm:$0xff] %v5739_v48  ;;  %v5764_v48 = vld [vmem:[%s6764_s2 + $0x6e0] sm:$0xf0] }
 0x19e   :  { %7181 = vst [vmem:[#allocation416_spill] sm:$0xff] %v5744_v29  ;;  %v5769_v29 = vld [vmem:[%s6764_s2 + $0x6dc] sm:$0xf0] }
 0x19f   :  { %7182 = vst [vmem:[#allocation417_spill] sm:$0xff] %v5749_v45  ;;  %v5774_v45 = vld [vmem:[%s6764_s2 + $0x6e8] sm:$0xf0] }
 0x1a0   :  { %7183 = vst [vmem:[#allocation418_spill] sm:$0xff] %v5754_v59  ;;  %v5779_v59 = vld [vmem:[%s6764_s2 + $0x6e4] sm:$0xf0] }
 0x1a1   :  { %7184 = vst [vmem:[#allocation419_spill] sm:$0xff] %v5759_v63  ;;  %v5784_v63 = vld [vmem:[%s6764_s2 + $0x6f0] sm:$0xf0] }
 0x1a2   :  { %7185 = vst [vmem:[#allocation420_spill] sm:$0xff] %v5764_v48  ;;  %v5789_v48 = vld [vmem:[%s6764_s2 + $0x6ec] sm:$0xf0] }
 0x1a3   :  { %7186 = vst [vmem:[#allocation421_spill] sm:$0xff] %v5774_v45  ;;  %v5799_v45 = vld [vmem:[%s6764_s2 + $0x6f4] sm:$0xf0] }
 0x1a4   :  { %7187 = vst [vmem:[#allocation422_spill] sm:$0xff] %v5779_v59  ;;  %v5804_v59 = vld [vmem:[%s6764_s2 + $0x704] sm:$0xf] }
 0x1a5   :  { %7188 = vst [vmem:[#allocation423_spill] sm:$0xff] %v5784_v63  ;;  %v5809_v63 = vld [vmem:[%s6764_s2 + $0x700] sm:$0xf] }
 0x1a6   :  { %7189 = vst [vmem:[#allocation424_spill] sm:$0xff] %v5789_v48  ;;  %v5814_v48 = vld [vmem:[%s6764_s2 + $0x70c] sm:$0xf] }
 0x1a7   :  { %7190 = vst [vmem:[#allocation425_spill] sm:$0xff] %v5794_v61  ;;  %v5819_v61 = vld [vmem:[%s6764_s2 + $0x708] sm:$0xf] }
 0x1a8   :  { %7191 = vst [vmem:[#allocation426_spill] sm:$0xff] %v5799_v45  ;;  %v5824_v45 = vld [vmem:[%s6764_s2 + $0x714] sm:$0xf] }
 0x1a9   :  { %7192 = vst [vmem:[#allocation427_spill] sm:$0xff] %v5804_v59  ;;  %v5829_v59 = vld [vmem:[%s6764_s2 + $0x710] sm:$0xf] }
 0x1aa   :  { %7193 = vst [vmem:[#allocation428_spill] sm:$0xff] %v5814_v48  ;;  %v5839_v48 = vld [vmem:[%s6764_s2 + $0x718] sm:$0xf] }
 0x1ab   :  { %7194 = vst [vmem:[#allocation429_spill] sm:$0xff] %v5819_v61  ;;  %v5844_v61 = vld [vmem:[%s6764_s2 + $0x720] sm:$0xf0] }
 0x1ac   :  { %7195 = vst [vmem:[#allocation430_spill] sm:$0xff] %v5824_v45  ;;  %v5849_v45 = vld [vmem:[%s6764_s2 + $0x71c] sm:$0xf0] }
 0x1ad   :  { %7196 = vst [vmem:[#allocation431_spill] sm:$0xff] %v5829_v59  ;;  %v5854_v59 = vld [vmem:[%s6764_s2 + $0x728] sm:$0xf0] }
 0x1ae   :  { %7197 = vst [vmem:[#allocation432_spill] sm:$0xff] %v5834_v34  ;;  %v5859_v34 = vld [vmem:[%s6764_s2 + $0x724] sm:$0xf0] }
 0x1af   :  { %7198 = vst [vmem:[#allocation433_spill] sm:$0xff] %v5839_v48  ;;  %v5864_v48 = vld [vmem:[%s6764_s2 + $0x730] sm:$0xf0] }
 0x1b0   :  { %7199 = vst [vmem:[#allocation434_spill] sm:$0xff] %v5844_v61  ;;  %v5869_v61 = vld [vmem:[%s6764_s2 + $0x72c] sm:$0xf0] }
 0x1b1   :  { %7200 = vst [vmem:[#allocation435_spill] sm:$0xff] %v5854_v59  ;;  %v5879_v59 = vld [vmem:[%s6764_s2 + $0x734] sm:$0xf0] }
 0x1b2   :  { %7201 = vst [vmem:[#allocation436_spill] sm:$0xff] %v5859_v34  ;;  %v5884_v34 = vld [vmem:[%s6764_s2 + $0x744] sm:$0xf] }
 0x1b3   :  { %7202 = vst [vmem:[#allocation437_spill] sm:$0xff] %v5864_v48  ;;  %v5889_v48 = vld [vmem:[%s6764_s2 + $0x740] sm:$0xf] }
 0x1b4   :  { %7203 = vst [vmem:[#allocation438_spill] sm:$0xff] %v5869_v61  ;;  %v5894_v61 = vld [vmem:[%s6764_s2 + $0x74c] sm:$0xf] }
 0x1b5   :  { %7204 = vst [vmem:[#allocation439_spill] sm:$0xff] %v5874_v46  ;;  %v5899_v46 = vld [vmem:[%s6764_s2 + $0x748] sm:$0xf] }
 0x1b6   :  { %7205 = vst [vmem:[#allocation440_spill] sm:$0xff] %v5879_v59  ;;  %v5904_v59 = vld [vmem:[%s6764_s2 + $0x754] sm:$0xf] }
 0x1b7   :  { %7206 = vst [vmem:[#allocation441_spill] sm:$0xff] %v5884_v34  ;;  %v5909_v34 = vld [vmem:[%s6764_s2 + $0x750] sm:$0xf] }
 0x1b8   :  { %7207 = vst [vmem:[#allocation442_spill] sm:$0xff] %v5894_v61  ;;  %v5919_v61 = vld [vmem:[%s6764_s2 + $0x758] sm:$0xf] }
 0x1b9   :  { %7208 = vst [vmem:[#allocation443_spill] sm:$0xff] %v5899_v46  ;;  %v5924_v46 = vld [vmem:[%s6764_s2 + $0x760] sm:$0xf0] }
 0x1ba   :  { %7209 = vst [vmem:[#allocation444_spill] sm:$0xff] %v5904_v59  ;;  %v5929_v59 = vld [vmem:[%s6764_s2 + $0x75c] sm:$0xf0] }
 0x1bb   :  { %7210 = vst [vmem:[#allocation445_spill] sm:$0xff] %v5909_v34  ;;  %v5934_v34 = vld [vmem:[%s6764_s2 + $0x768] sm:$0xf0] }
 0x1bc   :  { %7211 = vst [vmem:[#allocation446_spill] sm:$0xff] %v5914_v2  ;;  %v5939_v2 = vld [vmem:[%s6764_s2 + $0x764] sm:$0xf0] }
 0x1bd   :  { %7212 = vst [vmem:[#allocation447_spill] sm:$0xff] %v5919_v61  ;;  %v5944_v61 = vld [vmem:[%s6764_s2 + $0x770] sm:$0xf0] }
 0x1be   :  { %7213 = vst [vmem:[#allocation448_spill] sm:$0xff] %v5924_v46  ;;  %v5949_v46 = vld [vmem:[%s6764_s2 + $0x76c] sm:$0xf0] }
 0x1bf   :  { %7214 = vst [vmem:[#allocation449_spill] sm:$0xff] %v5934_v34  ;;  %v5959_v34 = vld [vmem:[%s6764_s2 + $0x774] sm:$0xf0] }
 0x1c0   :  { %7215 = vst [vmem:[#allocation450_spill] sm:$0xff] %v5939_v2  ;;  %v5964_v2 = vld [vmem:[%s6764_s2 + $0x784] sm:$0xf] }
 0x1c1   :  { %7216 = vst [vmem:[#allocation451_spill] sm:$0xff] %v5944_v61  ;;  %v5969_v61 = vld [vmem:[%s6764_s2 + $0x780] sm:$0xf] }
 0x1c2   :  { %7217 = vst [vmem:[#allocation452_spill] sm:$0xff] %v5949_v46  ;;  %v5974_v46 = vld [vmem:[%s6764_s2 + $0x78c] sm:$0xf] }
 0x1c3   :  { %7218 = vst [vmem:[#allocation453_spill] sm:$0xff] %v5954_v54  ;;  %v5979_v54 = vld [vmem:[%s6764_s2 + $0x788] sm:$0xf] }
 0x1c4   :  { %7219 = vst [vmem:[#allocation454_spill] sm:$0xff] %v5959_v34  ;;  %v5984_v34 = vld [vmem:[%s6764_s2 + $0x794] sm:$0xf] }
 0x1c5   :  { %7220 = vst [vmem:[#allocation455_spill] sm:$0xff] %v5964_v2  ;;  %v5989_v2 = vld [vmem:[%s6764_s2 + $0x790] sm:$0xf] }
 0x1c6   :  { %7221 = vst [vmem:[#allocation456_spill] sm:$0xff] %v5974_v46  ;;  %v5999_v46 = vld [vmem:[%s6764_s2 + $0x798] sm:$0xf] }
 0x1c7   :  { %7222 = vst [vmem:[#allocation457_spill] sm:$0xff] %v5979_v54  ;;  %v6004_v54 = vld [vmem:[%s6764_s2 + $0x7a0] sm:$0xf0] }
 0x1c8   :  { %7223 = vst [vmem:[#allocation458_spill] sm:$0xff] %v5984_v34  ;;  %v6009_v34 = vld [vmem:[%s6764_s2 + $0x79c] sm:$0xf0] }
 0x1c9   :  { %7224 = vst [vmem:[#allocation459_spill] sm:$0xff] %v5989_v2  ;;  %v6014_v2 = vld [vmem:[%s6764_s2 + $0x7a8] sm:$0xf0] }
 0x1ca   :  { %7225 = vst [vmem:[#allocation460_spill] sm:$0xff] %v5994_v3  ;;  %v6019_v3 = vld [vmem:[%s6764_s2 + $0x7a4] sm:$0xf0] }
 0x1cb   :  { %7226 = vst [vmem:[#allocation461_spill] sm:$0xff] %v5999_v46  ;;  %v6024_v46 = vld [vmem:[%s6764_s2 + $0x7b0] sm:$0xf0] }
 0x1cc   :  { %7227 = vst [vmem:[#allocation462_spill] sm:$0xff] %v6004_v54  ;;  %v6029_v54 = vld [vmem:[%s6764_s2 + $0x7ac] sm:$0xf0] }
 0x1cd   :  { %7228 = vst [vmem:[#allocation463_spill] sm:$0xff] %v6014_v2  ;;  %v6039_v2 = vld [vmem:[%s6764_s2 + $0x7b4] sm:$0xf0] }
 0x1ce   :  { %7229 = vst [vmem:[#allocation464_spill] sm:$0xff] %v6019_v3  ;;  %v6044_v3 = vld [vmem:[%s6764_s2 + $0x7c4] sm:$0xf] }
 0x1cf   :  { %7230 = vst [vmem:[#allocation465_spill] sm:$0xff] %v6024_v46  ;;  %v6049_v46 = vld [vmem:[%s6764_s2 + $0x7c0] sm:$0xf] }
 0x1d0   :  { %7231 = vst [vmem:[#allocation466_spill] sm:$0xff] %v6029_v54  ;;  %v6054_v54 = vld [vmem:[%s6764_s2 + $0x7cc] sm:$0xf] }
 0x1d1   :  { %7232 = vst [vmem:[#allocation467_spill] sm:$0xff] %v6034_v58  ;;  %v6059_v58 = vld [vmem:[%s6764_s2 + $0x7c8] sm:$0xf] }
 0x1d2   :  { %7233 = vst [vmem:[#allocation468_spill] sm:$0xff] %v6039_v2  ;;  %v6064_v2 = vld [vmem:[%s6764_s2 + $0x7d4] sm:$0xf] }
 0x1d3   :  { %7234 = vst [vmem:[#allocation469_spill] sm:$0xff] %v6044_v3  ;;  %v271_v3 = vlaneseq }
 0x1d4   :  { %7235 = vst [vmem:[#allocation470_spill] sm:$0xff] %v6054_v54  ;;  %v6074_v54 = vld [vmem:[%s6764_s2 + $0x7dc] sm:$0xf] }
 0x1d5   :  { %7236 = vst [vmem:[#allocation471_spill] sm:$0xff] %v6059_v58  ;;  %v6079_v58 = vld [vmem:[%s6764_s2 + $0x7d8] sm:$0xf] }
 0x1d6   :  { %7237 = vst [vmem:[#allocation472_spill] sm:$0xff] %v6064_v2  ;;  %v6084_v2 = vld [vmem:[%s6764_s2 + $0x7e0] sm:$0xf0] }
 0x1d7   :  { %7238 = vst [vmem:[#allocation473_spill] sm:$0xff] %v6069_v53  ;;  %v6094_v53 = vld [vmem:[%s6764_s2 + $0x7e8] sm:$0xf0] }
 0x1d8   :  { %7239 = vst [vmem:[#allocation474_spill] sm:$0xff] %v6074_v54  ;;  %v6099_v54 = vld [vmem:[%s6764_s2 + $0x7e4] sm:$0xf0] }
 0x1d9   :  { %7240 = vst [vmem:[#allocation475_spill] sm:$0xff] %v6079_v58  ;;  %v6104_v58 = vld [vmem:[%s6764_s2 + $0x7f0] sm:$0xf0] }
 0x1da   :  { %7241 = vst [vmem:[#allocation476_spill] sm:$0xff] %v6084_v2  ;;  %v6109_v2 = vld [vmem:[%s6764_s2 + $0x7ec] sm:$0xf0] }
 0x1db   :  { %7242 = vst [vmem:[#allocation477_spill] sm:$0xff] %v6089_v26 }
 0x1dc   :  { %7243 = vst [vmem:[#allocation478_spill] sm:$0xff] %v6094_v53  ;;  %v6119_v53 = vld [vmem:[%s6764_s2 + $0x7f4] sm:$0xf0] }
 0x1dd   :  { %7244 = vst [vmem:[#allocation479_spill] sm:$0xff] %v6099_v54  ;;  %v6124_v54 = vld [vmem:[%s6766_s1] sm:$0xff] }
 0x1de   :  { %7245 = vst [vmem:[#allocation480_spill] sm:$0xff] %v6104_v58  ;;  %v272_v58 = vshrl.u32 %v271_v3, 7 }
 0x1df   :  { %7246 = vst [vmem:[#allocation481_spill] sm:$0xff] %v6109_v2 }
 0x1e0   :  { %7247 = vst [vmem:[#allocation482_spill] sm:$0xff] %v6114_v5  ;;  %vm273_vm0 = vcmp.lt.s32.totalorder %v272_v58, 4 }
 0x1e1   :  { %7248 = vst [vmem:[#allocation483_spill] sm:$0xff] %v6119_v53  ;;  %v6126_v2 = vsel %vm273_vm0, 1.0, %v3538_v9 }
 0x1e2   :  { %277 = vst [vmem:[#allocation2] sm:$0xff] %v3538_v9 }
 0x1e3   :  { %7249 = vst [vmem:[#allocation484_spill] sm:$0xff] %v6126_v2 }
 0x1e4   :  { %278 = vst [vmem:[#allocation2 + $0x8] sm:$0xff] %v3538_v9 }
 0x1e5   :  { %279 = vst [vmem:[#allocation3 + $0x8] sm:$0xff] %v3538_v9 }
 0x1e6   :  { %280 = vst [vmem:[#allocation3] sm:$0xff] %v3538_v9 }
 0x1e7 LB: > { %v7251_v21 = vld [vmem:[#allocation110_spill] sm:$0xff]  ;;  %v7252_v38 = vld [vmem:[#allocation237_spill] sm:$0xff]  ;;  %v7253_v15 = vld [vmem:[#allocation359_spill] sm:$0xff]  ;;  %v2644_v53 = vor.u32 %v4729_v30, %v4689_v35  ;;  %s2140_s1 = scvt.s32.f32 %s3536_s12  ;;  %s3482_s2 = sshll.u32 %s3536_s12, 6  ;;  %s3536_s12 = sphi %s6129_s12, %s286_s12  }
 0x1e8   : > { %v2420_v3 = vor.u32 %v4169_v47, %v7251_v21  ;;  %v2676_v58 = vor.u32 %v7252_v38, %v4769_v39  ;;  %v2932_v5 = vor.u32 %v7253_v15, %v5409_v51  ;;  %v7254_v26 = vld [vmem:[#allocation477_spill] sm:$0xff]  ;;  %v7255_v23 = vld [vmem:[#allocation102_spill] sm:$0xff]  ;;  %v7256_v27 = vld [vmem:[#allocation344_spill] sm:$0xff]  ;;  %v3156_v38 = vor.u32 %v6009_v34, %v5969_v61  ;;  %s6698_s15 = scalar_lea.vmem %s6763_s0, %s3482_s2  ;;  %s3483_s16 = sshll.u32 %s3536_s12, 4 }
 0x1e9   : > { %v3188_v1 = vor.u32 %v7254_v26, %v6049_v46  ;;  %v2388_v9 = vor.u32 %v7255_v23, %v4049_v28  ;;  %v2900_v21 = vor.u32 %v7256_v27, %v5329_v56  ;;  %v7257_v12 = vld [vmem:[#allocation329_spill] sm:$0xff]  ;;  %v7260_v13 = vld [vmem:[#allocation186_spill] sm:$0xff]  ;;  %v7263_v16 = vld [vmem:[#allocation292_spill] sm:$0xff]  ;;  %s6752_s19 = scalar_lea.vmem %s6765_s3, %s3483_s16  ;;  %s286_s12 = sadd.s32 1, %s3536_s12  }
 0x1ea   : > { %v7250_v2 = vld [vmem:[#allocation484_spill] sm:$0xff]  ;;  %1590 = vmatpush.bf16.msra.mxu0 %v2420_v3  ;;  %1603 = vmatpush.bf16.msra.mxu1 %v2676_v58  ;;  %v2356_v3 = vor.u32 %v4009_v44, %v3969_v62  ;;  %v2612_v58 = vor.u32 %v4649_v31, %v4609_v43  ;;  %v7258_v14 = vld [vmem:[#allocation65_spill] sm:$0xff]  ;;  %v7261_v19 = vld [vmem:[#allocation194_spill] sm:$0xff]  ;;  %p283_p0 = scmp.ge.s32.totalorder %s286_s12, 8  }
 0x1eb   : > { %1616 = vmatpush.bf16.msra.mxu2 %v2932_v5  ;;  %1629 = vmatpush.bf16.msra.mxu3 %v3188_v1  ;;  %v2868_v5 = vor.u32 %v7257_v12, %v5249_v32  ;;  %v3124_v1 = vor.u32 %v5929_v59, %v5889_v48  ;;  %v7259_v7 = vld [vmem:[#allocation73_spill] sm:$0xff]  ;;  %v7262_v18 = vld [vmem:[#allocation178_spill] sm:$0xff]  ;;  %v7264_v24 = vld [vmem:[#allocation300_spill] sm:$0xff] }
 0x1ec   : > { %v7265_v20 = vld [vmem:[#allocation413_spill] sm:$0xff]  ;;  %v7266_v22 = vld [vmem:[#allocation156_spill] sm:$0xff]  ;;  %v7356_v23 = vld [vmem:[#allocation479_spill] sm:$0xff] }
 0x1ed   : > { %v7267_v4 = vld [vmem:[#allocation277_spill] sm:$0xff] }
 0x1ee   : > { %1591 = vmatpush.bf16.msra.mxu0 %v2388_v9  ;;  %1604 = vmatpush.bf16.msra.mxu1 %v2644_v53  ;;  %v2324_v9 = vor.u32 %v7259_v7, %v7258_v14  ;;  %v2580_v53 = vor.u32 %v7261_v19, %v7260_v13  ;;  %v7268_v11 = vld [vmem:[#allocation397_spill] sm:$0xff]  ;;  %v7289_v19 = vld [vmem:[#allocation358_spill] sm:$0xff] }
 0x1ef   : > { %1617 = vmatpush.bf16.msra.mxu2 %v2900_v21  ;;  %1630 = vmatpush.bf16.msra.mxu3 %v3156_v38  ;;  %v2836_v21 = vor.u32 %v5209_v40, %v5169_v50  ;;  %v3092_v38 = vor.u32 %v5849_v45, %v5809_v63  ;;  %v7269_v6 = vld [vmem:[#allocation405_spill] sm:$0xff] }
 0x1f0   : > { %v7270_v17 = vld [vmem:[#allocation21_spill] sm:$0xff] }
 0x1f1   : > { %v7271_v25 = vld [vmem:[#allocation29_spill] sm:$0xff] }
 0x1f2   : > { %1592 = vmatpush.bf16.msra.mxu0 %v2356_v3  ;;  %1605 = vmatpush.bf16.msra.mxu1 %v2612_v58  ;;  %v2292_v3 = vor.u32 %v3849_v57, %v3809_v49  ;;  %v2548_v58 = vor.u32 %v7262_v18, %v4449_v60  ;;  %v7272_v10 = vld [vmem:[#allocation141_spill] sm:$0xff] }
 0x1f3   : > { %1618 = vmatpush.bf16.msra.mxu2 %v2868_v5  ;;  %1631 = vmatpush.bf16.msra.mxu3 %v3124_v1  ;;  %v2804_v5 = vor.u32 %v7264_v24, %v7263_v16  ;;  %v3060_v1 = vor.u32 %v5769_v29, %v7265_v20  ;;  %v7273_v8 = vld [vmem:[#allocation261_spill] sm:$0xff]  ;;  %v7283_v16 = vld [vmem:[#allocation367_spill] sm:$0xff] }
 0x1f4   : > { %v7274_v0 = vld [vmem:[#allocation269_spill] sm:$0xff] }
 0x1f5   : > { %v288_v7 = vld [vmem:[#allocation2 + $0x8] sm:$0xff] }
 0x1f6   : > { %1593 = vmatpush.bf16.msra.mxu0 %v2324_v9  ;;  %1606 = vmatpush.bf16.msra.mxu1 %v2580_v53  ;;  %v2260_v9 = vor.u32 %v3769_v41, %v3729_v33  ;;  %v2516_v53 = vor.u32 %v4409_v52, %v7266_v22  ;;  %v7275_v12 = vld [vmem:[#allocation5_spill] sm:$0xff]  ;;  %v7291_v22 = vld [vmem:[#allocation476_spill] sm:$0xff] }
 0x1f7   : > { %1619 = vmatpush.bf16.msra.mxu2 %v2836_v21  ;;  %1632 = vmatpush.bf16.msra.mxu3 %v3092_v38  ;;  %v2772_v21 = vor.u32 %v5049_v37, %v7267_v4  ;;  %v3028_v38 = vor.u32 %v7269_v6, %v7268_v11  ;;  %v287_v4 = vld [vmem:[#allocation2] sm:$0xff]  ;;  %v7276_v6 = vld [vmem:[#allocation13_spill] sm:$0xff] }
 0x1f8   : > { %v7278_v11 = vld [vmem:[#allocation133_spill] sm:$0xff] }
 0x1f9   : > { %v7279_v14 = vld [vmem:[#allocation245_spill] sm:$0xff] }
 0x1fa   : > { %1594 = vmatpush.bf16.msra.mxu0 %v2292_v3  ;;  %1607 = vmatpush.bf16.msra.mxu1 %v2548_v58  ;;  %v2228_v3 = vor.u32 %v7271_v25, %v7270_v17  ;;  %v2484_v58 = vor.u32 %v4329_v42, %v7272_v10  ;;  %v7280_v10 = vld [vmem:[#allocation253_spill] sm:$0xff]  ;;  %v7284_v17 = vld [vmem:[#allocation375_spill] sm:$0xff]  ;;  %v7676_v25 = vld [vmem:[#allocation474_spill] sm:$0xff] }
 0x1fb   : > { %1620 = vmatpush.bf16.msra.mxu2 %v2804_v5  ;;  %1633 = vmatpush.bf16.msra.mxu3 %v3060_v1  ;;  %v2740_v5 = vor.u32 %v7274_v0, %v7273_v8  ;;  %v2996_v1 = vor.u32 %v5609_v55, %v5569_v36  ;;  %v2964_v18 = vor.u32 %v7284_v17, %v7283_v16  ;;  %v7293_v17 = vld [vmem:[#allocation101_spill] sm:$0xff] }
 0x1fc   : > { %v7719_v26 = vld [vmem:[#allocation153_spill] sm:$0xff] }
 0x1fe   : > { %1595 = vmatpush.bf16.msra.mxu0 %v2260_v9  ;;  %1608 = vmatpush.bf16.msra.mxu1 %v2516_v53  ;;  %v2196_v9 = vor.u32 %v7276_v6, %v7275_v12  ;;  %v7277_v53 = vld [vmem:[#allocation125_spill] sm:$0xff]  ;;  %v291_v6 = vmul.f32 %v7250_v2, %v287_v4 }
 0x1ff   : > { %1621 = vmatpush.bf16.msra.mxu2 %v2772_v21  ;;  %1634 = vmatpush.bf16.msra.mxu3 %v3028_v38  ;;  %v2452_v13 = vor.u32 %v7278_v11, %v7277_v53  ;;  %v2708_v21 = vor.u32 %v7280_v10, %v7279_v14  ;;  %v7281_v38 = vsub.f32 1.0, %v7250_v2  ;;  %v292_v11 = vmul.f32 %v7250_v2, %v288_v7  ;;  %v7285_v12 = vld [vmem:[#allocation117_spill] sm:$0xff]  ;;  %v7287_v53 = vld [vmem:[#allocation236_spill] sm:$0xff] }
 0x200   : > { %v7288_v10 = vld [vmem:[#allocation229_spill] sm:$0xff] }
 0x201   : > { %v293_v15 = vmul.f32 %v287_v4, %v7281_v38  ;;  %v7282_v0 = vmov %v7281_v38  ;;  %v2680_v14 = vor.u32 %v7288_v10, %v7287_v53  ;;  %v7290_v38 = vld [vmem:[#allocation351_spill] sm:$0xff]  ;;  %v6216_v4 = vpack.c.bf16 %v291_v6, %v291_v6  ;;  %v7304_v10 = vld [vmem:[#allocation201_spill] sm:$0xff] }
 0x202   : > { %1596 = vmatpush.bf16.msra.mxu0 %v2228_v3  ;;  %1609 = vmatpush.bf16.msra.mxu1 %v2484_v58  ;;  %v294_v8 = vmul.f32 %v288_v7, %v7282_v0  ;;  %v7286_v3 = vld [vmem:[#allocation109_spill] sm:$0xff]  ;;  %v2936_v20 = vor.u32 %v7290_v38, %v7289_v19  ;;  %v6218_v7 = vpack.c.bf16 %v292_v11, %v292_v11  ;;  %v7296_v53 = vld [vmem:[#allocation215_spill] sm:$0xff]  ;;  %v7302_v11 = vld [vmem:[#allocation80_spill] sm:$0xff] }
 0x203   : > { %1622 = vmatpush.bf16.msra.mxu2 %v2740_v5  ;;  %1635 = vmatpush.bf16.msra.mxu3 %v2996_v1  ;;  %v2424_v58 = vor.u32 %v7286_v3, %v7285_v12  ;;  %v7292_v0 = vld [vmem:[#allocation469_spill] sm:$0xff]  ;;  %v6212_v1 = vpack.c.bf16 %v293_v15, %v293_v15  ;;  %v7294_v12 = vld [vmem:[#allocation94_spill] sm:$0xff]  ;;  %v7298_v15 = vld [vmem:[#allocation336_spill] sm:$0xff] }
 0x204   : > { %v3192_v5 = vor.u32 %v7292_v0, %v7291_v22  ;;  %v6214_v16 = vpack.c.bf16 %v294_v8, %v294_v8  ;;  %v2392_v19 = vor.u32 %v7294_v12, %v7293_v17  ;;  %v7295_v3 = vld [vmem:[#allocation222_spill] sm:$0xff]  ;;  %v7301_v6 = vld [vmem:[#allocation87_spill] sm:$0xff]  ;;  %v7305_v38 = vld [vmem:[#allocation328_spill] sm:$0xff] }
 0x205   : > { %v2648_v22 = vor.u32 %v7296_v53, %v7295_v3  ;;  %v7306_v0 = vld [vmem:[#allocation321_spill] sm:$0xff]  ;;  %v7307_v17 = vld [vmem:[#allocation448_spill] sm:$0xff] }
 0x206   : > { %1597 = vmatpush.bf16.msra.mxu0 %v2196_v9  ;;  %1610 = vmatpush.bf16.msra.mxu1 %v2452_v13  ;;  %v7297_v13 = vld [vmem:[#allocation343_spill] sm:$0xff]  ;;  %v7299_v9 = vld [vmem:[#allocation462_spill] sm:$0xff]  ;;  %v7308_v12 = vld [vmem:[#allocation441_spill] sm:$0xff] }
 0x207   : > { %1623 = vmatpush.bf16.msra.mxu2 %v2708_v21  ;;  %1636 = vmatpush.bf16.msra.mxu3 %v2964_v18  ;;  %v2904_v8 = vor.u32 %v7298_v15, %v7297_v13  ;;  %v7300_v21 = vld [vmem:[#allocation455_spill] sm:$0xff]  ;;  %v3128_v3 = vor.u32 %v7308_v12, %v7307_v17  ;;  %v7309_v53 = vld [vmem:[#allocation72_spill] sm:$0xff]  ;;  %v7312_v15 = vld [vmem:[#allocation185_spill] sm:$0xff] }
 0x208   : > { %v3160_v18 = vor.u32 %v7300_v21, %v7299_v9  ;;  %v7310_v13 = vld [vmem:[#allocation64_spill] sm:$0xff]  ;;  %v7313_v21 = vld [vmem:[#allocation314_spill] sm:$0xff]  ;;  %v7321_v12 = vld [vmem:[#allocation299_spill] sm:$0xff] }
 0x209   : > { %1598 = vmatmul.bf16.vlgmr.msra.gmra.mxu0 %v6216_v4  ;;  %1611 = vmatmul.bf16.vlgmr.msra.gmra.mxu1 %v6218_v7  ;;  %v7354_v2 = vld [vmem:[#allocation361_spill] sm:$0xff] }
 0x20a   : > { %1642 = vmatpush.bf16.msrb.mxu0 %v2424_v58  ;;  %1655 = vmatpush.bf16.msrb.mxu1 %v2680_v14  ;;  %v7303_v58 = vld [vmem:[#allocation208_spill] sm:$0xff] }
 0x20b   : > { %1668 = vmatpush.bf16.msrb.mxu2 %v2936_v20  ;;  %1681 = vmatpush.bf16.msrb.mxu3 %v3192_v5  ;;  %v2360_v20 = vor.u32 %v7302_v11, %v7301_v6  ;;  %v2616_v14 = vor.u32 %v7304_v10, %v7303_v58  ;;  %v2872_v5 = vor.u32 %v7306_v0, %v7305_v38  ;;  %v7314_v6 = vld [vmem:[#allocation307_spill] sm:$0xff]  ;;  %v7317_v10 = vld [vmem:[#allocation57_spill] sm:$0xff]  ;;  %v7318_v38 = vld [vmem:[#allocation50_spill] sm:$0xff] }
 0x20c   : > { %1624 = vmatmul.bf16.vlgmr.msra.gmra.mxu2 %v6212_v1  ;;  %1637 = vmatmul.bf16.vlgmr.msra.gmra.mxu3 %v6214_v16  ;;  %v7316_v11 = vld [vmem:[#allocation427_spill] sm:$0xff]  ;;  %v7320_v0 = vld [vmem:[#allocation170_spill] sm:$0xff] }
 0x20e   : > { %1643 = vmatpush.bf16.msrb.mxu0 %v2392_v19  ;;  %1656 = vmatpush.bf16.msrb.mxu1 %v2648_v22  ;;  %v2328_v19 = vor.u32 %v7310_v13, %v7309_v53  ;;  %v7311_v22 = vld [vmem:[#allocation193_spill] sm:$0xff]  ;;  %v7322_v53 = vld [vmem:[#allocation291_spill] sm:$0xff]  ;;  %v7324_v13 = vld [vmem:[#allocation412_spill] sm:$0xff] }
 0x20f   : > { %1669 = vmatpush.bf16.msrb.mxu2 %v2904_v8  ;;  %1682 = vmatpush.bf16.msrb.mxu3 %v3160_v18  ;;  %v2584_v9 = vor.u32 %v7312_v15, %v7311_v22  ;;  %v2840_v8 = vor.u32 %v7314_v6, %v7313_v21  ;;  %v7315_v18 = vld [vmem:[#allocation434_spill] sm:$0xff]  ;;  %v7325_v15 = vld [vmem:[#allocation43_spill] sm:$0xff]  ;;  %v7326_v21 = vld [vmem:[#allocation36_spill] sm:$0xff] }
 0x210   : > { %v3096_v58 = vor.u32 %v7316_v11, %v7315_v18  ;;  %v7328_v6 = vld [vmem:[#allocation155_spill] sm:$0xff]  ;;  %v7329_v11 = vld [vmem:[#allocation284_spill] sm:$0xff] }
 0x212   : > { %1644 = vmatpush.bf16.msrb.mxu0 %v2360_v20  ;;  %1657 = vmatpush.bf16.msrb.mxu1 %v2616_v14  ;;  %v2296_v20 = vor.u32 %v7318_v38, %v7317_v10  ;;  %v7319_v14 = vld [vmem:[#allocation177_spill] sm:$0xff]  ;;  %v7330_v10 = vld [vmem:[#allocation276_spill] sm:$0xff] }
 0x213   : > { %1670 = vmatpush.bf16.msrb.mxu2 %v2872_v5  ;;  %1683 = vmatpush.bf16.msrb.mxu3 %v3128_v3  ;;  %v2552_v17 = vor.u32 %v7320_v0, %v7319_v14  ;;  %v2808_v5 = vor.u32 %v7322_v53, %v7321_v12  ;;  %v7323_v3 = vld [vmem:[#allocation420_spill] sm:$0xff] }
 0x214   : > { %v3064_v22 = vor.u32 %v7324_v13, %v7323_v3  ;;  %v7332_v38 = vld [vmem:[#allocation396_spill] sm:$0xff] }
 0x215   : > { %v7333_v0 = vld [vmem:[#allocation28_spill] sm:$0xff] }
 0x216   : > { %1645 = vmatpush.bf16.msrb.mxu0 %v2328_v19  ;;  %1658 = vmatpush.bf16.msrb.mxu1 %v2584_v9  ;;  %v2264_v19 = vor.u32 %v7326_v21, %v7325_v15  ;;  %v7327_v9 = vld [vmem:[#allocation163_spill] sm:$0xff]  ;;  %v7334_v12 = vld [vmem:[#allocation20_spill] sm:$0xff]  ;;  %v7340_v21 = vld [vmem:[#allocation382_spill] sm:$0xff] }
 0x217   : > { %1671 = vmatpush.bf16.msrb.mxu2 %v2840_v8  ;;  %1684 = vmatpush.bf16.msrb.mxu3 %v3096_v58  ;;  %v2520_v18 = vor.u32 %v7328_v6, %v7327_v9  ;;  %v2776_v8 = vor.u32 %v7330_v10, %v7329_v11  ;;  %v7331_v58 = vld [vmem:[#allocation404_spill] sm:$0xff] }
 0x218   : > { %v3032_v14 = vor.u32 %v7332_v38, %v7331_v58  ;;  %v7336_v53 = vld [vmem:[#allocation140_spill] sm:$0xff] }
 0x219   : > { %v7337_v13 = vld [vmem:[#allocation268_spill] sm:$0xff] }
 0x21a   : > { %1646 = vmatpush.bf16.msrb.mxu0 %v2296_v20  ;;  %1659 = vmatpush.bf16.msrb.mxu1 %v2552_v17  ;;  %v2232_v20 = vor.u32 %v7334_v12, %v7333_v0  ;;  %v7335_v17 = vld [vmem:[#allocation148_spill] sm:$0xff]  ;;  %v7348_v12 = vld [vmem:[#allocation366_spill] sm:$0xff] }
 0x21b   : > { %1672 = vmatpush.bf16.msrb.mxu2 %v2808_v5  ;;  %1685 = vmatpush.bf16.msrb.mxu3 %v3064_v22  ;;  %v2488_v3 = vor.u32 %v7336_v53, %v7335_v17  ;;  %v7338_v15 = vld [vmem:[#allocation260_spill] sm:$0xff]  ;;  %v7339_v22 = vld [vmem:[#allocation389_spill] sm:$0xff] }
 0x21c   : > { %v2744_v5 = vor.u32 %v7338_v15, %v7337_v13  ;;  %v3000_v9 = vor.u32 %v7340_v21, %v7339_v22  ;;  %v7341_v6 = vld [vmem:[#allocation12_spill] sm:$0xff]  ;;  %v7350_v13 = vld [vmem:[#allocation119_spill] sm:$0xff]  ;;  %v7353_v21 = vld [vmem:[#allocation353_spill] sm:$0xff] }
 0x21d   : > { %v7342_v11 = vld [vmem:[#allocation4_spill] sm:$0xff]  ;;  %v7351_v22 = vld [vmem:[#allocation231_spill] sm:$0xff] }
 0x21e   : > { %1647 = vmatpush.bf16.msrb.mxu0 %v2264_v19  ;;  %1660 = vmatpush.bf16.msrb.mxu1 %v2520_v18  ;;  %v2200_v19 = vor.u32 %v7342_v11, %v7341_v6  ;;  %v7343_v18 = vld [vmem:[#allocation132_spill] sm:$0xff]  ;;  %v2940_v6 = vor.u32 %v7354_v2, %v7353_v21  ;;  %v7355_v11 = vld [vmem:[#allocation471_spill] sm:$0xff] }
 0x21f   : > { %1673 = vmatpush.bf16.msrb.mxu2 %v2776_v8  ;;  %1686 = vmatpush.bf16.msrb.mxu3 %v3032_v14  ;;  %v7344_v10 = vld [vmem:[#allocation124_spill] sm:$0xff]  ;;  %v7347_v14 = vld [vmem:[#allocation374_spill] sm:$0xff]  ;;  %v7370_v21 = vld [vmem:[#allocation331_spill] sm:$0xff] }
 0x220   : > { %v2456_v58 = vor.u32 %v7344_v10, %v7343_v18  ;;  %v7345_v38 = vld [vmem:[#allocation252_spill] sm:$0xff]  ;;  %v2968_v17 = vor.u32 %v7348_v12, %v7347_v14  ;;  %v3196_v18 = vor.u32 %v7356_v23, %v7355_v11  ;;  %v7361_v12 = vld [vmem:[#allocation338_spill] sm:$0xff]  ;;  %v7371_v11 = vld [vmem:[#allocation443_spill] sm:$0xff] }
 0x221   : > { %v7346_v0 = vld [vmem:[#allocation244_spill] sm:$0xff] }
 0x222   : > { %1648 = vmatpush.bf16.msrb.mxu0 %v2232_v20  ;;  %1661 = vmatpush.bf16.msrb.mxu1 %v2488_v3  ;;  %v2712_v8 = vor.u32 %v7346_v0, %v7345_v38  ;;  %v7349_v53 = vld [vmem:[#allocation112_spill] sm:$0xff]  ;;  %v7352_v20 = vld [vmem:[#allocation239_spill] sm:$0xff]  ;;  %v7359_v38 = vld [vmem:[#allocation217_spill] sm:$0xff] }
 0x223   : > { %1674 = vmatpush.bf16.msrb.mxu2 %v2744_v5  ;;  %1687 = vmatpush.bf16.msrb.mxu3 %v3000_v9  ;;  %v2428_v15 = vor.u32 %v7350_v13, %v7349_v53  ;;  %v2684_v3 = vor.u32 %v7352_v20, %v7351_v22  ;;  %v7357_v5 = vld [vmem:[#allocation96_spill] sm:$0xff]  ;;  %v7362_v53 = vld [vmem:[#allocation346_spill] sm:$0xff]  ;;  %v7363_v13 = vld [vmem:[#allocation457_spill] sm:$0xff] }
 0x224   : > { %v7358_v9 = vld [vmem:[#allocation104_spill] sm:$0xff]  ;;  %v2908_v2 = vor.u32 %v7362_v53, %v7361_v12  ;;  %v7377_v53 = vld [vmem:[#allocation309_spill] sm:$0xff] }
 0x225   : > { %v2396_v10 = vor.u32 %v7358_v9, %v7357_v5  ;;  %v7360_v0 = vld [vmem:[#allocation224_spill] sm:$0xff]  ;;  %v7373_v9 = vld [vmem:[#allocation67_spill] sm:$0xff] }
 0x226   : > { %1649 = vmatpush.bf16.msrb.mxu0 %v2200_v19  ;;  %1662 = vmatpush.bf16.msrb.mxu1 %v2456_v58  ;;  %v2652_v14 = vor.u32 %v7360_v0, %v7359_v38  ;;  %v7364_v22 = vld [vmem:[#allocation464_spill] sm:$0xff]  ;;  %v7365_v19 = vld [vmem:[#allocation82_spill] sm:$0xff]  ;;  %v7366_v58 = vld [vmem:[#allocation89_spill] sm:$0xff] }
 0x227   : > { %1675 = vmatpush.bf16.msrb.mxu2 %v2712_v8  ;;  %1688 = vmatpush.bf16.msrb.mxu3 %v2968_v17  ;;  %v3164_v23 = vor.u32 %v7364_v22, %v7363_v13  ;;  %v2364_v8 = vor.u32 %v7366_v58, %v7365_v19  ;;  %v7367_v17 = vld [vmem:[#allocation203_spill] sm:$0xff]  ;;  %v7375_v0 = vld [vmem:[#allocation188_spill] sm:$0xff]  ;;  %v7379_v22 = vld [vmem:[#allocation429_spill] sm:$0xff] }
 0x228   : > { %v7374_v38 = vld [vmem:[#allocation75_spill] sm:$0xff]  ;;  %v7378_v13 = vld [vmem:[#allocation316_spill] sm:$0xff] }
 0x229   : > { %1650 = vmatmul.bf16.vlgmr.msrb.gmra.mxu0 %v6216_v4  ;;  %1663 = vmatmul.bf16.vlgmr.msrb.gmra.mxu1 %v6218_v7  ;;  %v7381_v58 = vld [vmem:[#allocation52_spill] sm:$0xff] }
 0x22a   : > { %1694 = vmatpush.bf16.msra.mxu0 %v2428_v15  ;;  %1707 = vmatpush.bf16.msra.mxu1 %v2684_v3  ;;  %v7368_v15 = vld [vmem:[#allocation210_spill] sm:$0xff]  ;;  %v7369_v3 = vld [vmem:[#allocation323_spill] sm:$0xff] }
 0x22b   : > { %1720 = vmatpush.bf16.msra.mxu2 %v2940_v6  ;;  %1733 = vmatpush.bf16.msra.mxu3 %v3196_v18  ;;  %v2620_v20 = vor.u32 %v7368_v15, %v7367_v17  ;;  %v2876_v6 = vor.u32 %v7370_v21, %v7369_v3  ;;  %v7372_v18 = vld [vmem:[#allocation450_spill] sm:$0xff]  ;;  %v7382_v17 = vld [vmem:[#allocation59_spill] sm:$0xff]  ;;  %v7383_v15 = vld [vmem:[#allocation172_spill] sm:$0xff] }
 0x22c   : > { %1676 = vmatmul.bf16.vlgmr.msrb.gmra.mxu2 %v6212_v1  ;;  %1689 = vmatmul.bf16.vlgmr.msrb.gmra.mxu3 %v6214_v16  ;;  %v3132_v5 = vor.u32 %v7372_v18, %v7371_v11  ;;  %v7385_v21 = vld [vmem:[#allocation294_spill] sm:$0xff]  ;;  %v7387_v18 = vld [vmem:[#allocation415_spill] sm:$0xff] }
 0x22d   : > { %v7386_v11 = vld [vmem:[#allocation302_spill] sm:$0xff] }
 0x22e   : > { %1695 = vmatpush.bf16.msra.mxu0 %v2396_v10  ;;  %1708 = vmatpush.bf16.msra.mxu1 %v2652_v14  ;;  %v2332_v10 = vor.u32 %v7374_v38, %v7373_v9  ;;  %v7376_v14 = vld [vmem:[#allocation196_spill] sm:$0xff]  ;;  %v7389_v38 = vld [vmem:[#allocation38_spill] sm:$0xff] }
 0x22f   : > { %1721 = vmatpush.bf16.msra.mxu2 %v2908_v2  ;;  %1734 = vmatpush.bf16.msra.mxu3 %v3164_v23  ;;  %v2588_v12 = vor.u32 %v7376_v14, %v7375_v0  ;;  %v2844_v2 = vor.u32 %v7378_v13, %v7377_v53  ;;  %v7380_v23 = vld [vmem:[#allocation436_spill] sm:$0xff]  ;;  %v7390_v0 = vld [vmem:[#allocation45_spill] sm:$0xff]  ;;  %v7391_v14 = vld [vmem:[#allocation158_spill] sm:$0xff] }
 0x230   : > { %v3100_v19 = vor.u32 %v7380_v23, %v7379_v22  ;;  %v7393_v13 = vld [vmem:[#allocation279_spill] sm:$0xff]  ;;  %v7394_v22 = vld [vmem:[#allocation286_spill] sm:$0xff] }
 0x231   : > { %v7395_v23 = vld [vmem:[#allocation399_spill] sm:$0xff] }
 0x232   : > { %1696 = vmatpush.bf16.msra.mxu0 %v2364_v8  ;;  %1709 = vmatpush.bf16.msra.mxu1 %v2620_v20  ;;  %v2300_v8 = vor.u32 %v7382_v17, %v7381_v58  ;;  %v7384_v20 = vld [vmem:[#allocation180_spill] sm:$0xff]  ;;  %v7397_v17 = vld [vmem:[#allocation23_spill] sm:$0xff] }
 0x233   : > { %1722 = vmatpush.bf16.msra.mxu2 %v2876_v6  ;;  %1735 = vmatpush.bf16.msra.mxu3 %v3132_v5  ;;  %v2556_v3 = vor.u32 %v7384_v20, %v7383_v15  ;;  %v2812_v6 = vor.u32 %v7386_v11, %v7385_v21  ;;  %v7388_v5 = vld [vmem:[#allocation422_spill] sm:$0xff]  ;;  %v7398_v15 = vld [vmem:[#allocation31_spill] sm:$0xff] }
 0x234   : > { %v3068_v9 = vor.u32 %v7388_v5, %v7387_v18  ;;  %v7399_v20 = vld [vmem:[#allocation143_spill] sm:$0xff]  ;;  %v7403_v5 = vld [vmem:[#allocation384_spill] sm:$0xff] }
 0x235   : > { %v7401_v11 = vld [vmem:[#allocation263_spill] sm:$0xff] }
 0x236   : > { %1697 = vmatpush.bf16.msra.mxu0 %v2332_v10  ;;  %1710 = vmatpush.bf16.msra.mxu1 %v2588_v12  ;;  %v2268_v10 = vor.u32 %v7390_v0, %v7389_v38  ;;  %v7392_v12 = vld [vmem:[#allocation165_spill] sm:$0xff]  ;;  %v7402_v18 = vld [vmem:[#allocation271_spill] sm:$0xff] }
 0x237   : > { %1723 = vmatpush.bf16.msra.mxu2 %v2844_v2  ;;  %1736 = vmatpush.bf16.msra.mxu3 %v3100_v19  ;;  %v2524_v53 = vor.u32 %v7392_v12, %v7391_v14  ;;  %v2780_v2 = vor.u32 %v7394_v22, %v7393_v13  ;;  %v7396_v19 = vld [vmem:[#allocation407_spill] sm:$0xff] }
 0x238   : > { %v3036_v58 = vor.u32 %v7396_v19, %v7395_v23  ;;  %v7405_v0 = vld [vmem:[#allocation7_spill] sm:$0xff]  ;;  %v7411_v19 = vld [vmem:[#allocation369_spill] sm:$0xff] }
 0x239   : > { %v7406_v14 = vld [vmem:[#allocation15_spill] sm:$0xff] }
 0x23a   : > { %1698 = vmatpush.bf16.msra.mxu0 %v2300_v8  ;;  %1711 = vmatpush.bf16.msra.mxu1 %v2556_v3  ;;  %v2236_v8 = vor.u32 %v7398_v15, %v7397_v17  ;;  %v7400_v3 = vld [vmem:[#allocation150_spill] sm:$0xff]  ;;  %v7407_v12 = vld [vmem:[#allocation127_spill] sm:$0xff] }
 0x23b   : > { %1724 = vmatpush.bf16.msra.mxu2 %v2812_v6  ;;  %1737 = vmatpush.bf16.msra.mxu3 %v3068_v9  ;;  %v2492_v21 = vor.u32 %v7400_v3, %v7399_v20  ;;  %v2748_v6 = vor.u32 %v7402_v18, %v7401_v11  ;;  %v7404_v9 = vld [vmem:[#allocation391_spill] sm:$0xff]  ;;  %v7413_v15 = vld [vmem:[#allocation118_spill] sm:$0xff]  ;;  %v7417_v18 = vld [vmem:[#allocation360_spill] sm:$0xff] }
 0x23c   : > { %v3004_v38 = vor.u32 %v7404_v9, %v7403_v5  ;;  %v7409_v22 = vld [vmem:[#allocation247_spill] sm:$0xff]  ;;  %v7415_v11 = vld [vmem:[#allocation238_spill] sm:$0xff]  ;;  %v7418_v5 = vld [vmem:[#allocation352_spill] sm:$0xff] }
 0x23d   : > { %v7410_v23 = vld [vmem:[#allocation255_spill] sm:$0xff]  ;;  %v2944_v9 = vor.u32 %v7418_v5, %v7417_v18  ;;  %v7433_v5 = vld [vmem:[#allocation330_spill] sm:$0xff] }
 0x23e   : > { %1699 = vmatpush.bf16.msra.mxu0 %v2268_v10  ;;  %1712 = vmatpush.bf16.msra.mxu1 %v2524_v53  ;;  %v2204_v10 = vor.u32 %v7406_v14, %v7405_v0  ;;  %v7408_v53 = vld [vmem:[#allocation135_spill] sm:$0xff]  ;;  %v7419_v0 = vld [vmem:[#allocation478_spill] sm:$0xff] }
 0x23f   : > { %1725 = vmatpush.bf16.msra.mxu2 %v2780_v2  ;;  %1738 = vmatpush.bf16.msra.mxu3 %v3036_v58  ;;  %v2460_v13 = vor.u32 %v7408_v53, %v7407_v12  ;;  %v2716_v2 = vor.u32 %v7410_v23, %v7409_v22  ;;  %v7412_v58 = vld [vmem:[#allocation377_spill] sm:$0xff]  ;;  %v7414_v20 = vld [vmem:[#allocation111_spill] sm:$0xff]  ;;  %v7420_v14 = vld [vmem:[#allocation470_spill] sm:$0xff] }
 0x240   : > { %v2972_v17 = vor.u32 %v7412_v58, %v7411_v19  ;;  %v2432_v3 = vor.u32 %v7414_v20, %v7413_v15  ;;  %v3200_v12 = vor.u32 %v7420_v14, %v7419_v0  ;;  %v7423_v22 = vld [vmem:[#allocation223_spill] sm:$0xff]  ;;  %v7424_v23 = vld [vmem:[#allocation216_spill] sm:$0xff]  ;;  %v7425_v58 = vld [vmem:[#allocation345_spill] sm:$0xff] }
 0x241   : > { %v2656_v19 = vor.u32 %v7424_v23, %v7423_v22  ;;  %v7426_v15 = vld [vmem:[#allocation337_spill] sm:$0xff]  ;;  %v7438_v22 = vld [vmem:[#allocation66_spill] sm:$0xff]  ;;  %v7439_v23 = vld [vmem:[#allocation195_spill] sm:$0xff] }
 0x242   : > { %1700 = vmatpush.bf16.msra.mxu0 %v2236_v8  ;;  %1713 = vmatpush.bf16.msra.mxu1 %v2492_v21  ;;  %v7416_v8 = vld [vmem:[#allocation230_spill] sm:$0xff]  ;;  %v2912_v20 = vor.u32 %v7426_v15, %v7425_v58  ;;  %v7435_v14 = vld [vmem:[#allocation449_spill] sm:$0xff]  ;;  %v7441_v15 = vld [vmem:[#allocation315_spill] sm:$0xff] }
 0x243   : > { %1726 = vmatpush.bf16.msra.mxu2 %v2748_v6  ;;  %1739 = vmatpush.bf16.msra.mxu3 %v3004_v38  ;;  %v2688_v21 = vor.u32 %v7416_v8, %v7415_v11  ;;  %v7421_v6 = vld [vmem:[#allocation103_spill] sm:$0xff]  ;;  %v7428_v8 = vld [vmem:[#allocation456_spill] sm:$0xff] }
 0x244   : > { %v7422_v38 = vld [vmem:[#allocation95_spill] sm:$0xff] }
 0x245   : > { %v2400_v53 = vor.u32 %v7422_v38, %v7421_v6  ;;  %v7427_v11 = vld [vmem:[#allocation463_spill] sm:$0xff]  ;;  %v7437_v38 = vld [vmem:[#allocation74_spill] sm:$0xff] }
 0x246   : > { %1701 = vmatpush.bf16.msra.mxu0 %v2204_v10  ;;  %1714 = vmatpush.bf16.msra.mxu1 %v2460_v13  ;;  %v3168_v18 = vor.u32 %v7428_v8, %v7427_v11  ;;  %v7429_v10 = vld [vmem:[#allocation88_spill] sm:$0xff]  ;;  %v7430_v13 = vld [vmem:[#allocation81_spill] sm:$0xff]  ;;  %v7443_v8 = vld [vmem:[#allocation435_spill] sm:$0xff] }
 0x247   : > { %1727 = vmatpush.bf16.msra.mxu2 %v2716_v2  ;;  %1740 = vmatpush.bf16.msra.mxu3 %v2972_v17  ;;  %v2368_v2 = vor.u32 %v7430_v13, %v7429_v10  ;;  %v7431_v17 = vld [vmem:[#allocation209_spill] sm:$0xff]  ;;  %v7442_v11 = vld [vmem:[#allocation308_spill] sm:$0xff]  ;;  %v7445_v13 = vld [vmem:[#allocation58_spill] sm:$0xff] }
 0x249   : > { %1702 = vmatmul.bf16.vlgmr.msra.gmra.mxu0 %v6216_v4  ;;  %1715 = vmatmul.bf16.vlgmr.msra.gmra.mxu1 %v6218_v7 }
 0x24a   : > { %1746 = vmatpush.bf16.msrb.mxu0 %v2432_v3  ;;  %1759 = vmatpush.bf16.msrb.mxu1 %v2688_v21  ;;  %v7432_v3 = vld [vmem:[#allocation202_spill] sm:$0xff] }
 0x24b   : > { %1772 = vmatpush.bf16.msrb.mxu2 %v2944_v9  ;;  %1785 = vmatpush.bf16.msrb.mxu3 %v3200_v12  ;;  %v2624_v21 = vor.u32 %v7432_v3, %v7431_v17  ;;  %v7434_v9 = vld [vmem:[#allocation322_spill] sm:$0xff]  ;;  %v7446_v17 = vld [vmem:[#allocation51_spill] sm:$0xff] }
 0x24c   : > { %1728 = vmatmul.bf16.vlgmr.msra.gmra.mxu2 %v6212_v1  ;;  %1741 = vmatmul.bf16.vlgmr.msra.gmra.mxu3 %v6214_v16  ;;  %v2880_v0 = vor.u32 %v7434_v9, %v7433_v5  ;;  %v7436_v12 = vld [vmem:[#allocation442_spill] sm:$0xff]  ;;  %v7447_v3 = vld [vmem:[#allocation179_spill] sm:$0xff]  ;;  %v7449_v9 = vld [vmem:[#allocation301_spill] sm:$0xff] }
 0x24d   : > { %v3136_v6 = vor.u32 %v7436_v12, %v7435_v14  ;;  %v7450_v14 = vld [vmem:[#allocation293_spill] sm:$0xff] }
 0x24e   : > { %1747 = vmatpush.bf16.msrb.mxu0 %v2400_v53  ;;  %1760 = vmatpush.bf16.msrb.mxu1 %v2656_v19  ;;  %v2336_v53 = vor.u32 %v7438_v22, %v7437_v38  ;;  %v7440_v19 = vld [vmem:[#allocation187_spill] sm:$0xff]  ;;  %v7451_v12 = vld [vmem:[#allocation421_spill] sm:$0xff]  ;;  %v7453_v22 = vld [vmem:[#allocation44_spill] sm:$0xff] }
 0x24f   : > { %1773 = vmatpush.bf16.msrb.mxu2 %v2912_v20  ;;  %1786 = vmatpush.bf16.msrb.mxu3 %v3168_v18  ;;  %v2592_v58 = vor.u32 %v7440_v19, %v7439_v23  ;;  %v2848_v20 = vor.u32 %v7442_v11, %v7441_v15  ;;  %v7444_v18 = vld [vmem:[#allocation428_spill] sm:$0xff]  ;;  %v7454_v23 = vld [vmem:[#allocation37_spill] sm:$0xff] }
 0x250   : > { %v3104_v10 = vor.u32 %v7444_v18, %v7443_v8  ;;  %v7455_v19 = vld [vmem:[#allocation164_spill] sm:$0xff]  ;;  %v7457_v11 = vld [vmem:[#allocation285_spill] sm:$0xff]  ;;  %v7458_v8 = vld [vmem:[#allocation278_spill] sm:$0xff] }
 0x251   : > { %v7459_v18 = vld [vmem:[#allocation406_spill] sm:$0xff] }
 0x252   : > { %1748 = vmatpush.bf16.msrb.mxu0 %v2368_v2  ;;  %1761 = vmatpush.bf16.msrb.mxu1 %v2624_v21  ;;  %v2304_v2 = vor.u32 %v7446_v17, %v7445_v13  ;;  %v7448_v21 = vld [vmem:[#allocation171_spill] sm:$0xff]  ;;  %v7461_v17 = vld [vmem:[#allocation30_spill] sm:$0xff] }
 0x253   : > { %1774 = vmatpush.bf16.msrb.mxu2 %v2880_v0  ;;  %1787 = vmatpush.bf16.msrb.mxu3 %v3136_v6  ;;  %v2560_v5 = vor.u32 %v7448_v21, %v7447_v3  ;;  %v2816_v0 = vor.u32 %v7450_v14, %v7449_v9  ;;  %v7452_v6 = vld [vmem:[#allocation414_spill] sm:$0xff]  ;;  %v7463_v21 = vld [vmem:[#allocation149_spill] sm:$0xff] }
 0x254   : > { %v3072_v38 = vor.u32 %v7452_v6, %v7451_v12  ;;  %v7462_v3 = vld [vmem:[#allocation22_spill] sm:$0xff] }
 0x255   : > { %v7465_v14 = vld [vmem:[#allocation270_spill] sm:$0xff] }
 0x256   : > { %1749 = vmatpush.bf16.msrb.mxu0 %v2336_v53  ;;  %1762 = vmatpush.bf16.msrb.mxu1 %v2592_v58  ;;  %v2272_v53 = vor.u32 %v7454_v23, %v7453_v22  ;;  %v7456_v58 = vld [vmem:[#allocation157_spill] sm:$0xff]  ;;  %v7466_v12 = vld [vmem:[#allocation262_spill] sm:$0xff] }
 0x257   : > { %1775 = vmatpush.bf16.msrb.mxu2 %v2848_v20  ;;  %1788 = vmatpush.bf16.msrb.mxu3 %v3104_v10  ;;  %v2528_v15 = vor.u32 %v7456_v58, %v7455_v19  ;;  %v2784_v20 = vor.u32 %v7458_v8, %v7457_v11  ;;  %v7460_v10 = vld [vmem:[#allocation398_spill] sm:$0xff] }
 0x258   : > { %v3040_v13 = vor.u32 %v7460_v10, %v7459_v18  ;;  %v7467_v6 = vld [vmem:[#allocation390_spill] sm:$0xff]  ;;  %v7475_v10 = vld [vmem:[#allocation376_spill] sm:$0xff] }
 0x259   : > { %v7469_v23 = vld [vmem:[#allocation14_spill] sm:$0xff] }
 0x25a   : > { %1750 = vmatpush.bf16.msrb.mxu0 %v2304_v2  ;;  %1763 = vmatpush.bf16.msrb.mxu1 %v2560_v5  ;;  %v2240_v2 = vor.u32 %v7462_v3, %v7461_v17  ;;  %v7464_v5 = vld [vmem:[#allocation142_spill] sm:$0xff] }
 0x25b   : > { %1776 = vmatpush.bf16.msrb.mxu2 %v2816_v0  ;;  %1789 = vmatpush.bf16.msrb.mxu3 %v3072_v38  ;;  %v2496_v9 = vor.u32 %v7464_v5, %v7463_v21  ;;  %v2752_v0 = vor.u32 %v7466_v12, %v7465_v14  ;;  %v7468_v38 = vld [vmem:[#allocation383_spill] sm:$0xff]  ;;  %v7470_v19 = vld [vmem:[#allocation6_spill] sm:$0xff]  ;;  %v7478_v21 = vld [vmem:[#allocation121_spill] sm:$0xff] }
 0x25c   : > { %v3008_v22 = vor.u32 %v7468_v38, %v7467_v6  ;;  %v7471_v58 = vld [vmem:[#allocation134_spill] sm:$0xff]  ;;  %v7479_v14 = vld [vmem:[#allocation233_spill] sm:$0xff]  ;;  %v7481_v12 = vld [vmem:[#allocation355_spill] sm:$0xff] }
 0x25d   : > { %v7473_v8 = vld [vmem:[#allocation254_spill] sm:$0xff]  ;;  %v7482_v6 = vld [vmem:[#allocation363_spill] sm:$0xff] }
 0x25e   : > { %1751 = vmatpush.bf16.msrb.mxu0 %v2272_v53  ;;  %1764 = vmatpush.bf16.msrb.mxu1 %v2528_v15  ;;  %v2208_v53 = vor.u32 %v7470_v19, %v7469_v23  ;;  %v7472_v15 = vld [vmem:[#allocation126_spill] sm:$0xff]  ;;  %v2948_v38 = vor.u32 %v7482_v6, %v7481_v12  ;;  %v7483_v23 = vld [vmem:[#allocation473_spill] sm:$0xff] }
 0x25f   : > { %1777 = vmatpush.bf16.msrb.mxu2 %v2784_v20  ;;  %1790 = vmatpush.bf16.msrb.mxu3 %v3040_v13  ;;  %v2464_v11 = vor.u32 %v7472_v15, %v7471_v58  ;;  %v7474_v18 = vld [vmem:[#allocation246_spill] sm:$0xff]  ;;  %v7476_v13 = vld [vmem:[#allocation368_spill] sm:$0xff]  ;;  %v7484_v19 = vld [vmem:[#allocation481_spill] sm:$0xff] }
 0x260   : > { %v2720_v20 = vor.u32 %v7474_v18, %v7473_v8  ;;  %v2976_v17 = vor.u32 %v7476_v13, %v7475_v10  ;;  %v7477_v3 = vld [vmem:[#allocation114_spill] sm:$0xff]  ;;  %v3204_v58 = vor.u32 %v7484_v19, %v7483_v23  ;;  %v7487_v8 = vld [vmem:[#allocation219_spill] sm:$0xff]  ;;  %v7489_v13 = vld [vmem:[#allocation340_spill] sm:$0xff] }
 0x261   : > { %v2436_v5 = vor.u32 %v7478_v21, %v7477_v3  ;;  %v7488_v18 = vld [vmem:[#allocation226_spill] sm:$0xff]  ;;  %v7490_v3 = vld [vmem:[#allocation348_spill] sm:$0xff]  ;;  %v7497_v6 = vld [vmem:[#allocation325_spill] sm:$0xff] }
 0x262   : > { %1752 = vmatpush.bf16.msrb.mxu0 %v2240_v2  ;;  %1765 = vmatpush.bf16.msrb.mxu1 %v2496_v9  ;;  %v7480_v2 = vld [vmem:[#allocation241_spill] sm:$0xff]  ;;  %v2660_v10 = vor.u32 %v7488_v18, %v7487_v8  ;;  %v2916_v21 = vor.u32 %v7490_v3, %v7489_v13  ;;  %v7503_v18 = vld [vmem:[#allocation190_spill] sm:$0xff]  ;;  %v7505_v3 = vld [vmem:[#allocation311_spill] sm:$0xff] }
 0x263   : > { %1778 = vmatpush.bf16.msrb.mxu2 %v2752_v0  ;;  %1791 = vmatpush.bf16.msrb.mxu3 %v3008_v22  ;;  %v2692_v9 = vor.u32 %v7480_v2, %v7479_v14  ;;  %v7485_v0 = vld [vmem:[#allocation98_spill] sm:$0xff]  ;;  %v7491_v14 = vld [vmem:[#allocation459_spill] sm:$0xff]  ;;  %v7499_v19 = vld [vmem:[#allocation445_spill] sm:$0xff] }
 0x264   : > { %v7486_v22 = vld [vmem:[#allocation106_spill] sm:$0xff]  ;;  %v7502_v8 = vld [vmem:[#allocation77_spill] sm:$0xff] }
 0x265   : > { %v2404_v15 = vor.u32 %v7486_v22, %v7485_v0  ;;  %v7492_v2 = vld [vmem:[#allocation466_spill] sm:$0xff]  ;;  %v7501_v22 = vld [vmem:[#allocation69_spill] sm:$0xff] }
 0x266   : > { %1753 = vmatpush.bf16.msrb.mxu0 %v2208_v53  ;;  %1766 = vmatpush.bf16.msrb.mxu1 %v2464_v11  ;;  %v3172_v12 = vor.u32 %v7492_v2, %v7491_v14  ;;  %v7493_v53 = vld [vmem:[#allocation84_spill] sm:$0xff]  ;;  %v7494_v11 = vld [vmem:[#allocation91_spill] sm:$0xff]  ;;  %v7506_v14 = vld [vmem:[#allocation318_spill] sm:$0xff] }
 0x267   : > { %1779 = vmatpush.bf16.msrb.mxu2 %v2720_v20  ;;  %1792 = vmatpush.bf16.msrb.mxu3 %v2976_v17  ;;  %v2372_v20 = vor.u32 %v7494_v11, %v7493_v53  ;;  %v7495_v17 = vld [vmem:[#allocation205_spill] sm:$0xff]  ;;  %v7507_v2 = vld [vmem:[#allocation431_spill] sm:$0xff]  ;;  %v7509_v11 = vld [vmem:[#allocation54_spill] sm:$0xff] }
 0x269   : > { %1754 = vmatmul.bf16.vlgmr.msrb.gmra.mxu0 %v6216_v4  ;;  %1767 = vmatmul.bf16.vlgmr.msrb.gmra.mxu1 %v6218_v7 }
 0x26a   : > { %1798 = vmatpush.bf16.msra.mxu0 %v2436_v5  ;;  %1811 = vmatpush.bf16.msra.mxu1 %v2692_v9  ;;  %v7496_v5 = vld [vmem:[#allocation212_spill] sm:$0xff] }
 0x26b   : > { %1824 = vmatpush.bf16.msra.mxu2 %v2948_v38  ;;  %1837 = vmatpush.bf16.msra.mxu3 %v3204_v58  ;;  %v2628_v9 = vor.u32 %v7496_v5, %v7495_v17  ;;  %v7498_v38 = vld [vmem:[#allocation333_spill] sm:$0xff]  ;;  %v7500_v58 = vld [vmem:[#allocation452_spill] sm:$0xff]  ;;  %v7511_v5 = vld [vmem:[#allocation174_spill] sm:$0xff] }
 0x26c   : > { %1780 = vmatmul.bf16.vlgmr.msrb.gmra.mxu2 %v6212_v1  ;;  %1793 = vmatmul.bf16.vlgmr.msrb.gmra.mxu3 %v6214_v16  ;;  %v2884_v23 = vor.u32 %v7498_v38, %v7497_v6  ;;  %v3140_v0 = vor.u32 %v7500_v58, %v7499_v19  ;;  %v7510_v17 = vld [vmem:[#allocation61_spill] sm:$0xff]  ;;  %v7513_v38 = vld [vmem:[#allocation296_spill] sm:$0xff] }
 0x26d   : > { %v7514_v19 = vld [vmem:[#allocation304_spill] sm:$0xff]  ;;  %v7515_v58 = vld [vmem:[#allocation417_spill] sm:$0xff] }
 0x26e   : > { %1799 = vmatpush.bf16.msra.mxu0 %v2404_v15  ;;  %1812 = vmatpush.bf16.msra.mxu1 %v2660_v10  ;;  %v2340_v15 = vor.u32 %v7502_v8, %v7501_v22  ;;  %v7504_v10 = vld [vmem:[#allocation198_spill] sm:$0xff]  ;;  %v7517_v8 = vld [vmem:[#allocation40_spill] sm:$0xff] }
 0x26f   : > { %1825 = vmatpush.bf16.msra.mxu2 %v2916_v21  ;;  %1838 = vmatpush.bf16.msra.mxu3 %v3172_v12  ;;  %v2596_v13 = vor.u32 %v7504_v10, %v7503_v18  ;;  %v2852_v21 = vor.u32 %v7506_v14, %v7505_v3  ;;  %v7508_v12 = vld [vmem:[#allocation438_spill] sm:$0xff]  ;;  %v7519_v10 = vld [vmem:[#allocation160_spill] sm:$0xff]  ;;  %v7521_v14 = vld [vmem:[#allocation281_spill] sm:$0xff] }
 0x270   : > { %v3108_v53 = vor.u32 %v7508_v12, %v7507_v2  ;;  %v7523_v12 = vld [vmem:[#allocation401_spill] sm:$0xff] }
 0x272   : > { %1800 = vmatpush.bf16.msra.mxu0 %v2372_v20  ;;  %1813 = vmatpush.bf16.msra.mxu1 %v2628_v9  ;;  %v2308_v20 = vor.u32 %v7510_v17, %v7509_v11  ;;  %v7512_v9 = vld [vmem:[#allocation182_spill] sm:$0xff]  ;;  %v7525_v17 = vld [vmem:[#allocation25_spill] sm:$0xff] }
 0x273   : > { %1826 = vmatpush.bf16.msra.mxu2 %v2884_v23  ;;  %1839 = vmatpush.bf16.msra.mxu3 %v3140_v0  ;;  %v2564_v6 = vor.u32 %v7512_v9, %v7511_v5  ;;  %v2820_v23 = vor.u32 %v7514_v19, %v7513_v38  ;;  %v7516_v0 = vld [vmem:[#allocation424_spill] sm:$0xff]  ;;  %v7527_v9 = vld [vmem:[#allocation145_spill] sm:$0xff] }
 0x274   : > { %v3076_v22 = vor.u32 %v7516_v0, %v7515_v58  ;;  %v7529_v19 = vld [vmem:[#allocation265_spill] sm:$0xff]  ;;  %v7531_v0 = vld [vmem:[#allocation386_spill] sm:$0xff] }
 0x275   : > { %v7530_v58 = vld [vmem:[#allocation273_spill] sm:$0xff] }
 0x276   : > { %1801 = vmatpush.bf16.msra.mxu0 %v2340_v15  ;;  %1814 = vmatpush.bf16.msra.mxu1 %v2596_v13  ;;  %v7518_v15 = vld [vmem:[#allocation47_spill] sm:$0xff] }
 0x277   : > { %1827 = vmatpush.bf16.msra.mxu2 %v2852_v21  ;;  %1840 = vmatpush.bf16.msra.mxu3 %v3108_v53  ;;  %v2276_v18 = vor.u32 %v7518_v15, %v7517_v8  ;;  %v7520_v13 = vld [vmem:[#allocation167_spill] sm:$0xff]  ;;  %v7522_v21 = vld [vmem:[#allocation288_spill] sm:$0xff]  ;;  %v7524_v53 = vld [vmem:[#allocation409_spill] sm:$0xff] }
 0x278   : > { %v2532_v3 = vor.u32 %v7520_v13, %v7519_v10  ;;  %v2788_v2 = vor.u32 %v7522_v21, %v7521_v14  ;;  %v3044_v11 = vor.u32 %v7524_v53, %v7523_v12  ;;  %v7533_v15 = vld [vmem:[#allocation9_spill] sm:$0xff]  ;;  %v7539_v53 = vld [vmem:[#allocation371_spill] sm:$0xff] }
 0x279   : > { %v7535_v13 = vld [vmem:[#allocation129_spill] sm:$0xff] }
 0x27a   : > { %1802 = vmatpush.bf16.msra.mxu0 %v2308_v20  ;;  %1815 = vmatpush.bf16.msra.mxu1 %v2564_v6  ;;  %v7526_v20 = vld [vmem:[#allocation33_spill] sm:$0xff]  ;;  %v7528_v6 = vld [vmem:[#allocation152_spill] sm:$0xff] }
 0x27b   : > { %1828 = vmatpush.bf16.msra.mxu2 %v2820_v23  ;;  %1841 = vmatpush.bf16.msra.mxu3 %v3076_v22  ;;  %v2244_v5 = vor.u32 %v7526_v20, %v7525_v17  ;;  %v2500_v38 = vor.u32 %v7528_v6, %v7527_v9  ;;  %v2756_v23 = vor.u32 %v7530_v58, %v7529_v19  ;;  %v7532_v22 = vld [vmem:[#allocation393_spill] sm:$0xff]  ;;  %v7541_v20 = vld [vmem:[#allocation120_spill] sm:$0xff]  ;;  %v3539_v58 = vmov 0  }
 0x27c   : > { %v3012_v8 = vor.u32 %v7532_v22, %v7531_v0  ;;  %v7537_v21 = vld [vmem:[#allocation249_spill] sm:$0xff]  ;;  %v7543_v19 = vld [vmem:[#allocation240_spill] sm:$0xff]  ;;  %3495 = vset.pattern.permute.xlu0 %v3539_v58  ;;  %v7545_v0 = vld [vmem:[#allocation362_spill] sm:$0xff] }
 0x27d   : > { %v7542_v9 = vld [vmem:[#allocation113_spill] sm:$0xff]  ;;  %v7546_v22 = vld [vmem:[#allocation354_spill] sm:$0xff] }
 0x27e   : > { %1803 = vmatpush.bf16.msra.mxu0 %v2276_v18  ;;  %1816 = vmatpush.bf16.msra.mxu1 %v2532_v3  ;;  %v7534_v18 = vld [vmem:[#allocation17_spill] sm:$0xff]  ;;  %v2440_v6 = vor.u32 %v7542_v9, %v7541_v20  ;;  %v7553_v9 = vld [vmem:[#allocation347_spill] sm:$0xff] }
 0x27f   : > { %1829 = vmatpush.bf16.msra.mxu2 %v2788_v2  ;;  %1842 = vmatpush.bf16.msra.mxu3 %v3044_v11  ;;  %v2212_v10 = vor.u32 %v7534_v18, %v7533_v15  ;;  %v7536_v3 = vld [vmem:[#allocation137_spill] sm:$0xff]  ;;  %v7540_v11 = vld [vmem:[#allocation379_spill] sm:$0xff]  ;;  %v2952_v15 = vor.u32 %v7546_v22, %v7545_v0  ;;  %v7547_v18 = vld [vmem:[#allocation480_spill] sm:$0xff] }
 0x280   : > { %v2468_v14 = vor.u32 %v7536_v3, %v7535_v13  ;;  %v7538_v2 = vld [vmem:[#allocation257_spill] sm:$0xff]  ;;  %v2980_v17 = vor.u32 %v7540_v11, %v7539_v53  ;;  %v2141_v13 = vstv %s2140_s1  ;;  %v7552_v11 = vld [vmem:[#allocation218_spill] sm:$0xff]  ;;  %v7559_v22 = vld [vmem:[#allocation211_spill] sm:$0xff] }
 0x281   : > { %v2724_v12 = vor.u32 %v7538_v2, %v7537_v21  ;;  %v7549_v3 = vld [vmem:[#allocation105_spill] sm:$0xff]  ;;  %vm2142_vm1 = vcmp.gt.f32.partialorder %v6124_v54, %v2141_v13 }
 0x282   : > { %1804 = vmatpush.bf16.msra.mxu0 %v2244_v5  ;;  %1817 = vmatpush.bf16.msra.mxu1 %v2500_v38  ;;  %v7544_v5 = vld [vmem:[#allocation232_spill] sm:$0xff]  ;;  %v7550_v21 = vld [vmem:[#allocation97_spill] sm:$0xff] }
 0x283   : > { %1830 = vmatpush.bf16.msra.mxu2 %v2756_v23  ;;  %1843 = vmatpush.bf16.msra.mxu3 %v3012_v8  ;;  %v2696_v38 = vor.u32 %v7544_v5, %v7543_v19  ;;  %v7548_v23 = vld [vmem:[#allocation472_spill] sm:$0xff]  ;;  %v2408_v2 = vor.u32 %v7550_v21, %v7549_v3  ;;  %v7551_v53 = vld [vmem:[#allocation225_spill] sm:$0xff]  ;;  %v7554_v19 = vld [vmem:[#allocation339_spill] sm:$0xff] }
 0x284   : > { %v3208_v8 = vor.u32 %v7548_v23, %v7547_v18  ;;  %v2664_v20 = vor.u32 %v7552_v11, %v7551_v53  ;;  %v2920_v5 = vor.u32 %v7554_v19, %v7553_v9  ;;  %v7555_v58 = vld [vmem:[#allocation465_spill] sm:$0xff]  ;;  %v7561_v23 = vld [vmem:[#allocation332_spill] sm:$0xff]  ;;  %v7563_v3 = vld [vmem:[#allocation451_spill] sm:$0xff] }
 0x285   : > { %v7564_v21 = vld [vmem:[#allocation444_spill] sm:$0xff]  ;;  %v7567_v9 = vld [vmem:[#allocation197_spill] sm:$0xff] }
 0x286   : > { %1805 = vmatpush.bf16.msra.mxu0 %v2212_v10  ;;  %1818 = vmatpush.bf16.msra.mxu1 %v2468_v14  ;;  %v7556_v10 = vld [vmem:[#allocation458_spill] sm:$0xff]  ;;  %v3144_v53 = vor.u32 %v7564_v21, %v7563_v3  ;;  %v7565_v11 = vld [vmem:[#allocation76_spill] sm:$0xff]  ;;  %v7568_v19 = vld [vmem:[#allocation189_spill] sm:$0xff] }
 0x287   : > { %1831 = vmatpush.bf16.msra.mxu2 %v2724_v12  ;;  %1844 = vmatpush.bf16.msra.mxu3 %v2980_v17  ;;  %v3176_v14 = vor.u32 %v7556_v10, %v7555_v58  ;;  %v3540_v12 = vmov 0.0   ;;  %v2600_v58 = vor.u32 %v7568_v19, %v7567_v9  ;;  %v1599_v10 = vpop.f32.mrf.mxu0  ;;  %v7575_v21 = vld [vmem:[#allocation181_spill] sm:$0xff]  ;;  %v7579_v19 = vld [vmem:[#allocation423_spill] sm:$0xff] }
 0x288   : > { %v3223_v17 = vsel %vm2142_vm1, 1.0, %v3540_v12  ;;  %v1612_v12 = vpop.f32.mrf.mxu1 }
 0x289   : > { %1806 = vmatmul.bf16.vlgmr.msra.gmra.mxu0 %v6216_v4  ;;  %1819 = vmatmul.bf16.vlgmr.msra.gmra.mxu1 %v6218_v7 }
 0x28a   : > { %1850 = vmatpush.bf16.msrb.mxu0 %v2440_v6  ;;  %1863 = vmatpush.bf16.msrb.mxu1 %v2696_v38  ;;  %v7557_v6 = vld [vmem:[#allocation90_spill] sm:$0xff]  ;;  %v7558_v38 = vld [vmem:[#allocation83_spill] sm:$0xff] }
 0x28b   : > { %1876 = vmatpush.bf16.msrb.mxu2 %v2952_v15  ;;  %1889 = vmatpush.bf16.msrb.mxu3 %v3208_v8  ;;  %v2376_v0 = vor.u32 %v7558_v38, %v7557_v6  ;;  %v7560_v15 = vld [vmem:[#allocation204_spill] sm:$0xff]  ;;  %v7571_v38 = vld [vmem:[#allocation437_spill] sm:$0xff] }
 0x28c   : > { %1832 = vmatmul.bf16.vlgmr.msra.gmra.mxu2 %v6212_v1  ;;  %1845 = vmatmul.bf16.vlgmr.msra.gmra.mxu3 %v6214_v16  ;;  %v2632_v18 = vor.u32 %v7560_v15, %v7559_v22  ;;  %v7562_v8 = vld [vmem:[#allocation324_spill] sm:$0xff]  ;;  %v7572_v22 = vld [vmem:[#allocation430_spill] sm:$0xff] }
 0x28d   : > { %v2888_v13 = vor.u32 %v7562_v8, %v7561_v23  ;;  %2147 = vperm.xlu0 %3495, %v3223_v17   ;;  %v3112_v15 = vor.u32 %v7572_v22, %v7571_v38  ;;  %v1613_v23 = vadd.f32 %v1612_v12, %v1599_v10  ;;  %v2152_v8 = vsub.f32 1.0, %v3223_v17  ;;  %v7581_v17 = vld [vmem:[#allocation46_spill] sm:$0xff]  ;;  %v7584_v22 = vld [vmem:[#allocation159_spill] sm:$0xff] }
 0x28e   : > { %1851 = vmatpush.bf16.msrb.mxu0 %v2408_v2  ;;  %1864 = vmatpush.bf16.msrb.mxu1 %v2664_v20  ;;  %v7566_v2 = vld [vmem:[#allocation68_spill] sm:$0xff]  ;;  %v7583_v12 = vld [vmem:[#allocation166_spill] sm:$0xff] }
 0x28f   : > { %1877 = vmatpush.bf16.msrb.mxu2 %v2920_v5  ;;  %1890 = vmatpush.bf16.msrb.mxu3 %v3176_v14  ;;  %v2344_v20 = vor.u32 %v7566_v2, %v7565_v11  ;;  %v7569_v5 = vld [vmem:[#allocation317_spill] sm:$0xff]  ;;  %v7570_v14 = vld [vmem:[#allocation310_spill] sm:$0xff]  ;;  %v1625_v24 = vpop.f32.mrf.mxu2  ;;  %v1638_v38 = vpop.f32.mrf.mxu3 }
 0x290   : > { %v2856_v6 = vor.u32 %v7570_v14, %v7569_v5  ;;  %v7576_v11 = vld [vmem:[#allocation173_spill] sm:$0xff]  ;;  %v7580_v5 = vld [vmem:[#allocation416_spill] sm:$0xff]  ;;  %v1626_v10 = vadd.f32 %v1625_v24, %v1613_v23 }
 0x291   : > { %v2568_v2 = vor.u32 %v7576_v11, %v7575_v21  ;;  %v3080_v14 = vor.u32 %v7580_v5, %v7579_v19  ;;  %v7585_v21 = vld [vmem:[#allocation287_spill] sm:$0xff]  ;;  %v7586_v11 = vld [vmem:[#allocation280_spill] sm:$0xff] }
 0x292   : > { %1852 = vmatpush.bf16.msrb.mxu0 %v2376_v0  ;;  %1865 = vmatpush.bf16.msrb.mxu1 %v2632_v18  ;;  %v7573_v0 = vld [vmem:[#allocation60_spill] sm:$0xff]  ;;  %v7574_v18 = vld [vmem:[#allocation53_spill] sm:$0xff]  ;;  %v7591_v19 = vld [vmem:[#allocation151_spill] sm:$0xff] }
 0x293   : > { %1878 = vmatpush.bf16.msrb.mxu2 %v2888_v13  ;;  %1891 = vmatpush.bf16.msrb.mxu3 %v3144_v53  ;;  %v2312_v3 = vor.u32 %v7574_v18, %v7573_v0  ;;  %v7577_v13 = vld [vmem:[#allocation303_spill] sm:$0xff]  ;;  %v2536_v0 = vor.u32 %v7584_v22, %v7583_v12  ;;  %v1614_v18 = vpop.f32.mrf.mxu1  ;;  %v7588_v24 = vld [vmem:[#allocation400_spill] sm:$0xff] }
 0x294   : > { %v7578_v53 = vld [vmem:[#allocation295_spill] sm:$0xff]  ;;  %v7592_v5 = vld [vmem:[#allocation144_spill] sm:$0xff] }
 0x295   : > { %v2824_v9 = vor.u32 %v7578_v53, %v7577_v13  ;;  %2155 = vperm.xlu0 %3495, %v2152_v8   ;;  %v2792_v13 = vor.u32 %v7586_v11, %v7585_v21  ;;  %v7587_v53 = vld [vmem:[#allocation408_spill] sm:$0xff] }
 0x296   : > { %1853 = vmatpush.bf16.msrb.mxu0 %v2344_v20  ;;  %1866 = vmatpush.bf16.msrb.mxu1 %v2600_v58  ;;  %v7582_v20 = vld [vmem:[#allocation39_spill] sm:$0xff]  ;;  %v3048_v23 = vor.u32 %v7588_v24, %v7587_v53  ;;  %v7589_v8 = vld [vmem:[#allocation32_spill] sm:$0xff] }
 0x297   : > { %1879 = vmatpush.bf16.msrb.mxu2 %v2856_v6  ;;  %1892 = vmatpush.bf16.msrb.mxu3 %v3112_v15  ;;  %v2280_v58 = vor.u32 %v7582_v20, %v7581_v17  ;;  %v6534_v6 = vadd.f32 %v1638_v38, %v1626_v10  ;;  %v1601_v15 = vpop.f32.mrf.mxu0  ;;  %v2504_v17 = vor.u32 %v7592_v5, %v7591_v19  ;;  %v7593_v38 = vld [vmem:[#allocation272_spill] sm:$0xff]  ;;  %v7596_v20 = vld [vmem:[#allocation385_spill] sm:$0xff]  ;;  %v1627_v22 = vpop.f32.mrf.mxu2 }
 0x298   : > { %v7594_v10 = vld [vmem:[#allocation264_spill] sm:$0xff]  ;;  %v1640_v15 = vpop.f32.mrf.mxu3  ;;  %v7610_v22 = vld [vmem:[#allocation365_spill] sm:$0xff] }
 0x299   : > { %v7599_v21 = vld [vmem:[#allocation136_spill] sm:$0xff] }
 0x29a   : > { %1854 = vmatpush.bf16.msrb.mxu0 %v2312_v3  ;;  %1867 = vmatpush.bf16.msrb.mxu1 %v2568_v2  ;;  %v7590_v3 = vld [vmem:[#allocation24_spill] sm:$0xff] }
 0x29b   : > { %1880 = vmatpush.bf16.msrb.mxu2 %v2824_v9  ;;  %1893 = vmatpush.bf16.msrb.mxu3 %v3080_v14  ;;  %v2248_v2 = vor.u32 %v7590_v3, %v7589_v8  ;;  %v2760_v9 = vor.u32 %v7594_v10, %v7593_v38  ;;  %v7595_v14 = vld [vmem:[#allocation392_spill] sm:$0xff]  ;;  %v7603_v8 = vld [vmem:[#allocation378_spill] sm:$0xff]  ;;  %v7606_v38 = vld [vmem:[#allocation123_spill] sm:$0xff] }
 0x29c   : > { %v3016_v12 = vor.u32 %v7596_v20, %v7595_v14  ;;  %v7600_v11 = vld [vmem:[#allocation128_spill] sm:$0xff]  ;;  %v7604_v3 = vld [vmem:[#allocation370_spill] sm:$0xff]  ;;  %v7607_v14 = vld [vmem:[#allocation235_spill] sm:$0xff] }
 0x29d   : > { %v2472_v53 = vor.u32 %v7600_v11, %v7599_v21  ;;  %v7602_v24 = vld [vmem:[#allocation248_spill] sm:$0xff]  ;;  %v2984_v19 = vor.u32 %v7604_v3, %v7603_v8  ;;  %v7609_v20 = vld [vmem:[#allocation357_spill] sm:$0xff]  ;;  %v7617_v3 = vld [vmem:[#allocation342_spill] sm:$0xff] }
 0x29e   : > { %1855 = vmatpush.bf16.msrb.mxu0 %v2280_v58  ;;  %1868 = vmatpush.bf16.msrb.mxu1 %v2536_v0  ;;  %v7597_v58 = vld [vmem:[#allocation16_spill] sm:$0xff]  ;;  %v2956_v15 = vor.u32 %v7610_v22, %v7609_v20  ;;  %v7625_v22 = vld [vmem:[#allocation327_spill] sm:$0xff] }
 0x29f   : > { %1881 = vmatpush.bf16.msrb.mxu2 %v2792_v13  ;;  %1894 = vmatpush.bf16.msrb.mxu3 %v3048_v23  ;;  %v7598_v0 = vld [vmem:[#allocation8_spill] sm:$0xff] }
 0x2a0   : > { %v2216_v18 = vor.u32 %v7598_v0, %v7597_v58  ;;  %v7601_v13 = vld [vmem:[#allocation256_spill] sm:$0xff]  ;;  %v7611_v58 = vld [vmem:[#allocation475_spill] sm:$0xff] }
 0x2a1   : > { %v2728_v23 = vor.u32 %v7602_v24, %v7601_v13  ;;  %v7605_v5 = vld [vmem:[#allocation116_spill] sm:$0xff]  ;;  %v7612_v0 = vld [vmem:[#allocation483_spill] sm:$0xff]  ;;  %v7615_v13 = vld [vmem:[#allocation221_spill] sm:$0xff] }
 0x2a2   : > { %1856 = vmatpush.bf16.msrb.mxu0 %v2248_v2  ;;  %1869 = vmatpush.bf16.msrb.mxu1 %v2504_v17  ;;  %v2444_v10 = vor.u32 %v7606_v38, %v7605_v5  ;;  %v7608_v2 = vld [vmem:[#allocation243_spill] sm:$0xff]  ;;  %v3212_v21 = vor.u32 %v7612_v0, %v7611_v58  ;;  %v7616_v24 = vld [vmem:[#allocation228_spill] sm:$0xff]  ;;  %v7618_v5 = vld [vmem:[#allocation350_spill] sm:$0xff] }
 0x2a3   : > { %1882 = vmatpush.bf16.msrb.mxu2 %v2760_v9  ;;  %1895 = vmatpush.bf16.msrb.mxu3 %v3016_v12  ;;  %v2700_v17 = vor.u32 %v7608_v2, %v7607_v14  ;;  %v7613_v9 = vld [vmem:[#allocation100_spill] sm:$0xff]  ;;  %v2668_v8 = vor.u32 %v7616_v24, %v7615_v13  ;;  %v2924_v38 = vor.u32 %v7618_v5, %v7617_v3  ;;  %v7619_v14 = vld [vmem:[#allocation461_spill] sm:$0xff]  ;;  %v7627_v0 = vld [vmem:[#allocation447_spill] sm:$0xff] }
 0x2a4   : > { %v7614_v12 = vld [vmem:[#allocation108_spill] sm:$0xff]  ;;  %v7630_v13 = vld [vmem:[#allocation79_spill] sm:$0xff] }
 0x2a5   : > { %v2412_v11 = vor.u32 %v7614_v12, %v7613_v9  ;;  %v7620_v2 = vld [vmem:[#allocation468_spill] sm:$0xff]  ;;  %v7629_v12 = vld [vmem:[#allocation71_spill] sm:$0xff] }
 0x2a6   : > { %1857 = vmatpush.bf16.msrb.mxu0 %v2216_v18  ;;  %1870 = vmatpush.bf16.msrb.mxu1 %v2472_v53  ;;  %v3180_v20 = vor.u32 %v7620_v2, %v7619_v14  ;;  %v7621_v18 = vld [vmem:[#allocation86_spill] sm:$0xff]  ;;  %v7622_v53 = vld [vmem:[#allocation93_spill] sm:$0xff]  ;;  %v7631_v24 = vld [vmem:[#allocation192_spill] sm:$0xff]  ;;  %v1651_v5 = vpop.f32.mrf.mxu0  ;;  %v1664_v14 = vpop.f32.mrf.mxu1 }
 0x2a7   : > { %1883 = vmatpush.bf16.msrb.mxu2 %v2728_v23  ;;  %1896 = vmatpush.bf16.msrb.mxu3 %v2984_v19  ;;  %v2380_v23 = vor.u32 %v7622_v53, %v7621_v18  ;;  %v7623_v19 = vld [vmem:[#allocation207_spill] sm:$0xff]  ;;  %v7634_v2 = vld [vmem:[#allocation320_spill] sm:$0xff]  ;;  %v7635_v18 = vld [vmem:[#allocation433_spill] sm:$0xff] }
 0x2a8   : > { %v7636_v53 = vld [vmem:[#allocation440_spill] sm:$0xff] }
 0x2a9   : > { %1858 = vmatmul.bf16.vlgmr.msrb.gmra.mxu0 %v6216_v4  ;;  %1871 = vmatmul.bf16.vlgmr.msrb.gmra.mxu1 %v6218_v7 }
 0x2aa   : > { %1902 = vmatpush.bf16.msra.mxu0 %v2444_v10  ;;  %1915 = vmatpush.bf16.msra.mxu1 %v2700_v17  ;;  %v7624_v10 = vld [vmem:[#allocation214_spill] sm:$0xff] }
 0x2ab   : > { %1928 = vmatpush.bf16.msra.mxu2 %v2956_v15  ;;  %1941 = vmatpush.bf16.msra.mxu3 %v3212_v21  ;;  %v2636_v17 = vor.u32 %v7624_v10, %v7623_v19  ;;  %v7626_v15 = vld [vmem:[#allocation335_spill] sm:$0xff]  ;;  %v7628_v21 = vld [vmem:[#allocation454_spill] sm:$0xff]  ;;  %v3116_v19 = vor.u32 %v7636_v53, %v7635_v18  ;;  %v1665_v10 = vadd.f32 %v1664_v14, %v1651_v5  ;;  %v7648_v53 = vld [vmem:[#allocation169_spill] sm:$0xff] }
 0x2ac   : > { %1884 = vmatmul.bf16.vlgmr.msrb.gmra.mxu2 %v6212_v1  ;;  %1897 = vmatmul.bf16.vlgmr.msrb.gmra.mxu3 %v6214_v16  ;;  %v2892_v58 = vor.u32 %v7626_v15, %v7625_v22  ;;  %v3148_v9 = vor.u32 %v7628_v21, %v7627_v0  ;;  %v7639_v15 = vld [vmem:[#allocation176_spill] sm:$0xff]  ;;  %v7647_v14 = vld [vmem:[#allocation162_spill] sm:$0xff] }
 0x2ad   : > { %v7640_v0 = vld [vmem:[#allocation184_spill] sm:$0xff] }
 0x2ae   : > { %1903 = vmatpush.bf16.msra.mxu0 %v2412_v11  ;;  %1916 = vmatpush.bf16.msra.mxu1 %v2668_v8  ;;  %v2348_v11 = vor.u32 %v7630_v13, %v7629_v12  ;;  %v7632_v8 = vld [vmem:[#allocation200_spill] sm:$0xff]  ;;  %v2572_v21 = vor.u32 %v7640_v0, %v7639_v15  ;;  %v7641_v12 = vld [vmem:[#allocation298_spill] sm:$0xff]  ;;  %v7643_v13 = vld [vmem:[#allocation419_spill] sm:$0xff] }
 0x2af   : > { %1929 = vmatpush.bf16.msra.mxu2 %v2924_v38  ;;  %1942 = vmatpush.bf16.msra.mxu3 %v3180_v20  ;;  %v2604_v3 = vor.u32 %v7632_v8, %v7631_v24  ;;  %v7633_v38 = vld [vmem:[#allocation313_spill] sm:$0xff]  ;;  %v7644_v24 = vld [vmem:[#allocation426_spill] sm:$0xff]  ;;  %v7649_v15 = vld [vmem:[#allocation283_spill] sm:$0xff] }
 0x2b0   : > { %v2860_v20 = vor.u32 %v7634_v2, %v7633_v38  ;;  %v3084_v8 = vor.u32 %v7644_v24, %v7643_v13  ;;  %v1677_v38 = vpop.f32.mrf.mxu2  ;;  %v1690_v2 = vpop.f32.mrf.mxu3  ;;  %v7650_v0 = vld [vmem:[#allocation290_spill] sm:$0xff]  ;;  %v7652_v13 = vld [vmem:[#allocation411_spill] sm:$0xff] }
 0x2b1   : > { %v1678_v18 = vadd.f32 %v1677_v38, %v1665_v10  ;;  %v7655_v38 = vld [vmem:[#allocation147_spill] sm:$0xff] }
 0x2b2   : > { %1904 = vmatpush.bf16.msra.mxu0 %v2380_v23  ;;  %1917 = vmatpush.bf16.msra.mxu1 %v2636_v17  ;;  %v7637_v23 = vld [vmem:[#allocation56_spill] sm:$0xff]  ;;  %v7638_v17 = vld [vmem:[#allocation63_spill] sm:$0xff] }
 0x2b3   : > { %1930 = vmatpush.bf16.msra.mxu2 %v2892_v58  ;;  %1943 = vmatpush.bf16.msra.mxu3 %v3148_v9  ;;  %v2316_v22 = vor.u32 %v7638_v17, %v7637_v23  ;;  %v7642_v58 = vld [vmem:[#allocation306_spill] sm:$0xff]  ;;  %v2540_v23 = vor.u32 %v7648_v53, %v7647_v14  ;;  %v6604_v17 = vadd.f32 %v1690_v2, %v1678_v18  ;;  %v7657_v2 = vld [vmem:[#allocation267_spill] sm:$0xff] }
 0x2b4   : > { %v2828_v9 = vor.u32 %v7642_v58, %v7641_v12  ;;  %v2796_v12 = vor.u32 %v7650_v0, %v7649_v15  ;;  %v7651_v58 = vld [vmem:[#allocation403_spill] sm:$0xff] }
 0x2b5   : > { %v3052_v10 = vor.u32 %v7652_v13, %v7651_v58  ;;  %v7658_v18 = vld [vmem:[#allocation275_spill] sm:$0xff] }
 0x2b6   : > { %1905 = vmatpush.bf16.msra.mxu0 %v2348_v11  ;;  %1918 = vmatpush.bf16.msra.mxu1 %v2604_v3  ;;  %v7645_v11 = vld [vmem:[#allocation42_spill] sm:$0xff]  ;;  %v7646_v3 = vld [vmem:[#allocation49_spill] sm:$0xff]  ;;  %v7660_v14 = vld [vmem:[#allocation395_spill] sm:$0xff] }
 0x2b7   : > { %1931 = vmatpush.bf16.msra.mxu2 %v2860_v20  ;;  %1944 = vmatpush.bf16.msra.mxu3 %v3116_v19  ;;  %v2284_v5 = vor.u32 %v7646_v3, %v7645_v11  ;;  %v1653_v20 = vpop.f32.mrf.mxu0  ;;  %v1666_v19 = vpop.f32.mrf.mxu1  ;;  %v7656_v11 = vld [vmem:[#allocation154_spill] sm:$0xff]  ;;  %v7663_v0 = vld [vmem:[#allocation131_spill] sm:$0xff] }
 0x2b8   : > { %v2508_v3 = vor.u32 %v7656_v11, %v7655_v38  ;;  %v1679_v20 = vpop.f32.mrf.mxu2  ;;  %v1692_v19 = vpop.f32.mrf.mxu3  ;;  %v7664_v58 = vld [vmem:[#allocation139_spill] sm:$0xff]  ;;  %v7668_v38 = vld [vmem:[#allocation381_spill] sm:$0xff] }
 0x2b9   : > { %v2476_v13 = vor.u32 %v7664_v58, %v7663_v0  ;;  %v7673_v20 = vld [vmem:[#allocation364_spill] sm:$0xff] }
 0x2ba   : > { %1906 = vmatpush.bf16.msra.mxu0 %v2316_v22  ;;  %1919 = vmatpush.bf16.msra.mxu1 %v2572_v21  ;;  %v7653_v22 = vld [vmem:[#allocation27_spill] sm:$0xff]  ;;  %v7674_v19 = vld [vmem:[#allocation356_spill] sm:$0xff] }
 0x2bb   : > { %1932 = vmatpush.bf16.msra.mxu2 %v2828_v9  ;;  %1945 = vmatpush.bf16.msra.mxu3 %v3084_v8  ;;  %v7654_v21 = vld [vmem:[#allocation35_spill] sm:$0xff]  ;;  %v2764_v9 = vor.u32 %v7658_v18, %v7657_v2  ;;  %v7659_v8 = vld [vmem:[#allocation388_spill] sm:$0xff]  ;;  %v7669_v2 = vld [vmem:[#allocation122_spill] sm:$0xff] }
 0x2bc   : > { %v2252_v24 = vor.u32 %v7654_v21, %v7653_v22  ;;  %v3020_v53 = vor.u32 %v7660_v14, %v7659_v8  ;;  %v7667_v21 = vld [vmem:[#allocation373_spill] sm:$0xff]  ;;  %v7670_v18 = vld [vmem:[#allocation115_spill] sm:$0xff]  ;;  %v7671_v14 = vld [vmem:[#allocation242_spill] sm:$0xff] }
 0x2bd   : > { %v2988_v11 = vor.u32 %v7668_v38, %v7667_v21  ;;  %v2448_v8 = vor.u32 %v7670_v18, %v7669_v2  ;;  %v7681_v38 = vld [vmem:[#allocation349_spill] sm:$0xff] }
 0x2be   : > { %1907 = vmatpush.bf16.msra.mxu0 %v2284_v5  ;;  %1920 = vmatpush.bf16.msra.mxu1 %v2540_v23  ;;  %v7661_v5 = vld [vmem:[#allocation11_spill] sm:$0xff]  ;;  %v7682_v2 = vld [vmem:[#allocation341_spill] sm:$0xff] }
 0x2bf   : > { %1933 = vmatpush.bf16.msra.mxu2 %v2796_v12  ;;  %1946 = vmatpush.bf16.msra.mxu3 %v3052_v10  ;;  %v7662_v23 = vld [vmem:[#allocation19_spill] sm:$0xff]  ;;  %v2928_v18 = vor.u32 %v7682_v2, %v7681_v38 }
 0x2c0   : > { %v2220_v15 = vor.u32 %v7662_v23, %v7661_v5  ;;  %v7665_v12 = vld [vmem:[#allocation251_spill] sm:$0xff]  ;;  %v2960_v5 = vor.u32 %v7674_v19, %v7673_v20  ;;  %v7675_v23 = vld [vmem:[#allocation482_spill] sm:$0xff] }
 0x2c1   : > { %v7666_v10 = vld [vmem:[#allocation259_spill] sm:$0xff]  ;;  %v3216_v0 = vor.u32 %v7676_v25, %v7675_v23  ;;  %v7689_v20 = vld [vmem:[#allocation334_spill] sm:$0xff]  ;;  %v7691_v23 = vld [vmem:[#allocation453_spill] sm:$0xff] }
 0x2c2   : > { %1908 = vmatpush.bf16.msra.mxu0 %v2252_v24  ;;  %1921 = vmatpush.bf16.msra.mxu1 %v2508_v3  ;;  %v2732_v22 = vor.u32 %v7666_v10, %v7665_v12  ;;  %v7672_v24 = vld [vmem:[#allocation234_spill] sm:$0xff]  ;;  %v7679_v12 = vld [vmem:[#allocation227_spill] sm:$0xff]  ;;  %v7680_v10 = vld [vmem:[#allocation220_spill] sm:$0xff] }
 0x2c3   : > { %1934 = vmatpush.bf16.msra.mxu2 %v2764_v9  ;;  %1947 = vmatpush.bf16.msra.mxu3 %v3020_v53  ;;  %v2704_v3 = vor.u32 %v7672_v24, %v7671_v14  ;;  %v7677_v9 = vld [vmem:[#allocation107_spill] sm:$0xff]  ;;  %v2672_v21 = vor.u32 %v7680_v10, %v7679_v12  ;;  %v7684_v24 = vld [vmem:[#allocation460_spill] sm:$0xff]  ;;  %v7690_v19 = vld [vmem:[#allocation326_spill] sm:$0xff] }
 0x2c4   : > { %v7678_v53 = vld [vmem:[#allocation99_spill] sm:$0xff]  ;;  %v7694_v12 = vld [vmem:[#allocation70_spill] sm:$0xff] }
 0x2c5   : > { %v2416_v58 = vor.u32 %v7678_v53, %v7677_v9  ;;  %v7683_v14 = vld [vmem:[#allocation467_spill] sm:$0xff]  ;;  %v7693_v53 = vld [vmem:[#allocation78_spill] sm:$0xff] }
 0x2c6   : > { %1909 = vmatpush.bf16.msra.mxu0 %v2220_v15  ;;  %1922 = vmatpush.bf16.msra.mxu1 %v2476_v13  ;;  %v3184_v25 = vor.u32 %v7684_v24, %v7683_v14  ;;  %v7685_v15 = vld [vmem:[#allocation92_spill] sm:$0xff]  ;;  %v7686_v13 = vld [vmem:[#allocation85_spill] sm:$0xff]  ;;  %v7695_v10 = vld [vmem:[#allocation199_spill] sm:$0xff]  ;;  %v1703_v2 = vpop.f32.mrf.mxu0  ;;  %v1716_v14 = vpop.f32.mrf.mxu1 }
 0x2c7   : > { %1935 = vmatpush.bf16.msra.mxu2 %v2732_v22  ;;  %1948 = vmatpush.bf16.msra.mxu3 %v2988_v11  ;;  %v2384_v22 = vor.u32 %v7686_v13, %v7685_v15  ;;  %v7687_v11 = vld [vmem:[#allocation213_spill] sm:$0xff]  ;;  %v7698_v24 = vld [vmem:[#allocation312_spill] sm:$0xff]  ;;  %v7699_v15 = vld [vmem:[#allocation439_spill] sm:$0xff] }
 0x2c8   : > { %v7700_v13 = vld [vmem:[#allocation432_spill] sm:$0xff] }
 0x2c9   : > { %1910 = vmatmul.bf16.vlgmr.msra.gmra.mxu0 %v6216_v4  ;;  %1923 = vmatmul.bf16.vlgmr.msra.gmra.mxu1 %v6218_v7 }
 0x2ca   : > { %1954 = vmatpush.bf16.msrb.mxu0 %v2448_v8  ;;  %1967 = vmatpush.bf16.msrb.mxu1 %v2704_v3  ;;  %v7688_v8 = vld [vmem:[#allocation206_spill] sm:$0xff] }
 0x2cb   : > { %1980 = vmatpush.bf16.msrb.mxu2 %v2960_v5  ;;  %1993 = vmatpush.bf16.msrb.mxu3 %v3216_v0  ;;  %v2640_v3 = vor.u32 %v7688_v8, %v7687_v11  ;;  %v2896_v5 = vor.u32 %v7690_v19, %v7689_v20  ;;  %v7692_v0 = vld [vmem:[#allocation446_spill] sm:$0xff]  ;;  %v3120_v11 = vor.u32 %v7700_v13, %v7699_v15  ;;  %v7702_v8 = vld [vmem:[#allocation55_spill] sm:$0xff]  ;;  %v7711_v15 = vld [vmem:[#allocation168_spill] sm:$0xff] }
 0x2cc   : > { %1936 = vmatmul.bf16.vlgmr.msra.gmra.mxu2 %v6212_v1  ;;  %1949 = vmatmul.bf16.vlgmr.msra.gmra.mxu3 %v6214_v16  ;;  %v3152_v9 = vor.u32 %v7692_v0, %v7691_v23  ;;  %v7703_v20 = vld [vmem:[#allocation183_spill] sm:$0xff]  ;;  %v7705_v0 = vld [vmem:[#allocation305_spill] sm:$0xff] }
 0x2cd   : > { %v7704_v19 = vld [vmem:[#allocation175_spill] sm:$0xff]  ;;  %v7712_v13 = vld [vmem:[#allocation161_spill] sm:$0xff] }
 0x2ce   : > { %1955 = vmatpush.bf16.msrb.mxu0 %v2416_v58  ;;  %1968 = vmatpush.bf16.msrb.mxu1 %v2672_v21  ;;  %v2352_v58 = vor.u32 %v7694_v12, %v7693_v53  ;;  %v7696_v21 = vld [vmem:[#allocation191_spill] sm:$0xff]  ;;  %v2576_v23 = vor.u32 %v7704_v19, %v7703_v20  ;;  %v7706_v53 = vld [vmem:[#allocation297_spill] sm:$0xff]  ;;  %v7708_v12 = vld [vmem:[#allocation418_spill] sm:$0xff]  ;;  %v1718_v20 = vpop.f32.mrf.mxu1 }
 0x2cf   : > { %1981 = vmatpush.bf16.msrb.mxu2 %v2928_v18  ;;  %1994 = vmatpush.bf16.msrb.mxu3 %v3184_v25  ;;  %v2608_v38 = vor.u32 %v7696_v21, %v7695_v10  ;;  %v7697_v18 = vld [vmem:[#allocation319_spill] sm:$0xff]  ;;  %v1729_v21 = vpop.f32.mrf.mxu2 }
 0x2d0   : > { %v2864_v25 = vor.u32 %v7698_v24, %v7697_v18  ;;  %v1742_v18 = vpop.f32.mrf.mxu3 }
 0x2d2   : > { %1956 = vmatpush.bf16.msrb.mxu0 %v2384_v22  ;;  %1969 = vmatpush.bf16.msrb.mxu1 %v2640_v3  ;;  %v7701_v22 = vld [vmem:[#allocation62_spill] sm:$0xff] }
 0x2d3   : > { %1982 = vmatpush.bf16.msrb.mxu2 %v2896_v5  ;;  %1995 = vmatpush.bf16.msrb.mxu3 %v3152_v9  ;;  %v2320_v3 = vor.u32 %v7702_v8, %v7701_v22  ;;  %v2832_v5 = vor.u32 %v7706_v53, %v7705_v0  ;;  %v7707_v9 = vld [vmem:[#allocation425_spill] sm:$0xff]  ;;  %v2544_v22 = vor.u32 %v7712_v13, %v7711_v15  ;;  %v1705_v8 = vpop.f32.mrf.mxu0  ;;  %v7715_v0 = vld [vmem:[#allocation410_spill] sm:$0xff] }
 0x2d4   : > { %v3088_v10 = vor.u32 %v7708_v12, %v7707_v9  ;;  %v7716_v53 = vld [vmem:[#allocation402_spill] sm:$0xff]  ;;  %v7724_v8 = vld [vmem:[#allocation387_spill] sm:$0xff] }
 0x2d5   : > { %v3056_v9 = vor.u32 %v7716_v53, %v7715_v0  ;;  %v7721_v15 = vld [vmem:[#allocation274_spill] sm:$0xff]  ;;  %v1717_v0 = vadd.f32 %v1716_v14, %v1703_v2 }
 0x2d6   : > { %1957 = vmatpush.bf16.msrb.mxu0 %v2352_v58  ;;  %1970 = vmatpush.bf16.msrb.mxu1 %v2608_v38  ;;  %v7709_v58 = vld [vmem:[#allocation48_spill] sm:$0xff]  ;;  %v7710_v38 = vld [vmem:[#allocation41_spill] sm:$0xff]  ;;  %v7723_v13 = vld [vmem:[#allocation394_spill] sm:$0xff] }
 0x2d7   : > { %1983 = vmatpush.bf16.msrb.mxu2 %v2864_v25  ;;  %1996 = vmatpush.bf16.msrb.mxu3 %v3120_v11  ;;  %v2288_v24 = vor.u32 %v7710_v38, %v7709_v58  ;;  %v7713_v25 = vld [vmem:[#allocation289_spill] sm:$0xff]  ;;  %v7714_v11 = vld [vmem:[#allocation282_spill] sm:$0xff]  ;;  %v3024_v20 = vor.u32 %v7724_v8, %v7723_v13  ;;  %v1730_v13 = vadd.f32 %v1729_v21, %v1717_v0  ;;  %v298_v21 = vld [vmem:[%s6698_s15] sm:$0xff] }
 0x2d8   : > { %v2800_v19 = vor.u32 %v7714_v11, %v7713_v25  ;;  %v7720_v58 = vld [vmem:[#allocation146_spill] sm:$0xff]  ;;  %v1731_v25 = vpop.f32.mrf.mxu2  ;;  %v1744_v11 = vpop.f32.mrf.mxu3 }
 0x2d9   : > { %v2512_v38 = vor.u32 %v7720_v58, %v7719_v26  ;;  %v1743_v2 = vadd.f32 %v1742_v18, %v1730_v13  ;;  %v300_v14 = vld [vmem:[%s6698_s15 + $0x10] sm:$0xff] }
 0x2da   : > { %1958 = vmatpush.bf16.msrb.mxu0 %v2320_v3  ;;  %1971 = vmatpush.bf16.msrb.mxu1 %v2576_v23  ;;  %v7717_v3 = vld [vmem:[#allocation34_spill] sm:$0xff] }
 0x2db   : > { %1984 = vmatpush.bf16.msrb.mxu2 %v2832_v5  ;;  %1997 = vmatpush.bf16.msrb.mxu3 %v3088_v10  ;;  %v7718_v23 = vld [vmem:[#allocation26_spill] sm:$0xff] }
 0x2dc   : > { %v2256_v12 = vor.u32 %v7718_v23, %v7717_v3  ;;  %v7722_v5 = vld [vmem:[#allocation266_spill] sm:$0xff] }
 0x2dd   : > { %v2768_v10 = vor.u32 %v7722_v5, %v7721_v15  ;;  %v7727_v3 = vld [vmem:[#allocation138_spill] sm:$0xff]  ;;  %v7731_v15 = vld [vmem:[#allocation380_spill] sm:$0xff] }
 0x2de   : > { %1959 = vmatpush.bf16.msrb.mxu0 %v2288_v24  ;;  %1972 = vmatpush.bf16.msrb.mxu1 %v2544_v22  ;;  %v7725_v24 = vld [vmem:[#allocation18_spill] sm:$0xff]  ;;  %v7732_v5 = vld [vmem:[#allocation372_spill] sm:$0xff] }
 0x2df   : > { %1985 = vmatpush.bf16.msrb.mxu2 %v2800_v19  ;;  %1998 = vmatpush.bf16.msrb.mxu3 %v3056_v9  ;;  %v7726_v22 = vld [vmem:[#allocation10_spill] sm:$0xff]  ;;  %v2992_v27 = vor.u32 %v7732_v5, %v7731_v15 }
 0x2e0   : > { %v2224_v53 = vor.u32 %v7726_v22, %v7725_v24  ;;  %v7728_v23 = vld [vmem:[#allocation130_spill] sm:$0xff] }
 0x2e1   : > { %v2480_v26 = vor.u32 %v7728_v23, %v7727_v3  ;;  %v7729_v19 = vld [vmem:[#allocation258_spill] sm:$0xff] }
 0x2e2   : > { %1960 = vmatpush.bf16.msrb.mxu0 %v2256_v12  ;;  %1973 = vmatpush.bf16.msrb.mxu1 %v2512_v38  ;;  %v7730_v9 = vld [vmem:[#allocation250_spill] sm:$0xff]  ;;  %v2008_v12 = vadd.f32 %v1743_v2, %v300_v14 }
 0x2e3   : > { %1986 = vmatpush.bf16.msrb.mxu2 %v2768_v10  ;;  %1999 = vmatpush.bf16.msrb.mxu3 %v3024_v20  ;;  %v2736_v58 = vor.u32 %v7730_v9, %v7729_v19  ;;  %v299_v9 = vld [vmem:[%s6698_s15 + $0x8] sm:$0xff] }
 0x2e4   : > { %v3219_v8 = vmul.f32 -1.442695, %v2008_v12  ;;  %v2007_v13 = vadd.f32 %v6604_v17, %v299_v9 }
 0x2e6   : > { %1961 = vmatpush.bf16.msrb.mxu0 %v2224_v53  ;;  %1974 = vmatpush.bf16.msrb.mxu1 %v2480_v26  ;;  %v1755_v38 = vpop.f32.mrf.mxu0  ;;  %v1768_v10 = vpop.f32.mrf.mxu1  ;;  %3496 = vpow2.f32 %v3219_v8  ;;  %v301_v26 = vld [vmem:[%s6698_s15 + $0x18] sm:$0xff] }
 0x2e7   : > { %1987 = vmatpush.bf16.msrb.mxu2 %v2736_v58  ;;  %2000 = vmatpush.bf16.msrb.mxu3 %v2992_v27  ;;  %v2006_v27 = vadd.f32 %v6534_v6, %v298_v21  ;;  %v1769_v22 = vadd.f32 %v1768_v10, %v1755_v38  ;;  %v3218_v10 = vmul.f32 -1.442695, %v2007_v13 }
 0x2e9   : > { %1962 = vmatmul.bf16.vlgmr.msrb.gmra.mxu0 %v6216_v4  ;;  %1975 = vmatmul.bf16.vlgmr.msrb.gmra.mxu1 %v6218_v7  ;;  %v3217_v20 = vmul.f32 -1.442695, %v2006_v27 }
 0x2ea   : > { %1988 = vmatmul.bf16.vlgmr.msrb.gmra.mxu2 %v6212_v1  ;;  %2001 = vmatmul.bf16.vlgmr.msrb.gmra.mxu3 %v6214_v16 }
 0x2eb   : > { %3498 = vpow2.f32 %v3217_v20 }
 0x2ec   : > { %v3497_v1 = vpop.eup %3496 }
 0x2ed   : > { %v2058_v24 = vadd.f32 1.0, %v3497_v1 }
 0x2ee   : > { %v1757_v4 = vpop.f32.mrf.mxu0  ;;  %v1770_v7 = vpop.f32.mrf.mxu1 }
 0x2ef   : > { %v1781_v25 = vpop.f32.mrf.mxu2  ;;  %v1794_v11 = vpop.f32.mrf.mxu3  ;;  %3500 = vrcp.f32 %v2058_v24  ;;  %v302_v4 = vld [vmem:[%s6698_s15 + $0x20] sm:$0xff]  ;;  %vm2065_vm2 = vweird.f32 %v2058_v24 }
 0x2f0   : > { %v1782_v6 = vadd.f32 %v1781_v25, %v1769_v22 }
 0x2f1   : > { %v3499_v18 = vpop.eup %3498 }
 0x2f2   : > { %v2020_v53 = vadd.f32 1.0, %v3499_v18  ;;  %v1795_v3 = vadd.f32 %v1794_v11, %v1782_v6  ;;  %v2071_v18 = vand.u32 2147483648, %v2058_v24  ;;  %v2069_v6 = vand.u32 2147483647, %v2058_v24 }
 0x2f4   : > { %3502 = vrcp.f32 %v2020_v53  ;;  %v2009_v15 = vadd.f32 %v1795_v3, %v301_v26  ;;  %vm2027_vm4 = vweird.f32 %v2020_v53  ;;  %v2033_v26 = vand.u32 2147483648, %v2020_v53 }
 0x2f5   : > { %v3501_v23 = vpop.eup %3500  ;;  %vm2070_vm8 = vcmp.eq.f32.partialorder %v2069_v6, 8.507059e+37 }
 0x2f6   : > { %v2061_v58 = vmul.f32 %v3501_v23, %v2058_v24  ;;  %v3220_v12 = vmul.f32 -1.442695, %v2009_v15  ;;  %vm2066_vm3 = vweird.f32 %v3501_v23 }
 0x2f7   : > { %v1783_v16 = vpop.f32.mrf.mxu2  ;;  %v1796_v0 = vpop.f32.mrf.mxu3  ;;  %vm6713_vm6 = vmor %vm2065_vm2, %vm2066_vm3 }
 0x2f8   : > { %v2062_v21 = vsub.f32 1.0, %v2061_v58  ;;  %3504 = vpow2.f32 %v3220_v12 }
 0x2f9   : > { %3506 = vpow2.f32 %v3218_v10 }
 0x2fa   : > { %v3503_v19 = vpop.eup %3502  ;;  %v2063_v25 = vmul.f32 %v3501_v23, %v2062_v21 }
 0x2fb   : > { %v2023_v5 = vmul.f32 %v3503_v19, %v2020_v53  ;;  %vm2028_vm5 = vweird.f32 %v3503_v19 }
 0x2fc   : > { %v2064_v22 = vadd.f32 %v3501_v23, %v2063_v25  ;;  %vm6717_vm7 = vmor %vm2027_vm4, %vm2028_vm5 }
 0x2fd   : > { %v2024_v38 = vsub.f32 1.0, %v2023_v5  ;;  %v2031_v5 = vand.u32 2147483647, %v2020_v53 }
 0x2fe   : > { %v3505_v58 = vpop.eup %3504  ;;  %v2068_v21 = vsel %vm6713_vm6, %v3501_v23, %v2064_v22 }
 0x2ff   : > { %v6711_v7 = vpop.permute.xlu0 %2147  ;;  %v2025_v1 = vmul.f32 %v3503_v19, %v2024_v38  ;;  %v2034_v38 = vor.u32 1.1754944e-38, %v2033_v26  ;;  %vm2032_vm9 = vcmp.eq.f32.partialorder %v2031_v5, 8.507059e+37 }
 0x301   : > { %v2026_v15 = vadd.f32 %v3503_v19, %v2025_v1 }
 0x303   : > { %v2030_v10 = vsel %vm6717_vm7, %v3503_v19, %v2026_v15 }
 0x306   : > { %v1807_v2 = vpop.f32.mrf.mxu0  ;;  %v1820_v14 = vpop.f32.mrf.mxu1 }
 0x307   : > { %v1821_v27 = vadd.f32 %v1820_v14, %v1807_v2  ;;  %v2072_v2 = vor.u32 1.1754944e-38, %v2071_v18  ;;  %v3507_v14 = vpop.eup %3506 }
 0x308   : > { %v2021_v53 = vadd.f32 1.0, %v3507_v14 }
 0x30a   : > { %vm2042_vm12 = vweird.f32 %v2021_v53 }
 0x30e   : > { %v1809_v16 = vpop.f32.mrf.mxu0  ;;  %v1822_v0 = vpop.f32.mrf.mxu1 }
 0x30f   : > { %v1833_v8 = vpop.f32.mrf.mxu2  ;;  %v1846_v20 = vpop.f32.mrf.mxu3 }
 0x310   : > { %v1834_v11 = vadd.f32 %v1833_v8, %v1821_v27  ;;  %v2059_v27 = vadd.f32 1.0, %v3505_v58  ;;  %v289_v8 = vld [vmem:[#allocation3 + $0x8] sm:$0xff] }
 0x312   : > { %v1847_v17 = vadd.f32 %v1846_v20, %v1834_v11  ;;  %v2073_v20 = vsel %vm2070_vm8, %v2072_v2, %v2068_v21  ;;  %v2035_v11 = vsel %vm2032_vm9, %v2034_v38, %v2030_v10  ;;  %vm2080_vm10 = vweird.f32 %v2059_v27 }
 0x313   : > { %v2130_v1 = vmul.f32 %v2073_v20, %v289_v8  ;;  %v2086_v38 = vand.u32 2147483648, %v2059_v27 }
 0x314   : > { %v2010_v3 = vadd.f32 %v1847_v17, %v302_v4  ;;  %v6725_v4 = vpop.permute.xlu0 %2155 }
 0x315   : > { %v2158_v18 = vmul.f32 %v6725_v4, %v289_v8 }
 0x316   : > { %3508 = vtanh.f32 %v2010_v3 }
 0x317   : > { %v1835_v24 = vpop.f32.mrf.mxu2  ;;  %v1848_v12 = vpop.f32.mrf.mxu3  ;;  %3510 = vrcp.f32 %v2059_v27 }
 0x318   : > { %3512 = vrcp.f32 %v2021_v53  ;;  %v303_v24 = vld [vmem:[%s6698_s15 + $0x28] sm:$0xff] }
 0x31c   : > { %v3509_v25 = vpop.eup %3508 }
 0x31d   : > { %v2132_v17 = vmul.f32 %v3509_v25, %v2035_v11  ;;  %v3511_v19 = vpop.eup %3510  ;;  %v2084_v11 = vand.u32 2147483647, %v2059_v27 }
 0x31e   : > { %v3513_v22 = vpop.eup %3512  ;;  %v2076_v6 = vmul.f32 %v3511_v19, %v2059_v27  ;;  %vm2081_vm11 = vweird.f32 %v3511_v19 }
 0x31f   : > { %v6727_v23 = vadd.f32 %v2132_v17, %v2130_v1  ;;  %v2038_v3 = vmul.f32 %v3513_v22, %v2021_v53  ;;  %vm2043_vm13 = vweird.f32 %v3513_v22  ;;  %vm6733_vm14 = vmor %vm2080_vm10, %vm2081_vm11  ;;  %vm2085_vm0 = vcmp.eq.f32.partialorder %v2084_v11, 8.507059e+37  ;;  %v304_v11 = vld [vmem:[%s6698_s15 + $0x30] sm:$0xff] }
 0x320   : > { %v2077_v58 = vsub.f32 1.0, %v2076_v6  ;;  %v2087_v6 = vor.u32 1.1754944e-38, %v2086_v38  ;;  %vm2044_vm15 = vmor %vm2042_vm12, %vm2043_vm13 }
 0x321   : > { %v2150_v16 = vmul.f32 %v6711_v7, %v6727_v23  ;;  %v2039_v5 = vsub.f32 1.0, %v2038_v3 }
 0x322   : > { %v2078_v13 = vmul.f32 %v3511_v19, %v2077_v58 }
 0x323   : > { %v2160_v0 = vadd.f32 %v2158_v18, %v2150_v16  ;;  %v2040_v12 = vmul.f32 %v3513_v22, %v2039_v5  ;;  %v2048_v18 = vand.u32 2147483648, %v2021_v53 }
 0x324   : > { %v2079_v25 = vadd.f32 %v3511_v19, %v2078_v13 }
 0x325   : > { %2162 = vst [vmem:[#allocation3 + $0x8] sm:$0xff] %v2160_v0  ;;  %v2041_v16 = vadd.f32 %v3513_v22, %v2040_v12  ;;  %v2046_v0 = vand.u32 2147483647, %v2021_v53  ;;  %v2049_v27 = vor.u32 1.1754944e-38, %v2048_v18 }
 0x326   : > { %v1859_v26 = vpop.f32.mrf.mxu0  ;;  %v1872_v9 = vpop.f32.mrf.mxu1  ;;  %v2083_v3 = vsel %vm6733_vm14, %v3511_v19, %v2079_v25 }
 0x327   : > { %v1873_v15 = vadd.f32 %v1872_v9, %v1859_v26  ;;  %v2045_v58 = vsel %vm2044_vm15, %v3513_v22, %v2041_v16  ;;  %vm2047_vm1 = vcmp.eq.f32.partialorder %v2046_v0, 8.507059e+37  ;;  %v2088_v5 = vsel %vm2085_vm0, %v2087_v6, %v2083_v3 }
 0x32e   : > { %v1861_v8 = vpop.f32.mrf.mxu0  ;;  %v1874_v20 = vpop.f32.mrf.mxu1 }
 0x32f   : > { %v1885_v2 = vpop.f32.mrf.mxu2  ;;  %v1898_v14 = vpop.f32.mrf.mxu3 }
 0x330   : > { %v1886_v21 = vadd.f32 %v1885_v2, %v1873_v15  ;;  %v290_v15 = vld [vmem:[#allocation3] sm:$0xff]  ;;  %v2050_v2 = vsel %vm2047_vm1, %v2049_v27, %v2045_v58 }
 0x331   : > { %v2159_v53 = vmul.f32 %v6725_v4, %v290_v15 }
 0x332   : > { %v1899_v10 = vadd.f32 %v1898_v14, %v1886_v21  ;;  %v2131_v14 = vmul.f32 %v2088_v5, %v290_v15 }
 0x334   : > { %v2011_v17 = vadd.f32 %v1899_v10, %v303_v24 }
 0x336   : > { %3514 = vtanh.f32 %v2011_v17 }
 0x337   : > { %v1887_v26 = vpop.f32.mrf.mxu2  ;;  %v1900_v9 = vpop.f32.mrf.mxu3 }
 0x33c   : > { %v3515_v13 = vpop.eup %3514 }
 0x33d   : > { %v2133_v21 = vmul.f32 %v3515_v13, %v2050_v2 }
 0x33f   : > { %v6740_v24 = vadd.f32 %v2133_v21, %v2131_v14 }
 0x341   : > { %v2151_v19 = vmul.f32 %v6711_v7, %v6740_v24 }
 0x343   : > { %v2161_v12 = vadd.f32 %v2159_v53, %v2151_v19 }
 0x345   : > { %2163 = vst [vmem:[#allocation3] sm:$0xff] %v2161_v12 }
 0x346   : > { %v1911_v38 = vpop.f32.mrf.mxu0  ;;  %v1924_v10 = vpop.f32.mrf.mxu1 }
 0x347   : > { %v1925_v22 = vadd.f32 %v1924_v10, %v1911_v38 }
 0x34e   : > { %v1913_v17 = vpop.f32.mrf.mxu0  ;;  %v1926_v18 = vpop.f32.mrf.mxu1 }
 0x34f   : > { %v1937_v8 = vpop.f32.mrf.mxu2  ;;  %v1950_v20 = vpop.f32.mrf.mxu3 }
 0x350   : > { %v1938_v25 = vadd.f32 %v1937_v8, %v1925_v22 }
 0x352   : > { %v1951_v1 = vadd.f32 %v1950_v20, %v1938_v25  ;;  %v305_v25 = vld [vmem:[%s6698_s15 + $0x38] sm:$0xff] }
 0x354   : > { %v2012_v16 = vadd.f32 %v1951_v1, %v304_v11 }
 0x356   : > { %v3221_v0 = vmul.f32 -1.442695, %v2012_v16  ;;  %v3528_v16 = vld [vmem:[#allocation2] sm:$0xff] }
 0x357   : > { %v1939_v6 = vpop.f32.mrf.mxu2  ;;  %v1952_v3 = vpop.f32.mrf.mxu3 }
 0x358   : > { %3516 = vpow2.f32 %v3221_v0  ;;  %v2166_v0 = vmul.f32 %v3528_v16, %v6725_v4 }
 0x35e   : > { %v3517_v26 = vpop.eup %3516 }
 0x35f   : > { %v2098_v9 = vadd.f32 1.0, %v3517_v26 }
 0x361   : > { %3518 = vrcp.f32 %v2098_v9  ;;  %vm2105_vm2 = vweird.f32 %v2098_v9  ;;  %v2111_v13 = vand.u32 2147483648, %v2098_v9  ;;  %v2109_v14 = vand.u32 2147483647, %v2098_v9 }
 0x362   : > { %3520 = vtanh.f32 %v6727_v23 }
 0x363   : > { %v2112_v19 = vor.u32 1.1754944e-38, %v2111_v13  ;;  %vm2110_vm5 = vcmp.eq.f32.partialorder %v2109_v14, 8.507059e+37 }
 0x366   : > { %v1963_v27 = vpop.f32.mrf.mxu0  ;;  %v1976_v58 = vpop.f32.mrf.mxu1 }
 0x367   : > { %v3519_v15 = vpop.eup %3518  ;;  %v1977_v21 = vadd.f32 %v1976_v58, %v1963_v27 }
 0x368   : > { %v2101_v5 = vmul.f32 %v3519_v15, %v2098_v9  ;;  %vm2106_vm3 = vweird.f32 %v3519_v15  ;;  %v3521_v17 = vpop.eup %3520 }
 0x369   : > { %vm2107_vm4 = vmor %vm2105_vm2, %vm2106_vm3 }
 0x36a   : > { %v2102_v2 = vsub.f32 1.0, %v2101_v5 }
 0x36c   : > { %v2103_v53 = vmul.f32 %v3519_v15, %v2102_v2 }
 0x36d   : > { %v1989_v12 = vpop.f32.mrf.mxu2  ;;  %v2002_v38 = vpop.f32.mrf.mxu3 }
 0x36e   : > { %v2104_v10 = vadd.f32 %v3519_v15, %v2103_v53  ;;  %v1990_v22 = vadd.f32 %v1989_v12, %v1977_v21  ;;  %v1965_v8 = vpop.f32.mrf.mxu0  ;;  %v1978_v20 = vpop.f32.mrf.mxu1 }
 0x370   : > { %v2108_v11 = vsel %vm2107_vm4, %v3519_v15, %v2104_v10  ;;  %v2003_v1 = vadd.f32 %v2002_v38, %v1990_v22 }
 0x371   : > { %v2113_v18 = vsel %vm2110_vm5, %v2112_v19, %v2108_v11 }
 0x372   : > { %v2138_v23 = vmul.f32 %v3521_v17, %v2113_v18  ;;  %v2013_v6 = vadd.f32 %v2003_v1, %v305_v25  ;;  %v3529_v25 = vld [vmem:[#allocation2 + $0x8] sm:$0xff] }
 0x373   : > { %v2167_v11 = vmul.f32 %v3529_v25, %v6725_v4 }
 0x374   : > { %v2164_v3 = vmul.f32 %v6711_v7, %v2138_v23  ;;  %v3222_v26 = vmul.f32 -1.442695, %v2013_v6 }
 0x375   : > { %v1991_v9 = vpop.f32.mrf.mxu2  ;;  %v2004_v27 = vpop.f32.mrf.mxu3 }
 0x376   : > { %v2168_v58 = vadd.f32 %v2166_v0, %v2164_v3  ;;  %2175 = vst [vmem:[%s6752_s19] sm:$0xff] %v2164_v3  ;;  %3522 = vpow2.f32 %v3222_v26 }
 0x378   : > { %2170 = vst [vmem:[#allocation2] sm:$0xff] %v2168_v58 }
 0x37c   : > { %v3523_v15 = vpop.eup %3522 }
 0x37d   : > { %v2099_v5 = vadd.f32 1.0, %v3523_v15 }
 0x37f   : > { %3524 = vrcp.f32 %v2099_v5  ;;  %v2126_v21 = vand.u32 2147483648, %v2099_v5  ;;  %v2124_v19 = vand.u32 2147483647, %v2099_v5  ;;  %vm2120_vm7 = vweird.f32 %v2099_v5 }
 0x380   : > { %3526 = vtanh.f32 %v6740_v24 }
 0x381   : > { %v2127_v38 = vor.u32 1.1754944e-38, %v2126_v21  ;;  %vm2125_vm9 = vcmp.eq.f32.partialorder %v2124_v19, 8.507059e+37 }
 0x385   : > { %v3525_v13 = vpop.eup %3524 }
 0x386   : > { %v2116_v2 = vmul.f32 %v3525_v13, %v2099_v5  ;;  %vm2121_vm6 = vweird.f32 %v3525_v13  ;;  %v3527_v22 = vpop.eup %3526 }
 0x387   : > { %vm2122_vm8 = vmor %vm2120_vm7, %vm2121_vm6 }
 0x388   : > { %v2117_v14 = vsub.f32 1.0, %v2116_v2 }
 0x38a   : > { %v2118_v53 = vmul.f32 %v3525_v13, %v2117_v14 }
 0x38c   : > { %v2119_v12 = vadd.f32 %v3525_v13, %v2118_v53 }
 0x38e   : > { %v2123_v10 = vsel %vm2122_vm8, %v3525_v13, %v2119_v12 }
 0x38f   : > { %v2128_v8 = vsel %vm2125_vm9, %v2127_v38, %v2123_v10 }
 0x390   : > { %v2139_v20 = vmul.f32 %v3527_v22, %v2128_v8 }
 0x392   : > { %v2165_v1 = vmul.f32 %v6711_v7, %v2139_v20  ;;  %285 = sbr.rel (!%p283_p0) target bundleno = 487 (0x1e7), region = 41 }
 0x394   : > { %v2169_v24 = vadd.f32 %v2167_v11, %v2165_v1  ;;  %2176 = vst [vmem:[%s6752_s19 + $0x8] sm:$0xff] %v2165_v1 }
 0x396   : > { %2171 = vst [vmem:[#allocation2 + $0x8] sm:$0xff] %v2169_v24 }

// kernel: my_model2_forward.19
= control target key start
LH: loop header
LB: loop body
LE: loop exit
PB: predicated region body
PF: predicated region fallthrough
CT: control target
= control target key end

     0   :  { %v654_v2 = vmov 0   ;;  %s817_s0 = inlined_call_operand.vmem [shape: f32[2,8,512], index: 0, kind: input, shape index: {}]   ;;  %s818_s1 = inlined_call_operand.vmem [shape: f32[2,8,1], index: 1, kind: input, shape index: {}]   ;;  %s819_s2 = inlined_call_operand.vmem [shape: bf16[512,128], index: 2, kind: input, shape index: {}]   ;;  %s820_s3 = inlined_call_operand.vmem [shape: f32[1,128], index: 3, kind: input, shape index: {}]   ;;  %s821_s4 = inlined_call_operand.hbm [shape: f32[2,128], index: 4, kind: output, shape index: {}]  }
   0x1   :  { %v26_v0 = vld [vmem:[%s818_s1] sm:$0xff]  ;;  %v599_v1 = vld [vmem:[%s819_s2 + $0x38] sm:$0xff]  ;;  %626 = vset.pattern.permute.xlu0 %v654_v2  ;;  %v27_v7 = vld [vmem:[%s818_s1 + $0x8] sm:$0xff] }
   0x2   :  { %v28_v3 = vsub.f32 1.0, %v26_v0  ;;  %v607_v4 = vld [vmem:[%s819_s2 + $0x78] sm:$0xff]  ;;  %395 = vmatpush.bf16.msra.mxu0 %v599_v1 }
   0x3   :  { %v615_v5 = vld [vmem:[%s819_s2 + $0xb8] sm:$0xff] }
   0x4   :  { %v623_v6 = vld [vmem:[%s819_s2 + $0xf8] sm:$0xff] }
   0x5   :  { %9 = vsyncpa [#allocation3], 0  ;;  %v30_v8 = vmul.f32 1000000.0, %v28_v3  ;;  %408 = vmatpush.bf16.msra.mxu1 %v607_v4  ;;  %421 = vmatpush.bf16.msra.mxu2 %v615_v5  ;;  %v29_v9 = vsub.f32 1.0, %v27_v7  ;;  %v598_v11 = vld [vmem:[%s819_s2 + $0x30] sm:$0xff] }
   0x6   :  { %434 = vmatpush.bf16.msra.mxu3 %v623_v6  ;;  %v606_v12 = vld [vmem:[%s819_s2 + $0x70] sm:$0xff]  ;;  %396 = vmatpush.bf16.msra.mxu0 %v598_v11  ;;  %v597_v15 = vld [vmem:[%s819_s2 + $0x28] sm:$0xff]  ;;  %v596_v19 = vld [vmem:[%s819_s2 + $0x20] sm:$0xff]  ;;  %vm190_vm0 = vcmask 1041409   ;;  %s655_s18 = smov [#allocation2]   ;;  %s455_s22 = sshll.u32 %s821_s4, 4  ;;  %s456_s22 = int_to_ptr.hbm [resolvable:$true] %s455_s22 }
   0x7   :  { %34 = vperm.xlu0 %626, %v30_v8   ;;  %v31_v10 = vmul.f32 1000000.0, %v29_v9  ;;  %v614_v13 = vld [vmem:[%s819_s2 + $0xb0] sm:$0xff]  ;;  %v605_v16 = vld [vmem:[%s819_s2 + $0x68] sm:$0xff]  ;;  %v604_v20 = vld [vmem:[%s819_s2 + $0x60] sm:$0xff]  ;;  %s453_s19 = sshll.u32 %s655_s18, 4  ;;  %s454_s19 = int_to_ptr.vmem [resolvable:$true] %s453_s19 }
   0x8   :  { %v622_v14 = vld [vmem:[%s819_s2 + $0xf0] sm:$0xff]  ;;  %v613_v17 = vld [vmem:[%s819_s2 + $0xa8] sm:$0xff]  ;;  %v612_v21 = vld [vmem:[%s819_s2 + $0xa0] sm:$0xff] }
   0x9   :  { %409 = vmatpush.bf16.msra.mxu1 %v606_v12  ;;  %422 = vmatpush.bf16.msra.mxu2 %v614_v13  ;;  %v621_v18 = vld [vmem:[%s819_s2 + $0xe8] sm:$0xff]  ;;  %v620_v22 = vld [vmem:[%s819_s2 + $0xe0] sm:$0xff]  ;;  %v595_v23 = vld [vmem:[%s819_s2 + $0x18] sm:$0xff] }
   0xa   :  { %435 = vmatpush.bf16.msra.mxu3 %v622_v14  ;;  %397 = vmatpush.bf16.msra.mxu0 %v597_v15  ;;  %v603_v24 = vld [vmem:[%s819_s2 + $0x58] sm:$0xff]  ;;  %v594_v27 = vld [vmem:[%s819_s2 + $0x10] sm:$0xff]  ;;  %v593_v31 = vld [vmem:[%s819_s2 + $0x8] sm:$0xff] }
   0xb   :  { %v611_v25 = vld [vmem:[%s819_s2 + $0x98] sm:$0xff]  ;;  %v602_v28 = vld [vmem:[%s819_s2 + $0x50] sm:$0xff]  ;;  %v601_v32 = vld [vmem:[%s819_s2 + $0x48] sm:$0xff] }
   0xc   :  { %v619_v26 = vld [vmem:[%s819_s2 + $0xd8] sm:$0xff]  ;;  %v610_v29 = vld [vmem:[%s819_s2 + $0x90] sm:$0xff]  ;;  %v609_v33 = vld [vmem:[%s819_s2 + $0x88] sm:$0xff] }
   0xd   :  { %410 = vmatpush.bf16.msra.mxu1 %v605_v16  ;;  %423 = vmatpush.bf16.msra.mxu2 %v613_v17  ;;  %v618_v30 = vld [vmem:[%s819_s2 + $0xd0] sm:$0xff]  ;;  %v617_v34 = vld [vmem:[%s819_s2 + $0xc8] sm:$0xff]  ;;  %v592_v35 = vld [vmem:[%s819_s2] sm:$0xff] }
   0xe   :  { %436 = vmatpush.bf16.msra.mxu3 %v621_v18  ;;  %398 = vmatpush.bf16.msra.mxu0 %v596_v19  ;;  %v600_v36 = vld [vmem:[%s819_s2 + $0x40] sm:$0xff]  ;;  %v19_v40 = vld [vmem:[%s817_s0 + $0x8] sm:$0xff]  ;;  %v20_v41 = vld [vmem:[%s817_s0 + $0x10] sm:$0xff] }
   0xf   :  { %39 = vperm.xlu0 %626, %v31_v10   ;;  %v608_v37 = vld [vmem:[%s819_s2 + $0x80] sm:$0xff]  ;;  %v21_v42 = vld [vmem:[%s817_s0 + $0x18] sm:$0xff]  ;;  %v23_v57 = vld [vmem:[%s817_s0 + $0x28] sm:$0xff] }
  0x10   :  { %v616_v38 = vld [vmem:[%s819_s2 + $0xc0] sm:$0xff]  ;;  %v24_v58 = vld [vmem:[%s817_s0 + $0x30] sm:$0xff]  ;;  %v25_v59 = vld [vmem:[%s817_s0 + $0x38] sm:$0xff] }
  0x11   :  { %411 = vmatpush.bf16.msra.mxu1 %v604_v20  ;;  %424 = vmatpush.bf16.msra.mxu2 %v612_v21  ;;  %v18_v39 = vld [vmem:[%s817_s0] sm:$0xff] }
  0x12   :  { %437 = vmatpush.bf16.msra.mxu3 %v620_v22  ;;  %399 = vmatpush.bf16.msra.mxu0 %v595_v23  ;;  %v22_v56 = vld [vmem:[%s817_s0 + $0x20] sm:$0xff] }
  0x15   :  { %412 = vmatpush.bf16.msra.mxu1 %v603_v24  ;;  %425 = vmatpush.bf16.msra.mxu2 %v611_v25 }
  0x16   :  { %438 = vmatpush.bf16.msra.mxu3 %v619_v26  ;;  %400 = vmatpush.bf16.msra.mxu0 %v594_v27 }
  0x19   :  { %413 = vmatpush.bf16.msra.mxu1 %v602_v28  ;;  %426 = vmatpush.bf16.msra.mxu2 %v610_v29 }
  0x1a   :  { %439 = vmatpush.bf16.msra.mxu3 %v618_v30  ;;  %401 = vmatpush.bf16.msra.mxu0 %v593_v31 }
  0x1d   :  { %414 = vmatpush.bf16.msra.mxu1 %v601_v32  ;;  %427 = vmatpush.bf16.msra.mxu2 %v609_v33 }
  0x1e   :  { %440 = vmatpush.bf16.msra.mxu3 %v617_v34  ;;  %402 = vmatpush.bf16.msra.mxu0 %v592_v35 }
  0x21   :  { %415 = vmatpush.bf16.msra.mxu1 %v600_v36  ;;  %428 = vmatpush.bf16.msra.mxu2 %v608_v37 }
  0x22   :  { %441 = vmatpush.bf16.msra.mxu3 %v616_v38 }
  0x79   :  { %v35_v43 = vpop.permute.xlu0 %34 }
  0x7a   :  { %v42_v44 = vsub.f32 %v18_v39, %v35_v43  ;;  %v43_v45 = vsub.f32 %v19_v40, %v35_v43  ;;  %v44_v46 = vsub.f32 %v20_v41, %v35_v43  ;;  %v45_v47 = vsub.f32 %v21_v42, %v35_v43 }
  0x7c   :  { %v50_v48 = vrot.slane %v42_v44, 4  ;;  %v56_v49 = vrot.slane %v43_v45, 4  ;;  %v62_v50 = vrot.slane %v44_v46, 4  ;;  %v68_v51 = vrot.slane %v45_v47, 4 }
  0x7e   :  { %v51_v52 = vmax.f32 %v42_v44, %v50_v48  ;;  %v57_v53 = vmax.f32 %v43_v45, %v56_v49  ;;  %v63_v54 = vmax.f32 %v44_v46, %v62_v50  ;;  %v69_v55 = vmax.f32 %v45_v47, %v68_v51 }
  0x80   :  { %v52_v60 = vrot.slane %v51_v52, 2  ;;  %v58_v61 = vrot.slane %v57_v53, 2  ;;  %v64_v62 = vrot.slane %v63_v54, 2  ;;  %v70_v63 = vrot.slane %v69_v55, 2 }
  0x81   :  { %v40_v0 = vpop.permute.xlu0 %39 }
  0x82   :  { %v46_v1 = vsub.f32 %v22_v56, %v40_v0  ;;  %v47_v2 = vsub.f32 %v23_v57, %v40_v0  ;;  %v48_v3 = vsub.f32 %v24_v58, %v40_v0  ;;  %v49_v4 = vsub.f32 %v25_v59, %v40_v0 }
  0x83   :  { %v53_v5 = vmax.f32 %v51_v52, %v52_v60  ;;  %v59_v6 = vmax.f32 %v57_v53, %v58_v61  ;;  %v65_v7 = vmax.f32 %v63_v54, %v64_v62  ;;  %v71_v8 = vmax.f32 %v69_v55, %v70_v63 }
  0x84   :  { %v74_v9 = vrot.slane %v46_v1, 4  ;;  %v80_v10 = vrot.slane %v47_v2, 4  ;;  %v86_v11 = vrot.slane %v48_v3, 4  ;;  %v92_v12 = vrot.slane %v49_v4, 4 }
  0x85   :  { %v54_v13 = vrot.slane %v53_v5, 1  ;;  %v60_v14 = vrot.slane %v59_v6, 1  ;;  %v66_v15 = vrot.slane %v65_v7, 1  ;;  %v72_v16 = vrot.slane %v71_v8, 1 }
  0x86   :  { %v75_v17 = vmax.f32 %v46_v1, %v74_v9  ;;  %v81_v18 = vmax.f32 %v47_v2, %v80_v10  ;;  %v87_v19 = vmax.f32 %v48_v3, %v86_v11  ;;  %v93_v20 = vmax.f32 %v49_v4, %v92_v12  ;;  %v627_v1 = vld [vmem:[%s820_s3] ss:$0 sm:$0xff] }
  0x87   :  { %v55_v25 = vmax.f32 %v53_v5, %v54_v13  ;;  %v61_v26 = vmax.f32 %v59_v6, %v60_v14  ;;  %v67_v27 = vmax.f32 %v65_v7, %v66_v15  ;;  %v73_v28 = vmax.f32 %v71_v8, %v72_v16 }
  0x88   :  { %v76_v21 = vrot.slane %v75_v17, 2  ;;  %v82_v22 = vrot.slane %v81_v18, 2  ;;  %v88_v23 = vrot.slane %v87_v19, 2  ;;  %v94_v24 = vrot.slane %v93_v20, 2 }
  0x89   :  { %v98_v37 = vpack.c.bf16 %v55_v25, %v55_v25  ;;  %v99_v38 = vpack.c.bf16 %v61_v26, %v61_v26  ;;  %v100_v39 = vpack.c.bf16 %v67_v27, %v67_v27  ;;  %v101_v40 = vpack.c.bf16 %v73_v28, %v73_v28 }
  0x8a   :  { %v77_v29 = vmax.f32 %v75_v17, %v76_v21  ;;  %v83_v30 = vmax.f32 %v81_v18, %v82_v22  ;;  %v89_v31 = vmax.f32 %v87_v19, %v88_v23  ;;  %v95_v32 = vmax.f32 %v93_v20, %v94_v24 }
  0x8b   :  { %v182_v49 = vunpack.c.l.b16 %v98_v37  ;;  %v183_v50 = vunpack.c.l.b16 %v99_v38  ;;  %v184_v51 = vunpack.c.l.b16 %v100_v39  ;;  %v185_v52 = vunpack.c.l.b16 %v101_v40 }
  0x8c   :  { %v78_v33 = vrot.slane %v77_v29, 1  ;;  %v84_v34 = vrot.slane %v83_v30, 1  ;;  %v90_v35 = vrot.slane %v89_v31, 1  ;;  %v96_v36 = vrot.slane %v95_v32, 1 }
  0x8e   :  { %v79_v41 = vmax.f32 %v77_v29, %v78_v33  ;;  %v85_v42 = vmax.f32 %v83_v30, %v84_v34  ;;  %v91_v43 = vmax.f32 %v89_v31, %v90_v35  ;;  %v97_v44 = vmax.f32 %v95_v32, %v96_v36 }
  0x90   :  { %v102_v45 = vpack.c.bf16 %v79_v41, %v79_v41  ;;  %v103_v46 = vpack.c.bf16 %v85_v42, %v85_v42  ;;  %v104_v47 = vpack.c.bf16 %v91_v43, %v91_v43  ;;  %v105_v48 = vpack.c.bf16 %v97_v44, %v97_v44 }
  0x92   :  { %v186_v53 = vunpack.c.l.b16 %v102_v45  ;;  %v187_v54 = vunpack.c.l.b16 %v103_v46  ;;  %v188_v55 = vunpack.c.l.b16 %v104_v47  ;;  %v189_v56 = vunpack.c.l.b16 %v105_v48 }
  0x94   :  { %v191_v57 = vsel %vm190_vm0, %v186_v53, %v182_v49  ;;  %v192_v58 = vsel %vm190_vm0, %v187_v54, %v183_v50  ;;  %v193_v59 = vsel %vm190_vm0, %v188_v55, %v184_v51  ;;  %v194_v60 = vsel %vm190_vm0, %v189_v56, %v185_v52 }
  0x95   :  { %v195_v61 = vpack.c.b16 %v191_v57, %v191_v57  ;;  %v196_v62 = vpack.c.b16 %v192_v58, %v192_v58  ;;  %v197_v63 = vpack.c.b16 %v193_v59, %v193_v59  ;;  %v198_v0 = vpack.c.b16 %v194_v60, %v194_v60 }
  0x97   :  { %403 = vmatmul.bf16.vlgmr.msra.gmra.mxu0 %v195_v61  ;;  %416 = vmatmul.bf16.vlgmr.msra.gmra.mxu1 %v196_v62 }
  0x98   :  { %429 = vmatmul.bf16.vlgmr.msra.gmra.mxu2 %v197_v63  ;;  %442 = vmatmul.bf16.vlgmr.msra.gmra.mxu3 %v198_v0 }
 0x114   :  { %v404_v2 = vpop.f32.mrf.mxu0  ;;  %v417_v3 = vpop.f32.mrf.mxu1 }
 0x115   :  { %v405_v4 = vadd.f32 %v627_v1, %v404_v2 }
 0x117   :  { %v418_v5 = vadd.f32 %v417_v3, %v405_v4 }
 0x11b   :  { %v430_v6 = vpop.f32.mrf.mxu2  ;;  %v443_v7 = vpop.f32.mrf.mxu3 }
 0x11c   :  { %v431_v8 = vadd.f32 %v430_v6, %v418_v5  ;;  %v406_v9 = vpop.f32.mrf.mxu0  ;;  %v419_v10 = vpop.f32.mrf.mxu1 }
 0x11e   :  { %v444_v11 = vadd.f32 %v443_v7, %v431_v8 }
 0x120   :  { %447 = vst [vmem:[#allocation2] sm:$0x3] %v444_v11 }
 0x121   :  { %458 = dma.vmem_to_hbm [thread:$0]  %s454_s19, 32, %s456_s22, [#allocation3]  }
 0x123   :  { %v432_v12 = vpop.f32.mrf.mxu2  ;;  %v445_v13 = vpop.f32.mrf.mxu3 }
 0x124   :  { %652 = dma.done.wait [#allocation3], 32  }
 0x125   :  { %653 = vsyncadd [#allocation3], 4294967264 }
 0x126   :  { %463 = vsyncpa [#allocation3], 1 }

</bundles_post_ra>
